<compile_context>
chip_gen: v5e
topology: v5e:2x2
jax: 0.10.0
libtpu: 0.0.40
codegen_flags: <defaults>
</compile_context>

<pallas_src>
import jax
import jax.numpy as jnp
from jax.experimental import pallas as pl
from jax.experimental.pallas import tpu as pltpu  # noqa: F401  (kept for TPU-specific tuning)

# ---------------- sizes ----------------
BATCH = 2
IMG = 48            # 48x48 input image
PATCH = 8           # stand-in backbone downsamples by 8
FH = IMG // PATCH   # 6
FW = IMG // PATCH   # 6
C_STEM_IN = 3 * PATCH * PATCH   # 192
C_FEAT = 1280       # efficientnet-b0 feature channels
C_PROJ = 256        # proj output channels
NUM_CLASSES = 9
N_WIN = 1 + 4 + 9   # SPP windows for out_pool_size [1, 2, 3]
FC_IN = C_PROJ * N_WIN          # 3584
BN_EPS = 1e-5


def _vmem_spec(shape):
    nd = len(shape)
    return pl.BlockSpec(shape, lambda _nd=nd: (0,) * _nd)


# ---------------- fused kernel: stem + proj + ReLU + BN + SPP + fc ----------------
def fused_kernel(p_ref, ws_ref, bs_ref, wp_ref, bp_ref, sc_ref, sh_ref,
                 wfc_ref, bfc_ref, o_ref):
    bf16 = jnp.bfloat16

    # --- stem (stand-in backbone): stride-8 patch-embed matmul + swish ---
    f = jnp.dot(p_ref[...], ws_ref[...],
                preferred_element_type=jnp.float32) + bs_ref[...]
    f = f * jax.nn.sigmoid(f)                                   # (72, 1280) f32

    # --- proj (1x1 conv == channel matmul) + ReLU + BatchNorm (eval, folded) ---
    y = jnp.dot(f.astype(bf16), wp_ref[...],
                preferred_element_type=jnp.float32) + bp_ref[...]
    y = jnp.maximum(y, 0.0)
    y = y * sc_ref[...] + sh_ref[...]                           # (72, 256); rows = (b, h, w)

    # --- SPP([1,2,3]) on the 6x6 map, vectorized (no per-window row slicing) ---
    # level 2: four 3x3 windows
    w2 = jnp.max(y.reshape(BATCH * FH * 2, 3, C_PROJ), axis=1)       # pool width by 3
    p2 = jnp.max(w2.reshape(BATCH * 2, 3, 2, C_PROJ), axis=1)        # pool height by 3
    p2 = p2.reshape(BATCH, 2, 2, C_PROJ)                             # (b, i, j, C)
    # level 3: nine 2x2 windows
    w3 = jnp.max(y.reshape(BATCH * FH * 3, 2, C_PROJ), axis=1)       # pool width by 2
    p3 = jnp.max(w3.reshape(BATCH * 3, 2, 3, C_PROJ), axis=1)        # pool height by 2
    p3 = p3.reshape(BATCH, 3, 3, C_PROJ)                             # (b, i, j, C)
    # level 1: global 6x6 max == max over the four level-2 pools
    p1 = jnp.max(jnp.max(p2, axis=2), axis=1)                        # (B, C)

    # lane-dense SPP feature; block order matches the reordered fc weight rows
    blocks = [p1]
    blocks += [p2[:, i, j, :] for i in range(2) for j in range(2)]
    blocks += [p3[:, i, j, :] for i in range(3) for j in range(3)]
    feat = jnp.concatenate(blocks, axis=-1)                          # (B, 3584)

    # --- fc: single matmul straight to (B, NUM_CLASSES) ---
    out = jnp.dot(feat.astype(bf16), wfc_ref[...],
                  preferred_element_type=jnp.float32)
    o_ref[...] = out + bfc_ref[...]                                  # (B, 9)


@jax.jit
def forward(x_nchw, p):
    patches = extract_patches(x_nchw)
    args = (patches, p["w_stem"], p["b_stem"], p["w_proj"], p["b_proj"],
            p["bn_scale"], p["bn_shift"], p["w_fc_dense"], p["b_fc_row"])
    return pl.pallas_call(
        fused_kernel,
        out_shape=jax.ShapeDtypeStruct((BATCH, NUM_CLASSES), jnp.float32),
        in_specs=[_vmem_spec(a.shape) for a in args],
        out_specs=_vmem_spec((BATCH, NUM_CLASSES)),
        cost_estimate=pl.CostEstimate(flops=83_000_000,
                                      transcendentals=92_160,
                                      bytes_accessed=1_250_000),
    )(*args)


# ---------------- glue (plain JAX, jitted together with the kernel) ----------------
def extract_patches(x_nchw):
    """NCHW -> non-overlapping 8x8 patches -> (B*FH*FW, 192) bf16.
    TODO(synk): patch pixels are not contiguous in NCHW/NHWC memory, so this
    cannot become a pure reshape; the transpose stays as one fused HLO before
    the kernel."""
    x = jnp.transpose(x_nchw, (0, 2, 3, 1))                       # (B, H, W, 3)
    x = x.reshape(BATCH, FH, PATCH, FW, PATCH, 3)
    x = jnp.transpose(x, (0, 1, 3, 2, 4, 5))                      # (B, FH, FW, P, P, 3)
    return x.reshape(BATCH * FH * FW, PATCH * PATCH * 3).astype(jnp.bfloat16)


def fc_weight_reordered(w_fc_pt):
    """Reorder PyTorch fc weight (num_classes, 3584) — whose columns follow the
    SPP flatten order (per level: c*k*k + i*k + j, levels [1,2,3]) — into a
    dense (3584, num_classes) matrix whose rows follow the kernel's
    [win0 ch0..255, win1 ch0..255, ...] feature order. No zero padding."""
    c = jnp.arange(C_PROJ)
    cols = [c]                                                   # level 1
    off = C_PROJ
    for i in range(2):
        for j in range(2):
            cols.append(off + c * 4 + i * 2 + j)                 # level 2
    off = C_PROJ + 4 * C_PROJ
    for i in range(3):
        for j in range(3):
            cols.append(off + c * 9 + i * 3 + j)                 # level 3
    cols = jnp.concatenate(cols)                                 # (3584,)
    return jnp.transpose(w_fc_pt[:, cols])                       # (3584, num_classes)


def init_params(key):
    ks = jax.random.split(key, 10)
    w_stem = 0.05 * jax.random.normal(ks[0], (C_STEM_IN, C_FEAT), jnp.float32)
    b_stem = 0.05 * jax.random.normal(ks[1], (1, C_FEAT), jnp.float32)
    w_proj = 0.02 * jax.random.normal(ks[2], (C_FEAT, C_PROJ), jnp.float32)
    b_proj = 0.02 * jax.random.normal(ks[3], (1, C_PROJ), jnp.float32)
    gamma = 1.0 + 0.1 * jax.random.normal(ks[4], (C_PROJ,), jnp.float32)
    beta = 0.05 * jax.random.normal(ks[5], (C_PROJ,), jnp.float32)
    r_mean = 0.1 * jax.random.normal(ks[6], (C_PROJ,), jnp.float32)
    r_var = 0.5 + jnp.abs(0.5 * jax.random.normal(ks[7], (C_PROJ,), jnp.float32))
    w_fc = 0.02 * jax.random.normal(ks[8], (NUM_CLASSES, FC_IN), jnp.float32)
    b_fc = 0.02 * jax.random.normal(ks[9], (NUM_CLASSES,), jnp.float32)

    bn_scale = (gamma / jnp.sqrt(r_var + BN_EPS)).reshape(1, C_PROJ)
    bn_shift = (beta - r_mean * gamma / jnp.sqrt(r_var + BN_EPS)).reshape(1, C_PROJ)

    # bf16 matmul weights (halves weight DMA, native MXU bf16); f32 accumulation.
    w_stem_bf = w_stem.astype(jnp.bfloat16)
    w_proj_bf = w_proj.astype(jnp.bfloat16)
    w_fc_bf = w_fc.astype(jnp.bfloat16)

    return dict(
        w_stem=w_stem_bf, b_stem=b_stem,
        w_proj=w_proj_bf, b_proj=b_proj,
        bn_scale=bn_scale, bn_shift=bn_shift,
        w_fc_pt=w_fc_bf, b_fc=b_fc,
        w_fc_dense=fc_weight_reordered(w_fc_bf),
        b_fc_row=b_fc.reshape(1, NUM_CLASSES),
    )


# ------- pure-JAX reference (PyTorch semantics, same matmul precision) -------
def reference_forward(x_nchw, p):
    bf16 = jnp.bfloat16
    patches = extract_patches(x_nchw)                                   # bf16
    f = jnp.dot(patches, p["w_stem"],
                preferred_element_type=jnp.float32) + p["b_stem"]
    f = f * jax.nn.sigmoid(f)
    y = jnp.dot(f.astype(bf16), p["w_proj"],
                preferred_element_type=jnp.float32) + p["b_proj"]
    y = jnp.maximum(y, 0.0)
    y = y * p["bn_scale"] + p["bn_shift"]
    y = jnp.transpose(y.reshape(BATCH, FH, FW, C_PROJ), (0, 3, 1, 2))   # NCHW
    l1 = jnp.max(y, axis=(2, 3)).reshape(BATCH, -1)
    l2 = jnp.max(y.reshape(BATCH, C_PROJ, 2, 3, 2, 3), axis=(3, 5)).reshape(BATCH, -1)
    l3 = jnp.max(y.reshape(BATCH, C_PROJ, 3, 2, 3, 2), axis=(3, 5)).reshape(BATCH, -1)
    feat = jnp.concatenate([l1, l2, l3], axis=1)                        # (B, 3584)
    return jnp.dot(feat.astype(bf16), p["w_fc_pt"].T,
                   preferred_element_type=jnp.float32) + p["b_fc"]


if __name__ == "__main__":
    key = jax.random.PRNGKey(0)
    kx, kp = jax.random.split(key)
    x = jax.random.normal(kx, (BATCH, 3, IMG, IMG), jnp.float32)
    params = init_params(kp)

    out = jax.block_until_ready(forward(x, params))
    assert out.shape == (BATCH, NUM_CLASSES)

    ref = reference_forward(x, params)
    if not jnp.allclose(out, ref, atol=1e-2, rtol=1e-2):
        raise AssertionError("Pallas kernel output mismatches JAX reference")
    print("KERNEL_OK")
</pallas_src>

<mosaic_0001>
module attributes {stable_mosaic.version = 11 : i64} {
  func.func @fused_kernel(%arg0: memref<72x192xbf16, #tpu.memory_space<vmem>>, %arg1: memref<192x1280xbf16, #tpu.memory_space<vmem>>, %arg2: memref<1x1280xf32, #tpu.memory_space<vmem>>, %arg3: memref<1280x256xbf16, #tpu.memory_space<vmem>>, %arg4: memref<1x256xf32, #tpu.memory_space<vmem>>, %arg5: memref<1x256xf32, #tpu.memory_space<vmem>>, %arg6: memref<1x256xf32, #tpu.memory_space<vmem>>, %arg7: memref<3584x9xbf16, #tpu.memory_space<vmem>>, %arg8: memref<1x9xf32, #tpu.memory_space<vmem>>, %arg9: memref<2x9xf32, #tpu.memory_space<vmem>>) attributes {dimension_semantics = [], scalar_prefetch = 0 : i64, scratch_operands = 0 : i64, tpu.core_type = #tpu.core_type<tc>} {
    %c0 = arith.constant 0 : index
    %c0_0 = arith.constant 0 : index
    %0 = vector.load %arg0[%c0, %c0_0] : memref<72x192xbf16, #tpu.memory_space<vmem>>, vector<72x192xbf16>
    %c0_1 = arith.constant 0 : index
    %c0_2 = arith.constant 0 : index
    %1 = vector.load %arg1[%c0_1, %c0_2] : memref<192x1280xbf16, #tpu.memory_space<vmem>>, vector<192x1280xbf16>
    %cst = arith.constant dense<0.000000e+00> : vector<72x1280xf32>
    %2 = tpu.matmul %0, %1, %cst {dimension_numbers = #tpu.dot_dimension_numbers<[1], [0], [0], [1], [0, 0, 1, 1], [], []>} : vector<72x192xbf16>, vector<192x1280xbf16>, vector<72x1280xf32> -> vector<72x1280xf32>
    %c0_3 = arith.constant 0 : index
    %c0_4 = arith.constant 0 : index
    %3 = vector.load %arg2[%c0_3, %c0_4] : memref<1x1280xf32, #tpu.memory_space<vmem>>, vector<1x1280xf32>
    %4 = vector.broadcast %3 : vector<1x1280xf32> to vector<72x1280xf32>
    %5 = arith.addf %2, %4 : vector<72x1280xf32>
    %6 = arith.negf %5 : vector<72x1280xf32>
    %7 = math.exp %6 : vector<72x1280xf32>
    %cst_5 = arith.constant 1.000000e+00 : f32
    %8 = vector.broadcast %cst_5 : f32 to vector<72x1280xf32>
    %9 = arith.addf %8, %7 : vector<72x1280xf32>
    %10 = arith.divf %8, %9 : vector<72x1280xf32>
    %11 = arith.mulf %5, %10 : vector<72x1280xf32>
    %12 = arith.truncf %11 : vector<72x1280xf32> to vector<72x1280xbf16>
    %c0_6 = arith.constant 0 : index
    %c0_7 = arith.constant 0 : index
    %13 = vector.load %arg3[%c0_6, %c0_7] : memref<1280x256xbf16, #tpu.memory_space<vmem>>, vector<1280x256xbf16>
    %cst_8 = arith.constant dense<0.000000e+00> : vector<72x256xf32>
    %14 = tpu.matmul %12, %13, %cst_8 {dimension_numbers = #tpu.dot_dimension_numbers<[1], [0], [0], [1], [0, 0, 1, 1], [], []>} : vector<72x1280xbf16>, vector<1280x256xbf16>, vector<72x256xf32> -> vector<72x256xf32>
    %c0_9 = arith.constant 0 : index
    %c0_10 = arith.constant 0 : index
    %15 = vector.load %arg4[%c0_9, %c0_10] : memref<1x256xf32, #tpu.memory_space<vmem>>, vector<1x256xf32>
    %16 = vector.broadcast %15 : vector<1x256xf32> to vector<72x256xf32>
    %17 = arith.addf %14, %16 : vector<72x256xf32>
    %cst_11 = arith.constant 0.000000e+00 : f32
    %18 = vector.broadcast %cst_11 : f32 to vector<72x256xf32>
    %19 = arith.maximumf %17, %18 : vector<72x256xf32>
    %c0_12 = arith.constant 0 : index
    %c0_13 = arith.constant 0 : index
    %20 = vector.load %arg5[%c0_12, %c0_13] : memref<1x256xf32, #tpu.memory_space<vmem>>, vector<1x256xf32>
    %21 = vector.broadcast %20 : vector<1x256xf32> to vector<72x256xf32>
    %22 = arith.mulf %19, %21 : vector<72x256xf32>
    %c0_14 = arith.constant 0 : index
    %c0_15 = arith.constant 0 : index
    %23 = vector.load %arg6[%c0_14, %c0_15] : memref<1x256xf32, #tpu.memory_space<vmem>>, vector<1x256xf32>
    %24 = vector.broadcast %23 : vector<1x256xf32> to vector<72x256xf32>
    %25 = arith.addf %22, %24 : vector<72x256xf32>
    %26 = vector.shape_cast %25 : vector<72x256xf32> to vector<24x3x256xf32>
    %cst_16 = arith.constant dense<0xFF800000> : vector<24x256xf32>
    %27 = vector.multi_reduction <maximumf>, %26, %cst_16 [1] : vector<24x3x256xf32> to vector<24x256xf32>
    %28 = vector.shape_cast %27 : vector<24x256xf32> to vector<4x3x2x256xf32>
    %cst_17 = arith.constant dense<0xFF800000> : vector<4x2x256xf32>
    %29 = vector.multi_reduction <maximumf>, %28, %cst_17 [1] : vector<4x3x2x256xf32> to vector<4x2x256xf32>
    %30 = vector.shape_cast %29 : vector<4x2x256xf32> to vector<2x2x2x256xf32>
    %31 = vector.shape_cast %25 : vector<72x256xf32> to vector<36x2x256xf32>
    %cst_18 = arith.constant dense<0xFF800000> : vector<36x256xf32>
    %32 = vector.multi_reduction <maximumf>, %31, %cst_18 [1] : vector<36x2x256xf32> to vector<36x256xf32>
    %33 = vector.shape_cast %32 : vector<36x256xf32> to vector<6x2x3x256xf32>
    %cst_19 = arith.constant dense<0xFF800000> : vector<6x3x256xf32>
    %34 = vector.multi_reduction <maximumf>, %33, %cst_19 [1] : vector<6x2x3x256xf32> to vector<6x3x256xf32>
    %35 = vector.shape_cast %34 : vector<6x3x256xf32> to vector<2x3x3x256xf32>
    %cst_20 = arith.constant dense<0xFF800000> : vector<2x2x256xf32>
    %36 = vector.multi_reduction <maximumf>, %30, %cst_20 [2] : vector<2x2x2x256xf32> to vector<2x2x256xf32>
    %cst_21 = arith.constant dense<0xFF800000> : vector<2x256xf32>
    %37 = vector.multi_reduction <maximumf>, %36, %cst_21 [1] : vector<2x2x256xf32> to vector<2x256xf32>
    %38 = vector.extract_strided_slice %30 {offsets = [0, 0, 0, 0], sizes = [2, 1, 1, 256], strides = [1, 1, 1, 1]} : vector<2x2x2x256xf32> to vector<2x1x1x256xf32>
    %39 = vector.shape_cast %38 : vector<2x1x1x256xf32> to vector<2x256xf32>
    %40 = vector.extract_strided_slice %30 {offsets = [0, 0, 1, 0], sizes = [2, 1, 1, 256], strides = [1, 1, 1, 1]} : vector<2x2x2x256xf32> to vector<2x1x1x256xf32>
    %41 = vector.shape_cast %40 : vector<2x1x1x256xf32> to vector<2x256xf32>
    %42 = vector.extract_strided_slice %30 {offsets = [0, 1, 0, 0], sizes = [2, 1, 1, 256], strides = [1, 1, 1, 1]} : vector<2x2x2x256xf32> to vector<2x1x1x256xf32>
    %43 = vector.shape_cast %42 : vector<2x1x1x256xf32> to vector<2x256xf32>
    %44 = vector.extract_strided_slice %30 {offsets = [0, 1, 1, 0], sizes = [2, 1, 1, 256], strides = [1, 1, 1, 1]} : vector<2x2x2x256xf32> to vector<2x1x1x256xf32>
    %45 = vector.shape_cast %44 : vector<2x1x1x256xf32> to vector<2x256xf32>
    %46 = vector.extract_strided_slice %35 {offsets = [0, 0, 0, 0], sizes = [2, 1, 1, 256], strides = [1, 1, 1, 1]} : vector<2x3x3x256xf32> to vector<2x1x1x256xf32>
    %47 = vector.shape_cast %46 : vector<2x1x1x256xf32> to vector<2x256xf32>
    %48 = vector.extract_strided_slice %35 {offsets = [0, 0, 1, 0], sizes = [2, 1, 1, 256], strides = [1, 1, 1, 1]} : vector<2x3x3x256xf32> to vector<2x1x1x256xf32>
    %49 = vector.shape_cast %48 : vector<2x1x1x256xf32> to vector<2x256xf32>
    %50 = vector.extract_strided_slice %35 {offsets = [0, 0, 2, 0], sizes = [2, 1, 1, 256], strides = [1, 1, 1, 1]} : vector<2x3x3x256xf32> to vector<2x1x1x256xf32>
    %51 = vector.shape_cast %50 : vector<2x1x1x256xf32> to vector<2x256xf32>
    %52 = vector.extract_strided_slice %35 {offsets = [0, 1, 0, 0], sizes = [2, 1, 1, 256], strides = [1, 1, 1, 1]} : vector<2x3x3x256xf32> to vector<2x1x1x256xf32>
    %53 = vector.shape_cast %52 : vector<2x1x1x256xf32> to vector<2x256xf32>
    %54 = vector.extract_strided_slice %35 {offsets = [0, 1, 1, 0], sizes = [2, 1, 1, 256], strides = [1, 1, 1, 1]} : vector<2x3x3x256xf32> to vector<2x1x1x256xf32>
    %55 = vector.shape_cast %54 : vector<2x1x1x256xf32> to vector<2x256xf32>
    %56 = vector.extract_strided_slice %35 {offsets = [0, 1, 2, 0], sizes = [2, 1, 1, 256], strides = [1, 1, 1, 1]} : vector<2x3x3x256xf32> to vector<2x1x1x256xf32>
    %57 = vector.shape_cast %56 : vector<2x1x1x256xf32> to vector<2x256xf32>
    %58 = vector.extract_strided_slice %35 {offsets = [0, 2, 0, 0], sizes = [2, 1, 1, 256], strides = [1, 1, 1, 1]} : vector<2x3x3x256xf32> to vector<2x1x1x256xf32>
    %59 = vector.shape_cast %58 : vector<2x1x1x256xf32> to vector<2x256xf32>
    %60 = vector.extract_strided_slice %35 {offsets = [0, 2, 1, 0], sizes = [2, 1, 1, 256], strides = [1, 1, 1, 1]} : vector<2x3x3x256xf32> to vector<2x1x1x256xf32>
    %61 = vector.shape_cast %60 : vector<2x1x1x256xf32> to vector<2x256xf32>
    %62 = vector.extract_strided_slice %35 {offsets = [0, 2, 2, 0], sizes = [2, 1, 1, 256], strides = [1, 1, 1, 1]} : vector<2x3x3x256xf32> to vector<2x1x1x256xf32>
    %63 = vector.shape_cast %62 : vector<2x1x1x256xf32> to vector<2x256xf32>
    %64 = tpu.concatenate %37, %39, %41, %43, %45, %47, %49, %51, %53, %55, %57, %59, %61, %63 in 1 : vector<2x256xf32>, vector<2x256xf32>, vector<2x256xf32>, vector<2x256xf32>, vector<2x256xf32>, vector<2x256xf32>, vector<2x256xf32>, vector<2x256xf32>, vector<2x256xf32>, vector<2x256xf32>, vector<2x256xf32>, vector<2x256xf32>, vector<2x256xf32>, vector<2x256xf32> -> vector<2x3584xf32>
    %65 = arith.truncf %64 : vector<2x3584xf32> to vector<2x3584xbf16>
    %c0_22 = arith.constant 0 : index
    %c0_23 = arith.constant 0 : index
    %66 = vector.load %arg7[%c0_22, %c0_23] : memref<3584x9xbf16, #tpu.memory_space<vmem>>, vector<3584x9xbf16>
    %cst_24 = arith.constant dense<0.000000e+00> : vector<2x9xf32>
    %67 = tpu.matmul %65, %66, %cst_24 {dimension_numbers = #tpu.dot_dimension_numbers<[1], [0], [0], [1], [0, 0, 1, 1], [], []>} : vector<2x3584xbf16>, vector<3584x9xbf16>, vector<2x9xf32> -> vector<2x9xf32>
    %c0_25 = arith.constant 0 : index
    %c0_26 = arith.constant 0 : index
    %68 = vector.load %arg8[%c0_25, %c0_26] : memref<1x9xf32, #tpu.memory_space<vmem>>, vector<1x9xf32>
    %69 = vector.broadcast %68 : vector<1x9xf32> to vector<2x9xf32>
    %70 = arith.addf %67, %69 : vector<2x9xf32>
    %c0_27 = arith.constant 0 : index
    %c0_28 = arith.constant 0 : index
    %71 = vector.load %arg9[%c0_27, %c0_28] : memref<2x9xf32, #tpu.memory_space<vmem>>, vector<2x9xf32>
    tpu.vector_store %arg9[%c0_27, %c0_28], %70 {strides = array<i32>} : memref<2x9xf32, #tpu.memory_space<vmem>>, vector<2x9xf32>,
    return
  }
}

</mosaic_0001>

<bundles_post_ra>
// kernel: forward.1
= control target key start
LH: loop header
LB: loop body
LE: loop exit
PB: predicated region body
PF: predicated region fallthrough
CT: control target
= control target key end

     0   :  { %vm829_vm0 = vcmask 523264   ;;  %s20206_s0 = inlined_call_operand.vmem [shape: bf16[72,192], index: 0, kind: input, shape index: {}]   ;;  %s20207_s1 = inlined_call_operand.vmem [shape: bf16[192,1280], index: 1, kind: input, shape index: {}]   ;;  %s20208_s2 = inlined_call_operand.vmem [shape: f32[1,1280], index: 2, kind: input, shape index: {}]   ;;  %s20209_s3 = inlined_call_operand.vmem [shape: bf16[1280,256], index: 3, kind: input, shape index: {}]   ;;  %s20210_s4 = inlined_call_operand.vmem [shape: f32[1,256], index: 4, kind: input, shape index: {}]   ;;  %s20211_s5 = inlined_call_operand.vmem [shape: f32[1,256], index: 5, kind: input, shape index: {}]   ;;  %s20212_s6 = inlined_call_operand.vmem [shape: f32[1,256], index: 6, kind: input, shape index: {}]   ;;  %s20213_s7 = inlined_call_operand.vmem [shape: bf16[3584,9], index: 7, kind: input, shape index: {}]   ;;  %s20214_s8 = inlined_call_operand.vmem [shape: f32[1,9], index: 8, kind: input, shape index: {}]   ;;  %s20215_s9 = inlined_call_operand.hbm [shape: f32[2,9], index: 9, kind: output, shape index: {}]  }
   0x1   :  { %v9197_v0 = vld [vmem:[%s20207_s1 + $0x230] sm:$0xf]  ;;  %v11154_v1 = vld [vmem:[%s20207_s1 + $0x254] sm:$0xf0]  ;;  %v11149_v5 = vld [vmem:[%s20207_s1 + $0x234] sm:$0xf] }
   0x2   :  { %v9357_v2 = vld [vmem:[%s20207_s1 + $0x370] sm:$0xf]  ;;  %v9198_v3 = vor.u32 %v11154_v1, %v9197_v0  ;;  %v11194_v4 = vld [vmem:[%s20207_s1 + $0x394] sm:$0xf0]  ;;  %v9199_v6 = vld [vmem:[%s20207_s1 + $0x258] sm:$0xf0] }
   0x3   :  { %v9358_v7 = vor.u32 %v11194_v4, %v9357_v2  ;;  %v9202_v8 = vor.u32 %v11149_v5, %v9199_v6  ;;  %v11189_v9 = vld [vmem:[%s20207_s1 + $0x374] sm:$0xf]  ;;  %v9359_v10 = vld [vmem:[%s20207_s1 + $0x398] sm:$0xf0]  ;;  %v9157_v11 = vld [vmem:[%s20207_s1 + $0x1e0] sm:$0xf] }
   0x4   :  { %845 = vmatpush.bf16.msra.mxu0 %v9198_v3  ;;  %v9362_v12 = vor.u32 %v11189_v9, %v9359_v10  ;;  %v11144_v13 = vld [vmem:[%s20207_s1 + $0x204] sm:$0xf0]  ;;  %v9317_v14 = vld [vmem:[%s20207_s1 + $0x320] sm:$0xf]  ;;  %v11139_v18 = vld [vmem:[%s20207_s1 + $0x1e4] sm:$0xf] }
   0x5   :  { %v11184_v15 = vld [vmem:[%s20207_s1 + $0x344] sm:$0xf0]  ;;  %882 = vmatpush.bf16.msra.mxu1 %v9358_v7  ;;  %911 = vmatpush.bf16.msra.mxu2 %v9202_v8  ;;  %v9158_v16 = vor.u32 %v11144_v13, %v9157_v11  ;;  %v9159_v19 = vld [vmem:[%s20207_s1 + $0x208] sm:$0xf0]  ;;  %v11179_v20 = vld [vmem:[%s20207_s1 + $0x324] sm:$0xf] }
   0x6   :  { %v9318_v17 = vor.u32 %v11184_v15, %v9317_v14  ;;  %948 = vmatpush.bf16.msra.mxu3 %v9362_v12  ;;  %v9162_v21 = vor.u32 %v11139_v18, %v9159_v19  ;;  %v9319_v22 = vld [vmem:[%s20207_s1 + $0x348] sm:$0xf0]  ;;  %v9117_v23 = vld [vmem:[%s20207_s1 + $0x190] sm:$0xf]  ;;  %v11134_v24 = vld [vmem:[%s20207_s1 + $0x1b4] sm:$0xf0] }
   0x7   :  { %v9322_v25 = vor.u32 %v11179_v20, %v9319_v22  ;;  %v9277_v26 = vld [vmem:[%s20207_s1 + $0x2d0] sm:$0xf]  ;;  %v11174_v27 = vld [vmem:[%s20207_s1 + $0x2f4] sm:$0xf0]  ;;  %v11129_v28 = vld [vmem:[%s20207_s1 + $0x194] sm:$0xf]  ;;  %v9118_v29 = vor.u32 %v11134_v24, %v9117_v23 }
   0x8   :  { %846 = vmatpush.bf16.msra.mxu0 %v9158_v16  ;;  %v9119_v30 = vld [vmem:[%s20207_s1 + $0x1b8] sm:$0xf0]  ;;  %v11169_v31 = vld [vmem:[%s20207_s1 + $0x2d4] sm:$0xf]  ;;  %v9278_v33 = vor.u32 %v11174_v27, %v9277_v26  ;;  %v9077_v35 = vld [vmem:[%s20207_s1 + $0x140] sm:$0xf] }
   0x9   :  { %v9279_v32 = vld [vmem:[%s20207_s1 + $0x2f8] sm:$0xf0]  ;;  %883 = vmatpush.bf16.msra.mxu1 %v9318_v17  ;;  %912 = vmatpush.bf16.msra.mxu2 %v9162_v21  ;;  %v9122_v34 = vor.u32 %v11129_v28, %v9119_v30  ;;  %v11124_v36 = vld [vmem:[%s20207_s1 + $0x164] sm:$0xf0]  ;;  %v9237_v37 = vld [vmem:[%s20207_s1 + $0x280] sm:$0xf] }
   0xa   :  { %949 = vmatpush.bf16.msra.mxu3 %v9322_v25  ;;  %v9282_v38 = vor.u32 %v11169_v31, %v9279_v32  ;;  %v11164_v39 = vld [vmem:[%s20207_s1 + $0x2a4] sm:$0xf0]  ;;  %v11119_v40 = vld [vmem:[%s20207_s1 + $0x144] sm:$0xf]  ;;  %v9079_v41 = vld [vmem:[%s20207_s1 + $0x168] sm:$0xf0]  ;;  %v9078_v44 = vor.u32 %v11124_v36, %v9077_v35 }
   0xb   :  { %v11159_v42 = vld [vmem:[%s20207_s1 + $0x284] sm:$0xf]  ;;  %v9239_v43 = vld [vmem:[%s20207_s1 + $0x2a8] sm:$0xf0]  ;;  %v9238_v46 = vor.u32 %v11164_v39, %v9237_v37  ;;  %v9082_v47 = vor.u32 %v11119_v40, %v9079_v41  ;;  %v9037_v49 = vld [vmem:[%s20207_s1 + $0xf0] sm:$0xf] }
   0xc   :  { %847 = vmatpush.bf16.msra.mxu0 %v9118_v29  ;;  %v11071_v45 = vld [vmem:[%s20206_s0 + $0x4] sm:$0xf]  ;;  %v8887_v48 = vld [vmem:[%s20206_s0 + $0x8] sm:$0xf0]  ;;  %v11114_v50 = vld [vmem:[%s20207_s1 + $0x114] sm:$0xf0]  ;;  %v9242_v51 = vor.u32 %v11159_v42, %v9239_v43 }
   0xd   :  { %884 = vmatpush.bf16.msra.mxu1 %v9278_v33  ;;  %913 = vmatpush.bf16.msra.mxu2 %v9122_v34  ;;  %v11109_v52 = vld [vmem:[%s20207_s1 + $0xf4] sm:$0xf]  ;;  %v9039_v53 = vld [vmem:[%s20207_s1 + $0x118] sm:$0xf0]  ;;  %v12139_v54 = vor.u32 %v11071_v45, %v8887_v48  ;;  %v9038_v55 = vor.u32 %v11114_v50, %v9037_v49  ;;  %v8997_v57 = vld [vmem:[%s20207_s1 + $0xa0] sm:$0xf] }
   0xe   :  { %950 = vmatpush.bf16.msra.mxu3 %v9282_v38  ;;  %v9042_v56 = vor.u32 %v11109_v52, %v9039_v53  ;;  %v11104_v58 = vld [vmem:[%s20207_s1 + $0xc4] sm:$0xf0]  ;;  %v11099_v59 = vld [vmem:[%s20207_s1 + $0xa4] sm:$0xf]  ;;  %v8999_v60 = vld [vmem:[%s20207_s1 + $0xc8] sm:$0xf0] }
   0xf   :  { %20332 = vst [vmem:[#allocation5_spill] sm:$0xff] %v12139_v54  ;;  %v9365_v61 = vld [vmem:[%s20207_s1 + $0x378] sm:$0xf]  ;;  %v11195_v62 = vld [vmem:[%s20207_s1 + $0x39c] sm:$0xf0]  ;;  %v8998_v63 = vor.u32 %v11104_v58, %v8997_v57  ;;  %v9002_v2 = vor.u32 %v11099_v59, %v8999_v60 }
  0x10   :  { %848 = vmatpush.bf16.msra.mxu0 %v9078_v44  ;;  %v8957_v0 = vld [vmem:[%s20207_s1 + $0x50] sm:$0xf]  ;;  %v9366_v1 = vor.u32 %v11195_v62, %v9365_v61  ;;  %v11094_v3 = vld [vmem:[%s20207_s1 + $0x74] sm:$0xf0]  ;;  %v11155_v5 = vld [vmem:[%s20207_s1 + $0x25c] sm:$0xf0] }
  0x11   :  { %885 = vmatpush.bf16.msra.mxu1 %v9238_v46  ;;  %914 = vmatpush.bf16.msra.mxu2 %v9082_v47  ;;  %v9205_v4 = vld [vmem:[%s20207_s1 + $0x238] sm:$0xf]  ;;  %v11089_v6 = vld [vmem:[%s20207_s1 + $0x54] sm:$0xf]  ;;  %v8959_v7 = vld [vmem:[%s20207_s1 + $0x78] sm:$0xf0]  ;;  %v8958_v11 = vor.u32 %v11094_v3, %v8957_v0 }
  0x12   :  { %951 = vmatpush.bf16.msra.mxu3 %v9242_v51  ;;  %v9206_v8 = vor.u32 %v11155_v5, %v9205_v4  ;;  %v9165_v9 = vld [vmem:[%s20207_s1 + $0x1e8] sm:$0xf]  ;;  %v11145_v10 = vld [vmem:[%s20207_s1 + $0x20c] sm:$0xf0]  ;;  %v8917_v12 = vld [vmem:[%s20207_s1] sm:$0xf]  ;;  %v8962_v14 = vor.u32 %v11089_v6, %v8959_v7 }
  0x13   :  { %v9166_v13 = vor.u32 %v11145_v10, %v9165_v9  ;;  %v11084_v15 = vld [vmem:[%s20207_s1 + $0x24] sm:$0xf0]  ;;  %v11079_v16 = vld [vmem:[%s20207_s1 + $0x4] sm:$0xf] }
  0x14   :  { %9395 = vmatmul.msk.bf16.vlgmr.msra.gmra.mxu1 %vm829_vm0, %v12139_v54  ;;  %849 = vmatpush.bf16.msra.mxu0 %v9038_v55 }
  0x15   :  { %9400 = vmatmul.msk.bf16.vlgmr.msra.gmra.mxu3 %vm829_vm0, %v12139_v54  ;;  %915 = vmatpush.bf16.msra.mxu2 %v9042_v56 }
  0x16   :  { %1014 = vmatpush.bf16.msrb.mxu3 %v9366_v1  ;;  %977 = vmatpush.bf16.msrb.mxu1 %v9206_v8 }
  0x18   :  { %850 = vmatpush.bf16.msra.mxu0 %v8998_v63 }
  0x19   :  { %916 = vmatpush.bf16.msra.mxu2 %v9002_v2 }
  0x1a   :  { %14 = vsyncpa [#allocation3], 0  ;;  %v8919_v17 = vld [vmem:[%s20207_s1 + $0x28] sm:$0xf0]  ;;  %v11150_v18 = vld [vmem:[%s20207_s1 + $0x23c] sm:$0xf]  ;;  %v8918_v22 = vor.u32 %v11084_v15, %v8917_v12  ;;  %978 = vmatpush.bf16.msrb.mxu1 %v9166_v13 }
  0x1b   :  { %v9207_v19 = vld [vmem:[%s20207_s1 + $0x260] sm:$0xf0]  ;;  %v11190_v20 = vld [vmem:[%s20207_s1 + $0x37c] sm:$0xf]  ;;  %v8885_v23 = vld [vmem:[%s20206_s0] sm:$0xf]  ;;  %v8922_v25 = vor.u32 %v11079_v16, %v8919_v17 }
  0x1c   :  { %v9367_v21 = vld [vmem:[%s20207_s1 + $0x3a0] sm:$0xf0]  ;;  %851 = vmatpush.bf16.msra.mxu0 %v8958_v11  ;;  %v11072_v24 = vld [vmem:[%s20206_s0 + $0x4] sm:$0xf0]  ;;  %v11073_v26 = vld [vmem:[%s20206_s0 + $0x14] sm:$0xf]  ;;  %v9210_v28 = vor.u32 %v11150_v18, %v9207_v19 }
  0x1d   :  { %917 = vmatpush.bf16.msra.mxu2 %v8962_v14  ;;  %v8895_v27 = vld [vmem:[%s20206_s0 + $0x18] sm:$0xf0]  ;;  %v9370_v29 = vor.u32 %v11190_v20, %v9367_v21  ;;  %v12223_v30 = vor.u32 %v11072_v24, %v8885_v23  ;;  %v11140_v32 = vld [vmem:[%s20207_s1 + $0x1ec] sm:$0xf]  ;;  %v9167_v33 = vld [vmem:[%s20207_s1 + $0x210] sm:$0xf0] }
  0x1e   :  { %v12225_v31 = vor.u32 %v11073_v26, %v8895_v27  ;;  %v9325_v34 = vld [vmem:[%s20207_s1 + $0x328] sm:$0xf]  ;;  %v9170_v35 = vor.u32 %v11140_v32, %v9167_v33  ;;  %v11185_v36 = vld [vmem:[%s20207_s1 + $0x34c] sm:$0xf0]  ;;  %v9125_v37 = vld [vmem:[%s20207_s1 + $0x198] sm:$0xf] }
  0x1f   :  { %20333 = vst [vmem:[#allocation6_spill] sm:$0xff] %v12223_v30  ;;  %v11135_v38 = vld [vmem:[%s20207_s1 + $0x1bc] sm:$0xf0]  ;;  %v9326_v39 = vor.u32 %v11185_v36, %v9325_v34  ;;  %v11180_v41 = vld [vmem:[%s20207_s1 + $0x32c] sm:$0xf]  ;;  %s8874_s16 = sshll.u32 %s20215_s9, 4  ;;  %s8875_s16 = int_to_ptr.hbm [resolvable:$true] %s8874_s16 }
  0x20   :  { %852 = vmatpush.bf16.msra.mxu0 %v8918_v22  ;;  %20334 = vst [vmem:[#allocation7_spill] sm:$0xff] %v12225_v31  ;;  %v9126_v40 = vor.u32 %v11135_v38, %v9125_v37  ;;  %v9327_v42 = vld [vmem:[%s20207_s1 + $0x350] sm:$0xf0]  ;;  %v11130_v43 = vld [vmem:[%s20207_s1 + $0x19c] sm:$0xf]  ;;  %v42_v37 = vld [vmem:[%s20206_s0 + $0x40] sm:$0xff] }
  0x21   :  { %918 = vmatpush.bf16.msra.mxu2 %v8922_v25  ;;  %v9330_v44 = vor.u32 %v11180_v41, %v9327_v42  ;;  %v9127_v45 = vld [vmem:[%s20207_s1 + $0x1c0] sm:$0xf0]  ;;  %v9085_v46 = vld [vmem:[%s20207_s1 + $0x148] sm:$0xf]  ;;  %v11125_v47 = vld [vmem:[%s20207_s1 + $0x16c] sm:$0xf0]  ;;  %1015 = vmatpush.bf16.msrb.mxu3 %v9326_v39  ;;  %v213_v42 = vunpack.c.h.b16 %v42_v37 }
  0x22   :  { %979 = vmatpush.bf16.msrb.mxu1 %v9126_v40  ;;  %v9130_v48 = vor.u32 %v11130_v43, %v9127_v45  ;;  %v9086_v49 = vor.u32 %v11125_v47, %v9085_v46  ;;  %v8893_v50 = vld [vmem:[%s20206_s0 + $0x10] sm:$0xf]  ;;  %v11074_v51 = vld [vmem:[%s20206_s0 + $0x14] sm:$0xf0]  ;;  %v11075_v52 = vld [vmem:[%s20206_s0 + $0x24] sm:$0xf] }
  0x23   :  { %853 = vmatmul.bf16.vlgmr.msra.gmra.mxu0 %v12223_v30  ;;  %v8903_v53 = vld [vmem:[%s20206_s0 + $0x28] sm:$0xf0]  ;;  %v12281_v55 = vor.u32 %v11074_v51, %v8893_v50  ;;  %v9045_v57 = vld [vmem:[%s20207_s1 + $0xf8] sm:$0xf]  ;;  %v11115_v58 = vld [vmem:[%s20207_s1 + $0x11c] sm:$0xf0]  ;;  %v12402_v45 = vpack.c.b16 %v213_v42, %v213_v42 }
  0x24   :  { %1043 = vmatpush.bf16.msrb.mxu0 %v9210_v28  ;;  %9396 = vmatmul.msk.bf16.gmra.mxu1 %vm829_vm0, %v12225_v31  ;;  %v12283_v56 = vor.u32 %v11075_v52, %v8903_v53  ;;  %v9046_v59 = vor.u32 %v11115_v58, %v9045_v57  ;;  %v11120_v60 = vld [vmem:[%s20207_s1 + $0x14c] sm:$0xf]  ;;  %v9087_v61 = vld [vmem:[%s20207_s1 + $0x170] sm:$0xf0]  ;;  %v9005_v62 = vld [vmem:[%s20207_s1 + $0xa8] sm:$0xf] }
  0x25   :  { %1080 = vmatpush.bf16.msrb.mxu2 %v9370_v29  ;;  %9401 = vmatmul.msk.bf16.gmra.mxu3 %vm829_vm0, %v12225_v31  ;;  %20335 = vst [vmem:[#allocation8_spill] sm:$0xff] %v12281_v55  ;;  %v9090_v63 = vor.u32 %v11120_v60, %v9087_v61  ;;  %v11105_v0 = vld [vmem:[%s20207_s1 + $0xcc] sm:$0xf0]  ;;  %v9285_v1 = vld [vmem:[%s20207_s1 + $0x2d8] sm:$0xf] }
  0x26   :  { %919 = vmatmul.bf16.vlgmr.msra.gmra.mxu2 %v12223_v30  ;;  %980 = vmatpush.bf16.msrb.mxu1 %v9086_v49  ;;  %20336 = vst [vmem:[#allocation9_spill] sm:$0xff] %v12283_v56  ;;  %v11175_v2 = vld [vmem:[%s20207_s1 + $0x2fc] sm:$0xf0]  ;;  %v9006_v3 = vor.u32 %v11105_v0, %v9005_v62  ;;  %v8965_v5 = vld [vmem:[%s20207_s1 + $0x58] sm:$0xf]  ;;  %v212_v49 = vunpack.c.l.b16 %v42_v37 }
  0x27   :  { %v9286_v4 = vor.u32 %v11175_v2, %v9285_v1  ;;  %v11095_v6 = vld [vmem:[%s20207_s1 + $0x7c] sm:$0xf0]  ;;  %v11170_v7 = vld [vmem:[%s20207_s1 + $0x2dc] sm:$0xf]  ;;  %v9287_v8 = vld [vmem:[%s20207_s1 + $0x300] sm:$0xf0] }
  0x28   :  { %1044 = vmatpush.bf16.msrb.mxu0 %v9170_v35  ;;  %v9290_v9 = vor.u32 %v11170_v7, %v9287_v8  ;;  %v9245_v10 = vld [vmem:[%s20207_s1 + $0x288] sm:$0xf]  ;;  %v11165_v11 = vld [vmem:[%s20207_s1 + $0x2ac] sm:$0xf0]  ;;  %v11110_v12 = vld [vmem:[%s20207_s1 + $0xfc] sm:$0xf]  ;;  %v8966_v13 = vor.u32 %v11095_v6, %v8965_v5  ;;  %v12416_v50 = vpack.c.b16 %v212_v49, %v212_v49 }
  0x29   :  { %1081 = vmatpush.bf16.msrb.mxu2 %v9330_v44  ;;  %1016 = vmatpush.bf16.msrb.mxu3 %v9286_v4  ;;  %v9246_v14 = vor.u32 %v11165_v11, %v9245_v10  ;;  %v9047_v15 = vld [vmem:[%s20207_s1 + $0x120] sm:$0xf0]  ;;  %v8925_v16 = vld [vmem:[%s20207_s1 + $0x8] sm:$0xf]  ;;  %v11085_v17 = vld [vmem:[%s20207_s1 + $0x2c] sm:$0xf0] }
  0x2a   :  { %981 = vmatpush.bf16.msrb.mxu1 %v9046_v59  ;;  %v9050_v18 = vor.u32 %v11110_v12, %v9047_v15  ;;  %v8901_v19 = vld [vmem:[%s20206_s0 + $0x20] sm:$0xf]  ;;  %v11076_v20 = vld [vmem:[%s20206_s0 + $0x24] sm:$0xf0]  ;;  %v11077_v21 = vld [vmem:[%s20206_s0 + $0x34] sm:$0xf]  ;;  %v8926_v23 = vor.u32 %v11085_v17, %v8925_v16 }
  0x2b   :  { %v8911_v22 = vld [vmem:[%s20206_s0 + $0x38] sm:$0xf0]  ;;  %v12357_v24 = vor.u32 %v11076_v20, %v8901_v19  ;;  %v11100_v26 = vld [vmem:[%s20207_s1 + $0xac] sm:$0xf]  ;;  %v9007_v27 = vld [vmem:[%s20207_s1 + $0xd0] sm:$0xf0] }
  0x2c   :  { %1045 = vmatpush.bf16.msrb.mxu0 %v9130_v48  ;;  %v12359_v25 = vor.u32 %v11077_v21, %v8911_v22  ;;  %v11090_v28 = vld [vmem:[%s20207_s1 + $0x5c] sm:$0xf]  ;;  %v9010_v29 = vor.u32 %v11100_v26, %v9007_v27  ;;  %v8967_v32 = vld [vmem:[%s20207_s1 + $0x80] sm:$0xf0]  ;;  %v11160_v33 = vld [vmem:[%s20207_s1 + $0x28c] sm:$0xf] }
  0x2d   :  { %1082 = vmatpush.bf16.msrb.mxu2 %v9290_v9  ;;  %1017 = vmatpush.bf16.msrb.mxu3 %v9246_v14  ;;  %20337 = vst [vmem:[#allocation10_spill] sm:$0xff] %v12357_v24  ;;  %v9247_v34 = vld [vmem:[%s20207_s1 + $0x2b0] sm:$0xf0]  ;;  %v8970_v35 = vor.u32 %v11090_v28, %v8967_v32  ;;  %v11080_v38 = vld [vmem:[%s20207_s1 + $0xc] sm:$0xf] }
  0x2e   :  { %982 = vmatpush.bf16.msrb.mxu1 %v9006_v3  ;;  %20338 = vst [vmem:[#allocation11_spill] sm:$0xff] %v12359_v25  ;;  %v9250_v36 = vor.u32 %v11160_v33, %v9247_v34  ;;  %v8927_v39 = vld [vmem:[%s20207_s1 + $0x30] sm:$0xf0]  ;;  %v8909_v40 = vld [vmem:[%s20206_s0 + $0x30] sm:$0xf] }
  0x2f   :  { %v11078_v41 = vld [vmem:[%s20206_s0 + $0x34] sm:$0xf0]  ;;  %v8930_v43 = vor.u32 %v11080_v38, %v8927_v39  ;;  %20340 = vst [vmem:[#allocation13_spill] sm:$0xff] %v12402_v45  ;;  %v9373_v46 = vld [vmem:[%s20207_s1 + $0x380] sm:$0xf] }
  0x30   :  { %1046 = vmatpush.bf16.msrb.mxu0 %v9090_v63  ;;  %v12400_v44 = vor.u32 %v11078_v41, %v8909_v40  ;;  %v11196_v47 = vld [vmem:[%s20207_s1 + $0x3a4] sm:$0xf0]  ;;  %20341 = vst [vmem:[#allocation14_spill] sm:$0xff] %v12416_v50  ;;  %v9213_v51 = vld [vmem:[%s20207_s1 + $0x240] sm:$0xf] }
  0x31   :  { %1083 = vmatpush.bf16.msrb.mxu2 %v9250_v36  ;;  %v9374_v48 = vor.u32 %v11196_v47, %v9373_v46  ;;  %v11156_v52 = vld [vmem:[%s20207_s1 + $0x264] sm:$0xf0]  ;;  %v11191_v53 = vld [vmem:[%s20207_s1 + $0x384] sm:$0xf]  ;;  %v9375_v58 = vld [vmem:[%s20207_s1 + $0x3a8] sm:$0xf0] }
  0x32   :  { %983 = vmatpush.bf16.msrb.mxu1 %v8966_v13  ;;  %20339 = vst [vmem:[#allocation12_spill] sm:$0xff] %v12400_v44  ;;  %v9214_v57 = vor.u32 %v11156_v52, %v9213_v51  ;;  %v11151_v59 = vld [vmem:[%s20207_s1 + $0x244] sm:$0xf]  ;;  %v9215_v60 = vld [vmem:[%s20207_s1 + $0x268] sm:$0xf0]  ;;  %v9378_v61 = vor.u32 %v11191_v53, %v9375_v58 }
  0x33   :  { %858 = vmatmul.bf16.gmra.mxu0 %v12281_v55  ;;  %1146 = vmatpush.bf16.msra.mxu3 %v9374_v48  ;;  %v9218_v62 = vor.u32 %v11151_v59, %v9215_v60  ;;  %v9173_v63 = vld [vmem:[%s20207_s1 + $0x1f0] sm:$0xf]  ;;  %v11146_v0 = vld [vmem:[%s20207_s1 + $0x214] sm:$0xf0]  ;;  %v11141_v2 = vld [vmem:[%s20207_s1 + $0x1f4] sm:$0xf] }
  0x34   :  { %9397 = vmatmul.msk.bf16.gmra.mxu1 %vm829_vm0, %v12283_v56  ;;  %1047 = vmatpush.bf16.msrb.mxu0 %v9050_v18  ;;  %v9174_v1 = vor.u32 %v11146_v0, %v9173_v63  ;;  %v9175_v3 = vld [vmem:[%s20207_s1 + $0x218] sm:$0xf0]  ;;  %v9333_v4 = vld [vmem:[%s20207_s1 + $0x330] sm:$0xf]  ;;  %v11186_v6 = vld [vmem:[%s20207_s1 + $0x354] sm:$0xf0] }
  0x35   :  { %9402 = vmatmul.msk.bf16.gmra.mxu3 %vm829_vm0, %v12283_v56  ;;  %1212 = vmatpush.bf16.msra.mxu2 %v9378_v61  ;;  %v9178_v5 = vor.u32 %v11141_v2, %v9175_v3  ;;  %v9334_v7 = vor.u32 %v11186_v6, %v9333_v4  ;;  %v9133_v8 = vld [vmem:[%s20207_s1 + $0x1a0] sm:$0xf]  ;;  %v11136_v9 = vld [vmem:[%s20207_s1 + $0x1c4] sm:$0xf0]  ;;  %v11181_v10 = vld [vmem:[%s20207_s1 + $0x334] sm:$0xf] }
  0x36   :  { %924 = vmatmul.bf16.gmra.mxu2 %v12281_v55  ;;  %984 = vmatpush.bf16.msrb.mxu1 %v8926_v23  ;;  %v9134_v11 = vor.u32 %v11136_v9, %v9133_v8  ;;  %v9335_v12 = vld [vmem:[%s20207_s1 + $0x358] sm:$0xf0]  ;;  %v11131_v13 = vld [vmem:[%s20207_s1 + $0x1a4] sm:$0xf]  ;;  %v9135_v14 = vld [vmem:[%s20207_s1 + $0x1c8] sm:$0xf0] }
  0x37   :  { %1147 = vmatpush.bf16.msra.mxu3 %v9334_v7  ;;  %v9338_v15 = vor.u32 %v11181_v10, %v9335_v12  ;;  %v9138_v16 = vor.u32 %v11131_v13, %v9135_v14  ;;  %v9093_v17 = vld [vmem:[%s20207_s1 + $0x150] sm:$0xf]  ;;  %v11126_v18 = vld [vmem:[%s20207_s1 + $0x174] sm:$0xf0]  ;;  %v9053_v20 = vld [vmem:[%s20207_s1 + $0x100] sm:$0xf] }
  0x38   :  { %1048 = vmatpush.bf16.msrb.mxu0 %v9010_v29  ;;  %v9094_v19 = vor.u32 %v11126_v18, %v9093_v17  ;;  %v11116_v21 = vld [vmem:[%s20207_s1 + $0x124] sm:$0xf0]  ;;  %v9013_v23 = vld [vmem:[%s20207_s1 + $0xb0] sm:$0xf]  ;;  %v11106_v26 = vld [vmem:[%s20207_s1 + $0xd4] sm:$0xf0] }
  0x39   :  { %1213 = vmatpush.bf16.msra.mxu2 %v9338_v15  ;;  %v9054_v22 = vor.u32 %v11116_v21, %v9053_v20  ;;  %v9014_v27 = vor.u32 %v11106_v26, %v9013_v23  ;;  %v9293_v28 = vld [vmem:[%s20207_s1 + $0x2e0] sm:$0xf]  ;;  %v11176_v29 = vld [vmem:[%s20207_s1 + $0x304] sm:$0xf0]  ;;  %v11121_v36 = vld [vmem:[%s20207_s1 + $0x154] sm:$0xf] }
  0x3a   :  { %1109 = vmatpush.bf16.msra.mxu1 %v9214_v57  ;;  %v8973_v32 = vld [vmem:[%s20207_s1 + $0x60] sm:$0xf]  ;;  %v9294_v33 = vor.u32 %v11176_v29, %v9293_v28  ;;  %v11096_v34 = vld [vmem:[%s20207_s1 + $0x84] sm:$0xf0]  ;;  %v9095_v37 = vld [vmem:[%s20207_s1 + $0x178] sm:$0xf0] }
  0x3b   :  { %v9098_v38 = vor.u32 %v11121_v36, %v9095_v37  ;;  %v8933_v40 = vld [vmem:[%s20207_s1 + $0x10] sm:$0xf]  ;;  %v11086_v41 = vld [vmem:[%s20207_s1 + $0x34] sm:$0xf0]  ;;  %v11111_v48 = vld [vmem:[%s20207_s1 + $0x104] sm:$0xf] }
  0x3c   :  { %1049 = vmatpush.bf16.msrb.mxu0 %v8970_v35  ;;  %v8974_v35 = vor.u32 %v11096_v34, %v8973_v32  ;;  %1148 = vmatpush.bf16.msra.mxu3 %v9294_v33  ;;  %v9253_v42 = vld [vmem:[%s20207_s1 + $0x290] sm:$0xf]  ;;  %v11166_v46 = vld [vmem:[%s20207_s1 + $0x2b4] sm:$0xf0]  ;;  %v9055_v49 = vld [vmem:[%s20207_s1 + $0x128] sm:$0xf0] }
  0x3d   :  { %v9254_v47 = vor.u32 %v11166_v46, %v9253_v42  ;;  %v9058_v51 = vor.u32 %v11111_v48, %v9055_v49  ;;  %v12552_v57 = vld [vmem:[%s20208_s2] sm:$0xff]  ;;  %v11101_v58 = vld [vmem:[%s20207_s1 + $0xb4] sm:$0xf]  ;;  %v9015_v59 = vld [vmem:[%s20207_s1 + $0xd8] sm:$0xf0] }
  0x3e   :  { %1110 = vmatpush.bf16.msra.mxu1 %v9174_v1  ;;  %v11171_v60 = vld [vmem:[%s20207_s1 + $0x2e4] sm:$0xf]  ;;  %v9295_v61 = vld [vmem:[%s20207_s1 + $0x308] sm:$0xf0]  ;;  %v12567_v0 = vperm.slane %v12552_v57, 0  ;;  %v12583_v9 = vperm.slane %v12552_v57, 1 }
  0x3f   :  { %v9298_v63 = vor.u32 %v11171_v60, %v9295_v61  ;;  %v11091_v1 = vld [vmem:[%s20207_s1 + $0x64] sm:$0xf]  ;;  %v8975_v2 = vld [vmem:[%s20207_s1 + $0x88] sm:$0xf0]  ;;  %v11081_v15 = vld [vmem:[%s20207_s1 + $0x14] sm:$0xf] }
  0x40   :  { %1050 = vmatpush.bf16.msrb.mxu0 %v8930_v43  ;;  %v8934_v43 = vor.u32 %v11086_v41, %v8933_v40  ;;  %1149 = vmatpush.bf16.msra.mxu3 %v9254_v47  ;;  %v8978_v3 = vor.u32 %v11091_v1, %v8975_v2  ;;  %v11161_v17 = vld [vmem:[%s20207_s1 + $0x294] sm:$0xf]  ;;  %v9255_v21 = vld [vmem:[%s20207_s1 + $0x2b8] sm:$0xf0] }
  0x41   :  { %1214 = vmatpush.bf16.msra.mxu2 %v9298_v63  ;;  %v9258_v23 = vor.u32 %v11161_v17, %v9255_v21 }
  0x42   :  { %1111 = vmatpush.bf16.msra.mxu1 %v9134_v11 }
  0x43   :  { %863 = vmatmul.bf16.gmra.mxu0 %v12357_v24 }
  0x44   :  { %9398 = vmatmul.msk.bf16.gmra.mxu1 %vm829_vm0, %v12359_v25  ;;  %1175 = vmatpush.bf16.msra.mxu0 %v9218_v62  ;;  %v9018_v62 = vor.u32 %v11101_v58, %v9015_v59 }
  0x45   :  { %9403 = vmatmul.msk.bf16.gmra.mxu3 %vm829_vm0, %v12359_v25  ;;  %1215 = vmatpush.bf16.msra.mxu2 %v9258_v23 }
  0x46   :  { %929 = vmatmul.bf16.gmra.mxu2 %v12357_v24  ;;  %1112 = vmatpush.bf16.msra.mxu1 %v9094_v19 }
  0x48   :  { %1176 = vmatpush.bf16.msra.mxu0 %v9178_v5 }
  0x4a   :  { %1113 = vmatpush.bf16.msra.mxu1 %v9054_v22 }
  0x4c   :  { %1177 = vmatpush.bf16.msra.mxu0 %v9138_v16  ;;  %v8935_v16 = vld [vmem:[%s20207_s1 + $0x38] sm:$0xf0] }
  0x4d   :  { %v8938_v20 = vor.u32 %v11081_v15, %v8935_v16 }
  0x4e   :  { %1114 = vmatpush.bf16.msra.mxu1 %v9014_v27 }
  0x50   :  { %1178 = vmatpush.bf16.msra.mxu0 %v9098_v38 }
  0x52   :  { %1115 = vmatpush.bf16.msra.mxu1 %v8974_v35 }
  0x53   :  { %868 = vmatmul.bf16.gmra.mxu0 %v12400_v44 }
  0x54   :  { %9399 = vmatmul.msk.bf16.gmra.mxu1 %vm829_vm0, %v12402_v45  ;;  %1179 = vmatpush.bf16.msra.mxu0 %v9058_v51 }
  0x55   :  { %9404 = vmatmul.msk.bf16.gmra.mxu3 %vm829_vm0, %v12402_v45 }
  0x56   :  { %934 = vmatmul.bf16.gmra.mxu2 %v12400_v44  ;;  %1116 = vmatpush.bf16.msra.mxu1 %v8934_v43 }
  0x58   :  { %1180 = vmatpush.bf16.msra.mxu0 %v9018_v62 }
  0x5c   :  { %1181 = vmatpush.bf16.msra.mxu0 %v8978_v3 }
  0x60   :  { %1182 = vmatpush.bf16.msra.mxu0 %v8938_v20 }
  0x63   :  { %873 = vmatmul.bf16.gmra.mxu0 %v12416_v50 }
  0x64   :  { %985 = vmatmul.bf16.vlgmr.msrb.gmra.mxu1 %v12223_v30 }
  0x65   :  { %9405 = vmatmul.msk.bf16.vlgmr.msrb.gmra.mxu3 %vm829_vm0, %v12139_v54 }
  0x66   :  { %939 = vmatmul.bf16.gmra.mxu2 %v12416_v50 }
  0x73   :  { %1051 = vmatmul.bf16.vlgmr.msrb.gmra.mxu0 %v12223_v30 }
  0x74   :  { %990 = vmatmul.bf16.gmra.mxu1 %v12281_v55 }
  0x75   :  { %9406 = vmatmul.msk.bf16.gmra.mxu3 %vm829_vm0, %v12225_v31 }
  0x76   :  { %9410 = vmatmul.msk.bf16.vlgmr.msrb.gmra.mxu2 %vm829_vm0, %v12139_v54 }
  0x83   :  { %1056 = vmatmul.bf16.gmra.mxu0 %v12281_v55 }
  0x84   :  { %995 = vmatmul.bf16.gmra.mxu1 %v12357_v24 }
  0x85   :  { %9407 = vmatmul.msk.bf16.gmra.mxu3 %vm829_vm0, %v12283_v56 }
  0x86   :  { %9411 = vmatmul.msk.bf16.gmra.mxu2 %vm829_vm0, %v12225_v31 }
  0x91   :  { %v887_v39 = vpop.f32.mrf.mxu1 }
  0x93   :  { %1061 = vmatmul.bf16.gmra.mxu0 %v12357_v24 }
  0x94   :  { %1000 = vmatmul.bf16.gmra.mxu1 %v12400_v44 }
  0x95   :  { %9408 = vmatmul.msk.bf16.gmra.mxu3 %vm829_vm0, %v12359_v25 }
  0x96   :  { %9412 = vmatmul.msk.bf16.gmra.mxu2 %vm829_vm0, %v12283_v56 }
  0x98   :  { %v953_v52 = vpop.f32.mrf.mxu3 }
  0x99   :  { %v889_v53 = vpop.f32.mrf.mxu1 }
  0xa0   :  { %v955_v4 = vpop.f32.mrf.mxu3  ;;  %v854_v5 = vpop.f32.mrf.mxu0 }
  0xa1   :  { %v855_v6 = vadd.f32 %v854_v5, %v12567_v0  ;;  %v892_v7 = vpop.f32.mrf.mxu1 }
  0xa3   :  { %v12576_v8 = vadd.f32 %v887_v39, %v855_v6  ;;  %1066 = vmatmul.bf16.gmra.mxu0 %v12400_v44 }
  0xa4   :  { %1005 = vmatmul.bf16.gmra.mxu1 %v12416_v50 }
  0xa5   :  { %v9445_v10 = vmul.f32 -1.442695, %v12576_v8  ;;  %9409 = vmatmul.msk.bf16.gmra.mxu3 %vm829_vm0, %v12402_v45 }
  0xa6   :  { %9413 = vmatmul.msk.bf16.gmra.mxu2 %vm829_vm0, %v12359_v25 }
  0xa7   :  { %11585 = vpow2.f32 %v9445_v10 }
  0xa8   :  { %v958_v13 = vpop.f32.mrf.mxu3  ;;  %v856_v14 = vpop.f32.mrf.mxu0 }
  0xa9   :  { %v920_v11 = vpop.f32.mrf.mxu2  ;;  %v857_v18 = vadd.f32 %v856_v14, %v12567_v0  ;;  %v894_v19 = vpop.f32.mrf.mxu1 }
  0xaa   :  { %v921_v12 = vadd.f32 %v920_v11, %v12583_v9 }
  0xab   :  { %v12604_v26 = vadd.f32 %v889_v53, %v857_v18 }
  0xac   :  { %v12602_v22 = vadd.f32 %v953_v52, %v921_v12 }
  0xad   :  { %v11586_v28 = vpop.eup %11585  ;;  %v9455_v29 = vmul.f32 -1.442695, %v12604_v26 }
  0xae   :  { %v9446_v27 = vmul.f32 -1.442695, %v12602_v22  ;;  %v1775_v32 = vadd.f32 1.0, %v11586_v28 }
  0xb0   :  { %11587 = vpow2.f32 %v9446_v27  ;;  %v12608_v34 = vpop.f32.mrf.mxu3  ;;  %v859_v35 = vpop.f32.mrf.mxu0  ;;  %v1874_v11 = vand.u32 2147483647, %v1775_v32  ;;  %v1876_v12 = vand.u32 2147483648, %v1775_v32  ;;  %vm1870_vm2 = vweird.f32 %v1775_v32 }
  0xb1   :  { %11589 = vpow2.f32 %v9455_v29  ;;  %v922_v33 = vpop.f32.mrf.mxu2  ;;  %v860_v37 = vadd.f32 %v859_v35, %v12567_v0  ;;  %v12612_v38 = vpop.f32.mrf.mxu1 }
  0xb2   :  { %11591 = vrcp.f32 %v1775_v32  ;;  %v923_v36 = vadd.f32 %v922_v33, %v12583_v9  ;;  %vm1875_vm5 = vcmp.eq.f32.partialorder %v1874_v11, 8.507059e+37  ;;  %v1877_v28 = vor.u32 1.1754944e-38, %v1876_v12 }
  0xb3   :  { %v12616_v40 = vadd.f32 %v892_v7, %v860_v37  ;;  %1071 = vmatmul.bf16.gmra.mxu0 %v12416_v50 }
  0xb4   :  { %v12614_v39 = vadd.f32 %v955_v4, %v923_v36  ;;  %1117 = vmatmul.bf16.vlgmr.msra.gmra.mxu1 %v12223_v30 }
  0xb5   :  { %9415 = vmatmul.msk.bf16.vlgmr.msra.gmra.mxu3 %vm829_vm0, %v12139_v54 }
  0xb6   :  { %v11588_v41 = vpop.eup %11587  ;;  %9414 = vmatmul.msk.bf16.gmra.mxu2 %vm829_vm0, %v12402_v45  ;;  %v9456_v46 = vmul.f32 -1.442695, %v12614_v39 }
  0xb7   :  { %v11590_v42 = vpop.eup %11589  ;;  %v12622_v43 = vadd.f32 1.0, %v11588_v41 }
  0xb8   :  { %v11592_v47 = vpop.eup %11591  ;;  %v1785_v48 = vadd.f32 1.0, %v11590_v42  ;;  %v12628_v52 = vpop.f32.mrf.mxu3 }
  0xb9   :  { %v1866_v49 = vmul.f32 %v11592_v47, %v1775_v32  ;;  %11593 = vrcp.f32 %v12622_v43  ;;  %v925_v51 = vpop.f32.mrf.mxu2  ;;  %v861_v53 = vpop.f32.mrf.mxu0  ;;  %vm1871_vm1 = vweird.f32 %v11592_v47  ;;  %vm1885_vm10 = vweird.f32 %v12622_v43 }
  0xba   :  { %11595 = vrcp.f32 %v1785_v48  ;;  %v12630_v59 = vpop.f32.mrf.mxu1  ;;  %v926_v60 = vadd.f32 %v925_v51, %v12583_v9  ;;  %v862_v62 = vadd.f32 %v861_v53, %v12567_v0  ;;  %vm12648_vm3 = vmor %vm1870_vm2, %vm1871_vm1  ;;  %v2026_v20 = vand.u32 2147483648, %v1785_v48 }
  0xbb   :  { %v1867_v58 = vsub.f32 1.0, %v1866_v49  ;;  %11597 = vpow2.f32 %v9456_v46  ;;  %v2024_v27 = vand.u32 2147483647, %v1785_v48  ;;  %vm2020_vm6 = vweird.f32 %v1785_v48 }
  0xbc   :  { %v12634_v63 = vadd.f32 %v958_v13, %v926_v60  ;;  %v12638_v2 = vadd.f32 %v894_v19, %v862_v62  ;;  %v2027_v37 = vor.u32 1.1754944e-38, %v2026_v20 }
  0xbd   :  { %v1868_v61 = vmul.f32 %v11592_v47, %v1867_v58  ;;  %vm2025_vm8 = vcmp.eq.f32.partialorder %v2024_v27, 8.507059e+37 }
  0xbf   :  { %v12636_v1 = vpop.eup %11593  ;;  %v1869_v6 = vadd.f32 %v11592_v47, %v1868_v61 }
  0xc0   :  { %v11596_v3 = vpop.eup %11595  ;;  %v1881_v4 = vmul.f32 %v12636_v1, %v12622_v43  ;;  %v12644_v15 = vpop.f32.mrf.mxu3  ;;  %vm1886_vm9 = vweird.f32 %v12636_v1 }
  0xc1   :  { %v11598_v5 = vpop.eup %11597  ;;  %v2016_v7 = vmul.f32 %v11596_v3, %v1785_v48  ;;  %v927_v10 = vpop.f32.mrf.mxu2  ;;  %v1873_v21 = vsel %vm12648_vm3, %v11592_v47, %v1869_v6  ;;  %vm2021_vm4 = vweird.f32 %v11596_v3  ;;  %vm1887_vm11 = vmor %vm1885_vm10, %vm1886_vm9 }
  0xc2   :  { %v12642_v14 = vadd.f32 1.0, %v11598_v5  ;;  %v864_v13 = vpop.f32.mrf.mxu0  ;;  %v1882_v16 = vsub.f32 1.0, %v1881_v4  ;;  %v12646_v18 = vpop.f32.mrf.mxu1  ;;  %v928_v33 = vadd.f32 %v927_v10, %v12583_v9  ;;  %v1878_v36 = vsel %vm1875_vm5, %v1877_v28, %v1873_v21  ;;  %vm2022_vm7 = vmor %vm2020_vm6, %vm2021_vm4 }
  0xc3   :  { %v2017_v17 = vsub.f32 1.0, %v2016_v7  ;;  %1183 = vmatmul.bf16.vlgmr.msra.gmra.mxu0 %v12223_v30  ;;  %v865_v35 = vadd.f32 %v864_v13, %v12567_v0  ;;  %v3215_v58 = vmul.f32 %v1878_v36, %v12576_v8 }
  0xc4   :  { %11599 = vrcp.f32 %v12642_v14  ;;  %1122 = vmatmul.bf16.gmra.mxu1 %v12281_v55  ;;  %v1883_v29 = vmul.f32 %v12636_v1, %v1882_v16  ;;  %v12665_v42 = vadd.f32 %v12608_v34, %v928_v33  ;;  %v2039_v8 = vand.u32 2147483647, %v12642_v14 }
  0xc5   :  { %v2018_v23 = vmul.f32 %v11596_v3, %v2017_v17  ;;  %9416 = vmatmul.msk.bf16.gmra.mxu3 %vm829_vm0, %v12225_v31  ;;  %v12669_v49 = vadd.f32 %v12612_v38, %v865_v35  ;;  %v1889_v38 = vand.u32 2147483647, %v12622_v43  ;;  %vm2035_vm14 = vweird.f32 %v12642_v14 }
  0xc6   :  { %9420 = vmatmul.msk.bf16.vlgmr.msra.gmra.mxu2 %vm829_vm0, %v12139_v54  ;;  %20344 = vst [vmem:[#allocation15_spill] sm:$0xff] %v12665_v42  ;;  %v1884_v60 = vadd.f32 %v12636_v1, %v1883_v29  ;;  %vm2040_vm1 = vcmp.eq.f32.partialorder %v2039_v8, 8.507059e+37 }
  0xc7   :  { %v2019_v32 = vadd.f32 %v11596_v3, %v2018_v23  ;;  %20345 = vst [vmem:[#allocation16_spill] sm:$0xff] %v12669_v49  ;;  %vm1890_vm13 = vcmp.eq.f32.partialorder %v1889_v38, 8.507059e+37 }
  0xc8   :  { %v12671_v51 = vpop.f32.mrf.mxu3  ;;  %v1888_v6 = vsel %vm1887_vm11, %v12636_v1, %v1884_v60 }
  0xc9   :  { %v2023_v41 = vsel %vm2022_vm7, %v11596_v3, %v2019_v32  ;;  %v930_v46 = vpop.f32.mrf.mxu2  ;;  %v1891_v3 = vand.u32 2147483648, %v12622_v43 }
  0xca   :  { %v11600_v47 = vpop.eup %11599  ;;  %v2028_v48 = vsel %vm2025_vm8, %v2027_v37, %v2023_v41  ;;  %v866_v53 = vpop.f32.mrf.mxu0  ;;  %v931_v11 = vadd.f32 %v930_v46, %v12583_v9 }
  0xcb   :  { %v3225_v61 = vmul.f32 %v2028_v48, %v12604_v26  ;;  %v2031_v34 = vmul.f32 %v11600_v47, %v12642_v14  ;;  %v12677_v62 = vpop.f32.mrf.mxu1  ;;  %v2041_v26 = vand.u32 2147483648, %v12642_v14  ;;  %vm2036_vm12 = vweird.f32 %v11600_v47  ;;  %v11197_v48 = vld [vmem:[%s20207_s1 + $0x3ac] sm:$0xf0] }
  0xcc   :  { %v1892_v10 = vor.u32 1.1754944e-38, %v1891_v3  ;;  %v867_v43 = vadd.f32 %v866_v53, %v12567_v0  ;;  %vm2037_vm15 = vmor %vm2035_vm14, %vm2036_vm12  ;;  %v12695_v21 = vadd.f32 %v12628_v52, %v931_v11  ;;  %v9221_v52 = vld [vmem:[%s20207_s1 + $0x248] sm:$0xf]  ;;  %v9465_v11 = vmul.f32 -1.442695, %v12616_v40 }
  0xcd   :  { %v12682_v4 = vpack.c.bf16 %v3225_v61, %v3215_v58  ;;  %v2032_v5 = vsub.f32 1.0, %v2031_v34  ;;  %v2042_v17 = vor.u32 1.1754944e-38, %v2041_v26  ;;  %v9383_v58 = vld [vmem:[%s20207_s1 + $0x3b0] sm:$0xf0] }
  0xce   :  { %v1893_v16 = vsel %vm1890_vm13, %v1892_v10, %v1888_v6  ;;  %20347 = vst [vmem:[#allocation18_spill] sm:$0xff] %v12695_v21  ;;  %v12698_v23 = vadd.f32 %v12630_v59, %v867_v43  ;;  %v11157_v59 = vld [vmem:[%s20207_s1 + $0x26c] sm:$0xf0]  ;;  %v9181_v43 = vld [vmem:[%s20207_s1 + $0x1f8] sm:$0xf]  ;;  %11601 = vpow2.f32 %v9465_v11 }
  0xcf   :  { %20346 = vst [vmem:[#allocation17_spill] sm:$0xff] %v12682_v4  ;;  %v2033_v7 = vmul.f32 %v11600_v47, %v2032_v5  ;;  %v3216_v29 = vmul.f32 %v1893_v16, %v12602_v22  ;;  %v9222_v36 = vor.u32 %v11157_v59, %v9221_v52  ;;  %v11142_v16 = vld [vmem:[%s20207_s1 + $0x1fc] sm:$0xf] }
  0xd0   :  { %v12692_v19 = vpop.f32.mrf.mxu3  ;;  %20348 = vst [vmem:[#allocation19_spill] sm:$0xff] %v12698_v23 }
  0xd1   :  { %v2034_v12 = vadd.f32 %v11600_v47, %v2033_v7  ;;  %v932_v13 = vpop.f32.mrf.mxu2  ;;  %1241 = vmatpush.bf16.msrb.mxu1 %v9222_v36  ;;  %v9141_v36 = vld [vmem:[%s20207_s1 + $0x1a8] sm:$0xf] }
  0xd2   :  { %v869_v20 = vpop.f32.mrf.mxu0  ;;  %v933_v27 = vadd.f32 %v932_v13, %v12583_v9  ;;  %v11147_v13 = vld [vmem:[%s20207_s1 + $0x21c] sm:$0xf0] }
  0xd3   :  { %v2038_v1 = vsel %vm2037_vm15, %v11600_v47, %v2034_v12  ;;  %v12701_v14 = vpop.f32.mrf.mxu1  ;;  %1188 = vmatmul.bf16.gmra.mxu0 %v12281_v55  ;;  %v11152_v12 = vld [vmem:[%s20207_s1 + $0x24c] sm:$0xf] }
  0xd4   :  { %v2043_v28 = vsel %vm2040_vm1, %v2042_v17, %v2038_v1  ;;  %1127 = vmatmul.bf16.gmra.mxu1 %v12357_v24  ;;  %v12718_v22 = vadd.f32 %v12644_v15, %v933_v27  ;;  %v9381_v15 = vld [vmem:[%s20207_s1 + $0x388] sm:$0xf]  ;;  %v9341_v1 = vld [vmem:[%s20207_s1 + $0x338] sm:$0xf]  ;;  %v11187_v27 = vld [vmem:[%s20207_s1 + $0x35c] sm:$0xf0] }
  0xd5   :  { %v3226_v32 = vmul.f32 %v2043_v28, %v12614_v39  ;;  %v870_v39 = vadd.f32 %v869_v20, %v12567_v0  ;;  %9417 = vmatmul.msk.bf16.gmra.mxu3 %vm829_vm0, %v12283_v56  ;;  %v9382_v53 = vor.u32 %v11197_v48, %v9381_v15  ;;  %v9183_v20 = vld [vmem:[%s20207_s1 + $0x220] sm:$0xf0]  ;;  %v9342_v48 = vor.u32 %v11187_v27, %v9341_v1 }
  0xd6   :  { %9421 = vmatmul.msk.bf16.gmra.mxu2 %vm829_vm0, %v12225_v31  ;;  %20350 = vst [vmem:[#allocation21_spill] sm:$0xff] %v12718_v22  ;;  %v9186_v15 = vor.u32 %v11142_v16, %v9183_v20 }
  0xd7   :  { %v12715_v33 = vpack.c.bf16 %v3226_v32, %v3216_v29  ;;  %v12724_v35 = vadd.f32 %v12646_v18, %v870_v39  ;;  %1278 = vmatpush.bf16.msrb.mxu3 %v9382_v53  ;;  %v11192_v18 = vld [vmem:[%s20207_s1 + $0x38c] sm:$0xf]  ;;  %v9182_v29 = vor.u32 %v11147_v13, %v9181_v43  ;;  %v12781_v39 = vperm.slane %v12552_v57, 2  ;;  %v9343_v43 = vld [vmem:[%s20207_s1 + $0x360] sm:$0xf0] }
  0xd8   :  { %v973_v41 = vpop.f32.mrf.mxu3  ;;  %v9386_v38 = vor.u32 %v11192_v18, %v9383_v58  ;;  %v9466_v53 = vmul.f32 -1.442695, %v12634_v63  ;;  %v9143_v13 = vld [vmem:[%s20207_s1 + $0x1d0] sm:$0xf0] }
  0xd9   :  { %20349 = vst [vmem:[#allocation20_spill] sm:$0xff] %v12715_v33  ;;  %v935_v37 = vpop.f32.mrf.mxu2  ;;  %1242 = vmatpush.bf16.msrb.mxu1 %v9182_v29  ;;  %v9101_v29 = vld [vmem:[%s20207_s1 + $0x158] sm:$0xf]  ;;  %v9303_v33 = vld [vmem:[%s20207_s1 + $0x310] sm:$0xf0] }
  0xda   :  { %20351 = vst [vmem:[#allocation22_spill] sm:$0xff] %v12724_v35  ;;  %v12726_v46 = vpop.f32.mrf.mxu0  ;;  %v936_v5 = vadd.f32 %v935_v37, %v12583_v9  ;;  %1344 = vmatpush.bf16.msrb.mxu2 %v9386_v38  ;;  %v11137_v37 = vld [vmem:[%s20207_s1 + $0x1cc] sm:$0xf0]  ;;  %v11602_v38 = vpop.eup %11601  ;;  %11603 = vpow2.f32 %v9466_v53  ;;  %v9061_v53 = vld [vmem:[%s20207_s1 + $0x108] sm:$0xf] }
  0xdb   :  { %v909_v47 = vpop.f32.mrf.mxu1  ;;  %1279 = vmatpush.bf16.msrb.mxu3 %v9342_v48 }
  0xdc   :  { %v12745_v8 = vadd.f32 %v12671_v51, %v936_v5  ;;  %v9223_v51 = vld [vmem:[%s20207_s1 + $0x270] sm:$0xf0] }
  0xdd   :  { %v9226_v17 = vor.u32 %v11152_v12, %v9223_v51  ;;  %v11182_v51 = vld [vmem:[%s20207_s1 + $0x33c] sm:$0xf] }
  0xdf   :  { %1307 = vmatpush.bf16.msrb.mxu0 %v9226_v17  ;;  %v9346_v17 = vor.u32 %v11182_v51, %v9343_v43 }
  0xe0   :  { %v975_v61 = vpop.f32.mrf.mxu3  ;;  %v11604_v27 = vpop.eup %11603 }
  0xe1   :  { %v12740_v60 = vpop.f32.mrf.mxu2  ;;  %1345 = vmatpush.bf16.msrb.mxu2 %v9346_v17 }
  0xe2   :  { %v874_v34 = vpop.f32.mrf.mxu0 }
  0xe3   :  { %v986_v3 = vpop.f32.mrf.mxu1  ;;  %1193 = vmatmul.bf16.gmra.mxu0 %v12357_v24  ;;  %v875_v59 = vadd.f32 %v874_v34, %v12567_v0  ;;  %v9142_v34 = vor.u32 %v11137_v37, %v9141_v36  ;;  %v9103_v36 = vld [vmem:[%s20207_s1 + $0x180] sm:$0xf0] }
  0xe4   :  { %1132 = vmatmul.bf16.gmra.mxu1 %v12400_v44  ;;  %v987_v58 = vadd.f32 %v986_v3, %v12781_v39  ;;  %1308 = vmatpush.bf16.msrb.mxu0 %v9186_v15  ;;  %v12805_v3 = vadd.f32 1.0, %v11602_v38  ;;  %v12844_v15 = vadd.f32 1.0, %v11604_v27  ;;  %v12858_v38 = vperm.slane %v12552_v57, 3 }
  0xe5   :  { %9418 = vmatmul.msk.bf16.gmra.mxu3 %vm829_vm0, %v12359_v25  ;;  %v12791_v18 = vadd.f32 %v12701_v14, %v875_v59  ;;  %1243 = vmatpush.bf16.msrb.mxu1 %v9142_v34  ;;  %v11127_v59 = vld [vmem:[%s20207_s1 + $0x17c] sm:$0xf0] }
  0xe6   :  { %9422 = vmatmul.msk.bf16.gmra.mxu2 %vm829_vm0, %v12283_v56  ;;  %vm2170_vm5 = vweird.f32 %v12805_v3  ;;  %vm2185_vm15 = vweird.f32 %v12844_v15 }
  0xe7   :  { %20352 = vst [vmem:[#allocation23_spill] sm:$0xff] %v12791_v18 }
  0xe8   :  { %v1019_v6 = vpop.f32.mrf.mxu3 }
  0xe9   :  { %v940_v26 = vpop.f32.mrf.mxu2 }
  0xea   :  { %v876_v7 = vpop.f32.mrf.mxu0  ;;  %v941_v61 = vadd.f32 %v940_v26, %v12583_v9  ;;  %v9475_v26 = vmul.f32 -1.442695, %v12638_v2 }
  0xeb   :  { %v988_v10 = vpop.f32.mrf.mxu1  ;;  %v12799_v7 = vadd.f32 %v1019_v6, %v987_v58  ;;  %v11117_v58 = vld [vmem:[%s20207_s1 + $0x12c] sm:$0xf0] }
  0xec   :  { %v12797_v5 = vadd.f32 %v973_v41, %v941_v61  ;;  %v989_v11 = vadd.f32 %v988_v10, %v12781_v39  ;;  %v11132_v41 = vld [vmem:[%s20207_s1 + $0x1ac] sm:$0xf]  ;;  %11605 = vpow2.f32 %v9475_v26  ;;  %v9102_v26 = vor.u32 %v11127_v59, %v9101_v29 }
  0xed   :  { %v9447_v16 = vmul.f32 -1.442695, %v12799_v7  ;;  %v9146_v20 = vor.u32 %v11132_v41, %v9143_v13  ;;  %11607 = vrcp.f32 %v12805_v3  ;;  %v9062_v17 = vor.u32 %v11117_v58, %v9061_v53 }
  0xee   :  { %20353 = vst [vmem:[#allocation24_spill] sm:$0xff] %v12797_v5  ;;  %1244 = vmatpush.bf16.msrb.mxu1 %v9102_v26  ;;  %v9485_v29 = vmul.f32 -1.442695, %v12669_v49 }
  0xef   :  { %11609 = vpow2.f32 %v9447_v16  ;;  %1309 = vmatpush.bf16.msrb.mxu0 %v9146_v20 }
  0xf0   :  { %v1021_v32 = vpop.f32.mrf.mxu3 }
  0xf1   :  { %v942_v28 = vpop.f32.mrf.mxu2  ;;  %v12826_v1 = vadd.f32 %v1021_v32, %v989_v11  ;;  %v11122_v32 = vld [vmem:[%s20207_s1 + $0x15c] sm:$0xf] }
  0xf2   :  { %v12777_v52 = vpop.f32.mrf.mxu0  ;;  %v11606_v41 = vpop.eup %11605  ;;  %v9106_v43 = vor.u32 %v11122_v32, %v9103_v36  ;;  %1245 = vmatpush.bf16.msrb.mxu1 %v9062_v17  ;;  %v11107_v32 = vld [vmem:[%s20207_s1 + $0xdc] sm:$0xf0]  ;;  %v11177_v36 = vld [vmem:[%s20207_s1 + $0x30c] sm:$0xf0] }
  0xf3   :  { %v991_v47 = vpop.f32.mrf.mxu1  ;;  %1198 = vmatmul.bf16.gmra.mxu0 %v12400_v44  ;;  %v9457_v28 = vmul.f32 -1.442695, %v12826_v1  ;;  %v12865_v13 = vpop.eup %11607  ;;  %v1053_v16 = vadd.f32 %v12777_v52, %v12858_v38  ;;  %v12871_v20 = vadd.f32 1.0, %v11606_v41  ;;  %v9021_v52 = vld [vmem:[%s20207_s1 + $0xb8] sm:$0xf] }
  0xf4   :  { %1137 = vmatmul.bf16.gmra.mxu1 %v12416_v50  ;;  %v992_v48 = vadd.f32 %v991_v47, %v12781_v39  ;;  %v9476_v47 = vmul.f32 -1.442695, %v12665_v42  ;;  %1310 = vmatpush.bf16.msrb.mxu0 %v9106_v43  ;;  %v2166_v59 = vmul.f32 %v12865_v13, %v12805_v3  ;;  %v8981_v41 = vld [vmem:[%s20207_s1 + $0x68] sm:$0xf]  ;;  %v9022_v17 = vor.u32 %v11107_v32, %v9021_v52 }
  0xf5   :  { %9419 = vmatmul.msk.bf16.gmra.mxu3 %vm829_vm0, %v12402_v45  ;;  %11611 = vpow2.f32 %v9457_v28  ;;  %v11610_v57 = vpop.eup %11609  ;;  %v9486_v32 = vmul.f32 -1.442695, %v12695_v21  ;;  %vm2171_vm8 = vweird.f32 %v12865_v13 }
  0xf6   :  { %9423 = vmatmul.msk.bf16.gmra.mxu2 %vm829_vm0, %v12359_v25  ;;  %11613 = vrcp.f32 %v12844_v15  ;;  %v12873_v27 = vadd.f32 1.0, %v11610_v57  ;;  %v2167_v4 = vsub.f32 1.0, %v2166_v59  ;;  %1246 = vmatpush.bf16.msrb.mxu1 %v9022_v17  ;;  %vm13074_vm13 = vmor %vm2170_vm5, %vm2171_vm8  ;;  %vm2320_vm5 = vweird.f32 %v12871_v20 }
  0xf7   :  { %11615 = vpow2.f32 %v9476_v47  ;;  %v11097_v47 = vld [vmem:[%s20207_s1 + $0x8c] sm:$0xf0] }
  0xf8   :  { %v1024_v6 = vpop.f32.mrf.mxu3  ;;  %11617 = vrcp.f32 %v12873_v27  ;;  %vm1900_vm2 = vweird.f32 %v12873_v27 }
  0xf9   :  { %v1085_v14 = vpop.f32.mrf.mxu2  ;;  %v12863_v51 = vadd.f32 %v1024_v6, %v992_v48  ;;  %11619 = vrcp.f32 %v12871_v20 }
  0xfa   :  { %v12812_v12 = vpop.f32.mrf.mxu0  ;;  %v12875_v6 = vadd.f32 %v1085_v14, %v1053_v16  ;;  %v9301_v14 = vld [vmem:[%s20207_s1 + $0x2e8] sm:$0xf]  ;;  %11621 = vpow2.f32 %v9485_v29 }
  0xfb   :  { %20354 = vst [vmem:[#allocation25_spill] sm:$0xff] %v12812_v12  ;;  %v12823_v10 = vpop.f32.mrf.mxu1  ;;  %v11612_v28 = vpop.eup %11611  ;;  %v9302_v57 = vor.u32 %v11177_v36, %v9301_v14  ;;  %v9495_v36 = vmul.f32 -1.442695, %v12698_v23 }
  0xfc   :  { %20357 = vst [vmem:[#allocation28_spill] sm:$0xff] %v12875_v6  ;;  %v12902_v26 = vadd.f32 1.0, %v11612_v28  ;;  %v12912_v16 = vpop.eup %11613  ;;  %v11172_v28 = vld [vmem:[%s20207_s1 + $0x2ec] sm:$0xf] }
  0xfd   :  { %1280 = vmatpush.bf16.msrb.mxu3 %v9302_v57  ;;  %v12926_v52 = vmul.f32 %v12912_v16, %v12844_v15  ;;  %v9306_v14 = vor.u32 %v11172_v28, %v9303_v33  ;;  %v2168_v57 = vmul.f32 %v12865_v13, %v2167_v4  ;;  %v9261_v33 = vld [vmem:[%s20207_s1 + $0x298] sm:$0xf]  ;;  %v11167_v28 = vld [vmem:[%s20207_s1 + $0x2bc] sm:$0xf0]  ;;  %v11112_v4 = vld [vmem:[%s20207_s1 + $0x10c] sm:$0xf]  ;;  %vm2186_vm14 = vweird.f32 %v12912_v16 }
  0xfe   :  { %11623 = vrcp.f32 %v12902_v26  ;;  %v2056_v12 = vand.u32 2147483648, %v12902_v26  ;;  %vm2050_vm9 = vweird.f32 %v12902_v26  ;;  %vm13115_vm1 = vmor %vm2185_vm15, %vm2186_vm14 }
  0xff   :  { %1346 = vmatpush.bf16.msrb.mxu2 %v9306_v14  ;;  %v9063_v14 = vld [vmem:[%s20207_s1 + $0x130] sm:$0xf0]  ;;  %v2182_v21 = vsub.f32 1.0, %v12926_v52  ;;  %11625 = vpow2.f32 %v9486_v32  ;;  %v11092_v52 = vld [vmem:[%s20207_s1 + $0x6c] sm:$0xf] }
 0x100   :  { %v12853_v61 = vpop.f32.mrf.mxu3  ;;  %11627 = vpow2.f32 %v9495_v36  ;;  %v872_v36 = vadd.f32 %v12726_v46, %v12567_v0  ;;  %v938_v0 = vadd.f32 %v12740_v60, %v12583_v9  ;;  %v2324_v46 = vand.u32 2147483647, %v12871_v20 }
 0x101   :  { %v12842_v37 = vpop.f32.mrf.mxu2  ;;  %20356 = vst [vmem:[#allocation27_spill] sm:$0xff] %v12853_v61 }
 0x102   :  { %20355 = vst [vmem:[#allocation26_spill] sm:$0xff] %v12842_v37  ;;  %v12855_v34 = vpop.f32.mrf.mxu0 }
 0x103   :  { %v12860_v11 = vpop.f32.mrf.mxu1  ;;  %1203 = vmatmul.bf16.gmra.mxu0 %v12416_v50  ;;  %v8982_v50 = vor.u32 %v11097_v47, %v8981_v41  ;;  %v8941_v41 = vld [vmem:[%s20207_s1 + $0x18] sm:$0xf]  ;;  %v11087_v47 = vld [vmem:[%s20207_s1 + $0x3c] sm:$0xf0] }
 0x104   :  { %v8942_v5 = vor.u32 %v11087_v47, %v8941_v41  ;;  %v9262_v41 = vor.u32 %v11167_v28, %v9261_v33  ;;  %v9066_v47 = vor.u32 %v11112_v4, %v9063_v14  ;;  %v1058_v33 = vadd.f32 %v12855_v34, %v12858_v38  ;;  %v9023_v34 = vld [vmem:[%s20207_s1 + $0xe0] sm:$0xf0] }
 0x105   :  { %1247 = vmatpush.bf16.msrb.mxu1 %v8982_v50  ;;  %v1904_v50 = vand.u32 2147483647, %v12873_v27  ;;  %v2176_v28 = vand.u32 2147483648, %v12805_v3  ;;  %v2169_v14 = vadd.f32 %v12865_v13, %v2168_v57 }
 0x106   :  { %9424 = vmatmul.msk.bf16.gmra.mxu2 %vm829_vm0, %v12402_v45  ;;  %v11616_v45 = vpop.eup %11615  ;;  %1281 = vmatpush.bf16.msrb.mxu3 %v9262_v41  ;;  %v8983_v41 = vld [vmem:[%s20207_s1 + $0x90] sm:$0xf0] }
 0x107   :  { %v12941_v29 = vadd.f32 1.0, %v11616_v45  ;;  %v997_v45 = vadd.f32 %v12860_v11, %v12781_v39  ;;  %v1906_v11 = vand.u32 2147483648, %v12873_v27  ;;  %vm12995_vm6 = vcmp.eq.f32.partialorder %v1904_v50, 8.507059e+37  ;;  %1311 = vmatpush.bf16.msrb.mxu0 %v9066_v47 }
 0x108   :  { %v12897_v53 = vpop.f32.mrf.mxu3  ;;  %v9505_v50 = vmul.f32 -1.442695, %v12724_v35  ;;  %v2057_v35 = vor.u32 1.1754944e-38, %v2056_v12  ;;  %v2173_v9 = vsel %vm13074_vm13, %v12865_v13, %v2169_v14 }
 0x109   :  { %v12895_v48 = vpop.f32.mrf.mxu2  ;;  %11629 = vrcp.f32 %v12941_v29  ;;  %1248 = vmatpush.bf16.msrb.mxu1 %v8942_v5  ;;  %9425 = vmatmul.msk.bf16.vlgmr.msrb.gmra.mxu3 %vm829_vm0, %v12139_v54 }
 0x10a   :  { %v12899_v58 = vpop.f32.mrf.mxu0 }
 0x10b   :  { %20358 = vst [vmem:[#allocation29_spill] sm:$0xff] %v12899_v58  ;;  %v12910_v43 = vpop.f32.mrf.mxu1  ;;  %v12921_v58 = vpop.eup %11617 }
 0x10c   :  { %20359 = vst [vmem:[#allocation30_spill] sm:$0xff] %v12910_v43  ;;  %v1896_v59 = vmul.f32 %v12921_v58, %v12873_v27  ;;  %v12938_v17 = vpop.eup %11619  ;;  %vm1901_vm3 = vweird.f32 %v12921_v58  ;;  %v1907_v27 = vor.u32 1.1754944e-38, %v1906_v11  ;;  %1249 = vmatmul.bf16.vlgmr.msrb.gmra.mxu1 %v12223_v30 }
 0x10d   :  { %v11622_v43 = vpop.eup %11621  ;;  %v12974_v37 = vmul.f32 %v12938_v17, %v12871_v20  ;;  %vm12985_vm4 = vmor %vm1900_vm2, %vm1901_vm3  ;;  %vm13123_vm3 = vcmp.eq.f32.partialorder %v2324_v46, 8.507059e+37  ;;  %v11162_v46 = vld [vmem:[%s20207_s1 + $0x29c] sm:$0xf] }
 0x10e   :  { %v1897_v44 = vsub.f32 1.0, %v1896_v59  ;;  %v12965_v59 = vpop.eup %11623  ;;  %v12979_v56 = vadd.f32 1.0, %v11622_v43  ;;  %v12992_v43 = vadd.f32 %v12897_v53, %v997_v45  ;;  %v11102_v53 = vld [vmem:[%s20207_s1 + $0xbc] sm:$0xf] }
 0x10f   :  { %v2046_v61 = vmul.f32 %v12965_v59, %v12902_v26  ;;  %vm2051_vm7 = vweird.f32 %v12965_v59  ;;  %v11626_v4 = vpop.eup %11625  ;;  %v2317_v24 = vsub.f32 1.0, %v12974_v37  ;;  %v2177_v37 = vor.u32 1.1754944e-38, %v2176_v28 }
 0x110   :  { %v12961_v23 = vpop.f32.mrf.mxu3  ;;  %20364 = vst [vmem:[#allocation33_spill] sm:$0xff] %v12992_v43  ;;  %11631 = vrcp.f32 %v12979_v56  ;;  %vm2052_vm11 = vmor %vm2050_vm9, %vm2051_vm7  ;;  %v9026_v43 = vor.u32 %v11102_v53, %v9023_v34  ;;  %vm2470_vm8 = vweird.f32 %v12979_v56 }
 0x111   :  { %v12949_v25 = vpop.f32.mrf.mxu2  ;;  %20361 = vst [vmem:[#allocation32_spill] sm:$0xff] %v12961_v23  ;;  %v1898_v23 = vmul.f32 %v12921_v58, %v1897_v44  ;;  %v2047_v32 = vsub.f32 1.0, %v2046_v61  ;;  %v2054_v61 = vand.u32 2147483647, %v12902_v26 }
 0x112   :  { %20360 = vst [vmem:[#allocation31_spill] sm:$0xff] %v12949_v25  ;;  %v12963_v25 = vpop.f32.mrf.mxu0  ;;  %1312 = vmatpush.bf16.msrb.mxu0 %v9026_v43 }
 0x113   :  { %v12970_v18 = vpop.f32.mrf.mxu1  ;;  %v1899_v44 = vadd.f32 %v12921_v58, %v1898_v23  ;;  %v2048_v5 = vmul.f32 %v12965_v59, %v2047_v32  ;;  %v20368_v32 = vand.u32 2147483647, %v12805_v3  ;;  %vm2055_vm12 = vcmp.eq.f32.partialorder %v2054_v61, 8.507059e+37 }
 0x114   :  { %v2318_v3 = vmul.f32 %v12938_v17, %v2317_v24 }
 0x115   :  { %v1903_v23 = vsel %vm12985_vm4, %v12921_v58, %v1899_v44  ;;  %v9496_v58 = vmul.f32 -1.442695, %v12718_v22  ;;  %v2049_v11 = vadd.f32 %v12965_v59, %v2048_v5  ;;  %v11628_v44 = vpop.eup %11627  ;;  %vm13039_vm10 = vcmp.eq.f32.partialorder %v20368_v32, 8.507059e+37 }
 0x116   :  { %v1908_v5 = vsel %vm12995_vm6, %v1907_v27, %v1903_v23  ;;  %v13048_v22 = vadd.f32 %v12895_v48, %v1058_v33  ;;  %v2183_v32 = vmul.f32 %v12912_v16, %v2182_v21  ;;  %v8986_v48 = vor.u32 %v11092_v52, %v8983_v41 }
 0x117   :  { %v2053_v42 = vsel %vm2052_vm11, %v12965_v59, %v2049_v11  ;;  %11633 = vpow2.f32 %v9496_v58  ;;  %v13059_v27 = vadd.f32 1.0, %v11626_v4  ;;  %v3217_v33 = vmul.f32 %v1908_v5, %v12799_v7 }
 0x118   :  { %v13033_v47 = vpop.f32.mrf.mxu3  ;;  %20371 = vst [vmem:[#allocation35_spill] sm:$0xff] %v13048_v22  ;;  %v2058_v12 = vsel %vm2055_vm12, %v2057_v35, %v2053_v42  ;;  %11635 = vpow2.f32 %v9505_v50  ;;  %v2189_v59 = vand.u32 2147483647, %v12844_v15  ;;  %v13066_v61 = vadd.f32 1.0, %v11628_v44  ;;  %1313 = vmatpush.bf16.msrb.mxu0 %v8986_v48 }
 0x119   :  { %v13019_v45 = vpop.f32.mrf.mxu2  ;;  %v3227_v23 = vmul.f32 %v2058_v12, %v12826_v1  ;;  %v2191_v35 = vand.u32 2147483648, %v12844_v15  ;;  %v2184_v60 = vadd.f32 %v12912_v16, %v2183_v32  ;;  %v13089_v1 = vadd.f32 %v12677_v62, %v872_v36  ;;  %9426 = vmatmul.msk.bf16.gmra.mxu3 %vm829_vm0, %v12225_v31 }
 0x11a   :  { %v13035_v57 = vpop.f32.mrf.mxu0  ;;  %11637 = vrcp.f32 %v13059_v27  ;;  %v2326_v62 = vand.u32 2147483648, %v12871_v20  ;;  %v9506_v58 = vmul.f32 -1.442695, %v12745_v8  ;;  %v13107_v15 = vadd.f32 %v12692_v19, %v938_v0 }
 0x11b   :  { %20367 = vst [vmem:[#allocation34_spill] sm:$0xff] %v13035_v57  ;;  %v13050_v49 = vpop.f32.mrf.mxu1  ;;  %v13052_v57 = vpop.eup %11629  ;;  %v13081_v7 = vpack.c.bf16 %v3227_v23, %v3217_v33  ;;  %11639 = vrcp.f32 %v13066_v61  ;;  %v2178_v50 = vsel %vm13039_vm10, %v2177_v37, %v2173_v9  ;;  %vm13119_vm2 = vcmp.eq.f32.partialorder %v2189_v59, 8.507059e+37 }
 0x11c   :  { %v13063_v21 = vpop.eup %11631  ;;  %v2331_v53 = vmul.f32 %v13052_v57, %v12941_v29  ;;  %v2192_v41 = vor.u32 1.1754944e-38, %v2191_v35  ;;  %v2188_v44 = vsel %vm13115_vm1, %v12912_v16, %v2184_v60  ;;  %v2319_v26 = vadd.f32 %v12938_v17, %v2318_v3  ;;  %v11082_v16 = vld [vmem:[%s20207_s1 + $0x1c] sm:$0xf]  ;;  %v8943_v35 = vld [vmem:[%s20207_s1 + $0x40] sm:$0xf0]  ;;  %1254 = vmatmul.bf16.gmra.mxu1 %v12281_v55 }
 0x11d   :  { %20374 = vst [vmem:[#allocation36_spill] sm:$0xff] %v13081_v7  ;;  %v2466_v34 = vmul.f32 %v13063_v21, %v12979_v56  ;;  %v11634_v24 = vpop.eup %11633  ;;  %vm2321_vm4 = vweird.f32 %v12938_v17  ;;  %v9515_v5 = vmul.f32 -1.442695, %v13089_v1  ;;  %v2339_v36 = vand.u32 2147483647, %v12941_v29 }
 0x11e   :  { %v11636_v14 = vpop.eup %11635  ;;  %v2332_v32 = vsub.f32 1.0, %v2331_v53  ;;  %v13134_v48 = vadd.f32 1.0, %v11634_v24  ;;  %v2327_v33 = vor.u32 1.1754944e-38, %v2326_v62  ;;  %11641 = vpow2.f32 %v9506_v58  ;;  %vm13164_vm7 = vmor %vm2320_vm5, %vm2321_vm4 }
 0x11f   :  { %v2467_v12 = vsub.f32 1.0, %v2466_v34  ;;  %v13136_v23 = vadd.f32 1.0, %v11636_v14  ;;  %v9516_v37 = vmul.f32 -1.442695, %v13107_v15  ;;  %v13145_v0 = vmul.f32 %v2178_v50, %v12616_v40  ;;  %v9263_v40 = vld [vmem:[%s20207_s1 + $0x2c0] sm:$0xf0] }
 0x120   :  { %v13099_v13 = vpop.f32.mrf.mxu3  ;;  %v13142_v59 = vpop.eup %11637  ;;  %v2193_v42 = vsel %vm13119_vm2, %v2192_v41, %v2188_v44  ;;  %vm2335_vm6 = vweird.f32 %v12941_v29  ;;  %v2341_v60 = vand.u32 2147483648, %v12941_v29  ;;  %11643 = vpow2.f32 %v9515_v5  ;;  %v20400_v29 = vld [vmem:[#allocation15_spill] sm:$0xff] }
 0x121   :  { %v13091_v43 = vpop.f32.mrf.mxu2  ;;  %20381 = vst [vmem:[#allocation37_spill] sm:$0xff] %v13145_v0  ;;  %v13160_v9 = vpop.eup %11639  ;;  %v1002_v3 = vadd.f32 %v12970_v18, %v12781_v39  ;;  %v1063_v53 = vadd.f32 %v12963_v25, %v12858_v38  ;;  %v2323_v24 = vsel %vm13164_vm7, %v12938_v17, %v2319_v26  ;;  %v2333_v62 = vmul.f32 %v13052_v57, %v2332_v32  ;;  %v20418_v0 = vld [vmem:[#allocation23_spill] sm:$0xff] }
 0x122   :  { %v13101_v28 = vpop.f32.mrf.mxu0  ;;  %v2468_v58 = vmul.f32 %v13063_v21, %v2467_v12  ;;  %11645 = vrcp.f32 %v13134_v48  ;;  %v2481_v14 = vmul.f32 %v13142_v59, %v13059_v27  ;;  %v8946_v50 = vor.u32 %v11082_v16, %v8943_v35 }
 0x123   :  { %v13109_v4 = vpop.f32.mrf.mxu1  ;;  %11647 = vrcp.f32 %v13136_v23  ;;  %v9266_v17 = vor.u32 %v11162_v46, %v9263_v40  ;;  %v13192_v52 = vmul.f32 %v2193_v42, %v12634_v63  ;;  %v2616_v41 = vmul.f32 %v13160_v9, %v13066_v61 }
 0x124   :  { %11649 = vpow2.f32 %v9516_v37  ;;  %v11642_v44 = vpop.eup %11641  ;;  %v2328_v26 = vsel %vm13123_vm3, %v2327_v33, %v2323_v24  ;;  %v2474_v5 = vand.u32 2147483647, %v12979_v56  ;;  %1314 = vmatpush.bf16.msrb.mxu0 %v8946_v50  ;;  %v13201_v32 = vadd.f32 %v13033_v47, %v1002_v3 }
 0x125   :  { %20385 = vst [vmem:[#allocation39_spill] sm:$0xff] %v13192_v52  ;;  %1347 = vmatpush.bf16.msrb.mxu2 %v9266_v17  ;;  %v13204_v63 = vadd.f32 %v13019_v45, %v1063_v53  ;;  %vm2336_vm9 = vweird.f32 %v13052_v57  ;;  %vm13207_vm10 = vcmp.eq.f32.partialorder %v2339_v36, 8.507059e+37  ;;  %v2342_v37 = vor.u32 1.1754944e-38, %v2341_v60  ;;  %v20411_v52 = vld [vmem:[#allocation27_spill] sm:$0xff] }
 0x126   :  { %v2476_v19 = vand.u32 2147483648, %v12979_v56  ;;  %v11644_v33 = vpop.eup %11643  ;;  %v2334_v16 = vadd.f32 %v13052_v57, %v2333_v62  ;;  %v2469_v42 = vadd.f32 %v13063_v21, %v2468_v58  ;;  %vm2471_vm11 = vweird.f32 %v13063_v21  ;;  %vm13233_vm12 = vmor %vm2335_vm6, %vm2336_vm9 }
 0x127   :  { %v2482_v47 = vsub.f32 1.0, %v2481_v14  ;;  %v2491_v45 = vand.u32 2147483648, %v13059_v27  ;;  %v2617_v46 = vsub.f32 1.0, %v2616_v41  ;;  %v2626_v36 = vand.u32 2147483648, %v13066_v61  ;;  %1315 = vmatmul.bf16.vlgmr.msrb.gmra.mxu0 %v12223_v30  ;;  %vm13249_vm14 = vmor %vm2470_vm8, %vm2471_vm11 }
 0x128   :  { %v13184_v18 = vpop.f32.mrf.mxu3  ;;  %v13215_v35 = vpop.eup %11645  ;;  %v13219_v40 = vadd.f32 1.0, %v11642_v44  ;;  %9430 = vmatmul.msk.bf16.vlgmr.msrb.gmra.mxu2 %vm829_vm0, %v12139_v54  ;;  %v13227_v60 = vmul.f32 %v2328_v26, %v12638_v2  ;;  %vm13237_vm13 = vcmp.eq.f32.partialorder %v2474_v5, 8.507059e+37  ;;  %v2489_v24 = vand.u32 2147483647, %v13059_v27 }
 0x129   :  { %v13174_v34 = vpop.f32.mrf.mxu2  ;;  %v13224_v20 = vpop.eup %11647  ;;  %v9467_v62 = vmul.f32 -1.442695, %v12863_v51  ;;  %v2477_v14 = vor.u32 1.1754944e-38, %v2476_v19  ;;  %vm2485_vm15 = vweird.f32 %v13059_v27  ;;  %v2624_v50 = vand.u32 2147483647, %v13066_v61 }
 0x12a   :  { %v13186_v25 = vpop.f32.mrf.mxu0  ;;  %20388 = vst [vmem:[#allocation40_spill] sm:$0xff] %v13227_v60  ;;  %v11650_v2 = vpop.eup %11649  ;;  %v13255_v17 = vadd.f32 1.0, %v11644_v33  ;;  %v2338_v44 = vsel %vm13233_vm12, %v13052_v57, %v2334_v16  ;;  %v2473_v56 = vsel %vm13249_vm14, %v13063_v21, %v2469_v42  ;;  %v2483_v26 = vmul.f32 %v13142_v59, %v2482_v47 }
 0x12b   :  { %20384 = vst [vmem:[#allocation38_spill] sm:$0xff] %v13186_v25  ;;  %v1008_v11 = vpop.f32.mrf.mxu1  ;;  %v2631_v5 = vmul.f32 %v13215_v35, %v13134_v48  ;;  %v13270_v33 = vor.u32 1.1754944e-38, %v2491_v45  ;;  %v13273_v7 = vor.u32 1.1754944e-38, %v2626_v36  ;;  %11651 = vrcp.f32 %v13219_v40  ;;  %v11153_v36 = vld [vmem:[%s20207_s1 + $0x254] sm:$0xf] }
 0x12c   :  { %vm2486_vm1 = vweird.f32 %v13142_v59  ;;  %vm13277_vm2 = vcmp.eq.f32.partialorder %v2489_v24, 8.507059e+37  ;;  %v2766_v21 = vmul.f32 %v13224_v20, %v13136_v23  ;;  %v13283_v16 = vadd.f32 1.0, %v11650_v2  ;;  %v11198_v2 = vld [vmem:[%s20207_s1 + $0x3b4] sm:$0xf0] }
 0x12d   :  { %11653 = vpow2.f32 %v9467_v62  ;;  %v2343_v42 = vsel %vm13207_vm10, %v2342_v37, %v2338_v44  ;;  %v2478_v47 = vsel %vm13237_vm13, %v2477_v14, %v2473_v56  ;;  %v2641_v45 = vand.u32 2147483648, %v13134_v48  ;;  %v9389_v62 = vld [vmem:[%s20207_s1 + $0x390] sm:$0xf]  ;;  %vm13326_vm7 = vmor %vm2485_vm15, %vm2486_vm1 }
 0x12e   :  { %11655 = vrcp.f32 %v13255_v17  ;;  %vm13292_vm3 = vcmp.eq.f32.partialorder %v2624_v50, 8.507059e+37  ;;  %v2632_v3 = vsub.f32 1.0, %v2631_v5  ;;  %v9448_v24 = vmul.f32 -1.442695, %v12875_v6  ;;  %v20402_v44 = vld [vmem:[#allocation10_spill] sm:$0xff]  ;;  %v20403_v5 = vld [vmem:[#allocation16_spill] sm:$0xff] }
 0x12f   :  { %v994_v12 = vadd.f32 %v12823_v10, %v12781_v39  ;;  %vm2620_vm4 = vweird.f32 %v13066_v61  ;;  %vm2621_vm5 = vweird.f32 %v13160_v9  ;;  %v2639_v53 = vand.u32 2147483647, %v13134_v48  ;;  %1259 = vmatmul.bf16.gmra.mxu1 %v20402_v44 }
 0x130   :  { %v1041_v11 = vpop.f32.mrf.mxu3  ;;  %v13310_v14 = vmul.f32 %v2343_v42, %v20400_v29  ;;  %vm2635_vm6 = vweird.f32 %v13134_v48  ;;  %v2767_v10 = vsub.f32 1.0, %v2766_v21  ;;  %11657 = vrcp.f32 %v13283_v16  ;;  %vm13346_vm8 = vmor %vm2620_vm4, %vm2621_vm5  ;;  %v9229_v42 = vld [vmem:[%s20207_s1 + $0x250] sm:$0xf] }
 0x131   :  { %v13243_v58 = vpop.f32.mrf.mxu2  ;;  %v2618_v11 = vmul.f32 %v13160_v9, %v2617_v46  ;;  %v2484_v46 = vadd.f32 %v13142_v59, %v2483_v26  ;;  %v9390_v50 = vor.u32 %v11198_v2, %v9389_v62  ;;  %v13317_v26 = vpop.eup %11651  ;;  %v13330_v21 = vor.u32 1.1754944e-38, %v2641_v45  ;;  %v20407_v2 = vld [vmem:[#allocation25_spill] sm:$0xff] }
 0x132   :  { %20393 = vst [vmem:[#allocation41_spill] sm:$0xff] %v13243_v58  ;;  %v13257_v41 = vpop.f32.mrf.mxu0  ;;  %v2774_v62 = vand.u32 2147483647, %v13136_v23  ;;  %v1055_v29 = vadd.f32 %v20407_v2, %v12858_v38  ;;  %v2633_v2 = vmul.f32 %v13215_v35, %v2632_v3  ;;  %11659 = vpow2.f32 %v9448_v24  ;;  %v20414_v24 = vld [vmem:[#allocation26_spill] sm:$0xff] }
 0x133   :  { %v13268_v19 = vpop.f32.mrf.mxu1  ;;  %v2619_v37 = vadd.f32 %v13160_v9, %v2618_v11  ;;  %20401 = vst [vmem:[#allocation15_spill] sm:$0xff] %v13310_v14  ;;  %v13320_v11 = vmul.f32 %v2478_v47, %v20403_v5  ;;  %v20408_v14 = vld [vmem:[#allocation9_spill] sm:$0xff]  ;;  %v2488_v27 = vsel %vm13326_vm7, %v13142_v59, %v2484_v46  ;;  %v13352_v60 = vadd.f32 %v20411_v52, %v994_v12  ;;  %v11158_v59 = vld [vmem:[%s20207_s1 + $0x274] sm:$0xf0] }
 0x134   :  { %9427 = vmatmul.msk.bf16.gmra.mxu3 %vm829_vm0, %v20408_v14  ;;  %vm2770_vm9 = vweird.f32 %v13136_v23  ;;  %v2776_v52 = vand.u32 2147483648, %v13136_v23  ;;  %v13370_v12 = vadd.f32 %v20414_v24, %v1055_v29  ;;  %vm13372_vm10 = vcmp.eq.f32.partialorder %v2639_v53, 8.507059e+37  ;;  %v9391_v53 = vld [vmem:[%s20207_s1 + $0x3b8] sm:$0xf0] }
 0x135   :  { %20404 = vst [vmem:[#allocation10_spill] sm:$0xff] %v13320_v11  ;;  %v11654_v11 = vpop.eup %11653  ;;  %1410 = vmatpush.bf16.msra.mxu3 %v9390_v50  ;;  %v2623_v3 = vsel %vm13346_vm8, %v13160_v9, %v2619_v37  ;;  %v1007_v54 = vadd.f32 %v13109_v4, %v12781_v39  ;;  %v1068_v9 = vadd.f32 %v13101_v28, %v12858_v38  ;;  %v11193_v37 = vld [vmem:[%s20207_s1 + $0x394] sm:$0xf]  ;;  %vm2636_vm11 = vweird.f32 %v13215_v35 }
 0x136   :  { %20412 = vst [vmem:[#allocation16_spill] sm:$0xff] %v13352_v60  ;;  %v13362_v46 = vpop.eup %11655  ;;  %v13392_v29 = vadd.f32 1.0, %v11654_v11  ;;  %v9230_v4 = vor.u32 %v11158_v59, %v9229_v42  ;;  %v2634_v28 = vadd.f32 %v13215_v35, %v2633_v2  ;;  %vm13397_vm12 = vcmp.eq.f32.partialorder %v2774_v62, 8.507059e+37  ;;  %vm13431_vm14 = vmor %vm2635_vm6, %vm2636_vm11 }
 0x137   :  { %20415 = vst [vmem:[#allocation27_spill] sm:$0xff] %v13370_v12  ;;  %v13394_v45 = vpop.eup %11657  ;;  %v2916_v57 = vmul.f32 %v13362_v46, %v13255_v17  ;;  %v2628_v11 = vsel %vm13292_vm3, %v13273_v7, %v2623_v3  ;;  %vm2771_vm13 = vweird.f32 %v13224_v20  ;;  %1320 = vmatmul.bf16.gmra.mxu0 %v12281_v55  ;;  %v9394_v62 = vor.u32 %v11193_v37, %v9391_v53  ;;  %v9231_v3 = vld [vmem:[%s20207_s1 + $0x278] sm:$0xf0]  ;;  %v20427_v55 = vld [vmem:[#allocation18_spill] sm:$0xff] }
 0x138   :  { %v13337_v47 = vpop.f32.mrf.mxu3  ;;  %9431 = vmatmul.msk.bf16.gmra.mxu2 %vm829_vm0, %v12225_v31  ;;  %v11660_v2 = vpop.eup %11659  ;;  %1373 = vmatpush.bf16.msra.mxu1 %v9230_v4  ;;  %v13416_v59 = vadd.f32 %v13184_v18, %v1007_v54  ;;  %v13419_v7 = vadd.f32 %v13174_v34, %v1068_v9  ;;  %v2931_v54 = vmul.f32 %v13394_v45, %v13283_v16  ;;  %v20425_v34 = vld [vmem:[#allocation24_spill] sm:$0xff]  ;;  %vm13455_vm15 = vmor %vm2770_vm9, %vm2771_vm13  ;;  %v2926_v23 = vand.u32 2147483648, %v13255_v17 }
 0x139   :  { %v13315_v56 = vpop.f32.mrf.mxu2  ;;  %v9526_v18 = vmul.f32 -1.442695, %v20425_v34  ;;  %1476 = vmatpush.bf16.msra.mxu2 %v9394_v62  ;;  %v2638_v53 = vsel %vm13431_vm14, %v13215_v35, %v2634_v28  ;;  %v2917_v4 = vsub.f32 1.0, %v2916_v57  ;;  %v13459_v35 = vadd.f32 1.0, %v11660_v2  ;;  %v20437_v34 = vld [vmem:[#allocation11_spill] sm:$0xff] }
 0x13a   :  { %v1074_v5 = vpop.f32.mrf.mxu0  ;;  %20421 = vst [vmem:[#allocation26_spill] sm:$0xff] %v13416_v59  ;;  %v13472_v57 = vsel %vm13372_vm10, %v13330_v21, %v2638_v53  ;;  %vm2785_vm1 = vweird.f32 %v13219_v40  ;;  %v2924_v2 = vand.u32 2147483647, %v13255_v17  ;;  %v20433_v21 = vld [vmem:[#allocation33_spill] sm:$0xff]  ;;  %vm2786_vm3 = vweird.f32 %v13317_v26 }
 0x13b   :  { %v13360_v61 = vpop.f32.mrf.mxu1  ;;  %v2768_v5 = vmul.f32 %v13224_v20, %v2767_v10  ;;  %v2493_v10 = vsel %vm13277_vm2, %v13270_v33, %v2488_v27  ;;  %v9477_v33 = vmul.f32 -1.442695, %v13352_v60  ;;  %v9458_v27 = vmul.f32 -1.442695, %v13370_v12  ;;  %20422 = vst [vmem:[#allocation42_spill] sm:$0xff] %v13419_v7  ;;  %vm13529_vm7 = vmor %vm2785_vm1, %vm2786_vm3 }
 0x13c   :  { %20413 = vst [vmem:[#allocation25_spill] sm:$0xff] %v13360_v61  ;;  %v9525_v61 = vmul.f32 -1.442695, %v20418_v0  ;;  %v2781_v0 = vmul.f32 %v13317_v26, %v13219_v40  ;;  %v13449_v30 = vmul.f32 %v2493_v10, %v20427_v55  ;;  %v2791_v10 = vand.u32 2147483648, %v13219_v40  ;;  %v11143_v12 = vld [vmem:[%s20207_s1 + $0x204] sm:$0xf] }
 0x13d   :  { %v2769_v42 = vadd.f32 %v13224_v20, %v2768_v5  ;;  %v9234_v5 = vor.u32 %v11153_v36, %v9231_v3  ;;  %v2777_v36 = vor.u32 1.1754944e-38, %v2776_v52  ;;  %v2932_v52 = vsub.f32 1.0, %v2931_v54  ;;  %v11148_v54 = vld [vmem:[%s20207_s1 + $0x224] sm:$0xf0] }
 0x13e   :  { %11661 = vpow2.f32 %v9525_v61  ;;  %v2782_v48 = vsub.f32 1.0, %v2781_v0  ;;  %20428 = vst [vmem:[#allocation18_spill] sm:$0xff] %v13449_v30  ;;  %v20431_v0 = vld [vmem:[#allocation19_spill] sm:$0xff]  ;;  %vm2920_vm2 = vweird.f32 %v13255_v17  ;;  %v9487_v3 = vmul.f32 -1.442695, %v20433_v21 }
 0x13f   :  { %11663 = vrcp.f32 %v13392_v29  ;;  %1439 = vmatpush.bf16.msra.mxu0 %v9234_v5  ;;  %v13462_v28 = vmul.f32 %v2628_v11, %v20431_v0  ;;  %v2773_v55 = vsel %vm13455_vm15, %v13224_v20, %v2769_v42  ;;  %v2918_v20 = vmul.f32 %v13362_v46, %v2917_v4  ;;  %v9189_v61 = vld [vmem:[%s20207_s1 + $0x200] sm:$0xf]  ;;  %v20436_v0 = vld [vmem:[#allocation30_spill] sm:$0xff] }
 0x140   :  { %v13439_v9 = vpop.f32.mrf.mxu3  ;;  %11665 = vpow2.f32 %v9477_v33  ;;  %v2783_v11 = vmul.f32 %v13317_v26, %v2782_v48  ;;  %v13483_v50 = vsel %vm13397_vm12, %v2777_v36, %v2773_v55  ;;  %v13495_v24 = vor.u32 1.1754944e-38, %v2791_v10  ;;  %v20434_v48 = vld [vmem:[#allocation12_spill] sm:$0xff] }
 0x141   :  { %v1107_v37 = vpop.f32.mrf.mxu2  ;;  %20426 = vst [vmem:[#allocation43_spill] sm:$0xff] %v13439_v9  ;;  %11667 = vpow2.f32 %v9458_v27  ;;  %v2789_v27 = vand.u32 2147483647, %v13219_v40  ;;  %v13497_v5 = vor.u32 1.1754944e-38, %v2926_v23  ;;  %v2939_v53 = vand.u32 2147483647, %v13283_v16  ;;  %1264 = vmatmul.bf16.gmra.mxu1 %v20434_v48 }
 0x142   :  { %v13446_v31 = vpop.f32.mrf.mxu0  ;;  %20432 = vst [vmem:[#allocation19_spill] sm:$0xff] %v13462_v28  ;;  %11669 = vpow2.f32 %v9526_v18  ;;  %vm2921_vm4 = vweird.f32 %v13362_v46  ;;  %v2933_v62 = vmul.f32 %v13394_v45, %v2932_v52  ;;  %v999_v55 = vadd.f32 %v20436_v0, %v12781_v39 }
 0x143   :  { %v13444_v37 = vpop.f32.mrf.mxu1  ;;  %11671 = vrcp.f32 %v13459_v35  ;;  %v2784_v10 = vadd.f32 %v13317_v26, %v2783_v11  ;;  %vm13510_vm5 = vcmp.eq.f32.partialorder %v2789_v27, 8.507059e+37  ;;  %v2919_v30 = vadd.f32 %v13362_v46, %v2918_v20  ;;  %vm13548_vm8 = vmor %vm2920_vm2, %vm2921_vm4 }
 0x144   :  { %v11662_v33 = vpop.eup %11661  ;;  %9428 = vmatmul.msk.bf16.gmra.mxu3 %vm829_vm0, %v20437_v34  ;;  %vm13515_vm6 = vcmp.eq.f32.partialorder %v2924_v2, 8.507059e+37  ;;  %v2941_v27 = vand.u32 2147483648, %v13283_v16  ;;  %11673 = vpow2.f32 %v9487_v3  ;;  %v13539_v2 = vld [vmem:[%s20208_s2] sm:$0xff]  ;;  %vm2935_vm9 = vweird.f32 %v13283_v16 }
 0x145   :  { %v13479_v42 = vpop.eup %11663  ;;  %v13503_v36 = vadd.f32 1.0, %v11662_v33  ;;  %v9190_v33 = vor.u32 %v11148_v54, %v9189_v61  ;;  %v13542_v61 = vperm.slane %v13539_v2, 4  ;;  %vm13553_vm10 = vcmp.eq.f32.partialorder %v2939_v53, 8.507059e+37  ;;  %v20455_v16 = vld [vmem:[#allocation31_spill] sm:$0xff] }
 0x146   :  { %v11666_v18 = vpop.eup %11665  ;;  %v2196_v52 = vmul.f32 %v13479_v42, %v13392_v29  ;;  %v2934_v53 = vadd.f32 %v13394_v45, %v2933_v62  ;;  %vm2936_vm11 = vweird.f32 %v13394_v45  ;;  %v2788_v62 = vsel %vm13529_vm7, %v13317_v26, %v2784_v10 }
 0x147   :  { %v11668_v4 = vpop.eup %11667  ;;  %20435 = vst [vmem:[#allocation44_spill] sm:$0xff] %v13503_v36  ;;  %v13534_v20 = vadd.f32 1.0, %v11666_v18  ;;  %v9468_v18 = vmul.f32 -1.442695, %v13048_v22  ;;  %1374 = vmatpush.bf16.msra.mxu1 %v9190_v33  ;;  %11675 = vrcp.f32 %v13503_v36  ;;  %v9191_v33 = vld [vmem:[%s20207_s1 + $0x228] sm:$0xf0]  ;;  %v1073_v59 = vadd.f32 %v13257_v41, %v12858_v38  ;;  %1325 = vmatmul.bf16.gmra.mxu0 %v20402_v44  ;;  %vm13606_vm12 = vmor %vm2935_vm9, %vm2936_vm11 }
 0x148   :  { %v13521_v0 = vpop.f32.mrf.mxu3  ;;  %v11670_v21 = vpop.eup %11669  ;;  %v13557_v54 = vadd.f32 1.0, %v11668_v4  ;;  %v20450_v4 = vld [vmem:[#allocation32_spill] sm:$0xff]  ;;  %v2197_v36 = vsub.f32 1.0, %v2196_v52  ;;  %v20452_v22 = vld [vmem:[#allocation29_spill] sm:$0xff]  ;;  %v1119_v6 = vadd.f32 %v13268_v19, %v13542_v61  ;;  %9432 = vmatmul.msk.bf16.gmra.mxu2 %vm829_vm0, %v20408_v14  ;;  %v9194_v41 = vor.u32 %v11143_v12, %v9191_v33 }
 0x149   :  { %v13523_v9 = vpop.f32.mrf.mxu2  ;;  %v13567_v60 = vpop.eup %11671  ;;  %v13573_v25 = vadd.f32 %v20450_v4, %v999_v55  ;;  %v2923_v55 = vsel %vm13548_vm8, %v13362_v46, %v2919_v30  ;;  %v13590_v4 = vadd.f32 1.0, %v11670_v21  ;;  %11677 = vrcp.f32 %v13534_v20 }
 0x14a   :  { %v13565_v58 = vpop.f32.mrf.mxu0  ;;  %v1060_v7 = vadd.f32 %v20452_v22, %v12858_v38  ;;  %v1911_v22 = vmul.f32 %v13567_v60, %v13459_v35  ;;  %11679 = vpow2.f32 %v9468_v18  ;;  %v11674_v19 = vpop.eup %11673  ;;  %v2938_v46 = vsel %vm13606_vm12, %v13394_v45, %v2934_v53  ;;  %1440 = vmatpush.bf16.msra.mxu0 %v9194_v41 }
 0x14b   :  { %v13563_v17 = vpop.f32.mrf.mxu1  ;;  %20449 = vst [vmem:[#allocation45_spill] sm:$0xff] %v13565_v58  ;;  %v11188_v58 = vld [vmem:[%s20207_s1 + $0x364] sm:$0xf0]  ;;  %11681 = vrcp.f32 %v13557_v54  ;;  %v9497_v21 = vmul.f32 -1.442695, %v13573_v25  ;;  %v2942_v52 = vor.u32 1.1754944e-38, %v2941_v27  ;;  %v2793_v45 = vsel %vm13510_vm5, %v13495_v24, %v2788_v62 }
 0x14c   :  { %20448 = vst [vmem:[#allocation30_spill] sm:$0xff] %v13563_v17  ;;  %v9349_v17 = vld [vmem:[%s20207_s1 + $0x340] sm:$0xf]  ;;  %v13618_v10 = vadd.f32 %v20455_v16, %v1060_v7  ;;  %11683 = vrcp.f32 %v13590_v4  ;;  %v2204_v11 = vand.u32 2147483647, %v13392_v29  ;;  %v2206_v12 = vand.u32 2147483648, %v13392_v29 }
 0x14d   :  { %20451 = vst [vmem:[#allocation32_spill] sm:$0xff] %v13590_v4  ;;  %v9350_v26 = vor.u32 %v11188_v58, %v9349_v17  ;;  %v13623_v58 = vpop.eup %11675  ;;  %v2928_v7 = vsel %vm13515_vm6, %v13497_v5, %v2923_v55  ;;  %v13632_v27 = vadd.f32 %v13315_v56, %v1073_v59  ;;  %v13635_v40 = vadd.f32 %v13337_v47, %v1119_v6  ;;  %v20457_v5 = vld [vmem:[#allocation21_spill] sm:$0xff]  ;;  %v20459_v6 = vld [vmem:[#allocation22_spill] sm:$0xff]  ;;  %v9109_v4 = vld [vmem:[%s20207_s1 + $0x160] sm:$0xf] }
 0x14e   :  { %20456 = vst [vmem:[#allocation29_spill] sm:$0xff] %v13623_v58  ;;  %v2943_v18 = vsel %vm13553_vm10, %v2942_v52, %v2938_v46  ;;  %v2198_v17 = vmul.f32 %v13479_v42, %v2197_v36  ;;  %v1912_v53 = vsub.f32 1.0, %v1911_v22  ;;  %v13640_v33 = vadd.f32 1.0, %v11674_v19  ;;  %v9351_v16 = vld [vmem:[%s20207_s1 + $0x368] sm:$0xf0] }
 0x14f   :  { %1411 = vmatpush.bf16.msra.mxu3 %v9350_v26  ;;  %v13646_v28 = vpop.eup %11677  ;;  %v13650_v56 = vmul.f32 %v13472_v57, %v20457_v5  ;;  %v13654_v47 = vmul.f32 %v13483_v50, %v20459_v6  ;;  %11685 = vpow2.f32 %v9497_v21  ;;  %v9478_v59 = vmul.f32 -1.442695, %v13618_v10  ;;  %v9149_v57 = vld [vmem:[%s20207_s1 + $0x1b0] sm:$0xf]  ;;  %v11138_v50 = vld [vmem:[%s20207_s1 + $0x1d4] sm:$0xf0] }
 0x150   :  { %v13642_v23 = vpop.f32.mrf.mxu3  ;;  %v11680_v36 = vpop.eup %11679  ;;  %vm2200_vm13 = vweird.f32 %v13392_v29  ;;  %vm2201_vm14 = vweird.f32 %v13479_v42  ;;  %vm13659_vm15 = vcmp.eq.f32.partialorder %v2204_v11, 8.507059e+37  ;;  %v13663_v62 = vor.u32 1.1754944e-38, %v2206_v12  ;;  %v11183_v21 = vld [vmem:[%s20207_s1 + $0x344] sm:$0xf]  ;;  %v9151_v12 = vld [vmem:[%s20207_s1 + $0x1d8] sm:$0xf0] }
 0x151   :  { %v13644_v24 = vpop.f32.mrf.mxu2  ;;  %20458 = vst [vmem:[#allocation31_spill] sm:$0xff] %v13650_v56  ;;  %v13675_v22 = vpop.eup %11681  ;;  %v13678_v41 = vmul.f32 %v2793_v45, %v12745_v8  ;;  %v13681_v26 = vmul.f32 %v2928_v7, %v13089_v1  ;;  %v13684_v19 = vmul.f32 %v2943_v18, %v13107_v15  ;;  %v1919_v46 = vand.u32 2147483647, %v13459_v35  ;;  %v11133_v15 = vld [vmem:[%s20207_s1 + $0x1b4] sm:$0xf]  ;;  %vm13710_vm1 = vmor %vm2200_vm13, %vm2201_vm14  ;;  %v20470_v5 = vld [vmem:[#allocation13_spill] sm:$0xff] }
 0x152   :  { %20460 = vst [vmem:[#allocation21_spill] sm:$0xff] %v13654_v47  ;;  %v13673_v30 = vpop.f32.mrf.mxu0  ;;  %v13693_v52 = vpop.eup %11683  ;;  %v2199_v8 = vadd.f32 %v13479_v42, %v2198_v17  ;;  %v1913_v1 = vmul.f32 %v13567_v60, %v1912_v53  ;;  %v1921_v11 = vand.u32 2147483648, %v13459_v35  ;;  %11687 = vrcp.f32 %v13640_v33  ;;  %v20467_v45 = vld [vmem:[#allocation14_spill] sm:$0xff] }
 0x153   :  { %v13671_v55 = vpop.f32.mrf.mxu1  ;;  %20463 = vst [vmem:[#allocation22_spill] sm:$0xff] %v13678_v41  ;;  %1269 = vmatmul.bf16.gmra.mxu1 %v20467_v45  ;;  %v2346_v18 = vmul.f32 %v13646_v28, %v13534_v20  ;;  %v13716_v17 = vadd.f32 1.0, %v11680_v36  ;;  %11689 = vpow2.f32 %v9478_v59  ;;  %v9150_v53 = vor.u32 %v11138_v50, %v9149_v57  ;;  %v11128_v59 = vld [vmem:[%s20207_s1 + $0x184] sm:$0xf0] }
 0x154   :  { %20464 = vst [vmem:[#allocation46_spill] sm:$0xff] %v13681_v26  ;;  %9429 = vmatmul.msk.bf16.gmra.mxu3 %vm829_vm0, %v20470_v5  ;;  %vm1915_vm2 = vweird.f32 %v13459_v35  ;;  %v2061_v6 = vmul.f32 %v13675_v22, %v13557_v54  ;;  %v9507_v29 = vmul.f32 -1.442695, %v13201_v32  ;;  %vm1916_vm3 = vweird.f32 %v13567_v60 }
 0x155   :  { %20465 = vst [vmem:[#allocation47_spill] sm:$0xff] %v13684_v19  ;;  %v11686_v36 = vpop.eup %11685  ;;  %1375 = vmatpush.bf16.msra.mxu1 %v9150_v53  ;;  %v9154_v57 = vor.u32 %v11133_v15, %v9151_v12  ;;  %v1124_v50 = vadd.f32 %v13444_v37, %v13542_v61  ;;  %v13734_v58 = vperm.slane %v13539_v2, 5  ;;  %v2203_v19 = vsel %vm13710_vm1, %v13479_v42, %v2199_v8  ;;  %v11123_v2 = vld [vmem:[%s20207_s1 + $0x164] sm:$0xf]  ;;  %v9111_v53 = vld [vmem:[%s20207_s1 + $0x188] sm:$0xf0]  ;;  %vm13781_vm4 = vmor %vm1915_vm2, %vm1916_vm3 }
 0x156   :  { %20466 = vst [vmem:[#allocation48_spill] sm:$0xff] %v13693_v52  ;;  %v9354_v52 = vor.u32 %v11183_v21, %v9351_v16  ;;  %v9069_v21 = vld [vmem:[%s20207_s1 + $0x110] sm:$0xf]  ;;  %v11118_v16 = vld [vmem:[%s20207_s1 + $0x134] sm:$0xf0]  ;;  %v1914_v15 = vadd.f32 %v13567_v60, %v1913_v1  ;;  %v2356_v12 = vand.u32 2147483648, %v13534_v20  ;;  %11691 = vrcp.f32 %v13716_v17 }
 0x157   :  { %v2071_v37 = vand.u32 2147483648, %v13557_v54  ;;  %v2347_v41 = vsub.f32 1.0, %v2346_v18  ;;  %1441 = vmatpush.bf16.msra.mxu0 %v9154_v57  ;;  %v1185_v42 = vadd.f32 %v13446_v31, %v13734_v58  ;;  %v9110_v8 = vor.u32 %v11128_v59, %v9109_v4 }
 0x158   :  { %1477 = vmatpush.bf16.msra.mxu2 %v9354_v52  ;;  %v13757_v1 = vpop.eup %11687  ;;  %v2062_v7 = vsub.f32 1.0, %v2061_v6  ;;  %v13759_v52 = vadd.f32 1.0, %v11686_v36  ;;  %v1004_v26 = vadd.f32 %v13050_v49, %v12781_v39  ;;  %v9070_v47 = vor.u32 %v11118_v16, %v9069_v21  ;;  %v13763_v56 = vpop.f32.mrf.mxu3  ;;  %1330 = vmatmul.bf16.gmra.mxu0 %v20434_v48  ;;  %v11098_v39 = vld [vmem:[%s20207_s1 + $0x94] sm:$0xf0] }
 0x159   :  { %v13765_v14 = vpop.f32.mrf.mxu2  ;;  %v11690_v18 = vpop.eup %11689  ;;  %11693 = vpow2.f32 %v9507_v29  ;;  %1376 = vmatpush.bf16.msra.mxu1 %v9110_v8  ;;  %v13769_v31 = vadd.f32 %v13521_v0, %v1124_v50  ;;  %v13772_v4 = vadd.f32 %v13523_v9, %v1185_v42  ;;  %v9114_v6 = vor.u32 %v11123_v2, %v9111_v53  ;;  %9433 = vmatmul.msk.bf16.gmra.mxu2 %vm829_vm0, %v20437_v34  ;;  %v20482_v42 = vld [vmem:[#allocation34_spill] sm:$0xff] }
 0x15a   :  { %v2208_v49 = vsel %vm13659_vm15, %v13663_v62, %v2203_v19  ;;  %vm13785_vm5 = vcmp.eq.f32.partialorder %v1919_v46, 8.507059e+37  ;;  %v1922_v0 = vor.u32 1.1754944e-38, %v1921_v11  ;;  %v2354_v9 = vand.u32 2147483647, %v13534_v20  ;;  %v13794_v62 = vpop.f32.mrf.mxu0  ;;  %v11173_v29 = vld [vmem:[%s20207_s1 + $0x2f4] sm:$0xf] }
 0x15b   :  { %v13792_v3 = vpop.f32.mrf.mxu1  ;;  %20476 = vst [vmem:[#allocation50_spill] sm:$0xff] %v13794_v62  ;;  %v1918_v35 = vsel %vm13781_vm4, %v13567_v60, %v1914_v15  ;;  %v2069_v19 = vand.u32 2147483647, %v13557_v54  ;;  %v2496_v46 = vmul.f32 %v13757_v1, %v13640_v33  ;;  %v9488_v11 = vmul.f32 -1.442695, %v13204_v63  ;;  %1442 = vmatpush.bf16.msra.mxu0 %v9114_v6 }
 0x15c   :  { %20475 = vst [vmem:[#allocation49_spill] sm:$0xff] %v13792_v3  ;;  %v2348_v59 = vmul.f32 %v13646_v28, %v2347_v41  ;;  %v2063_v36 = vmul.f32 %v13675_v22, %v2062_v7  ;;  %11695 = vrcp.f32 %v13759_v52  ;;  %v13806_v57 = vadd.f32 1.0, %v11690_v18  ;;  %v13808_v50 = vpop.eup %11691  ;;  %v9029_v41 = vld [vmem:[%s20207_s1 + $0xc0] sm:$0xf]  ;;  %v8989_v7 = vld [vmem:[%s20207_s1 + $0x70] sm:$0xf] }
 0x15d   :  { %vm2350_vm6 = vweird.f32 %v13534_v20  ;;  %v13811_v60 = vor.u32 1.1754944e-38, %v2356_v12  ;;  %v13813_v21 = vor.u32 1.1754944e-38, %v2071_v37  ;;  %v13816_v16 = vadd.f32 %v13099_v13, %v1004_v26  ;;  %1377 = vmatpush.bf16.msra.mxu1 %v9070_v47  ;;  %v11108_v13 = vld [vmem:[%s20207_s1 + $0xe4] sm:$0xf0]  ;;  %v11178_v47 = vld [vmem:[%s20207_s1 + $0x314] sm:$0xf0] }
 0x15e   :  { %v13822_v15 = vmul.f32 %v2208_v49, %v12863_v51  ;;  %v1923_v2 = vsel %vm13785_vm5, %v1922_v0, %v1918_v35  ;;  %vm2351_vm7 = vweird.f32 %v13646_v28  ;;  %vm13827_vm8 = vcmp.eq.f32.partialorder %v2354_v9, 8.507059e+37  ;;  %v9309_v51 = vld [vmem:[%s20207_s1 + $0x2f0] sm:$0xf]  ;;  %v9311_v0 = vld [vmem:[%s20207_s1 + $0x318] sm:$0xf0] }
 0x15f   :  { %vm2065_vm9 = vweird.f32 %v13557_v54  ;;  %v11694_v26 = vpop.eup %11693  ;;  %vm2066_vm10 = vweird.f32 %v13675_v22  ;;  %vm13842_vm11 = vcmp.eq.f32.partialorder %v2069_v19, 8.507059e+37  ;;  %v2497_v53 = vsub.f32 1.0, %v2496_v46  ;;  %vm13890_vm12 = vmor %vm2350_vm6, %vm2351_vm7 }
 0x160   :  { %20477 = vst [vmem:[#allocation51_spill] sm:$0xff] %v13822_v15  ;;  %11697 = vpow2.f32 %v9488_v11  ;;  %v1065_v8 = vadd.f32 %v20482_v42, %v12858_v38  ;;  %v2349_v18 = vadd.f32 %v13646_v28, %v2348_v59  ;;  %v2064_v6 = vadd.f32 %v13675_v22, %v2063_v36  ;;  %v13865_v9 = vpop.f32.mrf.mxu3  ;;  %v20485_v42 = vld [vmem:[#allocation28_spill] sm:$0xff]  ;;  %vm13903_vm14 = vmor %vm2065_vm9, %vm2066_vm10 }
 0x161   :  { %v2211_v49 = vmul.f32 %v13808_v50, %v13716_v17  ;;  %11699 = vrcp.f32 %v13806_v57  ;;  %20483 = vst [vmem:[#allocation34_spill] sm:$0xff] %v13865_v9  ;;  %v13867_v35 = vpop.f32.mrf.mxu2  ;;  %v9517_v19 = vmul.f32 -1.442695, %v13816_v16  ;;  %v9030_v11 = vor.u32 %v11108_v13, %v9029_v41 }
 0x162   :  { %20484 = vst [vmem:[#allocation52_spill] sm:$0xff] %v13867_v35  ;;  %v13871_v46 = vadd.f32 %v13091_v43, %v1065_v8  ;;  %v9310_v59 = vor.u32 %v11178_v47, %v9309_v51  ;;  %v13873_v36 = vpop.eup %11695  ;;  %v13876_v15 = vmul.f32 %v1923_v2, %v20485_v42  ;;  %v2504_v34 = vand.u32 2147483647, %v13640_v33  ;;  %v13884_v35 = vpop.f32.mrf.mxu0  ;;  %v20496_v42 = vld [vmem:[#allocation38_spill] sm:$0xff]  ;;  %v20497_v43 = vld [vmem:[#allocation16_spill] sm:$0xff] }
 0x163   :  { %v2506_v48 = vand.u32 2147483648, %v13640_v33  ;;  %v13880_v62 = vadd.f32 1.0, %v11694_v26  ;;  %v13882_v9 = vpop.f32.mrf.mxu1  ;;  %v2498_v41 = vmul.f32 %v13757_v1, %v2497_v53  ;;  %vm2500_vm13 = vweird.f32 %v13640_v33  ;;  %1378 = vmatpush.bf16.msra.mxu1 %v9030_v11  ;;  %v20490_v26 = vld [vmem:[#allocation26_spill] sm:$0xff] }
 0x164   :  { %1412 = vmatpush.bf16.msra.mxu3 %v9310_v59  ;;  %v8990_v2 = vor.u32 %v11098_v39, %v8989_v7  ;;  %v9314_v13 = vor.u32 %v11173_v29, %v9311_v0  ;;  %v2353_v51 = vsel %vm13890_vm12, %v13646_v28, %v2349_v18  ;;  %vm2501_vm15 = vweird.f32 %v13757_v1 }
 0x165   :  { %v2212_v47 = vsub.f32 1.0, %v2211_v49  ;;  %v9527_v53 = vmul.f32 -1.442695, %v20490_v26  ;;  %v2068_v7 = vsel %vm13903_vm14, %v13675_v22, %v2064_v6  ;;  %v2646_v28 = vmul.f32 %v13873_v36, %v13759_v52  ;;  %vm13936_vm3 = vmor %vm2500_vm13, %vm2501_vm15 }
 0x166   :  { %v11698_v8 = vpop.eup %11697  ;;  %11701 = vpow2.f32 %v9517_v19  ;;  %v9498_v54 = vmul.f32 -1.442695, %v13871_v46  ;;  %1478 = vmatpush.bf16.msra.mxu2 %v9314_v13  ;;  %vm13917_vm1 = vcmp.eq.f32.partialorder %v2504_v34, 8.507059e+37  ;;  %v2507_v49 = vor.u32 1.1754944e-38, %v2506_v48 }
 0x167   :  { %v13915_v18 = vpop.eup %11699  ;;  %v2221_v29 = vand.u32 2147483648, %v13716_v17  ;;  %11703 = vrcp.f32 %v13880_v62  ;;  %v2358_v22 = vsel %vm13827_vm8, %v13811_v60, %v2353_v51  ;;  %v2499_v6 = vadd.f32 %v13757_v1, %v2498_v41  ;;  %1379 = vmatpush.bf16.msra.mxu1 %v8990_v2 }
 0x168   :  { %vm2215_vm2 = vweird.f32 %v13716_v17  ;;  %v2219_v0 = vand.u32 2147483647, %v13716_v17  ;;  %v2073_v34 = vsel %vm13842_vm11, %v13813_v21, %v2068_v7  ;;  %v2213_v60 = vmul.f32 %v13808_v50, %v2212_v47  ;;  %v13943_v19 = vpop.f32.mrf.mxu3  ;;  %v20495_v21 = vld [vmem:[#allocation42_spill] sm:$0xff]  ;;  %1335 = vmatmul.bf16.gmra.mxu0 %v20467_v45  ;;  %v20522_v47 = vld [vmem:[#allocation5_spill] sm:$0xff] }
 0x169   :  { %v13941_v12 = vadd.f32 1.0, %v11698_v8  ;;  %11705 = vpow2.f32 %v9527_v53  ;;  %v13945_v11 = vpop.f32.mrf.mxu2  ;;  %v2647_v59 = vsub.f32 1.0, %v2646_v28  ;;  %v9508_v37 = vmul.f32 -1.442695, %v20495_v21  ;;  %9434 = vmatmul.msk.bf16.gmra.mxu2 %vm829_vm0, %v20470_v5  ;;  %v20501_v8 = vld [vmem:[#allocation41_spill] sm:$0xff] }
 0x16a   :  { %11707 = vpow2.f32 %v9498_v54  ;;  %v1070_v33 = vadd.f32 %v20496_v42, %v12858_v38  ;;  %v13952_v41 = vmul.f32 %v2358_v22, %v20497_v43  ;;  %v13954_v2 = vor.u32 1.1754944e-38, %v2221_v29  ;;  %v20504_v29 = vld [vmem:[#allocation27_spill] sm:$0xff]  ;;  %v13990_v42 = vpop.f32.mrf.mxu0  ;;  %v11168_v43 = vld [vmem:[%s20207_s1 + $0x2c4] sm:$0xf0]  ;;  %v11103_v5 = vld [vmem:[%s20207_s1 + $0xc4] sm:$0xf] }
 0x16b   :  { %v2656_v13 = vand.u32 2147483648, %v13759_v52  ;;  %v2361_v51 = vmul.f32 %v13915_v18, %v13806_v57  ;;  %v2503_v38 = vsel %vm13936_vm3, %v13757_v1, %v2499_v6  ;;  %vm13964_vm4 = vcmp.eq.f32.partialorder %v2219_v0, 8.507059e+37  ;;  %v13973_v28 = vpop.f32.mrf.mxu1  ;;  %v8949_v1 = vld [vmem:[%s20207_s1 + $0x20] sm:$0xf]  ;;  %v11088_v6 = vld [vmem:[%s20207_s1 + $0x44] sm:$0xf0] }
 0x16c   :  { %20498 = vst [vmem:[#allocation28_spill] sm:$0xff] %v13952_v41  ;;  %v11702_v20 = vpop.eup %11701  ;;  %vm2650_vm5 = vweird.f32 %v13759_v52  ;;  %v2654_v53 = vand.u32 2147483647, %v13759_v52  ;;  %v13971_v7 = vadd.f32 %v20501_v8, %v1070_v33  ;;  %v3228_v22 = vmul.f32 %v2073_v34, %v20504_v29  ;;  %v9269_v0 = vld [vmem:[%s20207_s1 + $0x2a0] sm:$0xf]  ;;  %v20521_v52 = vld [vmem:[#allocation6_spill] sm:$0xff] }
 0x16d   :  { %20503 = vst [vmem:[#allocation38_spill] sm:$0xff] %v13973_v28  ;;  %v13975_v54 = vpop.eup %11703  ;;  %v2214_v48 = vadd.f32 %v13808_v50, %v2213_v60  ;;  %vm2216_vm6 = vweird.f32 %v13808_v50  ;;  %11709 = vrcp.f32 %v13941_v12  ;;  %v2648_v34 = vmul.f32 %v13873_v36, %v2647_v59  ;;  %v11113_v8 = vld [vmem:[%s20207_s1 + $0x114] sm:$0xf]  ;;  %v9071_v29 = vld [vmem:[%s20207_s1 + $0x138] sm:$0xf0] }
 0x16e   :  { %20502 = vst [vmem:[#allocation26_spill] sm:$0xff] %v13971_v7  ;;  %11711 = vpow2.f32 %v9508_v37  ;;  %v1129_v60 = vadd.f32 %v13671_v55, %v13542_v61  ;;  %v1190_v33 = vadd.f32 %v13673_v30, %v13734_v58  ;;  %v2508_v37 = vsel %vm13917_vm1, %v2507_v49, %v2503_v38  ;;  %vm14016_vm7 = vmor %vm2215_vm2, %vm2216_vm6 }
 0x16f   :  { %20505 = vst [vmem:[#allocation16_spill] sm:$0xff] %v13990_v42  ;;  %v11706_v59 = vpop.eup %11705  ;;  %v14008_v55 = vor.u32 1.1754944e-38, %v2656_v13  ;;  %v2362_v41 = vsub.f32 1.0, %v2361_v51  ;;  %v14010_v30 = vadd.f32 1.0, %v11702_v20  ;;  %vm2651_vm8 = vweird.f32 %v13873_v36 }
 0x170   :  { %v11708_v42 = vpop.eup %11707  ;;  %v2369_v45 = vand.u32 2147483647, %v13806_v57  ;;  %v2796_v39 = vmul.f32 %v13975_v54, %v13880_v62  ;;  %v9518_v49 = vmul.f32 -1.442695, %v13971_v7  ;;  %v2218_v13 = vsel %vm14016_vm7, %v13808_v50, %v2214_v48  ;;  %v9031_v50 = vld [vmem:[%s20207_s1 + $0xe8] sm:$0xf0]  ;;  %vm14072_vm11 = vmor %vm2650_vm5, %vm2651_vm8 }
 0x171   :  { %vm14028_vm9 = vcmp.eq.f32.partialorder %v2654_v53, 8.507059e+37  ;;  %vm2365_vm10 = vweird.f32 %v13806_v57  ;;  %v8950_v17 = vor.u32 %v11088_v6, %v8949_v1  ;;  %v9270_v20 = vor.u32 %v11168_v43, %v9269_v0  ;;  %v14048_v53 = vpop.f32.mrf.mxu3  ;;  %v14059_v6 = vpop.f32.mrf.mxu2 }
 0x172   :  { %v9074_v38 = vor.u32 %v11113_v8, %v9071_v29  ;;  %v2649_v28 = vadd.f32 %v13873_v36, %v2648_v34  ;;  %v14034_v3 = vadd.f32 1.0, %v11706_v59  ;;  %v14037_v21 = vadd.f32 %v13763_v56, %v1129_v60  ;;  %20512 = vst [vmem:[#allocation53_spill] sm:$0xff] %v14048_v53  ;;  %v20515_v34 = vld [vmem:[#allocation33_spill] sm:$0xff] }
 0x173   :  { %v14040_v7 = vadd.f32 %v13765_v14, %v1190_v33  ;;  %v14050_v48 = vpop.eup %11709  ;;  %v14053_v1 = vpack.c.bf16 %v3228_v22, %v13876_v15  ;;  %v2363_v56 = vmul.f32 %v13915_v18, %v2362_v41  ;;  %11713 = vrcp.f32 %v14010_v30  ;;  %1380 = vmatpush.bf16.msra.mxu1 %v8950_v17  ;;  %1413 = vmatpush.bf16.msra.mxu3 %v9270_v20  ;;  %v14090_v59 = vpop.f32.mrf.mxu1  ;;  %v20525_v20 = vld [vmem:[#allocation25_spill] sm:$0xff] }
 0x174   :  { %20510 = vst [vmem:[#allocation41_spill] sm:$0xff] %v14037_v21  ;;  %v14057_v14 = vadd.f32 1.0, %v11708_v42  ;;  %v11712_v0 = vpop.eup %11711  ;;  %v14062_v60 = vmul.f32 %v2508_v37, %v20515_v34  ;;  %v2371_v33 = vand.u32 2147483648, %v13806_v57  ;;  %v2797_v43 = vsub.f32 1.0, %v2796_v39  ;;  %1443 = vmatpush.bf16.msra.mxu0 %v9074_v38  ;;  %v20523_v39 = vld [vmem:[#allocation35_spill] sm:$0xff] }
 0x175   :  { %20511 = vst [vmem:[#allocation27_spill] sm:$0xff] %v14040_v7  ;;  %11715 = vpow2.f32 %v9518_v49  ;;  %v2223_v15 = vsel %vm13964_vm4, %v13954_v2, %v2218_v13  ;;  %v2804_v22 = vand.u32 2147483647, %v13880_v62  ;;  %v2806_v42 = vand.u32 2147483648, %v13880_v62 }
 0x176   :  { %20513 = vst [vmem:[#allocation54_spill] sm:$0xff] %v14053_v1  ;;  %v9034_v8 = vor.u32 %v11103_v5, %v9031_v50  ;;  %v2653_v29 = vsel %vm14072_vm11, %v13873_v36, %v2649_v28  ;;  %vm2366_vm12 = vweird.f32 %v13915_v18  ;;  %vm14082_vm13 = vcmp.eq.f32.partialorder %v2369_v45, 8.507059e+37  ;;  %1381 = vmatmul.bf16.vlgmr.msra.gmra.mxu1 %v20521_v52  ;;  %9435 = vmatmul.msk.bf16.vlgmr.msra.gmra.mxu3 %vm829_vm0, %v20522_v47  ;;  %v14098_v28 = vpop.f32.mrf.mxu0  ;;  %v11093_v5 = vld [vmem:[%s20207_s1 + $0x74] sm:$0xf]  ;;  %v8991_v50 = vld [vmem:[%s20207_s1 + $0x98] sm:$0xf0] }
 0x177   :  { %20514 = vst [vmem:[#allocation55_spill] sm:$0xff] %v14059_v6  ;;  %11717 = vrcp.f32 %v14034_v3  ;;  %v2364_v37 = vadd.f32 %v13915_v18, %v2363_v56  ;;  %v2511_v36 = vmul.f32 %v14050_v48, %v13941_v12  ;;  %v14096_v45 = vadd.f32 1.0, %v11712_v0  ;;  %vm14127_vm15 = vmor %vm2365_vm10, %vm2366_vm12 }
 0x178   :  { %20516 = vst [vmem:[#allocation33_spill] sm:$0xff] %v14062_v60  ;;  %11719 = vrcp.f32 %v14057_v14  ;;  %v14101_v49 = vmul.f32 %v2223_v15, %v20523_v39  ;;  %v2372_v13 = vor.u32 1.1754944e-38, %v2371_v33  ;;  %v2798_v17 = vmul.f32 %v13975_v54, %v2797_v43  ;;  %1444 = vmatpush.bf16.msra.mxu0 %v9034_v8  ;;  %v11163_v39 = vld [vmem:[%s20207_s1 + $0x2a4] sm:$0xf] }
 0x179   :  { %v1121_v38 = vadd.f32 %v20525_v20, %v13542_v61  ;;  %v14112_v56 = vpop.eup %11713  ;;  %vm14114_vm14 = vcmp.eq.f32.partialorder %v2804_v22, 8.507059e+37  ;;  %v2807_v34 = vor.u32 1.1754944e-38, %v2806_v42  ;;  %v2519_v33 = vand.u32 2147483647, %v13941_v12  ;;  %v11083_v42 = vld [vmem:[%s20207_s1 + $0x24] sm:$0xf]  ;;  %v14180_v6 = vpop.f32.mrf.mxu2 }
 0x17a   :  { %20524 = vst [vmem:[#allocation6_spill] sm:$0xff] %v14101_v49  ;;  %v2521_v43 = vand.u32 2147483648, %v13941_v12  ;;  %v2658_v41 = vsel %vm14028_vm9, %v14008_v55, %v2653_v29  ;;  %vm2800_vm1 = vweird.f32 %v13880_v62  ;;  %vm2801_vm2 = vweird.f32 %v13975_v54  ;;  %v8951_v55 = vld [vmem:[%s20207_s1 + $0x48] sm:$0xf0] }
 0x17b   :  { %v11716_v15 = vpop.eup %11715  ;;  %v9528_v22 = vmul.f32 -1.442695, %v13632_v27  ;;  %v2368_v57 = vsel %vm14127_vm15, %v13915_v18, %v2364_v37  ;;  %v2512_v51 = vsub.f32 1.0, %v2511_v36  ;;  %11721 = vrcp.f32 %v14096_v45  ;;  %v9271_v20 = vld [vmem:[%s20207_s1 + $0x2c8] sm:$0xf0]  ;;  %v20530_v18 = vld [vmem:[#allocation43_spill] sm:$0xff]  ;;  %vm14171_vm3 = vmor %vm2800_vm1, %vm2801_vm2 }
 0x17c   :  { %v8994_v29 = vor.u32 %v11093_v5, %v8991_v50  ;;  %v2799_v49 = vadd.f32 %v13975_v54, %v2798_v17  ;;  %v2946_v8 = vmul.f32 %v14112_v56, %v14010_v30  ;;  %v14156_v37 = vadd.f32 %v20530_v18, %v1121_v38  ;;  %v14160_v5 = vpop.f32.mrf.mxu3 }
 0x17d   :  { %v14150_v60 = vpop.eup %11717  ;;  %v1134_v36 = vadd.f32 %v13882_v9, %v13542_v61  ;;  %v14165_v1 = vmul.f32 %v2658_v41, %v13573_v25  ;;  %vm2515_vm4 = vweird.f32 %v13941_v12  ;;  %v14176_v38 = vadd.f32 1.0, %v11716_v15 }
 0x17e   :  { %v14162_v50 = vpop.eup %11719  ;;  %1445 = vmatpush.bf16.msra.mxu0 %v8994_v29  ;;  %v1195_v9 = vadd.f32 %v13884_v35, %v13734_v58  ;;  %v8954_v18 = vor.u32 %v11083_v42, %v8951_v55  ;;  %v2373_v25 = vsel %vm14082_vm13, %v2372_v13, %v2368_v57  ;;  %11723 = vpow2.f32 %v9528_v22  ;;  %v14213_v55 = vpop.f32.mrf.mxu0 }
 0x17f   :  { %20531 = vst [vmem:[#allocation5_spill] sm:$0xff] %v14165_v1  ;;  %v9274_v62 = vor.u32 %v11163_v39, %v9271_v20  ;;  %v14185_v41 = vadd.f32 %v13943_v19, %v1134_v36  ;;  %v1140_v1 = vpop.f32.mrf.mxu1  ;;  %v2513_v53 = vmul.f32 %v14050_v48, %v2512_v51  ;;  %v14188_v15 = vor.u32 1.1754944e-38, %v2521_v43 }
 0x180   :  { %v3096_v29 = vmul.f32 %v14150_v60, %v14034_v3  ;;  %v9449_v35 = vmul.f32 -1.442695, %v13635_v40  ;;  %v2803_v2 = vsel %vm14171_vm3, %v13975_v54, %v2799_v49  ;;  %v2947_v13 = vsub.f32 1.0, %v2946_v8 }
 0x181   :  { %v2661_v22 = vmul.f32 %v14162_v50, %v14057_v14  ;;  %v9459_v19 = vmul.f32 -1.442695, %v14156_v37  ;;  %1479 = vmatpush.bf16.msra.mxu2 %v9274_v62  ;;  %v14199_v1 = vpop.eup %11721  ;;  %v14202_v43 = vmul.f32 %v2373_v25, %v13618_v10  ;;  %vm14204_vm5 = vcmp.eq.f32.partialorder %v2519_v33, 8.507059e+37  ;;  %v20544_v62 = vld [vmem:[#allocation7_spill] sm:$0xff] }
 0x182   :  { %11725 = vrcp.f32 %v14176_v38  ;;  %v9469_v54 = vmul.f32 -1.442695, %v13769_v31  ;;  %1446 = vmatpush.bf16.msra.mxu0 %v8954_v18  ;;  %v14211_v49 = vadd.f32 %v13945_v11, %v1195_v9  ;;  %vm2516_vm6 = vweird.f32 %v14050_v48 }
 0x183   :  { %20534 = vst [vmem:[#allocation35_spill] sm:$0xff] %v14202_v43  ;;  %v2954_v57 = vand.u32 2147483647, %v14010_v30  ;;  %v2956_v10 = vand.u32 2147483648, %v14010_v30  ;;  %v2671_v33 = vand.u32 2147483648, %v14057_v14  ;;  %v2808_v51 = vsel %vm14114_vm14, %v2807_v34, %v2803_v2  ;;  %vm14238_vm8 = vmor %vm2515_vm4, %vm2516_vm6  ;;  %v20582_v43 = vld [vmem:[#allocation52_spill] sm:$0xff] }
 0x184   :  { %20537 = vst [vmem:[#allocation25_spill] sm:$0xff] %v14211_v49  ;;  %v2514_v39 = vadd.f32 %v14050_v48, %v2513_v53  ;;  %v3097_v20 = vsub.f32 1.0, %v3096_v29  ;;  %11727 = vpow2.f32 %v9449_v35  ;;  %9440 = vmatmul.msk.bf16.vlgmr.msra.gmra.mxu2 %vm829_vm0, %v20522_v47  ;;  %v11724_v11 = vpop.eup %11723  ;;  %v2948_v8 = vmul.f32 %v14112_v56, %v2947_v13  ;;  %v1173_v9 = vpop.f32.mrf.mxu3 }
 0x185   :  { %v2662_v36 = vsub.f32 1.0, %v2661_v22  ;;  %v2811_v17 = vmul.f32 %v14199_v1, %v14096_v45  ;;  %11729 = vpow2.f32 %v9459_v19  ;;  %1447 = vmatmul.bf16.vlgmr.msra.gmra.mxu0 %v20521_v52  ;;  %vm2950_vm7 = vweird.f32 %v14010_v30  ;;  %v14262_v13 = vpop.f32.mrf.mxu2 }
 0x186   :  { %v2669_v53 = vand.u32 2147483647, %v14057_v14  ;;  %11731 = vpow2.f32 %v9469_v54  ;;  %v9450_v0 = vmul.f32 -1.442695, %v13772_v4  ;;  %v14232_v47 = vmul.f32 %v2808_v51, %v13201_v32  ;;  %v20543_v32 = vld [vmem:[#allocation8_spill] sm:$0xff]  ;;  %9436 = vmatmul.msk.bf16.gmra.mxu3 %vm829_vm0, %v20544_v62  ;;  %v20546_v51 = vld [vmem:[#allocation45_spill] sm:$0xff] }
 0x187   :  { %vm2951_vm9 = vweird.f32 %v14112_v56  ;;  %vm14243_vm10 = vcmp.eq.f32.partialorder %v2954_v57, 8.507059e+37  ;;  %v2957_v18 = vor.u32 1.1754944e-38, %v2956_v10  ;;  %vm2665_vm11 = vweird.f32 %v14057_v14  ;;  %1386 = vmatmul.bf16.gmra.mxu1 %v20543_v32 }
 0x188   :  { %20538 = vst [vmem:[#allocation43_spill] sm:$0xff] %v14232_v47  ;;  %v14248_v25 = vor.u32 1.1754944e-38, %v2671_v33  ;;  %v14253_v12 = vpop.eup %11725  ;;  %v2518_v29 = vsel %vm14238_vm8, %v14050_v48, %v2514_v39  ;;  %v3098_v35 = vmul.f32 %v14150_v60, %v3097_v20  ;;  %vm3100_vm12 = vweird.f32 %v14034_v3  ;;  %v20545_v48 = vld [vmem:[#allocation30_spill] sm:$0xff]  ;;  %v14272_v20 = vpop.f32.mrf.mxu0  ;;  %vm14291_vm1 = vmor %vm2950_vm7, %vm2951_vm9 }
 0x189   :  { %v14260_v2 = vadd.f32 1.0, %v11724_v11  ;;  %v2949_v22 = vadd.f32 %v14112_v56, %v2948_v8  ;;  %v2663_v19 = vmul.f32 %v14162_v50, %v2662_v36  ;;  %v3104_v54 = vand.u32 2147483647, %v14034_v3 }
 0x18a   :  { %v2812_v57 = vsub.f32 1.0, %v2811_v17  ;;  %v11728_v10 = vpop.eup %11727  ;;  %vm3101_vm13 = vweird.f32 %v14150_v60  ;;  %11733 = vpow2.f32 %v9450_v0  ;;  %v1126_v33 = vadd.f32 %v20545_v48, %v13542_v61 }
 0x18b   :  { %v1187_v39 = vadd.f32 %v20546_v51, %v13734_v58  ;;  %v11730_v11 = vpop.eup %11729  ;;  %v14277_v8 = vsel %vm14204_vm5, %v14188_v15, %v2518_v29  ;;  %vm2666_vm14 = vweird.f32 %v14162_v50  ;;  %vm14280_vm15 = vcmp.eq.f32.partialorder %v2669_v53, 8.507059e+37  ;;  %vm14309_vm2 = vmor %vm3100_vm12, %vm3101_vm13 }
 0x18c   :  { %v3106_v17 = vand.u32 2147483648, %v14034_v3  ;;  %v2961_v9 = vmul.f32 %v14253_v12, %v14176_v38  ;;  %v11732_v0 = vpop.eup %11731  ;;  %v3099_v15 = vadd.f32 %v14150_v60, %v3098_v35  ;;  %v2819_v53 = vand.u32 2147483647, %v14096_v45  ;;  %vm14337_vm5 = vmor %vm2665_vm11, %vm2666_vm14 }
 0x18d   :  { %11735 = vrcp.f32 %v14260_v2  ;;  %v14299_v34 = vadd.f32 %v13644_v24, %v1187_v39  ;;  %v2953_v29 = vsel %vm14291_vm1, %v14112_v56, %v2949_v22  ;;  %v2664_v48 = vadd.f32 %v14162_v50, %v2663_v19 }
 0x18e   :  { %v2813_v35 = vmul.f32 %v14199_v1, %v2812_v57  ;;  %v14314_v51 = vadd.f32 1.0, %v11728_v10  ;;  %vm14316_vm3 = vcmp.eq.f32.partialorder %v3104_v54, 8.507059e+37  ;;  %v2821_v56 = vand.u32 2147483648, %v14096_v45  ;;  %v20561_v10 = vld [vmem:[#allocation9_spill] sm:$0xff] }
 0x18f   :  { %v14321_v22 = vadd.f32 1.0, %v11730_v11  ;;  %v14324_v19 = vadd.f32 %v13642_v23, %v1126_v33  ;;  %v3107_v3 = vor.u32 1.1754944e-38, %v3106_v17  ;;  %vm2815_vm4 = vweird.f32 %v14096_v45 }
 0x190   :  { %v2962_v39 = vsub.f32 1.0, %v2961_v9  ;;  %v14327_v42 = vadd.f32 1.0, %v11732_v0  ;;  %v11734_v57 = vpop.eup %11733  ;;  %v14331_v54 = vsel %vm14243_vm10, %v2957_v18, %v2953_v29  ;;  %v3103_v23 = vsel %vm14309_vm2, %v14150_v60, %v3099_v15  ;;  %v14349_v18 = vpop.f32.mrf.mxu2 }
 0x191   :  { %vm14344_vm6 = vcmp.eq.f32.partialorder %v2819_v53, 8.507059e+37  ;;  %v9460_v52 = vmul.f32 -1.442695, %v14299_v34  ;;  %v2668_v14 = vsel %vm14337_vm5, %v14162_v50, %v2664_v48  ;;  %v2814_v11 = vadd.f32 %v14199_v1, %v2813_v35  ;;  %v1206_v15 = vpop.f32.mrf.mxu0 }
 0x192   :  { %vm2816_vm7 = vweird.f32 %v14199_v1  ;;  %11737 = vrcp.f32 %v14314_v51  ;;  %v2822_v60 = vor.u32 1.1754944e-38, %v2821_v56  ;;  %v2971_v9 = vand.u32 2147483648, %v14176_v38  ;;  %v11214_v15 = vld [vmem:[%s20209_s3 + $0x74] sm:$0xf0] }
 0x193   :  { %v14357_v17 = vpop.eup %11735  ;;  %11739 = vrcp.f32 %v14321_v22  ;;  %v9479_v0 = vmul.f32 -1.442695, %v14324_v19  ;;  %v3108_v53 = vsel %vm14316_vm3, %v3107_v3, %v3103_v23  ;;  %v2963_v50 = vmul.f32 %v14253_v12, %v2962_v39  ;;  %vm14373_vm8 = vmor %vm2815_vm4, %vm2816_vm7 }
 0x194   :  { %11741 = vrcp.f32 %v14327_v42  ;;  %v14366_v29 = vadd.f32 1.0, %v11734_v57  ;;  %v2673_v48 = vsel %vm14280_vm15, %v14248_v25, %v2668_v14  ;;  %v3121_v35 = vand.u32 2147483648, %v14260_v2  ;;  %9441 = vmatmul.msk.bf16.gmra.mxu2 %vm829_vm0, %v20544_v62  ;;  %v11230_v62 = vld [vmem:[%s20209_s3 + $0xf4] sm:$0xf0] }
 0x195   :  { %v1936_v24 = vand.u32 2147483648, %v14314_v51  ;;  %11743 = vpow2.f32 %v9460_v52  ;;  %v2818_v56 = vsel %vm14373_vm8, %v14199_v1, %v2814_v11  ;;  %vm2965_vm9 = vweird.f32 %v14176_v38  ;;  %1452 = vmatmul.bf16.gmra.mxu0 %v20543_v32  ;;  %v9657_v1 = vld [vmem:[%s20209_s3 + $0xf0] sm:$0xf]  ;;  %v11228_v32 = vld [vmem:[%s20209_s3 + $0xe4] sm:$0xf0] }
 0x196   :  { %v2969_v45 = vand.u32 2147483647, %v14176_v38  ;;  %v14388_v25 = vmul.f32 %v14357_v17, %v14260_v2  ;;  %v3297_v36 = vmul.f32 %v3108_v53, %v20490_v26  ;;  %vm2966_vm10 = vweird.f32 %v14253_v12  ;;  %9437 = vmatmul.msk.bf16.gmra.mxu3 %vm829_vm0, %v20561_v10  ;;  %v9785_v38 = vld [vmem:[%s20209_s3 + $0x1f0] sm:$0xf]  ;;  %v11246_v26 = vld [vmem:[%s20209_s3 + $0x174] sm:$0xf0] }
 0x197   :  { %v14393_v3 = vor.u32 1.1754944e-38, %v2971_v9  ;;  %11745 = vpow2.f32 %v9479_v0  ;;  %v14404_v57 = vadd.f32 %v14253_v12, %v2963_v50  ;;  %1391 = vmatmul.bf16.gmra.mxu1 %v20402_v44  ;;  %v2823_v52 = vsel %vm14344_vm6, %v2822_v60, %v2818_v56  ;;  %v9593_v0 = vld [vmem:[%s20209_s3 + $0x70] sm:$0xf]  ;;  %vm14434_vm11 = vmor %vm2965_vm9, %vm2966_vm10  ;;  %v11262_v56 = vld [vmem:[%s20209_s3 + $0x1f4] sm:$0xf0] }
 0x198   :  { %v14401_v39 = vpop.eup %11737  ;;  %11747 = vrcp.f32 %v14366_v29  ;;  %v14416_v14 = vor.u32 1.1754944e-38, %v3121_v35  ;;  %v14418_v11 = vor.u32 1.1754944e-38, %v1936_v24  ;;  %v1139_v9 = vadd.f32 %v14090_v59, %v13542_v61  ;;  %v1239_v53 = vpop.f32.mrf.mxu2 }
 0x199   :  { %v14412_v23 = vpop.eup %11739  ;;  %vm14438_vm12 = vcmp.eq.f32.partialorder %v2969_v45, 8.507059e+37  ;;  %v3112_v60 = vsub.f32 1.0, %v14388_v25  ;;  %v2086_v30 = vand.u32 2147483648, %v14321_v22  ;;  %v1200_v35 = vadd.f32 %v14098_v28, %v13734_v58  ;;  %v14548_v59 = vpop.f32.mrf.mxu3 }
 0x19a   :  { %v14428_v50 = vpop.eup %11741  ;;  %v9658_v24 = vor.u32 %v11230_v62, %v9657_v1  ;;  %v14454_v53 = vmul.f32 %v14277_v8, %v13204_v63  ;;  %v14458_v25 = vmul.f32 %v14331_v54, %v13816_v16  ;;  %v14461_v28 = vmul.f32 %v2673_v48, %v13871_v46  ;;  %v9649_v62 = vld [vmem:[%s20209_s3 + $0xe0] sm:$0xf]  ;;  %v20570_v8 = vld [vmem:[#allocation42_spill] sm:$0xff] }
 0x19b   :  { %v11744_v45 = vpop.eup %11743  ;;  %v14463_v1 = vpack.c.bf16 %v3297_v36, %v3297_v36  ;;  %v9585_v63 = vld [vmem:[%s20209_s3 + $0x60] sm:$0xf]  ;;  %v14475_v16 = vmul.f32 %v2823_v52, %v20570_v8  ;;  %v2968_v46 = vsel %vm14434_vm11, %v14253_v12, %v14404_v57  ;;  %v1926_v54 = vmul.f32 %v14401_v39, %v14314_v51  ;;  %v9721_v36 = vld [vmem:[%s20209_s3 + $0x170] sm:$0xf]  ;;  %v11212_v52 = vld [vmem:[%s20209_s3 + $0x64] sm:$0xf0] }
 0x19c   :  { %20566 = vst [vmem:[#allocation8_spill] sm:$0xff] %v14454_v53  ;;  %4354 = vmatpush.bf16.msrb.mxu3 %v9658_v24  ;;  %v9594_v48 = vor.u32 %v11214_v15, %v9593_v0  ;;  %v2076_v12 = vmul.f32 %v14412_v23, %v14321_v22  ;;  %v9786_v33 = vor.u32 %v11262_v56, %v9785_v38  ;;  %v14509_v47 = vor.u32 1.1754944e-38, %v2086_v30  ;;  %v20580_v30 = vld [vmem:[#allocation50_spill] sm:$0xff] }
 0x19d   :  { %20567 = vst [vmem:[#allocation7_spill] sm:$0xff] %v14458_v25  ;;  %v11746_v8 = vpop.eup %11745  ;;  %v14496_v0 = vadd.f32 %v14160_v5, %v1139_v9  ;;  %v14502_v24 = vmul.f32 %v14428_v50, %v14327_v42  ;;  %v9722_v25 = vor.u32 %v11246_v26, %v9721_v36  ;;  %v9489_v38 = vmul.f32 -1.442695, %v14037_v21  ;;  %v11260_v36 = vld [vmem:[%s20209_s3 + $0x1e4] sm:$0xf0]  ;;  %v14605_v21 = vld [vmem:[%s20208_s2] sm:$0xff] }
 0x19e   :  { %20568 = vst [vmem:[#allocation30_spill] sm:$0xff] %v14461_v28  ;;  %v14498_v15 = vpop.eup %11747  ;;  %4321 = vmatpush.bf16.msrb.mxu1 %v9594_v48  ;;  %4420 = vmatpush.bf16.msrb.mxu2 %v9786_v33  ;;  %v9650_v5 = vor.u32 %v11228_v32, %v9649_v62  ;;  %v9586_v9 = vor.u32 %v11212_v52, %v9585_v63  ;;  %v1927_v57 = vsub.f32 1.0, %v1926_v54  ;;  %v14514_v53 = vadd.f32 1.0, %v11746_v8  ;;  %v1250_v32 = vpop.f32.mrf.mxu1  ;;  %v20573_v62 = vld [vmem:[#allocation49_spill] sm:$0xff]  ;;  %v9777_v48 = vld [vmem:[%s20209_s3 + $0x1e0] sm:$0xf] }
 0x19f   :  { %20569 = vst [vmem:[#allocation45_spill] sm:$0xff] %v14463_v1  ;;  %v14504_v1 = vadd.f32 1.0, %v11744_v45  ;;  %v3113_v56 = vmul.f32 %v14357_v17, %v3112_v60  ;;  %4387 = vmatpush.bf16.msrb.mxu0 %v9722_v25  ;;  %v2077_v45 = vsub.f32 1.0, %v2076_v12  ;;  %v14519_v26 = vmul.f32 %v14498_v15, %v14366_v29  ;;  %v14530_v63 = vld [vmem:[%s20209_s3 + $0xd0] sm:$0xf] }
 0x1a0   :  { %20571 = vst [vmem:[#allocation9_spill] sm:$0xff] %v14475_v16  ;;  %v14507_v16 = vadd.f32 %v14180_v6, %v1200_v35  ;;  %4355 = vmatpush.bf16.msrb.mxu3 %v9650_v5  ;;  %v9470_v60 = vmul.f32 -1.442695, %v14040_v7  ;;  %v1131_v25 = vadd.f32 %v20573_v62, %v13542_v61  ;;  %v14535_v54 = vsel %vm14438_vm12, %v14393_v3, %v2968_v46  ;;  %v11226_v52 = vld [vmem:[%s20209_s3 + $0xd4] sm:$0xf0] }
 0x1a1   :  { %11749 = vrcp.f32 %v14504_v1  ;;  %vm3115_vm13 = vweird.f32 %v14260_v2  ;;  %vm1930_vm14 = vweird.f32 %v14314_v51  ;;  %vm3116_vm15 = vweird.f32 %v14357_v17  ;;  %v9713_v8 = vld [vmem:[%s20209_s3 + $0x160] sm:$0xf]  ;;  %v11244_v12 = vld [vmem:[%s20209_s3 + $0x164] sm:$0xf0]  ;;  %v9577_v33 = vld [vmem:[%s20209_s3 + $0x50] sm:$0xf] }
 0x1a2   :  { %20572 = vst [vmem:[#allocation42_spill] sm:$0xff] %v14507_v16  ;;  %4322 = vmatpush.bf16.msrb.mxu1 %v9586_v9  ;;  %11751 = vpow2.f32 %v9489_v38  ;;  %v20574_v3 = vand.u32 2147483647, %v14260_v2  ;;  %vm1931_vm2 = vweird.f32 %v14401_v39  ;;  %vm2080_vm3 = vweird.f32 %v14321_v22  ;;  %v20581_v28 = vld [vmem:[#allocation34_spill] sm:$0xff]  ;;  %vm14627_vm7 = vmor %vm3115_vm13, %vm3116_vm15 }
 0x1a3   :  { %vm2230_vm4 = vweird.f32 %v14327_v42  ;;  %11753 = vrcp.f32 %v14514_v53  ;;  %v3114_v38 = vadd.f32 %v14357_v17, %v3113_v56  ;;  %v1928_v5 = vmul.f32 %v14401_v39, %v1927_v57  ;;  %v11210_v56 = vld [vmem:[%s20209_s3 + $0x54] sm:$0xf0]  ;;  %v9769_v57 = vld [vmem:[%s20209_s3 + $0x1d0] sm:$0xf]  ;;  %vm14653_vm10 = vmor %vm1930_vm14, %vm1931_vm2 }
 0x1a4   :  { %vm14553_vm1 = vcmp.eq.f32.partialorder %v20574_v3, 8.507059e+37  ;;  %v20577_v9 = vand.u32 2147483647, %v14314_v51  ;;  %v2078_v3 = vmul.f32 %v14412_v23, %v2077_v45  ;;  %v1192_v6 = vadd.f32 %v20580_v30, %v13734_v58  ;;  %9442 = vmatmul.msk.bf16.gmra.mxu2 %vm829_vm0, %v20561_v10  ;;  %v9705_v2 = vld [vmem:[%s20209_s3 + $0x150] sm:$0xf] }
 0x1a5   :  { %v1942_v45 = vsub.f32 1.0, %v14519_v26  ;;  %v14594_v35 = vadd.f32 %v20581_v28, %v1131_v25  ;;  %v9778_v30 = vor.u32 %v11260_v36, %v9777_v48  ;;  %v1205_v10 = vadd.f32 %v14272_v20, %v13734_v58  ;;  %1457 = vmatmul.bf16.gmra.mxu0 %v20402_v44 }
 0x1a6   :  { %vm14574_vm5 = vcmp.eq.f32.partialorder %v20577_v9, 8.507059e+37  ;;  %v11258_v9 = vld [vmem:[%s20209_s3 + $0x1d4] sm:$0xf0]  ;;  %v14600_v7 = vadd.f32 %v20582_v43, %v1192_v6  ;;  %v14608_v16 = vperm.slane %v14605_v21, 6  ;;  %v9714_v26 = vor.u32 %v11244_v12, %v9713_v8  ;;  %v20586_v43 = vld [vmem:[#allocation12_spill] sm:$0xff] }
 0x1a7   :  { %v9642_v28 = vor.u32 %v11226_v52, %v14530_v63  ;;  %v14611_v25 = vpop.eup %11749  ;;  %v20583_v20 = vand.u32 2147483647, %v14321_v22  ;;  %11755 = vpow2.f32 %v9470_v60  ;;  %4421 = vmatpush.bf16.msrb.mxu2 %v9778_v30  ;;  %1396 = vmatmul.bf16.gmra.mxu1 %v20586_v43  ;;  %v14621_v6 = vadd.f32 %v14349_v18, %v1205_v10  ;;  %v20590_v12 = vld [vmem:[#allocation11_spill] sm:$0xff]  ;;  %v14674_v63 = vpop.f32.mrf.mxu1 }
 0x1a8   :  { %v9578_v48 = vor.u32 %v11210_v56, %v9577_v33  ;;  %v9770_v36 = vor.u32 %v11258_v9, %v9769_v57  ;;  %v11752_v8 = vpop.eup %11751  ;;  %v1929_v52 = vadd.f32 %v14401_v39, %v1928_v5  ;;  %vm2081_vm8 = vweird.f32 %v14412_v23  ;;  %9438 = vmatmul.msk.bf16.gmra.mxu3 %vm829_vm0, %v20590_v12  ;;  %4388 = vmatpush.bf16.msrb.mxu0 %v9714_v26  ;;  %v11242_v33 = vld [vmem:[%s20209_s3 + $0x154] sm:$0xf0]  ;;  %v9633_v22 = vld [vmem:[%s20209_s3 + $0xc0] sm:$0xf] }
 0x1a9   :  { %vm14615_vm6 = vcmp.eq.f32.partialorder %v20583_v20, 8.507059e+37  ;;  %20587 = vst [vmem:[#allocation49_spill] sm:$0xff] %v14621_v6  ;;  %vm1945_vm9 = vweird.f32 %v14366_v29  ;;  %v1951_v18 = vand.u32 2147483648, %v14366_v29  ;;  %v1251_v60 = vadd.f32 %v1250_v32, %v14608_v16  ;;  %v14644_v5 = vpop.eup %11753  ;;  %4356 = vmatpush.bf16.msrb.mxu3 %v9642_v28  ;;  %vm14692_vm13 = vmor %vm2080_vm3, %vm2081_vm8  ;;  %v20610_v32 = vld [vmem:[#allocation53_spill] sm:$0xff] }
 0x1aa   :  { %v3118_v56 = vsel %vm14627_vm7, %v14357_v17, %v3114_v38  ;;  %v2079_v57 = vadd.f32 %v14412_v23, %v2078_v3  ;;  %v20593_v9 = vsub.f32 1.0, %v14502_v24  ;;  %v20594_v10 = vand.u32 2147483647, %v14327_v42  ;;  %4323 = vmatpush.bf16.msrb.mxu1 %v9578_v48 }
 0x1ab   :  { %v9499_v17 = vmul.f32 -1.442695, %v14594_v35  ;;  %v20597_v51 = vand.u32 2147483648, %v14327_v42  ;;  %v1943_v20 = vmul.f32 %v14498_v15, %v1942_v45  ;;  %v2091_v24 = vmul.f32 %v14611_v25, %v14504_v1  ;;  %4422 = vmatpush.bf16.msrb.mxu2 %v9770_v36 }
 0x1ac   :  { %v2228_v30 = vmul.f32 %v14428_v50, %v20593_v9  ;;  %vm14663_vm11 = vcmp.eq.f32.partialorder %v20594_v10, 8.507059e+37  ;;  %v9480_v3 = vmul.f32 -1.442695, %v14600_v7  ;;  %vm2231_vm12 = vweird.f32 %v14428_v50 }
 0x1ad   :  { %v2237_v38 = vor.u32 1.1754944e-38, %v20597_v51  ;;  %v14677_v9 = vadd.f32 1.0, %v11752_v8  ;;  %v14680_v10 = vadd.f32 %v14548_v59, %v1251_v60  ;;  %v9706_v28 = vor.u32 %v11242_v33, %v9705_v2  ;;  %v11756_v60 = vpop.eup %11755  ;;  %vm14721_vm15 = vmor %vm2230_vm4, %vm2231_vm12 }
 0x1ae   :  { %v3123_v45 = vsel %vm14553_vm1, %v14416_v14, %v3118_v56  ;;  %v1933_v48 = vsel %vm14653_vm10, %v14401_v39, %v1929_v52  ;;  %v20600_v59 = vand.u32 2147483647, %v14366_v29  ;;  %v2376_v14 = vmul.f32 %v14644_v5, %v14514_v53  ;;  %v14705_v39 = vpop.f32.mrf.mxu3  ;;  %v11224_v52 = vld [vmem:[%s20209_s3 + $0xc4] sm:$0xf0]  ;;  %v20607_v29 = vld [vmem:[#allocation38_spill] sm:$0xff] }
 0x1af   :  { %v9509_v46 = vmul.f32 -1.442695, %v14185_v41  ;;  %v2083_v2 = vsel %vm14692_vm13, %v14412_v23, %v2079_v57  ;;  %v2229_v33 = vadd.f32 %v14428_v50, %v2228_v30  ;;  %v1952_v56 = vor.u32 1.1754944e-38, %v1951_v18  ;;  %4389 = vmatpush.bf16.msrb.mxu0 %v9706_v28 }
 0x1b0   :  { %vm14698_vm14 = vcmp.eq.f32.partialorder %v20600_v59, 8.507059e+37  ;;  %11757 = vpow2.f32 %v9499_v17  ;;  %v1944_v51 = vadd.f32 %v14498_v15, %v1943_v20  ;;  %vm1946_vm1 = vweird.f32 %v14498_v15 }
 0x1b1   :  { %v2092_v59 = vsub.f32 1.0, %v2091_v24  ;;  %11759 = vpow2.f32 %v9480_v3  ;;  %v1938_v23 = vsel %vm14574_vm5, %v14418_v11, %v1933_v48  ;;  %v9490_v18 = vmul.f32 -1.442695, %v14211_v49  ;;  %vm14745_vm2 = vmor %vm1945_vm9, %vm1946_vm1 }
 0x1b2   :  { %11761 = vrcp.f32 %v14677_v9  ;;  %v9634_v57 = vor.u32 %v11224_v52, %v9633_v22  ;;  %v2088_v42 = vsel %vm14615_vm6, %v14509_v47, %v2083_v2  ;;  %v2377_v30 = vsub.f32 1.0, %v2376_v14  ;;  %v20621_v22 = vld [vmem:[#allocation55_spill] sm:$0xff] }
 0x1b3   :  { %v14735_v17 = vadd.f32 1.0, %v11756_v60  ;;  %11763 = vpow2.f32 %v9509_v46  ;;  %v14738_v20 = vmul.f32 %v3123_v45, %v13632_v27  ;;  %v2233_v11 = vsel %vm14721_vm15, %v14428_v50, %v2229_v33  ;;  %v11208_v46 = vld [vmem:[%s20209_s3 + $0x44] sm:$0xf0] }
 0x1b4   :  { %v2099_v44 = vand.u32 2147483647, %v14504_v1  ;;  %v2101_v47 = vand.u32 2147483648, %v14504_v1  ;;  %4357 = vmatpush.bf16.msrb.mxu3 %v9634_v57  ;;  %v14752_v24 = vmul.f32 %v1938_v23, %v13635_v40  ;;  %v1948_v27 = vsel %vm14745_vm2, %v14498_v15, %v1944_v51  ;;  %9443 = vmatmul.msk.bf16.gmra.mxu2 %vm829_vm0, %v20590_v12 }
 0x1b5   :  { %v2093_v50 = vmul.f32 %v14611_v25, %v2092_v59  ;;  %v1136_v3 = vadd.f32 %v20607_v29, %v13542_v61  ;;  %v14761_v45 = vmul.f32 %v2088_v42, %v14156_v37  ;;  %vm2380_vm3 = vweird.f32 %v14514_v53  ;;  %v1255_v61 = vpop.f32.mrf.mxu1  ;;  %v9569_v37 = vld [vmem:[%s20209_s3 + $0x40] sm:$0xf]  ;;  %1462 = vmatmul.bf16.gmra.mxu0 %v20586_v43  ;;  %v20611_v42 = vld [vmem:[#allocation14_spill] sm:$0xff] }
 0x1b6   :  { %v11758_v28 = vpop.eup %11757  ;;  %11765 = vpow2.f32 %v9490_v18  ;;  %v14767_v8 = vsel %vm14663_vm11, %v2237_v38, %v2233_v11  ;;  %v2378_v15 = vmul.f32 %v14644_v5, %v2377_v30  ;;  %v14784_v38 = vsel %vm14698_vm14, %v1952_v56, %v1948_v27  ;;  %v9561_v56 = vld [vmem:[%s20209_s3 + $0x30] sm:$0xf]  ;;  %v1288_v51 = vpop.f32.mrf.mxu3  ;;  %v11206_v30 = vld [vmem:[%s20209_s3 + $0x34] sm:$0xf0]  ;;  %v11256_v27 = vld [vmem:[%s20209_s3 + $0x1c4] sm:$0xf0] }
 0x1b7   :  { %v11760_v40 = vpop.eup %11759  ;;  %11767 = vrcp.f32 %v14735_v17  ;;  %vm2096_vm4 = vweird.f32 %v14611_v25  ;;  %vm14787_vm5 = vcmp.eq.f32.partialorder %v2099_v44, 8.507059e+37  ;;  %v2102_v52 = vor.u32 1.1754944e-38, %v2101_v47  ;;  %v1316_v18 = vpop.f32.mrf.mxu0  ;;  %1401 = vmatmul.bf16.gmra.mxu1 %v20611_v42  ;;  %v9625_v11 = vld [vmem:[%s20209_s3 + $0xb0] sm:$0xf]  ;;  %v9761_v47 = vld [vmem:[%s20209_s3 + $0x1c0] sm:$0xf] }
 0x1b8   :  { %v14780_v26 = vpop.eup %11761  ;;  %v2094_v2 = vadd.f32 %v14611_v25, %v2093_v50  ;;  %v14794_v33 = vadd.f32 1.0, %v11758_v28  ;;  %v14797_v36 = vadd.f32 %v20610_v32, %v1136_v3  ;;  %v14802_v59 = vadd.f32 1.0, %v11760_v40  ;;  %v20612_v44 = vld [vmem:[#allocation13_spill] sm:$0xff]  ;;  %v11222_v50 = vld [vmem:[%s20209_s3 + $0xb4] sm:$0xf0] }
 0x1b9   :  { %v11764_v60 = vpop.eup %11763  ;;  %v1256_v23 = vadd.f32 %v1255_v61, %v14608_v16  ;;  %v14806_v43 = vperm.slane %v14605_v21, 7  ;;  %v9570_v57 = vor.u32 %v11208_v46, %v9569_v37  ;;  %v2379_v62 = vadd.f32 %v14644_v5, %v2378_v15  ;;  %9439 = vmatmul.msk.bf16.gmra.mxu3 %vm829_vm0, %v20612_v44  ;;  %v20615_v15 = vld [vmem:[#allocation16_spill] sm:$0xff]  ;;  %v1349_v37 = vpop.f32.mrf.mxu2 }
 0x1ba   :  { %vm2381_vm6 = vweird.f32 %v14644_v5  ;;  %vm2095_vm7 = vweird.f32 %v14504_v1  ;;  %v2526_v21 = vmul.f32 %v14780_v26, %v14677_v9  ;;  %v2536_v3 = vand.u32 2147483648, %v14677_v9  ;;  %v9697_v1 = vld [vmem:[%s20209_s3 + $0x140] sm:$0xf] }
 0x1bb   :  { %vm14833_vm8 = vmor %vm2095_vm7, %vm2096_vm4  ;;  %v2251_v28 = vand.u32 2147483648, %v14735_v17  ;;  %v14839_v40 = vadd.f32 1.0, %v11764_v60  ;;  %v1197_v61 = vadd.f32 %v20615_v15, %v13734_v58  ;;  %4324 = vmatpush.bf16.msrb.mxu1 %v9570_v57  ;;  %11769 = vrcp.f32 %v14794_v33 }
 0x1bc   :  { %v11766_v29 = vpop.eup %11765  ;;  %v2098_v32 = vsel %vm14833_vm8, %v14611_v25, %v2094_v2  ;;  %v9519_v12 = vmul.f32 -1.442695, %v14797_v36  ;;  %v1317_v14 = vadd.f32 %v1316_v18, %v14806_v43  ;;  %vm14855_vm9 = vmor %vm2380_vm3, %vm2381_vm6  ;;  %v9762_v57 = vor.u32 %v11256_v27, %v9761_v47 }
 0x1bd   :  { %v14843_v46 = vpop.eup %11767  ;;  %v9562_v15 = vor.u32 %v11206_v30, %v9561_v56  ;;  %v9626_v48 = vor.u32 %v11222_v50, %v9625_v11  ;;  %v14859_v49 = vadd.f32 %v1288_v51, %v1256_v23  ;;  %v2383_v25 = vsel %vm14855_vm9, %v14644_v5, %v2379_v62  ;;  %v11240_v56 = vld [vmem:[%s20209_s3 + $0x144] sm:$0xf0]  ;;  %v14890_v47 = vpop.f32.mrf.mxu1 }
 0x1be   :  { %v2527_v2 = vsub.f32 1.0, %v2526_v21  ;;  %11771 = vrcp.f32 %v14802_v59  ;;  %v14865_v18 = vadd.f32 1.0, %v11766_v29  ;;  %v2103_v51 = vsel %vm14787_vm5, %v2102_v52, %v2098_v32  ;;  %4423 = vmatpush.bf16.msrb.mxu2 %v9762_v57 }
 0x1bf   :  { %20618 = vst [vmem:[#allocation50_spill] sm:$0xff] %v14859_v49  ;;  %v14877_v23 = vmul.f32 %v14843_v46, %v14735_v17  ;;  %v2686_v5 = vand.u32 2147483648, %v14794_v33  ;;  %11773 = vrcp.f32 %v14839_v40  ;;  %4325 = vmatpush.bf16.msrb.mxu1 %v9562_v15  ;;  %v20619_v30 = vand.u32 2147483647, %v14514_v53  ;;  %4358 = vmatpush.bf16.msrb.mxu3 %v9626_v48  ;;  %v14906_v48 = vpop.f32.mrf.mxu3 }
 0x1c0   :  { %v20620_v11 = vand.u32 2147483648, %v14514_v53  ;;  %v14885_v21 = vor.u32 1.1754944e-38, %v2536_v3  ;;  %v14888_v52 = vadd.f32 %v20621_v22, %v1197_v61  ;;  %11775 = vpow2.f32 %v9519_v12  ;;  %v11202_v22 = vld [vmem:[%s20209_s3 + $0x14] sm:$0xf0] }
 0x1c1   :  { %vm2385_vm10 = vcmp.eq.f32.partialorder %v20619_v30, 8.507059e+37  ;;  %v14893_v50 = vadd.f32 %v1349_v37, %v1317_v14  ;;  %v9698_v29 = vor.u32 %v11240_v56, %v9697_v1  ;;  %v14895_v32 = vpop.eup %11769  ;;  %v3230_v53 = vmul.f32 %v2103_v51, %v14299_v34  ;;  %v14914_v34 = vpop.f32.mrf.mxu0  ;;  %v11204_v56 = vld [vmem:[%s20209_s3 + $0x24] sm:$0xf0] }
 0x1c2   :  { %v2387_v62 = vor.u32 1.1754944e-38, %v20620_v11  ;;  %v2528_v3 = vmul.f32 %v14780_v26, %v2527_v2  ;;  %v20623_v57 = vand.u32 2147483647, %v14677_v9  ;;  %11777 = vrcp.f32 %v14865_v18  ;;  %v9617_v11 = vld [vmem:[%s20209_s3 + $0xa0] sm:$0xf] }
 0x1c3   :  { %20622 = vst [vmem:[#allocation34_spill] sm:$0xff] %v14893_v50  ;;  %v2242_v14 = vsub.f32 1.0, %v14877_v23  ;;  %v14909_v12 = vor.u32 1.1754944e-38, %v2251_v28  ;;  %v14912_v15 = vor.u32 1.1754944e-38, %v2686_v5  ;;  %4390 = vmatpush.bf16.msrb.mxu0 %v9698_v29  ;;  %v3220_v2 = vmul.f32 %v14784_v38, %v13772_v4  ;;  %v9553_v28 = vld [vmem:[%s20209_s3 + $0x20] sm:$0xf] }
 0x1c4   :  { %v2388_v60 = vsel %vm2385_vm10, %v2387_v62, %v2383_v25  ;;  %vm14901_vm11 = vcmp.eq.f32.partialorder %v20623_v57, 8.507059e+37  ;;  %v14916_v25 = vpop.eup %11771  ;;  %vm2530_vm12 = vweird.f32 %v14677_v9  ;;  %vm2531_vm13 = vweird.f32 %v14780_v26  ;;  %v20626_v23 = vld [vmem:[#allocation26_spill] sm:$0xff]  ;;  %v14956_v62 = vpop.f32.mrf.mxu2  ;;  %9444 = vmatmul.msk.bf16.gmra.mxu2 %vm829_vm0, %v20612_v44 }
 0x1c5   :  { %v9500_v1 = vmul.f32 -1.442695, %v14888_v52  ;;  %v14929_v51 = vpop.eup %11773  ;;  %v14933_v5 = vmul.f32 %v14535_v54, %v20626_v23  ;;  %v14937_v4 = vpack.c.bf16 %v14738_v20, %v14738_v20  ;;  %v14941_v38 = vpack.c.bf16 %v14761_v45, %v14752_v24  ;;  %v11220_v54 = vld [vmem:[%s20209_s3 + $0xa4] sm:$0xf0]  ;;  %v9545_v20 = vld [vmem:[%s20209_s3 + $0x10] sm:$0xf]  ;;  %vm14981_vm14 = vmor %vm2530_vm12, %vm2531_vm13  ;;  %1467 = vmatmul.bf16.gmra.mxu0 %v20611_v42 }
 0x1c6   :  { %v14945_v30 = vmul.f32 %v14767_v8, %v13769_v31  ;;  %v14959_v24 = vmul.f32 %v2388_v60, %v14324_v19  ;;  %v14961_v45 = vpack.c.bf16 %v3230_v53, %v3220_v2  ;;  %v2529_v31 = vadd.f32 %v14780_v26, %v2528_v3  ;;  %v9753_v29 = vld [vmem:[%s20209_s3 + $0x1b0] sm:$0xf]  ;;  %v11254_v19 = vld [vmem:[%s20209_s3 + $0x1b4] sm:$0xf0]  ;;  %v11776_v60 = vpop.eup %11775 }
 0x1c7   :  { %20627 = vst [vmem:[#allocation52_spill] sm:$0xff] %v14933_v5  ;;  %v1202_v8 = vadd.f32 %v14213_v55, %v13734_v58  ;;  %v2676_v55 = vmul.f32 %v14895_v32, %v14794_v33  ;;  %v2391_v53 = vmul.f32 %v14916_v25, %v14802_v59  ;;  %v9554_v57 = vor.u32 %v11204_v56, %v9553_v28  ;;  %v9609_v44 = vld [vmem:[%s20209_s3 + $0x90] sm:$0xf]  ;;  %v11218_v9 = vld [vmem:[%s20209_s3 + $0x94] sm:$0xf0] }
 0x1c8   :  { %20628 = vst [vmem:[#allocation12_spill] sm:$0xff] %v14937_v4  ;;  %v14997_v2 = vpop.eup %11777  ;;  %v2826_v23 = vmul.f32 %v14929_v51, %v14839_v40  ;;  %v9529_v37 = vmul.f32 -1.442695, %v14496_v0  ;;  %v9618_v28 = vor.u32 %v11220_v54, %v9617_v11  ;;  %11779 = vpow2.f32 %v9500_v1 }
 0x1c9   :  { %20629 = vst [vmem:[#allocation11_spill] sm:$0xff] %v14941_v38  ;;  %v15003_v3 = vadd.f32 %v14262_v13, %v1202_v8  ;;  %4326 = vmatpush.bf16.msrb.mxu1 %v9554_v57  ;;  %v9546_v27 = vor.u32 %v11202_v22, %v9545_v20  ;;  %v2533_v42 = vsel %vm14981_vm14, %v14780_v26, %v2529_v31  ;;  %vm2245_vm0 = vweird.f32 %v14735_v17  ;;  %v1260_v8 = vpop.f32.mrf.mxu1  ;;  %v20635_v20 = vld [vmem:[#allocation42_spill] sm:$0xff] }
 0x1ca   :  { %20630 = vst [vmem:[#allocation38_spill] sm:$0xff] %v14945_v30  ;;  %v2243_v30 = vmul.f32 %v14843_v46, %v2242_v14  ;;  %4359 = vmatpush.bf16.msrb.mxu3 %v9618_v28  ;;  %v9610_v13 = vor.u32 %v11218_v9, %v9609_v44  ;;  %v2677_v11 = vsub.f32 1.0, %v2676_v55  ;;  %vm2680_vm15 = vweird.f32 %v14794_v33  ;;  %v11216_v55 = vld [vmem:[%s20209_s3 + $0x84] sm:$0xf0] }
 0x1cb   :  { %20631 = vst [vmem:[#allocation53_spill] sm:$0xff] %v14959_v24  ;;  %v9754_v24 = vor.u32 %v11254_v19, %v9753_v29  ;;  %v2392_v1 = vsub.f32 1.0, %v2391_v53  ;;  %v15016_v54 = vmul.f32 %v14997_v2, %v14865_v18  ;;  %v9510_v22 = vmul.f32 -1.442695, %v20635_v20  ;;  %v1293_v29 = vpop.f32.mrf.mxu3  ;;  %v9689_v53 = vld [vmem:[%s20209_s3 + $0x130] sm:$0xf] }
 0x1cc   :  { %20632 = vst [vmem:[#allocation14_spill] sm:$0xff] %v14961_v45  ;;  %v15011_v45 = vadd.f32 1.0, %v11776_v60  ;;  %vm2395_vm1 = vweird.f32 %v14802_v59  ;;  %v2827_v26 = vsub.f32 1.0, %v2826_v23  ;;  %11781 = vpow2.f32 %v9529_v37  ;;  %v9537_v60 = vld [vmem:[%s20209_s3] sm:$0xf]  ;;  %v1354_v28 = vpop.f32.mrf.mxu2 }
 0x1cd   :  { %4424 = vmatpush.bf16.msrb.mxu2 %v9754_v24  ;;  %v9520_v31 = vmul.f32 -1.442695, %v15003_v3  ;;  %v2538_v19 = vsel %vm14901_vm11, %v14885_v21, %v2533_v42  ;;  %vm2246_vm2 = vweird.f32 %v14843_v46  ;;  %vm2681_vm3 = vweird.f32 %v14895_v32  ;;  %4327 = vmatpush.bf16.msrb.mxu1 %v9546_v27  ;;  %v1321_v24 = vpop.f32.mrf.mxu0  ;;  %v11200_v37 = vld [vmem:[%s20209_s3 + $0x4] sm:$0xf0]  ;;  %v9601_v21 = vld [vmem:[%s20209_s3 + $0x80] sm:$0xf] }
 0x1ce   :  { %vm2830_vm4 = vweird.f32 %v14839_v40  ;;  %v15038_v61 = vadd.f32 %v14843_v46, %v2243_v30  ;;  %11783 = vrcp.f32 %v15011_v45  ;;  %4360 = vmatpush.bf16.msrb.mxu3 %v9610_v13  ;;  %v1261_v27 = vadd.f32 %v1260_v8, %v14608_v16  ;;  %v11238_v30 = vld [vmem:[%s20209_s3 + $0x134] sm:$0xf0]  ;;  %v11780_v57 = vpop.eup %11779  ;;  %v9745_v8 = vld [vmem:[%s20209_s3 + $0x1a0] sm:$0xf]  ;;  %vm15095_vm9 = vmor %vm2245_vm0, %vm2246_vm2 }
 0x1cf   :  { %v1322_v58 = vadd.f32 %v1321_v24, %v14806_v43  ;;  %v2678_v44 = vmul.f32 %v14895_v32, %v2677_v11  ;;  %v2393_v9 = vmul.f32 %v14916_v25, %v2392_v1  ;;  %v2542_v23 = vsub.f32 1.0, %v15016_v54  ;;  %v11252_v11 = vld [vmem:[%s20209_s3 + $0x1a4] sm:$0xf0]  ;;  %vm15111_vm11 = vmor %vm2680_vm15, %vm2681_vm3 }
 0x1d0   :  { %11785 = vpow2.f32 %v9510_v22  ;;  %vm2396_vm5 = vweird.f32 %v14916_v25  ;;  %v2828_v42 = vmul.f32 %v14929_v51, %v2827_v26  ;;  %v9530_v13 = vmul.f32 -1.442695, %v14621_v6 }
 0x1d1   :  { %11787 = vpow2.f32 %v9520_v31  ;;  %v20636_v1 = vand.u32 2147483647, %v14735_v17  ;;  %v1253_v22 = vadd.f32 %v14674_v63, %v14608_v16  ;;  %v9538_v26 = vor.u32 %v11200_v37, %v9537_v60  ;;  %vm15124_vm12 = vmor %vm2395_vm1, %vm2396_vm5  ;;  %v11250_v17 = vld [vmem:[%s20209_s3 + $0x194] sm:$0xf0] }
 0x1d2   :  { %v9602_v31 = vor.u32 %v11216_v55, %v9601_v21  ;;  %v9690_v24 = vor.u32 %v11238_v30, %v9689_v53  ;;  %v11782_v14 = vpop.eup %11781  ;;  %v20639_v56 = vand.u32 2147483647, %v14794_v33  ;;  %v20642_v4 = vand.u32 2147483647, %v14802_v59  ;;  %v9673_v33 = vld [vmem:[%s20209_s3 + $0x110] sm:$0xf] }
 0x1d3   :  { %vm15066_vm6 = vcmp.eq.f32.partialorder %v20636_v1, 8.507059e+37  ;;  %v2836_v5 = vand.u32 2147483648, %v14839_v40  ;;  %v15085_v6 = vadd.f32 1.0, %v11780_v57  ;;  %v15087_v63 = vadd.f32 %v1293_v29, %v1261_v27  ;;  %4328 = vmatpush.bf16.msrb.mxu1 %v9538_v26  ;;  %v20647_v27 = vld [vmem:[#allocation41_spill] sm:$0xff]  ;;  %v15118_v57 = vpop.f32.mrf.mxu1 }
 0x1d4   :  { %vm15074_vm7 = vcmp.eq.f32.partialorder %v20639_v56, 8.507059e+37  ;;  %vm15080_vm8 = vcmp.eq.f32.partialorder %v20642_v4, 8.507059e+37  ;;  %v15089_v60 = vadd.f32 %v1354_v28, %v1322_v58  ;;  %v2679_v4 = vadd.f32 %v14895_v32, %v2678_v44  ;;  %4361 = vmatpush.bf16.msrb.mxu3 %v9602_v31  ;;  %v15102_v21 = vpop.eup %11783  ;;  %4391 = vmatpush.bf16.msrb.mxu0 %v9690_v24 }
 0x1d5   :  { %v2394_v37 = vadd.f32 %v14916_v25, %v2393_v9  ;;  %vm2831_vm10 = vweird.f32 %v14929_v51  ;;  %v9746_v29 = vor.u32 %v11252_v11, %v9745_v8  ;;  %v15105_v58 = vmul.f32 %v2538_v19, %v20647_v27  ;;  %v20659_v11 = vld [vmem:[#allocation17_spill] sm:$0xff] }
 0x1d6   :  { %v20651_v55 = vand.u32 2147483648, %v14802_v59  ;;  %11789 = vpow2.f32 %v9530_v13  ;;  %v9451_v30 = vmul.f32 -1.442695, %v14680_v10  ;;  %v11786_v44 = vpop.eup %11785  ;;  %v2829_v19 = vadd.f32 %v14929_v51, %v2828_v42  ;;  %vm15143_vm13 = vmor %vm2830_vm4, %vm2831_vm10  ;;  %4329 = vmatmul.bf16.vlgmr.msrb.gmra.mxu1 %v20659_v11  ;;  %v9737_v27 = vld [vmem:[%s20209_s3 + $0x190] sm:$0xf] }
 0x1d7   :  { %20648 = vst [vmem:[#allocation13_spill] sm:$0xff] %v15105_v58  ;;  %v2543_v9 = vmul.f32 %v14997_v2, %v2542_v23  ;;  %v15130_v28 = vadd.f32 1.0, %v11782_v14  ;;  %v15133_v13 = vadd.f32 %v14705_v39, %v1253_v22  ;;  %4425 = vmatpush.bf16.msrb.mxu2 %v9746_v29  ;;  %v11788_v8 = vpop.eup %11787  ;;  %v2248_v59 = vsel %vm15095_vm9, %v14843_v46, %v15038_v61  ;;  %v20660_v46 = vld [vmem:[#allocation20_spill] sm:$0xff]  ;;  %v15157_v61 = vpop.f32.mrf.mxu3 }
 0x1d8   :  { %v2402_v53 = vor.u32 1.1754944e-38, %v20651_v55  ;;  %v20656_v14 = vand.u32 2147483647, %v14839_v40  ;;  %v2549_v23 = vand.u32 2147483647, %v14865_v18  ;;  %11791 = vrcp.f32 %v15085_v6  ;;  %4362 = vmatmul.bf16.vlgmr.msrb.gmra.mxu3 %v20660_v46  ;;  %v15228_v39 = vpop.f32.mrf.mxu2 }
 0x1d9   :  { %v2683_v22 = vsel %vm15111_vm11, %v14895_v32, %v2679_v4  ;;  %v2398_v40 = vsel %vm15124_vm12, %v14916_v25, %v2394_v37  ;;  %v2837_v26 = vor.u32 1.1754944e-38, %v2836_v5  ;;  %v2551_v31 = vand.u32 2147483648, %v14865_v18  ;;  %v9681_v29 = vld [vmem:[%s20209_s3 + $0x120] sm:$0xf]  ;;  %v11236_v32 = vld [vmem:[%s20209_s3 + $0x124] sm:$0xf0]  ;;  %v15183_v37 = vpop.f32.mrf.mxu0 }
 0x1da   :  { %vm15149_vm14 = vcmp.eq.f32.partialorder %v20656_v14, 8.507059e+37  ;;  %vm2546_vm0 = vweird.f32 %v14997_v2  ;;  %v2976_v24 = vmul.f32 %v15102_v21, %v15011_v45  ;;  %v15169_v56 = vadd.f32 1.0, %v11786_v44 }
 0x1db   :  { %11793 = vpow2.f32 %v9451_v30  ;;  %v2833_v25 = vsel %vm15143_vm13, %v14929_v51, %v2829_v19  ;;  %v2544_v5 = vadd.f32 %v14997_v2, %v2543_v9  ;;  %v9461_v4 = vmul.f32 -1.442695, %v15133_v13  ;;  %v11234_v19 = vld [vmem:[%s20209_s3 + $0x114] sm:$0xf0] }
 0x1dc   :  { %11795 = vrcp.f32 %v15130_v28  ;;  %v11790_v55 = vpop.eup %11789  ;;  %v2253_v51 = vsel %vm15066_vm6, %v14909_v12, %v2248_v59  ;;  %vm2545_vm15 = vweird.f32 %v14865_v18  ;;  %vm15195_vm1 = vcmp.eq.f32.partialorder %v2549_v23, 8.507059e+37  ;;  %v9665_v23 = vld [vmem:[%s20209_s3 + $0x100] sm:$0xf] }
 0x1dd   :  { %v15199_v44 = vadd.f32 1.0, %v11788_v8  ;;  %v2688_v12 = vsel %vm15074_vm7, %v14912_v15, %v2683_v22  ;;  %v2403_v18 = vsel %vm15080_vm8, %v2402_v53, %v2398_v40  ;;  %v2552_v54 = vor.u32 1.1754944e-38, %v2551_v31  ;;  %vm15218_vm2 = vmor %vm2545_vm15, %vm2546_vm0  ;;  %v20665_v40 = vld [vmem:[#allocation27_spill] sm:$0xff] }
 0x1de   :  { %v9682_v9 = vor.u32 %v11236_v32, %v9681_v29  ;;  %v15212_v59 = vpop.eup %11791  ;;  %v2838_v8 = vsel %vm15149_vm14, %v2837_v26, %v2833_v25  ;;  %v2977_v14 = vsub.f32 1.0, %v2976_v24  ;;  %11797 = vrcp.f32 %v15169_v56  ;;  %v1265_v24 = vpop.f32.mrf.mxu1  ;;  %v11232_v29 = vld [vmem:[%s20209_s3 + $0x104] sm:$0xf0]  ;;  %v9729_v32 = vld [vmem:[%s20209_s3 + $0x180] sm:$0xf] }
 0x1df   :  { %v9738_v15 = vor.u32 %v11250_v17, %v9737_v27  ;;  %v2548_v38 = vsel %vm15218_vm2, %v14997_v2, %v2544_v5  ;;  %v15226_v1 = vadd.f32 1.0, %v11790_v55  ;;  %11799 = vpow2.f32 %v9461_v4 }
 0x1e0   :  { %4392 = vmatpush.bf16.msrb.mxu0 %v9682_v9  ;;  %v9674_v53 = vor.u32 %v11234_v19, %v9673_v33  ;;  %v15234_v26 = vmul.f32 %v2253_v51, %v20665_v40  ;;  %v15237_v31 = vmul.f32 %v2688_v12, %v14594_v35  ;;  %v15240_v2 = vmul.f32 %v2403_v18, %v14600_v7  ;;  %v11248_v35 = vld [vmem:[%s20209_s3 + $0x184] sm:$0xf0]  ;;  %v1298_v33 = vpop.f32.mrf.mxu3 }
 0x1e1   :  { %v11794_v22 = vpop.eup %11793  ;;  %11801 = vrcp.f32 %v15199_v44  ;;  %4426 = vmatpush.bf16.msrb.mxu2 %v9738_v15  ;;  %v15255_v7 = vmul.f32 %v2838_v8, %v14185_v41  ;;  %v2986_v5 = vand.u32 2147483648, %v15011_v45  ;;  %v2691_v4 = vmul.f32 %v15212_v59, %v15085_v6  ;;  %v20671_v8 = vld [vmem:[#allocation40_spill] sm:$0xff]  ;;  %v20674_v15 = vld [vmem:[#allocation15_spill] sm:$0xff]  ;;  %v20676_v40 = vld [vmem:[#allocation25_spill] sm:$0xff] }
 0x1e2   :  { %20666 = vst [vmem:[#allocation16_spill] sm:$0xff] %v15234_v26  ;;  %v15252_v25 = vpop.eup %11795  ;;  %v2701_v27 = vand.u32 2147483648, %v15085_v6  ;;  %v2553_v17 = vsel %vm15195_vm1, %v2552_v54, %v2548_v38  ;;  %v2978_v55 = vmul.f32 %v15102_v21, %v2977_v14  ;;  %vm2980_vm3 = vweird.f32 %v15011_v45  ;;  %v20670_v54 = vld [vmem:[#allocation37_spill] sm:$0xff]  ;;  %v20673_v14 = vld [vmem:[#allocation39_spill] sm:$0xff] }
 0x1e3   :  { %20667 = vst [vmem:[#allocation55_spill] sm:$0xff] %v15237_v31  ;;  %v2984_v51 = vand.u32 2147483647, %v15011_v45  ;;  %11803 = vrcp.f32 %v15226_v1  ;;  %v15267_v41 = vadd.f32 1.0, %v11794_v22  ;;  %v9666_v19 = vor.u32 %v11232_v29, %v9665_v23 }
 0x1e4   :  { %20668 = vst [vmem:[#allocation26_spill] sm:$0xff] %v15240_v2  ;;  %4393 = vmatpush.bf16.msrb.mxu0 %v9674_v53  ;;  %v9730_v12 = vor.u32 %v11248_v35, %v9729_v32  ;;  %v15269_v18 = vpop.eup %11797  ;;  %v2699_v9 = vand.u32 2147483647, %v15085_v6  ;;  %v3126_v30 = vmul.f32 %v15252_v25, %v15130_v28  ;;  %v15276_v42 = vpack.c.bf16 %v20671_v8, %v20670_v54  ;;  %v1326_v35 = vpop.f32.mrf.mxu0  ;;  %v20704_v2 = vld [vmem:[#allocation28_spill] sm:$0xff] }
 0x1e5   :  { %20669 = vst [vmem:[#allocation42_spill] sm:$0xff] %v15255_v7  ;;  %v15280_v38 = vpack.c.bf16 %v20674_v15, %v20673_v14  ;;  %v11800_v22 = vpop.eup %11799  ;;  %v15283_v53 = vmul.f32 %v2553_v17, %v20676_v40  ;;  %v2987_v23 = vor.u32 1.1754944e-38, %v2986_v5  ;;  %v2692_v29 = vsub.f32 1.0, %v2691_v4  ;;  %v1359_v40 = vpop.f32.mrf.mxu2  ;;  %v20684_v7 = vld [vmem:[#allocation10_spill] sm:$0xff] }
 0x1e6   :  { %20672 = vst [vmem:[#allocation41_spill] sm:$0xff] %v15276_v42  ;;  %v15285_v32 = vor.u32 1.1754944e-38, %v2701_v27  ;;  %4427 = vmatpush.bf16.msrb.mxu2 %v9730_v12  ;;  %v2979_v11 = vadd.f32 %v15102_v21, %v2978_v55  ;;  %vm2981_vm4 = vweird.f32 %v15102_v21  ;;  %vm15291_vm5 = vcmp.eq.f32.partialorder %v2984_v51, 8.507059e+37  ;;  %4334 = vmatmul.bf16.gmra.mxu1 %v15276_v42 }
 0x1e7   :  { %20675 = vst [vmem:[#allocation27_spill] sm:$0xff] %v15280_v38  ;;  %v15287_v46 = vpop.eup %11801  ;;  %v1266_v8 = vadd.f32 %v1265_v24, %v14608_v16  ;;  %v1327_v17 = vadd.f32 %v1326_v35, %v14806_v43  ;;  %vm2695_vm6 = vweird.f32 %v15085_v6  ;;  %vm2696_vm7 = vweird.f32 %v15212_v59  ;;  %vm15315_vm9 = vmor %vm2980_vm3, %vm2981_vm4  ;;  %v20683_v35 = vld [vmem:[#allocation36_spill] sm:$0xff]  ;;  %v11294_v6 = vld [vmem:[%s20209_s3 + $0x2f4] sm:$0xf0] }
 0x1e8   :  { %20677 = vst [vmem:[#allocation37_spill] sm:$0xff] %v15283_v53  ;;  %v2841_v5 = vmul.f32 %v15269_v18, %v15169_v56  ;;  %11805 = vrcp.f32 %v15267_v41  ;;  %v9471_v4 = vmul.f32 -1.442695, %v14859_v49  ;;  %4394 = vmatpush.bf16.msrb.mxu0 %v9666_v19  ;;  %v3127_v27 = vsub.f32 1.0, %v3126_v30  ;;  %4367 = vmatmul.bf16.gmra.mxu3 %v15280_v38  ;;  %v20685_v53 = vld [vmem:[#allocation19_spill] sm:$0xff]  ;;  %vm15379_vm14 = vmor %vm2695_vm6, %vm2696_vm7 }
 0x1e9   :  { %vm3130_vm8 = vweird.f32 %v15130_v28  ;;  %v3134_v55 = vand.u32 2147483647, %v15130_v28  ;;  %v15305_v24 = vadd.f32 1.0, %v11800_v22  ;;  %v15309_v51 = vpop.eup %11803  ;;  %v2693_v19 = vmul.f32 %v15212_v59, %v2692_v29  ;;  %v20682_v22 = vld [vmem:[#allocation54_spill] sm:$0xff]  ;;  %v15333_v29 = vpop.f32.mrf.mxu1 }
 0x1ea   :  { %v3136_v30 = vand.u32 2147483648, %v15130_v28  ;;  %v2851_v14 = vand.u32 2147483648, %v15169_v56  ;;  %v2991_v15 = vmul.f32 %v15287_v46, %v15199_v44  ;;  %4428 = vmatmul.bf16.vlgmr.msrb.gmra.mxu2 %v20682_v22  ;;  %v2983_v45 = vsel %vm15315_vm9, %v15102_v21, %v2979_v11  ;;  %v15343_v11 = vpop.f32.mrf.mxu3 }
 0x1eb   :  { %4395 = vmatmul.bf16.vlgmr.msrb.gmra.mxu0 %v20683_v35  ;;  %v15329_v38 = vadd.f32 %v1298_v33, %v1266_v8  ;;  %v15331_v42 = vadd.f32 %v1359_v40, %v1327_v17  ;;  %v15337_v31 = vpack.c.bf16 %v20685_v53, %v20684_v7  ;;  %v2842_v58 = vsub.f32 1.0, %v2841_v5 }
 0x1ec   :  { %11807 = vpow2.f32 %v9471_v4  ;;  %v1258_v22 = vadd.f32 %v14890_v47, %v14608_v16  ;;  %v1319_v21 = vadd.f32 %v14914_v34, %v14806_v43  ;;  %v3128_v33 = vmul.f32 %v15252_v25, %v3127_v27 }
 0x1ed   :  { %20686 = vst [vmem:[#allocation40_spill] sm:$0xff] %v15337_v31  ;;  %v3141_v8 = vmul.f32 %v15309_v51, %v15226_v1  ;;  %11809 = vrcp.f32 %v15305_v24  ;;  %v9452_v7 = vmul.f32 -1.442695, %v14893_v50  ;;  %v2694_v17 = vadd.f32 %v15212_v59, %v2693_v19 }
 0x1ee   :  { %v15350_v53 = vpop.eup %11805  ;;  %vm15353_vm10 = vcmp.eq.f32.partialorder %v2699_v9, 8.507059e+37  ;;  %vm15357_vm11 = vcmp.eq.f32.partialorder %v3134_v55, 8.507059e+37  ;;  %v2992_v5 = vsub.f32 1.0, %v2991_v15  ;;  %v15362_v4 = vadd.f32 %v14956_v62, %v1319_v21  ;;  %v20701_v62 = vld [vmem:[#allocation31_spill] sm:$0xff] }
 0x1ef   :  { %vm3131_vm12 = vweird.f32 %v15252_v25  ;;  %v3137_v27 = vor.u32 1.1754944e-38, %v3136_v30  ;;  %vm2845_vm13 = vweird.f32 %v15169_v56  ;;  %v2849_v12 = vand.u32 2147483647, %v15169_v56 }
 0x1f0   :  { %20691 = vst [vmem:[#allocation39_spill] sm:$0xff] %v15362_v4  ;;  %v2988_v9 = vsel %vm15291_vm5, %v2987_v23, %v2983_v45  ;;  %v2843_v19 = vmul.f32 %v15269_v18, %v2842_v58  ;;  %v15370_v55 = vor.u32 1.1754944e-38, %v2851_v14  ;;  %v15373_v40 = vadd.f32 %v14906_v48, %v1258_v22  ;;  %vm15393_vm0 = vmor %vm3130_vm8, %vm3131_vm12  ;;  %v15400_v22 = vpop.f32.mrf.mxu0 }
 0x1f1   :  { %v3129_v30 = vadd.f32 %v15252_v25, %v3128_v33  ;;  %v3142_v15 = vsub.f32 1.0, %v3141_v8  ;;  %v1956_v23 = vmul.f32 %v15350_v53, %v15267_v41  ;;  %11811 = vpow2.f32 %v9452_v7  ;;  %20697 = vst [vmem:[#allocation25_spill] sm:$0xff] %v15400_v22 }
 0x1f2   :  { %20692 = vst [vmem:[#allocation15_spill] sm:$0xff] %v15373_v40  ;;  %v11808_v58 = vpop.eup %11807  ;;  %v2698_v48 = vsel %vm15379_vm14, %v15212_v59, %v2694_v17  ;;  %v2993_v54 = vmul.f32 %v15287_v46, %v2992_v5  ;;  %vm2995_vm15 = vweird.f32 %v15199_v44  ;;  %v9462_v14 = vmul.f32 -1.442695, %v15362_v4  ;;  %v15414_v17 = vpop.f32.mrf.mxu1  ;;  %v20700_v5 = vld [vmem:[#allocation18_spill] sm:$0xff] }
 0x1f3   :  { %v15402_v45 = vpop.eup %11809  ;;  %vm2846_vm1 = vweird.f32 %v15269_v18  ;;  %vm15405_vm2 = vcmp.eq.f32.partialorder %v2849_v12, 8.507059e+37  ;;  %v2999_v28 = vand.u32 2147483647, %v15199_v44  ;;  %v3001_v21 = vand.u32 2147483648, %v15199_v44  ;;  %v20703_v12 = vld [vmem:[#allocation51_spill] sm:$0xff] }
 0x1f4   :  { %v3149_v33 = vand.u32 2147483647, %v15226_v1  ;;  %v2844_v8 = vadd.f32 %v15269_v18, %v2843_v19  ;;  %v9481_v7 = vmul.f32 -1.442695, %v15373_v40  ;;  %v15418_v35 = vpack.c.bf16 %v20701_v62, %v20700_v5  ;;  %v15430_v40 = vpop.f32.mrf.mxu3  ;;  %vm15446_vm4 = vmor %vm2845_vm13, %vm2846_vm1 }
 0x1f5   :  { %v15422_v26 = vpack.c.bf16 %v20704_v2, %v20703_v12  ;;  %v3133_v49 = vsel %vm15393_vm0, %v15252_v25, %v3129_v30  ;;  %v3143_v4 = vmul.f32 %v15309_v51, %v3142_v15  ;;  %v1957_v50 = vsub.f32 1.0, %v1956_v23 }
 0x1f6   :  { %20702 = vst [vmem:[#allocation10_spill] sm:$0xff] %v15418_v35  ;;  %v15428_v19 = vadd.f32 1.0, %v11808_v58  ;;  %v2994_v22 = vadd.f32 %v15287_v46, %v2993_v54  ;;  %vm2996_vm3 = vweird.f32 %v15287_v46  ;;  %v2106_v5 = vmul.f32 %v15402_v45, %v15305_v24  ;;  %4339 = vmatmul.bf16.gmra.mxu1 %v15337_v31 }
 0x1f7   :  { %20705 = vst [vmem:[#allocation19_spill] sm:$0xff] %v15422_v26  ;;  %11813 = vpow2.f32 %v9462_v14  ;;  %v11812_v2 = vpop.eup %11811  ;;  %v15437_v62 = vmul.f32 %v2988_v9, %v14797_v36  ;;  %v2703_v25 = vsel %vm15353_vm10, %v15285_v32, %v2698_v48  ;;  %vm15450_vm5 = vcmp.eq.f32.partialorder %v2999_v28, 8.507059e+37  ;;  %vm15462_vm6 = vmor %vm2995_vm15, %vm2996_vm3  ;;  %v15487_v48 = vpop.f32.mrf.mxu2 }
 0x1f8   :  { %v3002_v23 = vor.u32 1.1754944e-38, %v3001_v21  ;;  %v3138_v36 = vsel %vm15357_vm11, %v3137_v27, %v3133_v49  ;;  %v2848_v32 = vsel %vm15446_vm4, %v15269_v18, %v2844_v8  ;;  %v3151_v47 = vand.u32 2147483648, %v15226_v1  ;;  %4372 = vmatmul.bf16.gmra.mxu3 %v15418_v35  ;;  %v1331_v14 = vpop.f32.mrf.mxu0 }
 0x1f9   :  { %20706 = vst [vmem:[#allocation18_spill] sm:$0xff] %v15437_v62  ;;  %11815 = vpow2.f32 %v9481_v7  ;;  %v3144_v9 = vadd.f32 %v15309_v51, %v3143_v4  ;;  %vm3146_vm7 = vweird.f32 %v15309_v51  ;;  %v1958_v34 = vmul.f32 %v15350_v53, %v1957_v50  ;;  %v11270_v62 = vld [vmem:[%s20209_s3 + $0x234] sm:$0xf0] }
 0x1fa   :  { %11817 = vrcp.f32 %v15428_v19  ;;  %v2998_v49 = vsel %vm15462_vm6, %v15287_v46, %v2994_v22  ;;  %vm15475_vm8 = vcmp.eq.f32.partialorder %v3149_v33, 8.507059e+37  ;;  %v2107_v18 = vsub.f32 1.0, %v2106_v5  ;;  %v9913_v46 = vld [vmem:[%s20209_s3 + $0x2f0] sm:$0xf]  ;;  %v1272_v22 = vpop.f32.mrf.mxu1 }
 0x1fb   :  { %v15479_v4 = vadd.f32 1.0, %v11812_v2  ;;  %v15482_v27 = vmul.f32 %v2703_v25, %v14888_v52  ;;  %v3299_v50 = vmul.f32 %v3138_v36, %v14496_v0  ;;  %vm3145_vm9 = vweird.f32 %v15226_v1  ;;  %4400 = vmatmul.bf16.gmra.mxu0 %v15422_v26  ;;  %v20718_v5 = vld [vmem:[#allocation6_spill] sm:$0xff]  ;;  %v20719_v2 = vld [vmem:[#allocation35_spill] sm:$0xff]  ;;  %v20728_v1 = vld [vmem:[#allocation49_spill] sm:$0xff] }
 0x1fc   :  { %v1964_v58 = vand.u32 2147483647, %v15267_v41  ;;  %v2853_v0 = vsel %vm15405_vm2, %v15370_v55, %v2848_v32  ;;  %vm15501_vm10 = vmor %vm3145_vm9, %vm3146_vm7  ;;  %vm1960_vm11 = vweird.f32 %v15267_v41  ;;  %vm1961_vm12 = vweird.f32 %v15350_v53  ;;  %v1305_v33 = vpop.f32.mrf.mxu3  ;;  %v20734_v36 = vld [vmem:[#allocation46_spill] sm:$0xff] }
 0x1fd   :  { %20715 = vst [vmem:[#allocation31_spill] sm:$0xff] %v15482_v27  ;;  %v11814_v52 = vpop.eup %11813  ;;  %v1966_v54 = vand.u32 2147483648, %v15267_v41  ;;  %v3003_v28 = vsel %vm15450_vm5, %v3002_v23, %v2998_v49  ;;  %v3148_v55 = vsel %vm15501_vm10, %v15309_v51, %v3144_v9  ;;  %v3152_v59 = vor.u32 1.1754944e-38, %v3151_v47  ;;  %vm15531_vm13 = vmor %vm1960_vm11, %vm1961_vm12  ;;  %v11278_v49 = vld [vmem:[%s20209_s3 + $0x274] sm:$0xf0]  ;;  %v20733_v23 = vld [vmem:[#allocation21_spill] sm:$0xff] }
 0x1fe   :  { %v1959_v21 = vadd.f32 %v15350_v53, %v1958_v34  ;;  %v2108_v7 = vmul.f32 %v15402_v45, %v2107_v18  ;;  %11819 = vrcp.f32 %v15479_v4  ;;  %v9914_v12 = vor.u32 %v11294_v6, %v9913_v46  ;;  %v11326_v46 = vld [vmem:[%s20209_s3 + $0x3f4] sm:$0xf0]  ;;  %v20790_v27 = vld [vmem:[#allocation24_spill] sm:$0xff] }
 0x1ff   :  { %v11816_v8 = vpop.eup %11815  ;;  %v15518_v25 = vpack.c.bf16 %v20719_v2, %v20718_v5  ;;  %v15522_v15 = vpack.c.bf16 %v3299_v50, %v3299_v50  ;;  %v15525_v51 = vmul.f32 %v2853_v0, %v20635_v20  ;;  %vm15535_vm14 = vcmp.eq.f32.partialorder %v1964_v58, 8.507059e+37  ;;  %v9977_v5 = vld [vmem:[%s20209_s3 + $0x370] sm:$0xf] }
 0x200   :  { %v15520_v30 = vpop.eup %11817  ;;  %v15539_v32 = vadd.f32 1.0, %v11814_v52  ;;  %v15542_v47 = vmul.f32 %v3003_v28, %v15003_v3  ;;  %v1967_v56 = vor.u32 1.1754944e-38, %v1966_v54  ;;  %vm2110_vm0 = vweird.f32 %v15305_v24  ;;  %4486 = vmatpush.bf16.msra.mxu3 %v9914_v12  ;;  %v9849_v3 = vld [vmem:[%s20209_s3 + $0x270] sm:$0xf] }
 0x201   :  { %20720 = vst [vmem:[#allocation51_spill] sm:$0xff] %v15518_v25  ;;  %v2114_v20 = vand.u32 2147483647, %v15305_v24  ;;  %4433 = vmatmul.bf16.gmra.mxu2 %v15518_v25  ;;  %v3153_v41 = vsel %vm15475_vm8, %v3152_v59, %v3148_v55  ;;  %vm2111_vm15 = vweird.f32 %v15402_v45  ;;  %v15550_v9 = vadd.f32 1.0, %v11816_v8  ;;  %v1364_v8 = vpop.f32.mrf.mxu2 }
 0x202   :  { %20721 = vst [vmem:[#allocation28_spill] sm:$0xff] %v15522_v15  ;;  %v1271_v34 = vadd.f32 %v15414_v17, %v14608_v16  ;;  %v1963_v44 = vsel %vm15531_vm13, %v15350_v53, %v1959_v21  ;;  %v2109_v18 = vadd.f32 %v15402_v45, %v2108_v7  ;;  %v2256_v50 = vmul.f32 %v15520_v30, %v15428_v19  ;;  %v10041_v17 = vld [vmem:[%s20209_s3 + $0x3f0] sm:$0xf]  ;;  %vm15589_vm1 = vmor %vm2110_vm0, %vm2111_vm15  ;;  %v20738_v21 = vld [vmem:[#allocation47_spill] sm:$0xff] }
 0x203   :  { %20722 = vst [vmem:[#allocation6_spill] sm:$0xff] %v15525_v51  ;;  %v9491_v58 = vmul.f32 -1.442695, %v15087_v63  ;;  %v2116_v6 = vand.u32 2147483648, %v15305_v24  ;;  %11821 = vrcp.f32 %v15539_v32  ;;  %v9472_v53 = vmul.f32 -1.442695, %v15089_v60  ;;  %v15601_v24 = vpop.f32.mrf.mxu0 }
 0x204   :  { %20727 = vst [vmem:[#allocation35_spill] sm:$0xff] %v15542_v47  ;;  %v1332_v52 = vadd.f32 %v1331_v14, %v14806_v43  ;;  %v15577_v0 = vpop.eup %11819  ;;  %v3300_v54 = vmul.f32 %v3153_v41, %v20728_v1  ;;  %v2266_v22 = vand.u32 2147483648, %v15428_v19  ;;  %v1263_v28 = vadd.f32 %v15118_v57, %v14608_v16  ;;  %v9817_v51 = vld [vmem:[%s20209_s3 + $0x230] sm:$0xf] }
 0x205   :  { %v9850_v55 = vor.u32 %v11278_v49, %v9849_v3  ;;  %v1968_v59 = vsel %vm15535_vm14, %v1967_v56, %v1963_v44  ;;  %11823 = vrcp.f32 %v15550_v9  ;;  %v10042_v14 = vor.u32 %v11326_v46, %v10041_v17  ;;  %v9905_v49 = vld [vmem:[%s20209_s3 + $0x2e0] sm:$0xf]  ;;  %v11292_v44 = vld [vmem:[%s20209_s3 + $0x2e4] sm:$0xf0] }
 0x206   :  { %v15595_v33 = vadd.f32 %v15430_v40, %v1271_v34  ;;  %v2113_v57 = vsel %vm15589_vm1, %v15402_v45, %v2109_v18  ;;  %v2257_v7 = vsub.f32 1.0, %v2256_v50  ;;  %v1981_v12 = vand.u32 2147483648, %v15479_v4  ;;  %v11310_v40 = vld [vmem:[%s20209_s3 + $0x374] sm:$0xf0] }
 0x207   :  { %11825 = vpow2.f32 %v9491_v58  ;;  %4453 = vmatpush.bf16.msra.mxu1 %v9850_v55  ;;  %v1971_v2 = vmul.f32 %v15577_v0, %v15479_v4  ;;  %4552 = vmatpush.bf16.msra.mxu2 %v10042_v14  ;;  %v15611_v45 = vadd.f32 %v1364_v8, %v1332_v52  ;;  %v15615_v56 = vpack.c.bf16 %v20734_v36, %v20733_v23  ;;  %v20740_v23 = vld [vmem:[#allocation33_spill] sm:$0xff] }
 0x208   :  { %20731 = vst [vmem:[#allocation49_spill] sm:$0xff] %v15595_v33  ;;  %11827 = vpow2.f32 %v9472_v53  ;;  %vm2115_vm2 = vcmp.eq.f32.partialorder %v2114_v20, 8.507059e+37  ;;  %v2117_v41 = vor.u32 1.1754944e-38, %v2116_v6  ;;  %v15618_v34 = vadd.f32 %v15157_v61, %v1263_v28 }
 0x209   :  { %20732 = vst [vmem:[#allocation56_spill] sm:$0xff] %v15611_v45  ;;  %v9978_v3 = vor.u32 %v11310_v40, %v9977_v5  ;;  %v15626_v18 = vpop.eup %11821  ;;  %v15628_v50 = vpack.c.bf16 %v3300_v54, %v3300_v54  ;;  %vm2260_vm3 = vweird.f32 %v15428_v19  ;;  %v15632_v58 = vor.u32 1.1754944e-38, %v2266_v22  ;;  %4344 = vmatmul.bf16.gmra.mxu1 %v15615_v56  ;;  %v9841_v5 = vld [vmem:[%s20209_s3 + $0x260] sm:$0xf]  ;;  %v11276_v40 = vld [vmem:[%s20209_s3 + $0x264] sm:$0xf0] }
 0x20a   :  { %20735 = vst [vmem:[#allocation21_spill] sm:$0xff] %v15615_v56  ;;  %v3221_v61 = vmul.f32 %v1968_v59, %v14680_v10  ;;  %v2118_v17 = vsel %vm2115_vm2, %v2117_v41, %v2113_v57  ;;  %v2258_v46 = vmul.f32 %v15520_v30, %v2257_v7  ;;  %v1979_v6 = vand.u32 2147483647, %v15479_v4  ;;  %v20737_v59 = vld [vmem:[#allocation22_spill] sm:$0xff]  ;;  %v20744_v41 = vld [vmem:[#allocation29_spill] sm:$0xff]  ;;  %v1382_v56 = vpop.f32.mrf.mxu1 }
 0x20b   :  { %20736 = vst [vmem:[#allocation46_spill] sm:$0xff] %v15628_v50  ;;  %4519 = vmatpush.bf16.msra.mxu0 %v9978_v3  ;;  %v15638_v53 = vpop.eup %11823  ;;  %vm2261_vm4 = vweird.f32 %v15520_v30  ;;  %v1972_v52 = vsub.f32 1.0, %v1971_v2  ;;  %v15641_v1 = vor.u32 1.1754944e-38, %v1981_v12  ;;  %v9906_v54 = vor.u32 %v11292_v44, %v9905_v49  ;;  %v15654_v12 = vpop.f32.mrf.mxu2  ;;  %v10033_v2 = vld [vmem:[%s20209_s3 + $0x3e0] sm:$0xf] }
 0x20c   :  { %v2416_v28 = vand.u32 2147483648, %v15550_v9  ;;  %v2121_v10 = vmul.f32 %v15626_v18, %v15539_v32  ;;  %v9501_v55 = vmul.f32 -1.442695, %v15618_v34  ;;  %v15649_v14 = vpack.c.bf16 %v20738_v21, %v20737_v59  ;;  %v15681_v59 = vld [vmem:[%s20208_s2 + $0x8] sm:$0x3]  ;;  %vm15720_vm7 = vmor %vm2260_vm3, %vm2261_vm4 }
 0x20d   :  { %v11826_v22 = vpop.eup %11825  ;;  %v3231_v57 = vmul.f32 %v2118_v17, %v15133_v13  ;;  %v1324_v7 = vadd.f32 %v15183_v37, %v14806_v43  ;;  %4487 = vmatpush.bf16.msra.mxu3 %v9906_v54  ;;  %v20741_v13 = vld [vmem:[#allocation5_spill] sm:$0xff]  ;;  %v20743_v37 = vld [vmem:[#allocation44_spill] sm:$0xff]  ;;  %v15672_v49 = vadd.f32 %v15520_v30, %v2258_v46  ;;  %vm1976_vm5 = vweird.f32 %v15577_v0  ;;  %v1336_v54 = vpop.f32.mrf.mxu0 }
 0x20e   :  { %20739 = vst [vmem:[#allocation22_spill] sm:$0xff] %v15649_v14  ;;  %v11828_v8 = vpop.eup %11827  ;;  %v15667_v36 = vpack.c.bf16 %v20741_v13, %v20740_v23  ;;  %v3066_v3 = vmul.f32 %v20744_v41, %v20743_v37  ;;  %v9842_v44 = vor.u32 %v11276_v40, %v9841_v5  ;;  %v11324_v17 = vld [vmem:[%s20209_s3 + $0x3e4] sm:$0xf0]  ;;  %4377 = vmatmul.bf16.gmra.mxu3 %v15649_v14  ;;  %v20746_v23 = vld [vmem:[#allocation30_spill] sm:$0xff]  ;;  %v9969_v46 = vld [vmem:[%s20209_s3 + $0x360] sm:$0xf]  ;;  %vm1975_vm6 = vweird.f32 %v15479_v4 }
 0x20f   :  { %v20745_v21 = vld [vmem:[#allocation8_spill] sm:$0xff]  ;;  %v1973_v5 = vmul.f32 %v15577_v0, %v1972_v52  ;;  %v15694_v40 = vadd.f32 %v15228_v39, %v1324_v7  ;;  %v10034_v20 = vor.u32 %v11324_v17, %v10033_v2  ;;  %v15697_v25 = vperm.slane %v15681_v59, 0  ;;  %v11290_v2 = vld [vmem:[%s20209_s3 + $0x2d4] sm:$0xf0]  ;;  %vm15780_vm12 = vmor %vm1975_vm6, %vm1976_vm5 }
 0x210   :  { %20742 = vst [vmem:[#allocation47_spill] sm:$0xff] %v15667_v36  ;;  %v15686_v13 = vpack.c.bf16 %v20746_v23, %v20745_v21  ;;  %4405 = vmatmul.bf16.gmra.mxu0 %v15667_v36  ;;  %v11308_v21 = vld [vmem:[%s20209_s3 + $0x364] sm:$0xf0]  ;;  %v9897_v23 = vld [vmem:[%s20209_s3 + $0x2d0] sm:$0xf]  ;;  %v2406_v52 = vmul.f32 %v15638_v53, %v15550_v9  ;;  %v2122_v26 = vsub.f32 1.0, %v2121_v10  ;;  %4454 = vmatpush.bf16.msra.mxu1 %v9842_v44  ;;  %11829 = vpow2.f32 %v9501_v55 }
 0x211   :  { %v15708_v39 = vadd.f32 1.0, %v11826_v22  ;;  %v15710_v7 = vadd.f32 1.0, %v11828_v8  ;;  %4553 = vmatpush.bf16.msra.mxu2 %v10034_v20  ;;  %v9970_v22 = vor.u32 %v11308_v21, %v9969_v46  ;;  %v9898_v10 = vor.u32 %v11290_v2, %v9897_v23  ;;  %v1415_v2 = vpop.f32.mrf.mxu3  ;;  %v20763_v20 = vld [vmem:[#allocation32_spill] sm:$0xff] }
 0x212   :  { %20747 = vst [vmem:[#allocation33_spill] sm:$0xff] %v15686_v13  ;;  %4438 = vmatmul.bf16.gmra.mxu2 %v15686_v13  ;;  %v3067_v8 = vsub.f32 1.0, %v3066_v3  ;;  %v15724_v44 = vpack.c.bf16 %v3231_v57, %v3221_v61  ;;  %v2129_v36 = vand.u32 2147483647, %v15539_v32  ;;  %v1337_v14 = vadd.f32 %v1336_v54, %v14806_v43  ;;  %v20764_v13 = vld [vmem:[#allocation48_spill] sm:$0xff] }
 0x213   :  { %vm15729_vm8 = vcmp.eq.f32.partialorder %v1979_v6, 8.507059e+37  ;;  %v15733_v31 = vor.u32 1.1754944e-38, %v2416_v28  ;;  %v9482_v55 = vmul.f32 -1.442695, %v15694_v40  ;;  %v1383_v61 = vadd.f32 %v1382_v56, %v15697_v25  ;;  %4520 = vmatpush.bf16.msra.mxu0 %v9970_v22  ;;  %4488 = vmatpush.bf16.msra.mxu3 %v9898_v10  ;;  %v1369_v56 = vpop.f32.mrf.mxu2 }
 0x214   :  { %20750 = vst [vmem:[#allocation5_spill] sm:$0xff] %v15724_v44  ;;  %11831 = vrcp.f32 %v15708_v39  ;;  %v1268_v6 = vadd.f32 %v15333_v29, %v14608_v16  ;;  %v3068_v28 = vmul.f32 %v20744_v41, %v3067_v8  ;;  %v1974_v3 = vadd.f32 %v15577_v0, %v1973_v5  ;;  %v10025_v8 = vld [vmem:[%s20209_s3 + $0x3d0] sm:$0xf] }
 0x215   :  { %v2407_v54 = vsub.f32 1.0, %v2406_v52  ;;  %v2123_v46 = vmul.f32 %v15626_v18, %v2122_v26  ;;  %vm2125_vm9 = vweird.f32 %v15539_v32  ;;  %11833 = vrcp.f32 %v15710_v7  ;;  %v1338_v5 = vpop.f32.mrf.mxu0  ;;  %v9833_v26 = vld [vmem:[%s20209_s3 + $0x250] sm:$0xf]  ;;  %v11274_v52 = vld [vmem:[%s20209_s3 + $0x254] sm:$0xf0] }
 0x216   :  { %v20753_v21 = vand.u32 2147483647, %v15428_v19  ;;  %v9511_v16 = vmul.f32 -1.442695, %v15329_v38  ;;  %v15757_v29 = vadd.f32 %v1369_v56, %v1337_v14  ;;  %v3069_v19 = vadd.f32 %v20744_v41, %v3068_v28  ;;  %v11830_v22 = vpop.eup %11829  ;;  %v11322_v56 = vld [vmem:[%s20209_s3 + $0x3d4] sm:$0xf0] }
 0x217   :  { %vm3071_vm11 = vweird.f32 %v20744_v41  ;;  %11835 = vpow2.f32 %v9482_v55  ;;  %v15767_v10 = vadd.f32 %v1415_v2, %v1383_v61  ;;  %v9834_v14 = vor.u32 %v11274_v52, %v9833_v26  ;;  %v9961_v2 = vld [vmem:[%s20209_s3 + $0x350] sm:$0xf]  ;;  %v11306_v52 = vld [vmem:[%s20209_s3 + $0x354] sm:$0xf0] }
 0x218   :  { %vm15752_vm10 = vcmp.eq.f32.partialorder %v20753_v21, 8.507059e+37  ;;  %v3076_v21 = vand.u32 2147483648, %v20743_v37  ;;  %vm2410_vm13 = vweird.f32 %v15550_v9  ;;  %v15786_v55 = vadd.f32 %v15343_v11, %v1268_v6 }
 0x219   :  { %v10026_v61 = vor.u32 %v11322_v56, %v10025_v8  ;;  %vm3070_vm14 = vweird.f32 %v20743_v37  ;;  %v3074_v5 = vand.u32 2147483647, %v20743_v37  ;;  %v1978_v4 = vsel %vm15780_vm12, %v15577_v0, %v1974_v3  ;;  %4455 = vmatpush.bf16.msra.mxu1 %v9834_v14  ;;  %v20762_v56 = vld [vmem:[#allocation25_spill] sm:$0xff] }
 0x21a   :  { %v2408_v26 = vmul.f32 %v15638_v53, %v2407_v54  ;;  %vm2126_vm0 = vweird.f32 %v15626_v18  ;;  %vm15798_vm15 = vcmp.eq.f32.partialorder %v2129_v36, 8.507059e+37  ;;  %v9492_v6 = vmul.f32 -1.442695, %v15331_v42  ;;  %vm15808_vm1 = vmor %vm3070_vm14, %vm3071_vm11  ;;  %v15812_v0 = vpop.eup %11831 }
 0x21b   :  { %v2124_v36 = vadd.f32 %v15626_v18, %v2123_v46  ;;  %v15815_v3 = vadd.f32 1.0, %v11830_v22  ;;  %4554 = vmatpush.bf16.msra.mxu2 %v10026_v61  ;;  %v9962_v54 = vor.u32 %v11306_v52, %v9961_v2  ;;  %v3073_v14 = vsel %vm15808_vm1, %v20744_v41, %v3069_v19  ;;  %v15820_v8 = vpop.eup %11833  ;;  %v1371_v35 = vpop.f32.mrf.mxu2  ;;  %vm15845_vm5 = vmor %vm2125_vm9, %vm2126_vm0  ;;  %v11272_v41 = vld [vmem:[%s20209_s3 + $0x244] sm:$0xf0] }
 0x21c   :  { %11837 = vpow2.f32 %v9511_v16  ;;  %v1329_v28 = vadd.f32 %v20762_v56, %v14806_v43  ;;  %v3077_v57 = vor.u32 1.1754944e-38, %v3076_v21  ;;  %v3081_v50 = vmul.f32 %v20764_v13, %v20763_v20  ;;  %v15862_v56 = vpop.f32.mrf.mxu3 }
 0x21d   :  { %v1983_v46 = vsel %vm15729_vm8, %v15641_v1, %v1978_v4  ;;  %vm2411_vm2 = vweird.f32 %v15638_v53  ;;  %v20765_v22 = vand.u32 2147483647, %v15550_v9  ;;  %v9521_v16 = vmul.f32 -1.442695, %v15786_v55  ;;  %4521 = vmatpush.bf16.msra.mxu0 %v9962_v54  ;;  %v11836_v19 = vpop.eup %11835  ;;  %v15852_v4 = vpop.f32.mrf.mxu1 }
 0x21e   :  { %vm3075_vm4 = vcmp.eq.f32.partialorder %v3074_v5, 8.507059e+37  ;;  %v2409_v21 = vadd.f32 %v15638_v53, %v2408_v26  ;;  %11839 = vpow2.f32 %v9492_v6  ;;  %v15839_v61 = vadd.f32 %v15487_v48, %v1329_v28  ;;  %v20770_v26 = vld [vmem:[#allocation23_spill] sm:$0xff]  ;;  %vm15887_vm6 = vmor %vm2410_vm13, %vm2411_vm2 }
 0x21f   :  { %vm15832_vm3 = vcmp.eq.f32.partialorder %v20765_v22, 8.507059e+37  ;;  %v3078_v1 = vsel %vm3075_vm4, %v3077_v57, %v3073_v14  ;;  %v2556_v5 = vmul.f32 %v15812_v0, %v15708_v39  ;;  %11841 = vrcp.f32 %v15815_v3 }
 0x220   :  { %v3295_v48 = vmul.f32 %v3078_v1, %v20770_v26  ;;  %v3082_v6 = vsub.f32 1.0, %v3081_v50  ;;  %v2128_v57 = vsel %vm15845_vm5, %v15626_v18, %v2124_v36  ;;  %v20771_v52 = vand.u32 2147483648, %v15539_v32  ;;  %v20774_v36 = vld [vmem:[#allocation34_spill] sm:$0xff] }
 0x221   :  { %v2566_v54 = vand.u32 2147483648, %v15708_v39  ;;  %v2281_v14 = vand.u32 2147483648, %v15710_v7  ;;  %v2271_v28 = vmul.f32 %v15820_v8, %v15710_v7  ;;  %v15866_v22 = vadd.f32 1.0, %v11836_v19 }
 0x222   :  { %v2132_v37 = vor.u32 1.1754944e-38, %v20771_v52  ;;  %11843 = vpow2.f32 %v9521_v16  ;;  %v15868_v50 = vpack.c.bf16 %v3295_v48, %v3295_v48  ;;  %v11838_v35 = vpop.eup %11837  ;;  %v20773_v32 = vsel %vm15720_vm7, %v15520_v30, %v15672_v49 }
 0x223   :  { %v15878_v18 = vsel %vm15752_vm10, %v15632_v58, %v20773_v32  ;;  %v15881_v1 = vmul.f32 %v1983_v46, %v20774_v36  ;;  %vm2560_vm8 = vweird.f32 %v15708_v39  ;;  %v9502_v30 = vmul.f32 -1.442695, %v15839_v61 }
 0x224   :  { %20772 = vst [vmem:[#allocation44_spill] sm:$0xff] %v15868_v50  ;;  %v2413_v58 = vsel %vm15887_vm6, %v15638_v53, %v2409_v21  ;;  %v2133_v49 = vsel %vm15798_vm15, %v2132_v37, %v2128_v57  ;;  %v2557_v17 = vsub.f32 1.0, %v2556_v5  ;;  %4349 = vmatmul.bf16.gmra.mxu1 %v15868_v50  ;;  %v3083_v9 = vmul.f32 %v20764_v13, %v3082_v6  ;;  %v11840_v23 = vpop.eup %11839  ;;  %v9889_v5 = vld [vmem:[%s20209_s3 + $0x2c0] sm:$0xf]  ;;  %v11288_v37 = vld [vmem:[%s20209_s3 + $0x2c4] sm:$0xf0]  ;;  %v15979_v50 = vpop.f32.mrf.mxu0 }
 0x225   :  { %v2564_v46 = vand.u32 2147483647, %v15708_v39  ;;  %v15901_v19 = vor.u32 1.1754944e-38, %v2566_v54  ;;  %v15904_v26 = vor.u32 1.1754944e-38, %v2281_v14  ;;  %v15906_v48 = vpop.eup %11841  ;;  %v2272_v53 = vsub.f32 1.0, %v2271_v28  ;;  %v20777_v57 = vld [vmem:[#allocation39_spill] sm:$0xff] }
 0x226   :  { %v2716_v11 = vand.u32 2147483648, %v15815_v3  ;;  %11845 = vrcp.f32 %v15866_v22  ;;  %v15910_v21 = vadd.f32 1.0, %v11838_v35  ;;  %v15918_v6 = vsel %vm15832_vm3, %v15733_v31, %v2413_v58  ;;  %v9825_v54 = vld [vmem:[%s20209_s3 + $0x240] sm:$0xf] }
 0x227   :  { %v15921_v52 = vmul.f32 %v2133_v49, %v20777_v57  ;;  %vm2561_vm7 = vweird.f32 %v15812_v0  ;;  %11847 = vpow2.f32 %v9502_v30  ;;  %v2558_v14 = vmul.f32 %v15812_v0, %v2557_v17  ;;  %v1387_v49 = vpop.f32.mrf.mxu1 }
 0x228   :  { %v11844_v31 = vpop.eup %11843  ;;  %v15934_v28 = vadd.f32 1.0, %v11840_v23  ;;  %v3084_v35 = vadd.f32 %v20764_v13, %v3083_v9  ;;  %vm3086_vm9 = vweird.f32 %v20764_v13  ;;  %v2706_v32 = vmul.f32 %v15906_v48, %v15815_v3  ;;  %vm15999_vm14 = vmor %vm2560_vm8, %vm2561_vm7 }
 0x229   :  { %v9531_v16 = vmul.f32 -1.442695, %v15595_v33  ;;  %v3091_v30 = vand.u32 2147483648, %v20763_v20  ;;  %vm2275_vm10 = vweird.f32 %v15710_v7  ;;  %v9890_v58 = vor.u32 %v11288_v37, %v9889_v5  ;;  %v1420_v37 = vpop.f32.mrf.mxu3  ;;  %v20785_v5 = vld [vmem:[#allocation9_spill] sm:$0xff] }
 0x22a   :  { %v9826_v17 = vor.u32 %v11272_v41, %v9825_v54  ;;  %vm3085_vm11 = vweird.f32 %v20763_v20  ;;  %v3089_v9 = vand.u32 2147483647, %v20763_v20  ;;  %vm15946_vm12 = vcmp.eq.f32.partialorder %v2564_v46, 8.507059e+37  ;;  %v10017_v54 = vld [vmem:[%s20209_s3 + $0x3c0] sm:$0xf] }
 0x22b   :  { %v2273_v57 = vmul.f32 %v15820_v8, %v2272_v53  ;;  %v15951_v36 = vor.u32 1.1754944e-38, %v2716_v11  ;;  %11849 = vrcp.f32 %v15910_v21  ;;  %v15954_v2 = vadd.f32 1.0, %v11844_v31  ;;  %vm15958_vm13 = vmor %vm3085_vm11, %vm3086_vm9  ;;  %4489 = vmatpush.bf16.msra.mxu3 %v9890_v58  ;;  %v11320_v41 = vld [vmem:[%s20209_s3 + $0x3c4] sm:$0xf0]  ;;  %v20782_v58 = vld [vmem:[#allocation43_spill] sm:$0xff] }
 0x22c   :  { %v15962_v20 = vpop.eup %11845  ;;  %v15965_v46 = vadd.f32 %v15812_v0, %v2558_v14  ;;  %v2431_v53 = vand.u32 2147483648, %v15866_v22  ;;  %11851 = vrcp.f32 %v15934_v28  ;;  %4456 = vmatpush.bf16.msra.mxu1 %v9826_v17  ;;  %v3088_v11 = vsel %vm15958_vm13, %v20764_v13, %v3084_v35  ;;  %v20783_v17 = vld [vmem:[#allocation7_spill] sm:$0xff]  ;;  %v20786_v13 = vld [vmem:[#allocation52_spill] sm:$0xff] }
 0x22d   :  { %v11848_v31 = vpop.eup %11847  ;;  %v1388_v14 = vadd.f32 %v1387_v49, %v15697_v25  ;;  %v3092_v15 = vor.u32 1.1754944e-38, %v3091_v30  ;;  %v15983_v47 = vpack.c.bf16 %v20783_v17, %v20782_v58  ;;  %v15987_v35 = vpack.c.bf16 %v20786_v13, %v20785_v5  ;;  %v9881_v58 = vld [vmem:[%s20209_s3 + $0x2b0] sm:$0xf]  ;;  %v11286_v17 = vld [vmem:[%s20209_s3 + $0x2b4] sm:$0xf0] }
 0x22e   :  { %vm2276_vm0 = vweird.f32 %v15820_v8  ;;  %v2707_v49 = vsub.f32 1.0, %v2706_v32  ;;  %11853 = vpow2.f32 %v9531_v16  ;;  %vm3090_vm15 = vcmp.eq.f32.partialorder %v3089_v9, 8.507059e+37  ;;  %v11304_v30 = vld [vmem:[%s20209_s3 + $0x344] sm:$0xf0] }
 0x22f   :  { %20784 = vst [vmem:[#allocation29_spill] sm:$0xff] %v15983_v47  ;;  %v16012_v39 = vmul.f32 %v15962_v20, %v15866_v22  ;;  %11855 = vrcp.f32 %v15954_v2  ;;  %v3093_v5 = vsel %vm3090_vm15, %v3092_v15, %v3088_v11  ;;  %4410 = vmatmul.bf16.gmra.mxu0 %v15983_v47  ;;  %4443 = vmatmul.bf16.gmra.mxu2 %v15987_v35  ;;  %v16021_v13 = vadd.f32 1.0, %v11848_v31  ;;  %vm16056_vm2 = vmor %vm2275_vm10, %vm2276_vm0 }
 0x230   :  { %20787 = vst [vmem:[#allocation8_spill] sm:$0xff] %v15987_v35  ;;  %v10018_v32 = vor.u32 %v11320_v41, %v10017_v54  ;;  %v16018_v16 = vadd.f32 %v15820_v8, %v2273_v57  ;;  %v3296_v44 = vmul.f32 %v3093_v5, %v20790_v27  ;;  %v2563_v15 = vsel %vm15999_vm14, %v15812_v0, %v15965_v46  ;;  %v9953_v27 = vld [vmem:[%s20209_s3 + $0x340] sm:$0xf] }
 0x231   :  { %v16024_v33 = vpop.eup %11849  ;;  %v20791_v11 = vand.u32 2147483647, %v15710_v7  ;;  %v9818_v57 = vor.u32 %v11270_v62, %v9817_v51  ;;  %v9882_v41 = vor.u32 %v11286_v17, %v9881_v58  ;;  %v16036_v31 = vadd.f32 %v1420_v37, %v1388_v14  ;;  %v20798_v7 = vld [vmem:[#allocation50_spill] sm:$0xff] }
 0x232   :  { %4555 = vmatpush.bf16.msra.mxu2 %v10018_v32  ;;  %v16044_v0 = vpop.eup %11851  ;;  %v2708_v46 = vmul.f32 %v15906_v48, %v2707_v49  ;;  %v16047_v5 = vor.u32 1.1754944e-38, %v2431_v53  ;;  %v2866_v32 = vand.u32 2147483648, %v15910_v21  ;;  %v1334_v62 = vadd.f32 %v15601_v24, %v14806_v43  ;;  %v9809_v43 = vld [vmem:[%s20209_s3 + $0x220] sm:$0xf] }
 0x233   :  { %vm16032_vm1 = vcmp.eq.f32.partialorder %v20791_v11, 8.507059e+37  ;;  %20794 = vst [vmem:[#allocation30_spill] sm:$0xff] %v16036_v31  ;;  %v2422_v37 = vsub.f32 1.0, %v16012_v39  ;;  %v2581_v14 = vand.u32 2147483648, %v15934_v28  ;;  %v9512_v53 = vmul.f32 -1.442695, %v15611_v45  ;;  %4457 = vmatpush.bf16.msra.mxu1 %v9818_v57  ;;  %4490 = vmatpush.bf16.msra.mxu3 %v9882_v41  ;;  %v16076_v11 = vpop.f32.mrf.mxu1 }
 0x234   :  { %v16063_v49 = vpack.c.bf16 %v3296_v44, %v3296_v44  ;;  %v11854_v24 = vpop.eup %11853  ;;  %v16070_v58 = vmul.f32 %v15878_v18, %v20798_v7  ;;  %11857 = vrcp.f32 %v16021_v13  ;;  %v16074_v17 = vadd.f32 %v15654_v12, %v1334_v62  ;;  %v11268_v44 = vld [vmem:[%s20209_s3 + $0x224] sm:$0xf0]  ;;  %v9873_v57 = vld [vmem:[%s20209_s3 + $0x2a0] sm:$0xf]  ;;  %v9801_v62 = vld [vmem:[%s20209_s3 + $0x210] sm:$0xf] }
 0x235   :  { %v9954_v39 = vor.u32 %v11304_v30, %v9953_v27  ;;  %v11284_v18 = vld [vmem:[%s20209_s3 + $0x2a4] sm:$0xf0]  ;;  %v16087_v41 = vpop.eup %11855  ;;  %v20800_v7 = vld [vmem:[#allocation15_spill] sm:$0xff]  ;;  %v16095_v27 = vpack.c.bf16 %v15921_v52, %v15881_v1  ;;  %vm2710_vm3 = vweird.f32 %v15815_v3  ;;  %vm2711_vm4 = vweird.f32 %v15906_v48  ;;  %v16100_v30 = vpop.f32.mrf.mxu2  ;;  %v9865_v1 = vld [vmem:[%s20209_s3 + $0x290] sm:$0xf] }
 0x236   :  { %20797 = vst [vmem:[#allocation25_spill] sm:$0xff] %v16063_v49  ;;  %v16091_v12 = vmul.f32 %v15918_v6, %v20800_v7  ;;  %4382 = vmatmul.bf16.gmra.mxu3 %v16063_v49  ;;  %v11266_v6 = vld [vmem:[%s20209_s3 + $0x214] sm:$0xf0]  ;;  %v16111_v52 = vpop.f32.mrf.mxu3  ;;  %v2568_v7 = vsel %vm15946_vm12, %v15901_v19, %v2563_v15  ;;  %v2278_v9 = vsel %vm16056_vm2, %v15820_v8, %v16018_v16  ;;  %v20803_v47 = vand.u32 2147483647, %v15815_v3  ;;  %v16142_v16 = vpop.f32.mrf.mxu0  ;;  %vm16164_vm8 = vmor %vm2710_vm3, %vm2711_vm4  ;;  %v20813_v49 = vld [vmem:[#allocation45_spill] sm:$0xff] }
 0x237   :  { %20799 = vst [vmem:[#allocation32_spill] sm:$0xff] %v16070_v58  ;;  %v2709_v35 = vadd.f32 %v15906_v48, %v2708_v46  ;;  %4522 = vmatpush.bf16.msra.mxu0 %v9954_v39  ;;  %v11282_v19 = vld [vmem:[%s20209_s3 + $0x294] sm:$0xf0]  ;;  %v10009_v8 = vld [vmem:[%s20209_s3 + $0x3b0] sm:$0xf]  ;;  %v16140_v23 = vadd.f32 1.0, %v11854_v24  ;;  %11859 = vpow2.f32 %v9512_v53  ;;  %v9810_v15 = vor.u32 %v11268_v44, %v9809_v43 }
 0x238   :  { %20801 = vst [vmem:[#allocation48_spill] sm:$0xff] %v16091_v12  ;;  %vm16123_vm5 = vcmp.eq.f32.partialorder %v20803_v47, 8.507059e+37  ;;  %v16129_v12 = vmul.f32 %v16024_v33, %v15910_v21  ;;  %v11318_v47 = vld [vmem:[%s20209_s3 + $0x3b4] sm:$0xf0]  ;;  %v9874_v46 = vor.u32 %v11284_v18, %v9873_v57  ;;  %v2571_v51 = vmul.f32 %v16044_v0, %v15934_v28 }
 0x239   :  { %20802 = vst [vmem:[#allocation23_spill] sm:$0xff] %v16095_v27  ;;  %v16148_v39 = vmul.f32 %v16087_v41, %v15954_v2  ;;  %v9522_v58 = vmul.f32 -1.442695, %v16074_v17  ;;  %v1385_v45 = vadd.f32 %v15852_v4, %v15697_v25  ;;  %vm2425_vm6 = vweird.f32 %v15866_v22  ;;  %4458 = vmatpush.bf16.msra.mxu1 %v9810_v15 }
 0x23a   :  { %v9532_v53 = vmul.f32 -1.442695, %v15757_v29  ;;  %4491 = vmatpush.bf16.msra.mxu3 %v9874_v46  ;;  %v9802_v43 = vor.u32 %v11266_v6, %v9801_v62  ;;  %v9866_v24 = vor.u32 %v11282_v19, %v9865_v1  ;;  %v10010_v44 = vor.u32 %v11318_v47, %v10009_v8  ;;  %v16155_v57 = vpop.eup %11857 }
 0x23b   :  { %v2283_v18 = vsel %vm16032_vm1, %v15904_v26, %v2278_v9  ;;  %v2864_v15 = vand.u32 2147483647, %v15910_v21  ;;  %v16169_v46 = vor.u32 1.1754944e-38, %v2866_v32  ;;  %v2579_v62 = vand.u32 2147483647, %v15934_v28 }
 0x23c   :  { %v2713_v6 = vsel %vm16164_vm8, %v15906_v48, %v2709_v35  ;;  %v2423_v26 = vmul.f32 %v15962_v20, %v2422_v37  ;;  %v16176_v9 = vor.u32 1.1754944e-38, %v2581_v14  ;;  %11861 = vrcp.f32 %v16140_v23  ;;  %4556 = vmatpush.bf16.msra.mxu2 %v10010_v44 }
 0x23d   :  { %v2857_v3 = vsub.f32 1.0, %v16129_v12  ;;  %v2572_v54 = vsub.f32 1.0, %v2571_v51  ;;  %v3007_v1 = vsub.f32 1.0, %v16148_v39  ;;  %11863 = vpow2.f32 %v9522_v58  ;;  %v11860_v32 = vpop.eup %11859  ;;  %4459 = vmatpush.bf16.msra.mxu1 %v9802_v43  ;;  %v16217_v47 = vpop.f32.mrf.mxu2  ;;  %v11280_v39 = vld [vmem:[%s20209_s3 + $0x284] sm:$0xf0] }
 0x23e   :  { %v2721_v19 = vmul.f32 %v16155_v57, %v16021_v13  ;;  %11865 = vpow2.f32 %v9532_v53  ;;  %v9453_v48 = vmul.f32 -1.442695, %v15767_v10  ;;  %v16185_v35 = vadd.f32 %v15862_v56, %v1385_v45  ;;  %4492 = vmatpush.bf16.msra.mxu3 %v9866_v24  ;;  %v1392_v45 = vpop.f32.mrf.mxu1  ;;  %v9793_v56 = vld [vmem:[%s20209_s3 + $0x200] sm:$0xf]  ;;  %v9945_v53 = vld [vmem:[%s20209_s3 + $0x330] sm:$0xf]  ;;  %v1425_v24 = vpop.f32.mrf.mxu3 }
 0x23f   :  { %v16188_v37 = vmul.f32 %v2568_v7, %v15087_v63  ;;  %v16191_v14 = vmul.f32 %v2283_v18, %v15089_v60  ;;  %vm2426_vm7 = vweird.f32 %v15962_v20  ;;  %v20810_v58 = vand.u32 2147483647, %v15866_v22  ;;  %v11264_v63 = vld [vmem:[%s20209_s3 + $0x204] sm:$0xf0]  ;;  %v9857_v60 = vld [vmem:[%s20209_s3 + $0x280] sm:$0xf]  ;;  %4415 = vmatmul.bf16.gmra.mxu0 %v20813_v49 }
 0x240   :  { %20808 = vst [vmem:[#allocation34_spill] sm:$0xff] %v16185_v35  ;;  %vm2860_vm10 = vweird.f32 %v15910_v21  ;;  %v16213_v7 = vsel %vm16123_vm5, %v15951_v36, %v2713_v6  ;;  %v2424_v8 = vadd.f32 %v15962_v20, %v2423_v26  ;;  %vm2575_vm11 = vweird.f32 %v15934_v28  ;;  %v11302_v36 = vld [vmem:[%s20209_s3 + $0x334] sm:$0xf0]  ;;  %v20814_v43 = vld [vmem:[#allocation12_spill] sm:$0xff]  ;;  %vm16250_vm0 = vmor %vm2425_vm6, %vm2426_vm7 }
 0x241   :  { %20809 = vst [vmem:[#allocation39_spill] sm:$0xff] %v16188_v37  ;;  %vm16196_vm9 = vcmp.eq.f32.partialorder %v20810_v58, 8.507059e+37  ;;  %v1393_v51 = vadd.f32 %v1392_v45, %v15697_v25  ;;  %4448 = vmatmul.bf16.gmra.mxu2 %v20814_v43  ;;  %v2858_v44 = vmul.f32 %v16024_v33, %v2857_v3  ;;  %vm2861_vm12 = vweird.f32 %v16024_v33  ;;  %v16244_v43 = vpop.f32.mrf.mxu0  ;;  %v11316_v21 = vld [vmem:[%s20209_s3 + $0x3a4] sm:$0xf0] }
 0x242   :  { %v2573_v18 = vmul.f32 %v16044_v0, %v2572_v54  ;;  %vm3010_vm13 = vweird.f32 %v15954_v2  ;;  %v16235_v4 = vadd.f32 1.0, %v11860_v32  ;;  %v16237_v6 = vpop.eup %11861  ;;  %vm16239_vm14 = vcmp.eq.f32.partialorder %v2864_v15, 8.507059e+37  ;;  %vm16277_vm2 = vmor %vm2860_vm10, %vm2861_vm12  ;;  %v20828_v54 = vld [vmem:[#allocation14_spill] sm:$0xff] }
 0x243   :  { %v2722_v58 = vsub.f32 1.0, %v2721_v19  ;;  %11867 = vpow2.f32 %v9453_v48  ;;  %v9463_v45 = vmul.f32 -1.442695, %v16185_v35  ;;  %v9794_v3 = vor.u32 %v11264_v63, %v9793_v56  ;;  %v11864_v49 = vpop.eup %11863 }
 0x244   :  { %v3008_v15 = vmul.f32 %v16087_v41, %v3007_v1  ;;  %v3014_v32 = vand.u32 2147483647, %v15954_v2  ;;  %v9858_v19 = vor.u32 %v11280_v39, %v9857_v60  ;;  %v9946_v48 = vor.u32 %v11302_v36, %v9945_v53  ;;  %v11866_v37 = vpop.eup %11865 }
 0x245   :  { %v2428_v56 = vsel %vm16250_vm0, %v15962_v20, %v2424_v8  ;;  %vm16259_vm15 = vcmp.eq.f32.partialorder %v2579_v62, 8.507059e+37  ;;  %v3016_v22 = vand.u32 2147483648, %v15954_v2  ;;  %v16265_v35 = vperm.slane %v15681_v59, 1  ;;  %4460 = vmatpush.bf16.msra.mxu1 %v9794_v3  ;;  %v11300_v2 = vld [vmem:[%s20209_s3 + $0x324] sm:$0xf0] }
 0x246   :  { %v16267_v1 = vadd.f32 %v1425_v24, %v1393_v51  ;;  %v2859_v60 = vadd.f32 %v16024_v33, %v2858_v44  ;;  %v2574_v39 = vadd.f32 %v16044_v0, %v2573_v18  ;;  %vm2576_vm1 = vweird.f32 %v16044_v0  ;;  %4493 = vmatpush.bf16.msra.mxu3 %v9858_v19  ;;  %4523 = vmatpush.bf16.msra.mxu0 %v9946_v48  ;;  %v10001_v51 = vld [vmem:[%s20209_s3 + $0x3a0] sm:$0xf] }
 0x247   :  { %11869 = vrcp.f32 %v16235_v4  ;;  %v2723_v20 = vmul.f32 %v16155_v57, %v2722_v58  ;;  %v3156_v62 = vmul.f32 %v16237_v6, %v16140_v23  ;;  %v16284_v8 = vadd.f32 1.0, %v11864_v49  ;;  %v20823_v44 = vld [vmem:[#allocation11_spill] sm:$0xff]  ;;  %vm16305_vm4 = vmor %vm2575_vm11, %vm2576_vm1 }
 0x248   :  { %11871 = vpow2.f32 %v9463_v45  ;;  %v3009_v53 = vadd.f32 %v16087_v41, %v3008_v15  ;;  %vm3011_vm3 = vweird.f32 %v16087_v41  ;;  %v2729_v36 = vand.u32 2147483647, %v16021_v13  ;;  %4461 = vmatmul.bf16.vlgmr.msra.gmra.mxu1 %v20823_v44  ;;  %v9937_v48 = vld [vmem:[%s20209_s3 + $0x320] sm:$0xf] }
 0x249   :  { %v16295_v24 = vadd.f32 1.0, %v11866_v37  ;;  %v11868_v49 = vpop.eup %11867  ;;  %v2433_v18 = vsel %vm16196_vm9, %v16047_v5, %v2428_v56  ;;  %vm16309_vm5 = vcmp.eq.f32.partialorder %v3014_v32, 8.507059e+37  ;;  %v3017_v37 = vor.u32 1.1754944e-38, %v3016_v22  ;;  %4494 = vmatmul.bf16.vlgmr.msra.gmra.mxu3 %v20828_v54  ;;  %v16323_v32 = vpop.f32.mrf.mxu1  ;;  %vm16329_vm6 = vmor %vm3010_vm13, %vm3011_vm3 }
 0x24a   :  { %v1449_v3 = vadd.f32 %v15979_v50, %v16265_v35  ;;  %v2863_v5 = vsel %vm16277_vm2, %v16024_v33, %v2859_v60  ;;  %v2578_v28 = vsel %vm16305_vm4, %v16044_v0, %v2574_v39  ;;  %v2731_v12 = vand.u32 2147483648, %v16021_v13  ;;  %v16336_v0 = vpop.f32.mrf.mxu2  ;;  %v16344_v56 = vpop.f32.mrf.mxu3 }
 0x24b   :  { %v10002_v15 = vor.u32 %v11316_v21, %v10001_v51  ;;  %v2724_v19 = vadd.f32 %v16155_v57, %v2723_v20  ;;  %vm2726_vm8 = vweird.f32 %v16155_v57  ;;  %v3157_v33 = vsub.f32 1.0, %v3156_v62  ;;  %v9929_v20 = vld [vmem:[%s20209_s3 + $0x310] sm:$0xf] }
 0x24c   :  { %11873 = vrcp.f32 %v16284_v8  ;;  %v3013_v60 = vsel %vm16329_vm6, %v16087_v41, %v3009_v53  ;;  %vm16351_vm7 = vcmp.eq.f32.partialorder %v2729_v36, 8.507059e+37  ;;  %v16356_v59 = vadd.f32 1.0, %v11868_v49  ;;  %v16372_v53 = vpop.f32.mrf.mxu0  ;;  %v11298_v36 = vld [vmem:[%s20209_s3 + $0x314] sm:$0xf0]  ;;  %v9993_v49 = vld [vmem:[%s20209_s3 + $0x390] sm:$0xf] }
 0x24d   :  { %v16346_v22 = vpop.eup %11869  ;;  %11875 = vrcp.f32 %v16295_v24  ;;  %4557 = vmatpush.bf16.msra.mxu2 %v10002_v15  ;;  %v16363_v51 = vmul.f32 %v16213_v7, %v15618_v34  ;;  %v16366_v41 = vmul.f32 %v2433_v18, %v15694_v40  ;;  %vm2725_vm9 = vweird.f32 %v16021_v13  ;;  %v11314_v34 = vld [vmem:[%s20209_s3 + $0x394] sm:$0xf0] }
 0x24e   :  { %v11872_v62 = vpop.eup %11871  ;;  %v16370_v21 = vadd.f32 %v16100_v30, %v1449_v3  ;;  %v2868_v40 = vsel %vm16239_vm14, %v16169_v46, %v2863_v5  ;;  %v2583_v13 = vsel %vm16259_vm15, %v16176_v9, %v2578_v28  ;;  %vm16391_vm10 = vmor %vm2725_vm9, %vm2726_vm8  ;;  %v2732_v7 = vor.u32 1.1754944e-38, %v2731_v12 }
 0x24f   :  { %v9938_v18 = vor.u32 %v11300_v2, %v9937_v48  ;;  %v3018_v58 = vsel %vm16309_vm5, %v3017_v37, %v3013_v60  ;;  %v2728_v26 = vsel %vm16391_vm10, %v16155_v57, %v2724_v19  ;;  %v3158_v46 = vmul.f32 %v16237_v6, %v3157_v33 }
 0x250   :  { %v2871_v9 = vmul.f32 %v16346_v22, %v16235_v4  ;;  %vm3160_vm11 = vweird.f32 %v16140_v23  ;;  %v16404_v63 = vadd.f32 1.0, %v11872_v62  ;;  %v9930_v3 = vor.u32 %v11298_v36, %v9929_v20 }
 0x251   :  { %4524 = vmatpush.bf16.msra.mxu0 %v9938_v18  ;;  %v9994_v5 = vor.u32 %v11314_v34, %v9993_v49  ;;  %vm3161_vm12 = vweird.f32 %v16237_v6  ;;  %11877 = vrcp.f32 %v16356_v59  ;;  %v9454_v57 = vmul.f32 -1.442695, %v16370_v21  ;;  %v1397_v39 = vpop.f32.mrf.mxu1  ;;  %v9921_v49 = vld [vmem:[%s20209_s3 + $0x300] sm:$0xf] }
 0x252   :  { %v16406_v28 = vpop.eup %11873  ;;  %v1390_v45 = vadd.f32 %v16076_v11, %v15697_v25  ;;  %v16416_v12 = vmul.f32 %v2868_v40, %v15329_v38  ;;  %v16419_v15 = vmul.f32 %v2583_v13, %v15331_v42  ;;  %v3164_v50 = vand.u32 2147483647, %v16140_v23  ;;  %vm16431_vm13 = vmor %vm3160_vm11, %vm3161_vm12  ;;  %v16447_v36 = vpop.f32.mrf.mxu2 }
 0x253   :  { %v16413_v37 = vpop.eup %11875  ;;  %v3166_v19 = vand.u32 2147483648, %v16140_v23  ;;  %4558 = vmatpush.bf16.msra.mxu2 %v9994_v5  ;;  %v16424_v33 = vmul.f32 %v3018_v58, %v15786_v55  ;;  %v2733_v48 = vsel %vm16351_vm7, %v2732_v7, %v2728_v26  ;;  %v3159_v11 = vadd.f32 %v16237_v6, %v3158_v46  ;;  %v1430_v34 = vpop.f32.mrf.mxu3  ;;  %v9985_v46 = vld [vmem:[%s20209_s3 + $0x380] sm:$0xf] }
 0x254   :  { %v2872_v2 = vsub.f32 1.0, %v2871_v9  ;;  %v3021_v42 = vmul.f32 %v16406_v28, %v16284_v8  ;;  %11879 = vrcp.f32 %v16404_v63  ;;  %v9473_v55 = vmul.f32 -1.442695, %v16036_v31  ;;  %v16473_v26 = vpop.f32.mrf.mxu0 }
 0x255   :  { %v1451_v60 = vadd.f32 %v16142_v16, %v16265_v35  ;;  %4525 = vmatpush.bf16.msra.mxu0 %v9930_v3  ;;  %v2879_v20 = vand.u32 2147483647, %v16235_v4  ;;  %v3171_v23 = vmul.f32 %v16413_v37, %v16295_v24  ;;  %11881 = vpow2.f32 %v9454_v57  ;;  %v11296_v16 = vld [vmem:[%s20209_s3 + $0x304] sm:$0xf0] }
 0x256   :  { %v16445_v62 = vadd.f32 %v16111_v52, %v1390_v45  ;;  %v16456_v40 = vmul.f32 %v2733_v48, %v15839_v61  ;;  %vm16458_vm14 = vcmp.eq.f32.partialorder %v3164_v50, 8.507059e+37  ;;  %v3167_v52 = vor.u32 1.1754944e-38, %v3166_v19 }
 0x257   :  { %v16463_v30 = vadd.f32 %v16217_v47, %v1451_v60  ;;  %v16465_v7 = vpop.eup %11877  ;;  %v3163_v18 = vsel %vm16431_vm13, %v16237_v6, %v3159_v11  ;;  %v2873_v58 = vmul.f32 %v16346_v22, %v2872_v2  ;;  %vm2875_vm0 = vweird.f32 %v16235_v4  ;;  %v11312_v47 = vld [vmem:[%s20209_s3 + $0x384] sm:$0xf0] }
 0x258   :  { %20837 = vst [vmem:[#allocation43_spill] sm:$0xff] %v16445_v62  ;;  %v2881_v61 = vand.u32 2147483648, %v16235_v4  ;;  %v3022_v9 = vsub.f32 1.0, %v3021_v42  ;;  %11883 = vpow2.f32 %v9473_v55  ;;  %v1398_v6 = vadd.f32 %v1397_v39, %v15697_v25  ;;  %v20842_v39 = vld [vmem:[#allocation38_spill] sm:$0xff] }
 0x259   :  { %v9922_v3 = vor.u32 %v11296_v16, %v9921_v49  ;;  %vm2876_vm15 = vweird.f32 %v16346_v22  ;;  %vm16483_vm1 = vcmp.eq.f32.partialorder %v2879_v20, 8.507059e+37  ;;  %v3031_v57 = vand.u32 2147483648, %v16284_v8  ;;  %v20843_v20 = vld [vmem:[#allocation53_spill] sm:$0xff]  ;;  %v20845_v49 = vld [vmem:[#allocation16_spill] sm:$0xff]  ;;  %v20846_v16 = vld [vmem:[#allocation26_spill] sm:$0xff] }
 0x25a   :  { %v3172_v45 = vsub.f32 1.0, %v3171_v23  ;;  %v9483_v50 = vmul.f32 -1.442695, %v16445_v62  ;;  %v16489_v19 = vpop.eup %11879  ;;  %v3029_v48 = vand.u32 2147483647, %v16284_v8  ;;  %v1986_v11 = vmul.f32 %v16465_v7, %v16356_v59  ;;  %vm16522_vm3 = vmor %vm2875_vm0, %vm2876_vm15 }
 0x25b   :  { %v9464_v2 = vmul.f32 -1.442695, %v16463_v30  ;;  %4526 = vmatpush.bf16.msra.mxu0 %v9922_v3  ;;  %v9986_v38 = vor.u32 %v11312_v47, %v9985_v46  ;;  %v11882_v42 = vpop.eup %11881  ;;  %v3168_v55 = vsel %vm16458_vm14, %v3167_v52, %v3163_v18  ;;  %v2874_v60 = vadd.f32 %v16346_v22, %v2873_v58  ;;  %v20852_v3 = vld [vmem:[#allocation5_spill] sm:$0xff] }
 0x25c   :  { %v16500_v23 = vpack.c.bf16 %v20843_v20, %v20842_v39  ;;  %v16504_v54 = vpack.c.bf16 %v20846_v16, %v20845_v49  ;;  %v2882_v44 = vor.u32 1.1754944e-38, %v2881_v61  ;;  %v3023_v31 = vmul.f32 %v16406_v28, %v3022_v9  ;;  %v20849_v61 = vld [vmem:[#allocation49_spill] sm:$0xff]  ;;  %v16555_v20 = vpop.f32.mrf.mxu0 }
 0x25d   :  { %vm3025_vm2 = vweird.f32 %v16284_v8  ;;  %4559 = vmatpush.bf16.msra.mxu2 %v9986_v38  ;;  %v16508_v46 = vadd.f32 %v1430_v34, %v1398_v6  ;;  %v16510_v13 = vor.u32 1.1754944e-38, %v3031_v57  ;;  %v3173_v52 = vmul.f32 %v16413_v37, %v3172_v45  ;;  %v16529_v57 = vpop.f32.mrf.mxu1  ;;  %v16544_v38 = vpop.f32.mrf.mxu3 }
 0x25e   :  { %20844 = vst [vmem:[#allocation7_spill] sm:$0xff] %v16500_v23  ;;  %v2136_v18 = vmul.f32 %v16489_v19, %v16404_v63  ;;  %11885 = vpow2.f32 %v9483_v50  ;;  %4466 = vmatmul.bf16.gmra.mxu1 %v16500_v23  ;;  %4499 = vmatmul.bf16.gmra.mxu3 %v16504_v54  ;;  %v11884_v58 = vpop.eup %11883  ;;  %v3301_v47 = vmul.f32 %v3168_v55, %v20849_v61  ;;  %v1987_v9 = vsub.f32 1.0, %v1986_v11  ;;  %v20877_v23 = vld [vmem:[#allocation48_spill] sm:$0xff] }
 0x25f   :  { %20847 = vst [vmem:[#allocation9_spill] sm:$0xff] %v16504_v54  ;;  %v16526_v6 = vadd.f32 1.0, %v11882_v42  ;;  %11887 = vpow2.f32 %v9464_v2  ;;  %4527 = vmatmul.bf16.vlgmr.msra.gmra.mxu0 %v20852_v3  ;;  %v2878_v45 = vsel %vm16522_vm3, %v16346_v22, %v2874_v60  ;;  %vm3026_vm4 = vweird.f32 %v16406_v28  ;;  %v16542_v2 = vpop.f32.mrf.mxu2  ;;  %v20876_v54 = vld [vmem:[#allocation32_spill] sm:$0xff] }
 0x260   :  { %20848 = vst [vmem:[#allocation52_spill] sm:$0xff] %v16508_v46  ;;  %vm16535_vm5 = vcmp.eq.f32.partialorder %v3029_v48, 8.507059e+37  ;;  %v3179_v50 = vand.u32 2147483647, %v16295_v24  ;;  %v3181_v11 = vand.u32 2147483648, %v16295_v24  ;;  %4560 = vmatmul.bf16.vlgmr.msra.gmra.mxu2 %v16095_v27  ;;  %v3024_v42 = vadd.f32 %v16406_v28, %v3023_v31  ;;  %vm16567_vm7 = vmor %vm3025_vm2, %vm3026_vm4 }
 0x261   :  { %vm3175_vm6 = vweird.f32 %v16295_v24  ;;  %v1994_v22 = vand.u32 2147483647, %v16356_v59  ;;  %v1395_v48 = vadd.f32 %v16323_v32, %v15697_v25  ;;  %v3174_v55 = vadd.f32 %v16413_v37, %v3173_v52  ;;  %v11358_v24 = vld [vmem:[%s20209_s3 + $0x4f4] sm:$0xf0] }
 0x262   :  { %vm3176_vm8 = vweird.f32 %v16413_v37  ;;  %v2137_v60 = vsub.f32 1.0, %v2136_v18  ;;  %v16553_v39 = vadd.f32 1.0, %v11884_v58  ;;  %v16557_v49 = vpack.c.bf16 %v3301_v47, %v3301_v47 }
 0x263   :  { %v2883_v31 = vsel %vm16483_vm1, %v2882_v44, %v2878_v45  ;;  %v1988_v16 = vmul.f32 %v16465_v7, %v1987_v9  ;;  %11889 = vrcp.f32 %v16526_v6  ;;  %vm16571_vm9 = vcmp.eq.f32.partialorder %v3179_v50, 8.507059e+37  ;;  %vm16581_vm10 = vmor %vm3175_vm6, %vm3176_vm8  ;;  %v10169_v9 = vld [vmem:[%s20209_s3 + $0x4f0] sm:$0xf] }
 0x264   :  { %20855 = vst [vmem:[#allocation24_spill] sm:$0xff] %v16557_v49  ;;  %v11886_v61 = vpop.eup %11885  ;;  %v3182_v18 = vor.u32 1.1754944e-38, %v3181_v11  ;;  %v1996_v44 = vand.u32 2147483648, %v16356_v59  ;;  %v9493_v5 = vmul.f32 -1.442695, %v16267_v1  ;;  %vm1990_vm11 = vweird.f32 %v16356_v59 }
 0x265   :  { %v11888_v58 = vpop.eup %11887  ;;  %vm1991_vm12 = vweird.f32 %v16465_v7  ;;  %vm16587_vm13 = vcmp.eq.f32.partialorder %v1994_v22, 8.507059e+37  ;;  %v16592_v34 = vadd.f32 %v16344_v56, %v1395_v48  ;;  %v3028_v45 = vsel %vm16567_vm7, %v16406_v28, %v3024_v42  ;;  %v1402_v27 = vpop.f32.mrf.mxu1 }
 0x266   :  { %v3178_v50 = vsel %vm16581_vm10, %v16413_v37, %v3174_v55  ;;  %v2138_v11 = vmul.f32 %v16489_v19, %v2137_v60  ;;  %11891 = vrcp.f32 %v16553_v39  ;;  %v1989_v56 = vadd.f32 %v16465_v7, %v1988_v16  ;;  %vm16615_vm14 = vmor %vm1990_vm11, %vm1991_vm12  ;;  %v1435_v60 = vpop.f32.mrf.mxu3 }
 0x267   :  { %v16609_v22 = vadd.f32 1.0, %v11886_v61  ;;  %v1454_v48 = vadd.f32 %v16244_v43, %v16265_v35  ;;  %v10170_v3 = vor.u32 %v11358_v24, %v10169_v9  ;;  %v1997_v37 = vor.u32 1.1754944e-38, %v1996_v44  ;;  %v20866_v61 = vld [vmem:[#allocation56_spill] sm:$0xff]  ;;  %v10105_v44 = vld [vmem:[%s20209_s3 + $0x470] sm:$0xf]  ;;  %v16640_v4 = vpop.f32.mrf.mxu2 }
 0x268   :  { %v16619_v42 = vadd.f32 1.0, %v11888_v58  ;;  %11893 = vpow2.f32 %v9493_v5  ;;  %v1403_v55 = vadd.f32 %v1402_v27, %v15697_v25  ;;  %v16625_v32 = vmul.f32 %v2883_v31, %v20866_v61  ;;  %v9659_v31 = vld [vmem:[%s20209_s3 + $0xf8] sm:$0xf0] }
 0x269   :  { %v16622_v16 = vpop.eup %11889  ;;  %v3033_v43 = vsel %vm16535_vm5, %v16510_v13, %v3028_v45  ;;  %v2144_v59 = vand.u32 2147483647, %v16404_v63  ;;  %v9503_v8 = vmul.f32 -1.442695, %v16592_v34  ;;  %4618 = vmatpush.bf16.msrb.mxu3 %v10170_v3  ;;  %v3183_v27 = vsel %vm16571_vm9, %v3182_v18, %v3178_v50  ;;  %v11342_v13 = vld [vmem:[%s20209_s3 + $0x474] sm:$0xf0]  ;;  %v16664_v45 = vpop.f32.mrf.mxu0 }
 0x26a   :  { %v2139_v5 = vadd.f32 %v16489_v19, %v2138_v11  ;;  %vm2140_vm0 = vweird.f32 %v16404_v63  ;;  %vm2141_vm15 = vweird.f32 %v16489_v19  ;;  %v11229_v3 = vld [vmem:[%s20209_s3 + $0xf4] sm:$0xf]  ;;  %v1993_v52 = vsel %vm16615_vm14, %v16465_v7, %v1989_v56  ;;  %v20868_v50 = vld [vmem:[#allocation13_spill] sm:$0xff]  ;;  %v20869_v11 = vld [vmem:[#allocation55_spill] sm:$0xff] }
 0x26b   :  { %v2146_v18 = vand.u32 2147483648, %v16404_v63  ;;  %11895 = vrcp.f32 %v16609_v22  ;;  %v16657_v58 = vadd.f32 %v16336_v0, %v1454_v48  ;;  %v2001_v24 = vmul.f32 %v16622_v16, %v16526_v6  ;;  %v20871_v7 = vld [vmem:[#allocation37_spill] sm:$0xff]  ;;  %v20872_v56 = vld [vmem:[#allocation31_spill] sm:$0xff]  ;;  %vm16679_vm1 = vmor %vm2140_vm0, %vm2141_vm15 }
 0x26c   :  { %v16659_v9 = vpop.eup %11891  ;;  %11897 = vrcp.f32 %v16619_v42  ;;  %v16668_v28 = vpack.c.bf16 %v20869_v11, %v20868_v50  ;;  %v16672_v61 = vpack.c.bf16 %v20872_v56, %v20871_v7  ;;  %v3302_v0 = vmul.f32 %v3183_v27, %v15757_v29 }
 0x26d   :  { %20867 = vst [vmem:[#allocation50_spill] sm:$0xff] %v16657_v58  ;;  %v16685_v62 = vpack.c.bf16 %v20877_v23, %v20876_v54  ;;  %v10106_v50 = vor.u32 %v11342_v13, %v10105_v44  ;;  %v9662_v11 = vor.u32 %v11229_v3, %v9659_v31  ;;  %v16688_v7 = vmul.f32 %v3033_v43, %v16074_v17 }
 0x26e   :  { %20870 = vst [vmem:[#allocation15_spill] sm:$0xff] %v16668_v28  ;;  %v11894_v49 = vpop.eup %11893  ;;  %v2143_v29 = vsel %vm16679_vm1, %v16489_v19, %v2139_v5  ;;  %11899 = vpow2.f32 %v9503_v8  ;;  %4471 = vmatmul.bf16.gmra.mxu1 %v16668_v28  ;;  %4504 = vmatmul.bf16.gmra.mxu3 %v16672_v61  ;;  %v16697_v63 = vpack.c.bf16 %v16366_v41, %v16191_v14  ;;  %v2147_v23 = vor.u32 1.1754944e-38, %v2146_v18  ;;  %v1404_v19 = vpop.f32.mrf.mxu1  ;;  %v20880_v18 = vld [vmem:[#allocation34_spill] sm:$0xff] }
 0x26f   :  { %20873 = vst [vmem:[#allocation38_spill] sm:$0xff] %v16672_v61  ;;  %v1998_v54 = vsel %vm16587_vm13, %v1997_v37, %v1993_v52  ;;  %v2286_v17 = vmul.f32 %v16659_v9, %v16553_v39  ;;  %v1456_v43 = vadd.f32 %v16372_v53, %v16265_v35  ;;  %4532 = vmatmul.bf16.gmra.mxu0 %v16685_v62  ;;  %vm2145_vm2 = vcmp.eq.f32.partialorder %v2144_v59, 8.507059e+37  ;;  %v1437_v41 = vpop.f32.mrf.mxu3  ;;  %v11213_v19 = vld [vmem:[%s20209_s3 + $0x74] sm:$0xf] }
 0x270   :  { %20878 = vst [vmem:[#allocation53_spill] sm:$0xff] %v16685_v62  ;;  %4585 = vmatpush.bf16.msrb.mxu1 %v10106_v50  ;;  %v2002_v8 = vsub.f32 1.0, %v2001_v24  ;;  %v9474_v44 = vmul.f32 -1.442695, %v16657_v58  ;;  %4565 = vmatmul.bf16.gmra.mxu2 %v16697_v63  ;;  %v16708_v14 = vadd.f32 %v1435_v60, %v1403_v55  ;;  %v16712_v37 = vpack.c.bf16 %v3302_v0, %v3302_v0  ;;  %v16733_v0 = vpop.f32.mrf.mxu2  ;;  %v20896_v50 = vld [vmem:[#allocation35_spill] sm:$0xff] }
 0x271   :  { %20879 = vst [vmem:[#allocation16_spill] sm:$0xff] %v16697_v63  ;;  %v16710_v47 = vpop.eup %11895  ;;  %v2148_v27 = vsel %vm2145_vm2, %v2147_v23, %v2143_v29  ;;  %v16714_v5 = vadd.f32 1.0, %v11894_v49  ;;  %v16717_v53 = vadd.f32 %v16447_v36, %v1456_v43  ;;  %4684 = vmatpush.bf16.msrb.mxu2 %v9662_v11  ;;  %v3223_v13 = vmul.f32 %v1998_v54, %v15767_v10  ;;  %v16747_v54 = vpop.f32.mrf.mxu0  ;;  %v9651_v63 = vld [vmem:[%s20209_s3 + $0xe8] sm:$0xf0] }
 0x272   :  { %v16719_v59 = vpop.eup %11897  ;;  %v2296_v3 = vand.u32 2147483648, %v16553_v39  ;;  %v2009_v55 = vand.u32 2147483647, %v16526_v6  ;;  %v2011_v60 = vand.u32 2147483648, %v16526_v6  ;;  %v2287_v31 = vsub.f32 1.0, %v2286_v17 }
 0x273   :  { %vm2290_vm3 = vweird.f32 %v16553_v39  ;;  %v2294_v49 = vand.u32 2147483647, %v16553_v39  ;;  %v1400_v36 = vadd.f32 %v16529_v57, %v15697_v25  ;;  %v3233_v24 = vmul.f32 %v2148_v27, %v20880_v18 }
 0x274   :  { %v11900_v52 = vpop.eup %11899  ;;  %v2003_v56 = vmul.f32 %v16622_v16, %v2002_v8  ;;  %v2436_v10 = vmul.f32 %v16710_v47, %v16609_v22  ;;  %11901 = vpow2.f32 %v9474_v44  ;;  %vm2005_vm4 = vweird.f32 %v16526_v6  ;;  %v9595_v8 = vld [vmem:[%s20209_s3 + $0x78] sm:$0xf0] }
 0x275   :  { %v2151_v48 = vmul.f32 %v16719_v59, %v16619_v42  ;;  %11903 = vrcp.f32 %v16714_v5  ;;  %v9484_v25 = vmul.f32 -1.442695, %v16717_v53  ;;  %v16740_v57 = vor.u32 1.1754944e-38, %v2296_v3  ;;  %v10161_v3 = vld [vmem:[%s20209_s3 + $0x4e0] sm:$0xf] }
 0x276   :  { %vm16742_vm5 = vcmp.eq.f32.partialorder %v2009_v55, 8.507059e+37  ;;  %v2012_v11 = vor.u32 1.1754944e-38, %v2011_v60  ;;  %v2446_v29 = vand.u32 2147483648, %v16609_v22  ;;  %v2288_v23 = vmul.f32 %v16659_v9, %v2287_v31  ;;  %v11356_v55 = vld [vmem:[%s20209_s3 + $0x4e4] sm:$0xf0]  ;;  %v4330_v62 = vpop.f32.mrf.mxu1 }
 0x277   :  { %vm2291_vm6 = vweird.f32 %v16659_v9  ;;  %v16751_v17 = vadd.f32 1.0, %v11900_v52  ;;  %v16754_v43 = vadd.f32 %v16544_v38, %v1400_v36  ;;  %v16762_v44 = vpack.c.bf16 %v3233_v24, %v3223_v13 }
 0x278   :  { %vm16764_vm8 = vcmp.eq.f32.partialorder %v2294_v49, 8.507059e+37  ;;  %v2004_v27 = vadd.f32 %v16622_v16, %v2003_v56  ;;  %vm2006_vm7 = vweird.f32 %v16622_v16  ;;  %v2437_v38 = vsub.f32 1.0, %v2436_v10  ;;  %vm16782_vm9 = vmor %vm2290_vm3, %vm2291_vm6  ;;  %v16808_v6 = vpop.f32.mrf.mxu2 }
 0x279   :  { %v2444_v13 = vand.u32 2147483647, %v16609_v22  ;;  %v2152_v60 = vsub.f32 1.0, %v2151_v48  ;;  %v2161_v31 = vand.u32 2147483648, %v16619_v42  ;;  %11905 = vpow2.f32 %v9484_v25  ;;  %vm16796_vm10 = vmor %vm2005_vm4, %vm2006_vm7 }
 0x27a   :  { %v11902_v49 = vpop.eup %11901  ;;  %v16786_v52 = vor.u32 1.1754944e-38, %v2446_v29  ;;  %v2159_v18 = vand.u32 2147483647, %v16619_v42  ;;  %v9598_v24 = vor.u32 %v11213_v19, %v9595_v8  ;;  %v10162_v56 = vor.u32 %v11356_v55, %v10161_v3  ;;  %v10097_v8 = vld [vmem:[%s20209_s3 + $0x460] sm:$0xf] }
 0x27b   :  { %v16789_v10 = vpop.eup %11903  ;;  %v2289_v48 = vadd.f32 %v16659_v9, %v2288_v23  ;;  %11907 = vrcp.f32 %v16751_v17  ;;  %v9513_v25 = vmul.f32 -1.442695, %v16508_v46  ;;  %v9523_v29 = vmul.f32 -1.442695, %v16754_v43  ;;  %v11340_v3 = vld [vmem:[%s20209_s3 + $0x464] sm:$0xf0] }
 0x27c   :  { %v2008_v19 = vsel %vm16796_vm10, %v16622_v16, %v2004_v27  ;;  %v2438_v23 = vmul.f32 %v16710_v47, %v2437_v38  ;;  %vm2440_vm11 = vweird.f32 %v16609_v22  ;;  %4651 = vmatpush.bf16.msrb.mxu0 %v9598_v24  ;;  %4619 = vmatpush.bf16.msrb.mxu3 %v10162_v56  ;;  %v11227_v16 = vld [vmem:[%s20209_s3 + $0xe4] sm:$0xf]  ;;  %v20889_v27 = vld [vmem:[#allocation42_spill] sm:$0xff]  ;;  %v2153_v24 = vmul.f32 %v16719_v59, %v2152_v60  ;;  %v16836_v60 = vpop.f32.mrf.mxu0 }
 0x27d   :  { %v20890_v38 = vld [vmem:[#allocation18_spill] sm:$0xff]  ;;  %vm2155_vm12 = vweird.f32 %v16619_v42  ;;  %v16825_v56 = vor.u32 1.1754944e-38, %v2161_v31  ;;  %v16827_v39 = vadd.f32 1.0, %v11902_v49  ;;  %v2586_v61 = vmul.f32 %v16789_v10, %v16714_v5  ;;  %v3515_v31 = vld [vmem:[%s20210_s4] sm:$0x3] }
 0x27e   :  { %v16821_v55 = vpack.c.bf16 %v20890_v38, %v20889_v27  ;;  %v1459_v27 = vadd.f32 %v16473_v26, %v16265_v35  ;;  %v10098_v38 = vor.u32 %v11340_v3, %v10097_v8  ;;  %v9654_v28 = vor.u32 %v11227_v16, %v9651_v63  ;;  %v11211_v3 = vld [vmem:[%s20209_s3 + $0x64] sm:$0xf]  ;;  %v20899_v16 = vld [vmem:[#allocation39_spill] sm:$0xff] }
 0x27f   :  { %v11906_v49 = vpop.eup %11905  ;;  %v2293_v46 = vsel %vm16782_vm9, %v16659_v9, %v2289_v48  ;;  %v2013_v58 = vsel %vm16742_vm5, %v2012_v11, %v2008_v19  ;;  %vm2441_vm13 = vweird.f32 %v16710_v47  ;;  %11909 = vpow2.f32 %v9513_v25  ;;  %v20895_v9 = vld [vmem:[#allocation6_spill] sm:$0xff] }
 0x280   :  { %4476 = vmatmul.bf16.gmra.mxu1 %v16821_v55  ;;  %v16849_v26 = vadd.f32 %v16710_v47, %v2438_v23  ;;  %vm16851_vm14 = vcmp.eq.f32.partialorder %v2444_v13, 8.507059e+37  ;;  %vm16855_vm0 = vcmp.eq.f32.partialorder %v2159_v18, 8.507059e+37  ;;  %v2596_v36 = vand.u32 2147483648, %v16714_v5  ;;  %4685 = vmatpush.bf16.msrb.mxu2 %v9654_v28  ;;  %vm16875_vm1 = vmor %vm2440_vm11, %vm2441_vm13  ;;  %v4363_v28 = vpop.f32.mrf.mxu3 }
 0x281   :  { %11911 = vpow2.f32 %v9523_v29  ;;  %4586 = vmatpush.bf16.msrb.mxu1 %v10098_v38  ;;  %v16862_v11 = vpack.c.bf16 %v20896_v50, %v20895_v9  ;;  %v16864_v48 = vpop.eup %11907  ;;  %v2154_v13 = vadd.f32 %v16719_v59, %v2153_v24  ;;  %vm2156_vm15 = vweird.f32 %v16719_v59  ;;  %v9587_v24 = vld [vmem:[%s20209_s3 + $0x68] sm:$0xf0]  ;;  %v16931_v38 = vpop.f32.mrf.mxu2 }
 0x282   :  { %11913 = vrcp.f32 %v16827_v39  ;;  %v16869_v18 = vperm.slane %v3515_v31, 0  ;;  %v2587_v25 = vsub.f32 1.0, %v2586_v61  ;;  %v2594_v29 = vand.u32 2147483647, %v16714_v5  ;;  %vm16919_vm3 = vmor %vm2155_vm12, %vm2156_vm15 }
 0x283   :  { %v16880_v19 = vadd.f32 1.0, %v11906_v49  ;;  %v16883_v23 = vadd.f32 %v16542_v2, %v1459_v27  ;;  %4509 = vmatmul.bf16.gmra.mxu3 %v16862_v11  ;;  %v16892_v22 = vsel %vm16764_vm8, %v16740_v57, %v2293_v46  ;;  %v16895_v61 = vmul.f32 %v2013_v58, %v16370_v21  ;;  %v10153_v27 = vld [vmem:[%s20209_s3 + $0x4d0] sm:$0xf]  ;;  %v11354_v46 = vld [vmem:[%s20209_s3 + $0x4d4] sm:$0xf0] }
 0x284   :  { %vm2590_vm2 = vweird.f32 %v16714_v5  ;;  %v16900_v2 = vpack.c.bf16 %v16363_v51, %v20899_v16  ;;  %v2443_v21 = vsel %vm16875_vm1, %v16710_v47, %v16849_v26  ;;  %v16923_v58 = vor.u32 1.1754944e-38, %v2596_v36  ;;  %v9643_v51 = vld [vmem:[%s20209_s3 + $0xd8] sm:$0xf0] }
 0x285   :  { %v2736_v57 = vmul.f32 %v16864_v48, %v16751_v17  ;;  %v16929_v41 = vpack.c.bf16 %v16456_v40, %v16419_v15  ;;  %v11910_v47 = vpop.eup %11909  ;;  %v2158_v42 = vsel %vm16919_vm3, %v16719_v59, %v2154_v13  ;;  %v2311_v31 = vand.u32 2147483648, %v16827_v39  ;;  %v1470_v59 = vpop.f32.mrf.mxu0  ;;  %v10089_v13 = vld [vmem:[%s20209_s3 + $0x450] sm:$0xf] }
 0x286   :  { %20900 = vst [vmem:[#allocation26_spill] sm:$0xff] %v16900_v2  ;;  %v1461_v49 = vadd.f32 %v16555_v20, %v16265_v35  ;;  %v4331_v26 = vadd.f32 %v4330_v62, %v16869_v18  ;;  %4537 = vmatmul.bf16.gmra.mxu0 %v16900_v2  ;;  %v2588_v15 = vmul.f32 %v16789_v10, %v2587_v25  ;;  %v9494_v40 = vmul.f32 -1.442695, %v16883_v23  ;;  %v11338_v62 = vld [vmem:[%s20209_s3 + $0x454] sm:$0xf0] }
 0x287   :  { %20903 = vst [vmem:[#allocation49_spill] sm:$0xff] %v16929_v41  ;;  %v11912_v36 = vpop.eup %11911  ;;  %4570 = vmatmul.bf16.gmra.mxu2 %v16929_v41  ;;  %v9590_v9 = vor.u32 %v11211_v3, %v9587_v24  ;;  %v10154_v50 = vor.u32 %v11354_v46, %v10153_v27  ;;  %vm16952_vm4 = vcmp.eq.f32.partialorder %v2594_v29, 8.507059e+37  ;;  %11915 = vrcp.f32 %v16880_v19  ;;  %v4332_v24 = vpop.f32.mrf.mxu1  ;;  %v11225_v46 = vld [vmem:[%s20209_s3 + $0xd4] sm:$0xf] }
 0x288   :  { %v16950_v20 = vpop.eup %11913  ;;  %v16958_v3 = vadd.f32 %v16640_v4, %v1461_v49  ;;  %v4364_v16 = vadd.f32 %v4363_v28, %v4331_v26  ;;  %v10090_v27 = vor.u32 %v11338_v62, %v10089_v13  ;;  %vm2591_vm5 = vweird.f32 %v16789_v10  ;;  %v11209_v4 = vld [vmem:[%s20209_s3 + $0x54] sm:$0xf]  ;;  %v11336_v62 = vld [vmem:[%s20209_s3 + $0x444] sm:$0xf0] }
 0x289   :  { %v2737_v59 = vsub.f32 1.0, %v2736_v57  ;;  %v16968_v41 = vadd.f32 1.0, %v11910_v47  ;;  %4652 = vmatpush.bf16.msrb.mxu0 %v9590_v9  ;;  %4620 = vmatpush.bf16.msrb.mxu3 %v10154_v50  ;;  %v16976_v49 = vsel %vm16851_vm14, %v16786_v52, %v2443_v21  ;;  %v2163_v26 = vsel %vm16855_vm0, %v16825_v56, %v2158_v42  ;;  %v9579_v47 = vld [vmem:[%s20209_s3 + $0x58] sm:$0xf0]  ;;  %v10145_v9 = vld [vmem:[%s20209_s3 + $0x4c0] sm:$0xf]  ;;  %vm17005_vm6 = vmor %vm2590_vm2, %vm2591_vm5 }
 0x28a   :  { %v16981_v28 = vadd.f32 1.0, %v11912_v36  ;;  %4587 = vmatpush.bf16.msrb.mxu1 %v10090_v27  ;;  %v9646_v57 = vor.u32 %v11225_v46, %v9643_v51  ;;  %v16990_v63 = vadd.f32 %v16789_v10, %v2588_v15  ;;  %v2301_v52 = vmul.f32 %v16950_v20, %v16827_v39  ;;  %v11352_v21 = vld [vmem:[%s20209_s3 + $0x4c4] sm:$0xf0]  ;;  %v10081_v42 = vld [vmem:[%s20209_s3 + $0x440] sm:$0xf]  ;;  %v1503_v46 = vpop.f32.mrf.mxu2 }
 0x28b   :  { %v2744_v56 = vand.u32 2147483647, %v16751_v17  ;;  %v9582_v8 = vor.u32 %v11209_v4, %v9579_v47  ;;  %v17009_v15 = vor.u32 1.1754944e-38, %v2311_v31  ;;  %v2746_v50 = vand.u32 2147483648, %v16751_v17  ;;  %v9635_v51 = vld [vmem:[%s20209_s3 + $0xc8] sm:$0xf0]  ;;  %v4365_v46 = vpop.f32.mrf.mxu3 }
 0x28c   :  { %11917 = vpow2.f32 %v9494_v40  ;;  %v9504_v13 = vmul.f32 -1.442695, %v16958_v3  ;;  %4686 = vmatpush.bf16.msrb.mxu2 %v9646_v57  ;;  %v3234_v27 = vmul.f32 %v2163_v26, %v16463_v30  ;;  %v2738_v5 = vmul.f32 %v16864_v48, %v2737_v59  ;;  %v11223_v40 = vld [vmem:[%s20209_s3 + $0xc4] sm:$0xf]  ;;  %v10073_v4 = vld [vmem:[%s20209_s3 + $0x430] sm:$0xf] }
 0x28d   :  { %11919 = vrcp.f32 %v16968_v41  ;;  %4653 = vmatpush.bf16.msrb.mxu0 %v9582_v8  ;;  %v10146_v31 = vor.u32 %v11352_v21, %v10145_v9  ;;  %v17028_v30 = vpop.eup %11915  ;;  %v4333_v59 = vadd.f32 %v4332_v24, %v16869_v18  ;;  %v10082_v26 = vor.u32 %v11336_v62, %v10081_v42  ;;  %v11334_v47 = vld [vmem:[%s20209_s3 + $0x434] sm:$0xf0]  ;;  %v10137_v9 = vld [vmem:[%s20209_s3 + $0x4b0] sm:$0xf]  ;;  %v4396_v24 = vpop.f32.mrf.mxu0  ;;  %v20908_v42 = vld [vmem:[#allocation28_spill] sm:$0xff] }
 0x28e   :  { %11921 = vrcp.f32 %v16981_v28  ;;  %v9638_v57 = vor.u32 %v11223_v40, %v9635_v51  ;;  %v2593_v8 = vsel %vm17005_vm6, %v16789_v10, %v16990_v63  ;;  %v2302_v21 = vsub.f32 1.0, %v2301_v52  ;;  %v11350_v40 = vld [vmem:[%s20209_s3 + $0x4b4] sm:$0xf0]  ;;  %v11207_v51 = vld [vmem:[%s20209_s3 + $0x44] sm:$0xf] }
 0x28f   :  { %vm2740_vm8 = vweird.f32 %v16751_v17  ;;  %4621 = vmatpush.bf16.msrb.mxu3 %v10146_v31  ;;  %v10074_v62 = vor.u32 %v11334_v47, %v10073_v4  ;;  %vm2741_vm7 = vweird.f32 %v16864_v48  ;;  %v17051_v10 = vadd.f32 %v4365_v46, %v4333_v59  ;;  %v4335_v63 = vpop.f32.mrf.mxu1  ;;  %4588 = vmatpush.bf16.msrb.mxu1 %v10082_v26  ;;  %v9571_v31 = vld [vmem:[%s20209_s3 + $0x48] sm:$0xf0]  ;;  %v10065_v4 = vld [vmem:[%s20209_s3 + $0x420] sm:$0xf]  ;;  %v11332_v26 = vld [vmem:[%s20209_s3 + $0x424] sm:$0xf0] }
 0x290   :  { %4481 = vmatmul.bf16.gmra.mxu1 %v20908_v42  ;;  %v4397_v52 = vadd.f32 %v4396_v24, %v4364_v16  ;;  %4687 = vmatpush.bf16.msrb.mxu2 %v9638_v57  ;;  %v10138_v36 = vor.u32 %v11350_v40, %v10137_v9  ;;  %v17060_v47 = vadd.f32 %v16864_v48, %v2738_v5  ;;  %11923 = vpow2.f32 %v9504_v13  ;;  %v10129_v57 = vld [vmem:[%s20209_s3 + $0x4a0] sm:$0xf]  ;;  %v11348_v9 = vld [vmem:[%s20209_s3 + $0x4a4] sm:$0xf0]  ;;  %vm17096_vm10 = vmor %vm2740_vm8, %vm2741_vm7 }
 0x291   :  { %v17064_v59 = vmul.f32 %v17028_v30, %v16880_v19  ;;  %v9574_v16 = vor.u32 %v11207_v51, %v9571_v31  ;;  %v17076_v46 = vpack.c.bf16 %v3234_v27, %v16895_v61  ;;  %vm17078_vm9 = vcmp.eq.f32.partialorder %v2744_v56, 8.507059e+37  ;;  %v11219_v56 = vld [vmem:[%s20209_s3 + $0xa4] sm:$0xf] }
 0x292   :  { %v11918_v5 = vpop.eup %11917  ;;  %v17082_v13 = vor.u32 1.1754944e-38, %v2746_v50  ;;  %v1464_v40 = vadd.f32 %v16664_v45, %v16265_v35  ;;  %v2598_v31 = vsel %vm16952_vm4, %v16923_v58, %v2593_v8  ;;  %v2303_v29 = vmul.f32 %v16950_v20, %v2302_v21  ;;  %v20913_v50 = vld [vmem:[#allocation46_spill] sm:$0xff]  ;;  %v9627_v45 = vld [vmem:[%s20209_s3 + $0xb8] sm:$0xf0] }
 0x293   :  { %v17086_v51 = vpop.eup %11919  ;;  %4514 = vmatmul.bf16.gmra.mxu3 %v20913_v50  ;;  %4654 = vmatpush.bf16.msrb.mxu0 %v9574_v16  ;;  %v17106_v58 = vld [vmem:[%s20209_s3 + $0x410] sm:$0xf]  ;;  %v17112_v17 = vpack.c.bf16 %v16424_v33, %v16416_v12  ;;  %v10066_v27 = vor.u32 %v11332_v26, %v10065_v4  ;;  %v10130_v8 = vor.u32 %v11348_v9, %v10129_v57  ;;  %v11330_v21 = vld [vmem:[%s20209_s3 + $0x414] sm:$0xf0]  ;;  %v11221_v16 = vld [vmem:[%s20209_s3 + $0xb4] sm:$0xf]  ;;  %v4429_v4 = vpop.f32.mrf.mxu2  ;;  %vm2306_vm11 = vweird.f32 %v16950_v20 }
 0x294   :  { %v17108_v25 = vpop.eup %11921  ;;  %4589 = vmatpush.bf16.msrb.mxu1 %v10074_v62  ;;  %4622 = vmatpush.bf16.msrb.mxu3 %v10138_v36  ;;  %v2743_v12 = vsel %vm17096_vm10, %v16864_v48, %v17060_v47  ;;  %v2452_v33 = vsub.f32 1.0, %v17064_v59  ;;  %v17128_v62 = vadd.f32 1.0, %v11918_v5  ;;  %v17132_v36 = vpack.c.bf16 %v16688_v7, %v16625_v32  ;;  %v10121_v26 = vld [vmem:[%s20209_s3 + $0x490] sm:$0xf]  ;;  %v11346_v57 = vld [vmem:[%s20209_s3 + $0x494] sm:$0xf0] }
 0x295   :  { %20914 = vst [vmem:[#allocation56_spill] sm:$0xff] %v17112_v17  ;;  %v17142_v48 = vmul.f32 %v17086_v51, %v16968_v41  ;;  %v17145_v47 = vadd.f32 %v16733_v0, %v1464_v40  ;;  %v4336_v59 = vadd.f32 %v4335_v63, %v16869_v18  ;;  %v17149_v32 = vadd.f32 %v4429_v4, %v4397_v52  ;;  %v11205_v7 = vld [vmem:[%s20209_s3 + $0x34] sm:$0xf]  ;;  %v4368_v0 = vpop.f32.mrf.mxu3  ;;  %v4398_v63 = vpop.f32.mrf.mxu0  ;;  %v9563_v4 = vld [vmem:[%s20209_s3 + $0x38] sm:$0xf0] }
 0x296   :  { %20915 = vst [vmem:[#allocation13_spill] sm:$0xff] %v17132_v36  ;;  %4542 = vmatmul.bf16.gmra.mxu0 %v17112_v17  ;;  %v11924_v9 = vpop.eup %11923  ;;  %v17156_v5 = vmul.f32 %v17108_v25, %v16981_v28  ;;  %v1466_v61 = vadd.f32 %v16747_v54, %v16265_v35  ;;  %v10058_v40 = vor.u32 %v11330_v21, %v17106_v58  ;;  %v9619_v17 = vld [vmem:[%s20209_s3 + $0xa8] sm:$0xf0]  ;;  %v10049_v58 = vld [vmem:[%s20209_s3 + $0x400] sm:$0xf]  ;;  %vm2305_vm12 = vweird.f32 %v16827_v39 }
 0x297   :  { %4575 = vmatmul.bf16.gmra.mxu2 %v17132_v36  ;;  %v9630_v52 = vor.u32 %v11221_v16, %v9627_v45  ;;  %v4369_v54 = vadd.f32 %v4368_v0, %v4336_v59  ;;  %v4337_v36 = vpop.f32.mrf.mxu1  ;;  %v4399_v2 = vadd.f32 %v4398_v63, %v17051_v10  ;;  %v10122_v45 = vor.u32 %v11346_v57, %v10121_v26  ;;  %v11203_v21 = vld [vmem:[%s20209_s3 + $0x24] sm:$0xf]  ;;  %v9555_v16 = vld [vmem:[%s20209_s3 + $0x28] sm:$0xf0]  ;;  %v10113_v26 = vld [vmem:[%s20209_s3 + $0x480] sm:$0xf] }
 0x298   :  { %4590 = vmatpush.bf16.msrb.mxu1 %v10066_v27  ;;  %4623 = vmatpush.bf16.msrb.mxu3 %v10130_v8  ;;  %v17183_v59 = vadd.f32 %v16950_v20, %v2303_v29  ;;  %v17186_v10 = vadd.f32 %v16808_v6, %v1466_v61  ;;  %v4338_v27 = vadd.f32 %v4337_v36, %v16869_v18  ;;  %v11328_v8 = vld [vmem:[%s20209_s3 + $0x404] sm:$0xf0]  ;;  %v17203_v36 = vadd.f32 1.0, %v11924_v9  ;;  %v11217_v63 = vld [vmem:[%s20209_s3 + $0x94] sm:$0xf]  ;;  %vm17275_vm2 = vmor %vm2305_vm12, %vm2306_vm11 }
 0x299   :  { %4688 = vmatpush.bf16.msrb.mxu2 %v9630_v52  ;;  %v11344_v57 = vld [vmem:[%s20209_s3 + $0x484] sm:$0xf0]  ;;  %v9566_v29 = vor.u32 %v11205_v7, %v9563_v4  ;;  %v3263_v0 = vmul.f32 %v2598_v31, %v16267_v1  ;;  %v2748_v6 = vsel %vm17078_vm9, %v17082_v13, %v2743_v12  ;;  %v9622_v61 = vor.u32 %v11219_v56, %v9619_v17  ;;  %v9611_v52 = vld [vmem:[%s20209_s3 + $0x98] sm:$0xf0] }
 0x29a   :  { %v2453_v7 = vmul.f32 %v17028_v30, %v2452_v33  ;;  %vm2455_vm13 = vweird.f32 %v16880_v19  ;;  %v2887_v1 = vsub.f32 1.0, %v17142_v48  ;;  %v3037_v24 = vsub.f32 1.0, %v17156_v5  ;;  %v11201_v48 = vld [vmem:[%s20209_s3 + $0x14] sm:$0xf]  ;;  %v9547_v5 = vld [vmem:[%s20209_s3 + $0x18] sm:$0xf0] }
 0x29b   :  { %4655 = vmatpush.bf16.msrb.mxu0 %v9566_v29  ;;  %v9558_v13 = vor.u32 %v11203_v21, %v9555_v16  ;;  %vm2456_vm14 = vweird.f32 %v17028_v30  ;;  %v9514_v31 = vmul.f32 -1.442695, %v17145_v47  ;;  %v10050_v56 = vor.u32 %v11328_v8, %v10049_v58  ;;  %v4431_v9 = vpop.f32.mrf.mxu2  ;;  %v9603_v58 = vld [vmem:[%s20209_s3 + $0x88] sm:$0xf0] }
 0x29c   :  { %4591 = vmatpush.bf16.msrb.mxu1 %v10058_v40  ;;  %4624 = vmatpush.bf16.msrb.mxu3 %v10122_v45  ;;  %v10114_v17 = vor.u32 %v11344_v57, %v10113_v26  ;;  %v3273_v12 = vmul.f32 %v2748_v6, %v16592_v34  ;;  %11925 = vrcp.f32 %v17128_v62  ;;  %v9524_v33 = vmul.f32 -1.442695, %v17186_v10  ;;  %v11215_v45 = vld [vmem:[%s20209_s3 + $0x84] sm:$0xf]  ;;  %vm17301_vm5 = vmor %vm2455_vm13, %vm2456_vm14 }
 0x29d   :  { %4689 = vmatpush.bf16.msrb.mxu2 %v9622_v61  ;;  %v9614_v40 = vor.u32 %v11217_v63, %v9611_v52  ;;  %vm2890_vm0 = vweird.f32 %v16968_v41  ;;  %v2894_v4 = vand.u32 2147483647, %v16968_v41  ;;  %11927 = vrcp.f32 %v17203_v36  ;;  %v4370_v57 = vpop.f32.mrf.mxu3  ;;  %v11199_v52 = vld [vmem:[%s20209_s3 + $0x4] sm:$0xf] }
 0x29e   :  { %v17229_v34 = vadd.f32 %v4431_v9, %v4399_v2  ;;  %v17238_v21 = vadd.f32 %v17028_v30, %v2453_v7  ;;  %v2888_v16 = vmul.f32 %v17086_v51, %v2887_v1  ;;  %v2896_v8 = vand.u32 2147483648, %v16968_v41  ;;  %v4401_v2 = vpop.f32.mrf.mxu0  ;;  %v9539_v1 = vld [vmem:[%s20209_s3 + $0x8] sm:$0xf0] }
 0x29f   :  { %v3038_v26 = vmul.f32 %v17108_v25, %v3037_v24  ;;  %4656 = vmatpush.bf16.msrb.mxu0 %v9558_v13  ;;  %11929 = vpow2.f32 %v9514_v31  ;;  %v17243_v29 = vadd.f32 %v4370_v57, %v4338_v27  ;;  %v4340_v6 = vpop.f32.mrf.mxu1  ;;  %v4402_v61 = vadd.f32 %v4401_v2, %v4369_v54  ;;  %v11261_v54 = vld [vmem:[%s20209_s3 + $0x1f4] sm:$0xf]  ;;  %v9787_v27 = vld [vmem:[%s20209_s3 + $0x1f8] sm:$0xf0] }
 0x2a0   :  { %4592 = vmatpush.bf16.msrb.mxu1 %v10050_v56  ;;  %4625 = vmatpush.bf16.msrb.mxu3 %v10114_v17  ;;  %v9550_v63 = vor.u32 %v11201_v48, %v9547_v5  ;;  %11931 = vpow2.f32 %v9524_v33  ;;  %v4341_v7 = vadd.f32 %v4340_v6, %v16869_v18  ;;  %v9606_v24 = vor.u32 %v11215_v45, %v9603_v58 }
 0x2a1   :  { %4690 = vmatpush.bf16.msrb.mxu2 %v9614_v40  ;;  %v17258_v13 = vpack.c.bf16 %v3273_v12, %v3263_v0  ;;  %v20916_v31 = vand.u32 2147483647, %v16827_v39  ;;  %vm2891_vm1 = vweird.f32 %v17086_v51  ;;  %v3044_v17 = vand.u32 2147483647, %v16981_v28 }
 0x2a2   :  { %v3046_v33 = vand.u32 2147483648, %v16981_v28  ;;  %v9790_v9 = vor.u32 %v11261_v54, %v9787_v27  ;;  %v17269_v48 = vpop.eup %11925  ;;  %v20921_v12 = vand.u32 2147483647, %v16880_v19  ;;  %v3039_v40 = vadd.f32 %v17108_v25, %v3038_v26  ;;  %vm17316_vm6 = vmor %vm2890_vm0, %vm2891_vm1  ;;  %v11277_v26 = vld [vmem:[%s20209_s3 + $0x274] sm:$0xf] }
 0x2a3   :  { %vm17262_vm15 = vcmp.eq.f32.partialorder %v20916_v31, 8.507059e+37  ;;  %vm3041_vm4 = vweird.f32 %v17108_v25  ;;  %v1469_v45 = vadd.f32 %v16836_v60, %v16265_v35  ;;  %4593 = vmatmul.bf16.vlgmr.msrb.gmra.mxu1 %v16762_v44  ;;  %4626 = vmatmul.bf16.vlgmr.msrb.gmra.mxu3 %v17076_v46  ;;  %v17291_v39 = vpop.eup %11927  ;;  %v2308_v58 = vsel %vm17275_vm2, %v16950_v20, %v17183_v59  ;;  %v4434_v6 = vpop.f32.mrf.mxu2 }
 0x2a4   :  { %vm17281_vm3 = vcmp.eq.f32.partialorder %v20921_v12, 8.507059e+37  ;;  %v20926_v35 = vand.u32 2147483648, %v16880_v19  ;;  %v2889_v57 = vadd.f32 %v17086_v51, %v2888_v16  ;;  %4657 = vmatpush.bf16.msrb.mxu0 %v9550_v63  ;;  %v9542_v2 = vor.u32 %v11199_v52, %v9539_v1  ;;  %4750 = vmatpush.bf16.msra.mxu3 %v9790_v9  ;;  %v20935_v52 = vld [vmem:[#allocation24_spill] sm:$0xff] }
 0x2a5   :  { %v2458_v20 = vsel %vm17301_vm5, %v17028_v30, %v17238_v21  ;;  %vm17320_vm8 = vcmp.eq.f32.partialorder %v2894_v4, 8.507059e+37  ;;  %v2897_v16 = vor.u32 1.1754944e-38, %v2896_v8  ;;  %vm3040_vm7 = vweird.f32 %v16981_v28  ;;  %4691 = vmatpush.bf16.msrb.mxu2 %v9606_v24  ;;  %v11930_v63 = vpop.eup %11929  ;;  %v4373_v31 = vpop.f32.mrf.mxu3  ;;  %v20939_v19 = vld [vmem:[#allocation52_spill] sm:$0xff] }
 0x2a6   :  { %v2462_v60 = vor.u32 1.1754944e-38, %v20926_v35  ;;  %vm17327_vm9 = vmor %vm3040_vm7, %vm3041_vm4  ;;  %vm17331_vm10 = vcmp.eq.f32.partialorder %v3044_v17, 8.507059e+37  ;;  %v3047_v4 = vor.u32 1.1754944e-38, %v3046_v33  ;;  %v9533_v21 = vmul.f32 -1.442695, %v16708_v14  ;;  %4547 = vmatmul.bf16.gmra.mxu0 %v20935_v52  ;;  %v11932_v28 = vpop.eup %11931  ;;  %v4403_v17 = vpop.f32.mrf.mxu0 }
 0x2a7   :  { %v17337_v8 = vadd.f32 %v4434_v6, %v4402_v61  ;;  %v2601_v1 = vmul.f32 %v17269_v48, %v17128_v62  ;;  %v3043_v24 = vsel %vm17327_vm9, %v17108_v25, %v3039_v40  ;;  %v2751_v54 = vmul.f32 %v17291_v39, %v17203_v36  ;;  %4580 = vmatmul.bf16.gmra.mxu2 %v16712_v37  ;;  %v11245_v61 = vld [vmem:[%s20209_s3 + $0x174] sm:$0xf]  ;;  %v9723_v33 = vld [vmem:[%s20209_s3 + $0x178] sm:$0xf0]  ;;  %v4342_v0 = vpop.f32.mrf.mxu1 }
 0x2a8   :  { %v17347_v27 = vadd.f32 %v16931_v38, %v1469_v45  ;;  %v11293_v25 = vld [vmem:[%s20209_s3 + $0x2f4] sm:$0xf]  ;;  %v2893_v38 = vsel %vm17316_vm6, %v17086_v51, %v2889_v57  ;;  %v4374_v9 = vadd.f32 %v4373_v31, %v4341_v7  ;;  %v4404_v12 = vadd.f32 %v4403_v17, %v17243_v29  ;;  %4658 = vmatpush.bf16.msrb.mxu0 %v9542_v2  ;;  %v9915_v45 = vld [vmem:[%s20209_s3 + $0x2f8] sm:$0xf0]  ;;  %v11259_v57 = vld [vmem:[%s20209_s3 + $0x1e4] sm:$0xf] }
 0x2a9   :  { %v9726_v40 = vor.u32 %v11245_v61, %v9723_v33  ;;  %v9851_v35 = vld [vmem:[%s20209_s3 + $0x278] sm:$0xf0]  ;;  %v17372_v59 = vadd.f32 1.0, %v11930_v63  ;;  %v4343_v51 = vadd.f32 %v4342_v0, %v16869_v18  ;;  %v9918_v7 = vor.u32 %v11293_v25, %v9915_v45  ;;  %v9779_v2 = vld [vmem:[%s20209_s3 + $0x1e8] sm:$0xf0] }
 0x2aa   :  { %v9854_v29 = vor.u32 %v11277_v26, %v9851_v35  ;;  %v2463_v6 = vsel %vm17281_vm3, %v2462_v60, %v2458_v20  ;;  %v3048_v30 = vsel %vm17331_vm10, %v3047_v4, %v3043_v24  ;;  %v17385_v63 = vadd.f32 1.0, %v11932_v28  ;;  %v20936_v0 = vld [vmem:[#allocation43_spill] sm:$0xff]  ;;  %v20937_v20 = vld [vmem:[#allocation30_spill] sm:$0xff]  ;;  %v11243_v24 = vld [vmem:[%s20209_s3 + $0x164] sm:$0xf] }
 0x2ab   :  { %4717 = vmatpush.bf16.msra.mxu1 %v9726_v40  ;;  %v9782_v31 = vor.u32 %v11259_v57, %v9779_v2  ;;  %v2313_v17 = vsel %vm17262_vm15, %v17009_v15, %v2308_v58  ;;  %v2602_v61 = vsub.f32 1.0, %v2601_v1  ;;  %v2752_v33 = vsub.f32 1.0, %v2751_v54  ;;  %4816 = vmatpush.bf16.msra.mxu2 %v9918_v7  ;;  %v4436_v58 = vpop.f32.mrf.mxu2  ;;  %v20938_v4 = vld [vmem:[#allocation50_spill] sm:$0xff]  ;;  %v9715_v54 = vld [vmem:[%s20209_s3 + $0x168] sm:$0xf0] }
 0x2ac   :  { %v9534_v25 = vmul.f32 -1.442695, %v17347_v27  ;;  %4783 = vmatpush.bf16.msra.mxu0 %v9854_v29  ;;  %v3253_v5 = vmul.f32 %v16976_v49, %v20936_v0  ;;  %v2898_v60 = vsel %vm17320_vm8, %v2897_v16, %v2893_v38  ;;  %11933 = vpow2.f32 %v9533_v21  ;;  %v11291_v38 = vld [vmem:[%s20209_s3 + $0x2e4] sm:$0xf]  ;;  %v9907_v7 = vld [vmem:[%s20209_s3 + $0x2e8] sm:$0xf0] }
 0x2ad   :  { %4751 = vmatpush.bf16.msra.mxu3 %v9782_v31  ;;  %v3243_v41 = vmul.f32 %v16892_v22, %v20937_v20  ;;  %v3254_v56 = vmul.f32 %v2463_v6, %v16717_v53  ;;  %v3293_v15 = vmul.f32 %v3048_v30, %v16754_v43  ;;  %11935 = vrcp.f32 %v17372_v59  ;;  %v4375_v53 = vpop.f32.mrf.mxu3 }
 0x2ae   :  { %v3244_v28 = vmul.f32 %v2313_v17, %v20938_v4  ;;  %v2611_v1 = vand.u32 2147483648, %v17128_v62  ;;  %11937 = vrcp.f32 %v17385_v63  ;;  %v17403_v49 = vadd.f32 %v4436_v58, %v4404_v12  ;;  %v4406_v43 = vpop.f32.mrf.mxu0  ;;  %v20944_v58 = vld [vmem:[#allocation17_spill] sm:$0xff] }
 0x2af   :  { %v3283_v16 = vmul.f32 %v2898_v60, %v20939_v19  ;;  %v2603_v21 = vmul.f32 %v17269_v48, %v2602_v61  ;;  %v2753_v22 = vmul.f32 %v17291_v39, %v2752_v33  ;;  %11939 = vpow2.f32 %v9534_v25  ;;  %v4345_v40 = vpop.f32.mrf.mxu1 }
 0x2b0   :  { %v4376_v12 = vadd.f32 %v4375_v53, %v4343_v51  ;;  %v4407_v45 = vadd.f32 %v4406_v43, %v4374_v9  ;;  %v17417_v26 = vpack.c.bf16 %v3253_v5, %v3243_v41  ;;  %v9718_v35 = vor.u32 %v11243_v24, %v9715_v54 }
 0x2b1   :  { %v4346_v29 = vadd.f32 %v4345_v40, %v16869_v18  ;;  %v17423_v57 = vpack.c.bf16 %v3254_v56, %v3244_v28  ;;  %v9910_v2 = vor.u32 %v11291_v38, %v9907_v7  ;;  %v17425_v6 = vpack.c.bf16 %v3293_v15, %v3283_v16  ;;  %v9771_v40 = vld [vmem:[%s20209_s3 + $0x1d8] sm:$0xf0] }
 0x2b2   :  { %v11934_v30 = vpop.eup %11933  ;;  %v2759_v31 = vand.u32 2147483647, %v17203_v36  ;;  %v2761_v51 = vand.u32 2147483648, %v17203_v36  ;;  %4718 = vmatpush.bf16.msra.mxu1 %v9718_v35  ;;  %v2754_v17 = vadd.f32 %v17291_v39, %v2753_v22  ;;  %vm2756_vm11 = vweird.f32 %v17291_v39  ;;  %v9843_v22 = vld [vmem:[%s20209_s3 + $0x268] sm:$0xf0] }
 0x2b3   :  { %v17429_v9 = vpop.eup %11935  ;;  %4598 = vmatmul.bf16.gmra.mxu1 %v17417_v26  ;;  %4631 = vmatmul.bf16.gmra.mxu3 %v17423_v57  ;;  %v2609_v33 = vand.u32 2147483647, %v17128_v62  ;;  %v2604_v0 = vadd.f32 %v17269_v48, %v2603_v21  ;;  %vm2606_vm12 = vweird.f32 %v17269_v48  ;;  %v2612_v5 = vor.u32 1.1754944e-38, %v2611_v1  ;;  %v4439_v60 = vpop.f32.mrf.mxu2  ;;  %v20945_v1 = vld [vmem:[#allocation20_spill] sm:$0xff] }
 0x2b4   :  { %v17435_v61 = vpop.eup %11937  ;;  %4817 = vmatpush.bf16.msra.mxu2 %v9910_v2  ;;  %vm2755_vm13 = vweird.f32 %v17203_v36  ;;  %vm17445_vm0 = vcmp.eq.f32.partialorder %v2759_v31, 8.507059e+37  ;;  %v2762_v56 = vor.u32 1.1754944e-38, %v2761_v51  ;;  %v17449_v15 = vadd.f32 1.0, %v11934_v30  ;;  %v11275_v21 = vld [vmem:[%s20209_s3 + $0x264] sm:$0xf] }
 0x2b5   :  { %v11940_v25 = vpop.eup %11939  ;;  %vm17441_vm14 = vmor %vm2755_vm13, %vm2756_vm11  ;;  %v17452_v4 = vadd.f32 %v4439_v60, %v4407_v45  ;;  %vm2605_vm15 = vweird.f32 %v17128_v62  ;;  %v3051_v28 = vmul.f32 %v17435_v61, %v17385_v63  ;;  %v4378_v19 = vpop.f32.mrf.mxu3  ;;  %v11257_v62 = vld [vmem:[%s20209_s3 + $0x1d4] sm:$0xf]  ;;  %v9846_v38 = vor.u32 %v11275_v21, %v9843_v22  ;;  %v9899_v51 = vld [vmem:[%s20209_s3 + $0x2d8] sm:$0xf0] }
 0x2b6   :  { %4659 = vmatmul.bf16.vlgmr.msrb.gmra.mxu0 %v20944_v58  ;;  %v2758_v36 = vsel %vm17441_vm14, %v17291_v39, %v2754_v17  ;;  %v4408_v16 = vpop.f32.mrf.mxu0  ;;  %vm17472_vm1 = vmor %vm2605_vm15, %vm2606_vm12  ;;  %v17476_v53 = vadd.f32 1.0, %v11940_v25  ;;  %v4379_v43 = vadd.f32 %v4378_v19, %v4346_v29  ;;  %v2901_v35 = vmul.f32 %v17429_v9, %v17372_v59  ;;  %v11241_v29 = vld [vmem:[%s20209_s3 + $0x154] sm:$0xf]  ;;  %v9835_v25 = vld [vmem:[%s20209_s3 + $0x258] sm:$0xf0] }
 0x2b7   :  { %4692 = vmatmul.bf16.vlgmr.msrb.gmra.mxu2 %v20945_v1  ;;  %v4347_v24 = vpop.f32.mrf.mxu1  ;;  %v4409_v54 = vadd.f32 %v4408_v16, %v4376_v12  ;;  %v2608_v45 = vsel %vm17472_vm1, %v17269_v48, %v2604_v0  ;;  %v9774_v2 = vor.u32 %v11257_v62, %v9771_v40  ;;  %v9707_v12 = vld [vmem:[%s20209_s3 + $0x158] sm:$0xf0]  ;;  %v11289_v30 = vld [vmem:[%s20209_s3 + $0x2d4] sm:$0xf]  ;;  %v2763_v48 = vsel %vm17445_vm0, %v2762_v56, %v2758_v36  ;;  %v11255_v39 = vld [vmem:[%s20209_s3 + $0x1c4] sm:$0xf] }
 0x2b8   :  { %v4348_v7 = vadd.f32 %v4347_v24, %v16869_v18  ;;  %4784 = vmatpush.bf16.msra.mxu0 %v9846_v38  ;;  %v9710_v31 = vor.u32 %v11241_v29, %v9707_v12  ;;  %v11273_v17 = vld [vmem:[%s20209_s3 + $0x254] sm:$0xf]  ;;  %vm2610_vm2 = vcmp.eq.f32.partialorder %v2609_v33, 8.507059e+37  ;;  %v3052_v0 = vsub.f32 1.0, %v3051_v28  ;;  %v9763_v24 = vld [vmem:[%s20209_s3 + $0x1c8] sm:$0xf0] }
 0x2b9   :  { %4752 = vmatpush.bf16.msra.mxu3 %v9774_v2  ;;  %v9902_v60 = vor.u32 %v11289_v30, %v9899_v51  ;;  %v9838_v20 = vor.u32 %v11273_v17, %v9835_v25  ;;  %v2613_v41 = vsel %vm2610_vm2, %v2612_v5, %v2608_v45  ;;  %v3274_v56 = vmul.f32 %v2763_v48, %v16958_v3  ;;  %v11239_v45 = vld [vmem:[%s20209_s3 + $0x144] sm:$0xf] }
 0x2ba   :  { %4719 = vmatpush.bf16.msra.mxu1 %v9710_v31  ;;  %11941 = vrcp.f32 %v17449_v15  ;;  %v2902_v58 = vsub.f32 1.0, %v2901_v35  ;;  %v3264_v33 = vmul.f32 %v2613_v41, %v16883_v23  ;;  %v2909_v28 = vand.u32 2147483647, %v17372_v59  ;;  %v9675_v31 = vld [vmem:[%s20209_s3 + $0x118] sm:$0xf0] }
 0x2bb   :  { %v4441_v36 = vpop.f32.mrf.mxu2  ;;  %4818 = vmatpush.bf16.msra.mxu2 %v9902_v60  ;;  %11943 = vrcp.f32 %v17476_v53  ;;  %v3053_v19 = vmul.f32 %v17435_v61, %v3052_v0  ;;  %v2911_v3 = vand.u32 2147483648, %v17372_v59  ;;  %v9766_v40 = vor.u32 %v11255_v39, %v9763_v24  ;;  %v20956_v60 = vld [vmem:[#allocation41_spill] sm:$0xff]  ;;  %v11253_v39 = vld [vmem:[%s20209_s3 + $0x1b4] sm:$0xf]  ;;  %v9755_v24 = vld [vmem:[%s20209_s3 + $0x1b8] sm:$0xf0] }
 0x2bc   :  { %v17510_v1 = vadd.f32 %v4441_v36, %v4409_v54  ;;  %4785 = vmatpush.bf16.msra.mxu0 %v9838_v20  ;;  %v2903_v23 = vmul.f32 %v17429_v9, %v2902_v58  ;;  %v17524_v38 = vpack.c.bf16 %v3274_v56, %v3264_v33  ;;  %vm2906_vm3 = vweird.f32 %v17429_v9  ;;  %v20957_v58 = vld [vmem:[#allocation27_spill] sm:$0xff] }
 0x2bd   :  { %v4380_v5 = vpop.f32.mrf.mxu3  ;;  %v3059_v35 = vand.u32 2147483647, %v17385_v63  ;;  %vm3056_vm4 = vweird.f32 %v17435_v61  ;;  %vm2905_vm5 = vweird.f32 %v17372_v59  ;;  %4753 = vmatpush.bf16.msra.mxu3 %v9766_v40  ;;  %vm17549_vm8 = vcmp.eq.f32.partialorder %v2909_v28, 8.507059e+37  ;;  %v11287_v28 = vld [vmem:[%s20209_s3 + $0x2c4] sm:$0xf] }
 0x2be   :  { %v4411_v16 = vpop.f32.mrf.mxu0  ;;  %v4381_v21 = vadd.f32 %v4380_v5, %v4348_v7  ;;  %v3061_v7 = vand.u32 2147483648, %v17385_v63  ;;  %v2904_v30 = vadd.f32 %v17429_v9, %v2903_v23  ;;  %vm17545_vm6 = vmor %vm2905_vm5, %vm2906_vm3  ;;  %vm3055_vm7 = vweird.f32 %v17385_v63  ;;  %v11237_v5 = vld [vmem:[%s20209_s3 + $0x134] sm:$0xf] }
 0x2bf   :  { %v4350_v22 = vpop.f32.mrf.mxu1  ;;  %v4412_v62 = vadd.f32 %v4411_v16, %v4379_v43  ;;  %v9699_v43 = vld [vmem:[%s20209_s3 + $0x148] sm:$0xf0]  ;;  %v2912_v17 = vor.u32 1.1754944e-38, %v2911_v3  ;;  %vm17554_vm9 = vmor %vm3055_vm7, %vm3056_vm4  ;;  %vm17558_vm10 = vcmp.eq.f32.partialorder %v3059_v35, 8.507059e+37  ;;  %v9758_v40 = vor.u32 %v11253_v39, %v9755_v24 }
 0x2c0   :  { %v4351_v54 = vadd.f32 %v4350_v22, %v16869_v18  ;;  %v9702_v2 = vor.u32 %v11239_v45, %v9699_v43  ;;  %v17535_v29 = vpop.eup %11941  ;;  %v3054_v18 = vadd.f32 %v17435_v61, %v3053_v19  ;;  %v3062_v0 = vor.u32 1.1754944e-38, %v3061_v7  ;;  %v9891_v19 = vld [vmem:[%s20209_s3 + $0x2c8] sm:$0xf0]  ;;  %v11235_v43 = vld [vmem:[%s20209_s3 + $0x124] sm:$0xf] }
 0x2c1   :  { %v17541_v12 = vpop.eup %11943  ;;  %v3186_v41 = vmul.f32 %v17535_v29, %v17449_v15  ;;  %v9894_v22 = vor.u32 %v11287_v28, %v9891_v19  ;;  %v2908_v23 = vsel %vm17545_vm6, %v17429_v9, %v2904_v30  ;;  %v9827_v45 = vld [vmem:[%s20209_s3 + $0x248] sm:$0xf0]  ;;  %4754 = vmatpush.bf16.msra.mxu3 %v9758_v40  ;;  %vm3190_vm11 = vweird.f32 %v17449_v15  ;;  %v11231_v40 = vld [vmem:[%s20209_s3 + $0x104] sm:$0xf] }
 0x2c2   :  { %4720 = vmatpush.bf16.msra.mxu1 %v9702_v2  ;;  %v3058_v63 = vsel %vm17554_vm9, %v17435_v61, %v3054_v18  ;;  %v3201_v56 = vmul.f32 %v17541_v12, %v17476_v53  ;;  %v9683_v9 = vld [vmem:[%s20209_s3 + $0x128] sm:$0xf0]  ;;  %v11251_v2 = vld [vmem:[%s20209_s3 + $0x1a4] sm:$0xf]  ;;  %v2913_v59 = vsel %vm17549_vm8, %v2912_v17, %v2908_v23  ;;  %v11249_v17 = vld [vmem:[%s20209_s3 + $0x194] sm:$0xf]  ;;  %vm3191_vm12 = vweird.f32 %v17535_v29 }
 0x2c3   :  { %4603 = vmatmul.bf16.gmra.mxu1 %v17258_v13  ;;  %4636 = vmatmul.bf16.gmra.mxu3 %v17524_v38  ;;  %v4444_v51 = vpop.f32.mrf.mxu2  ;;  %v3063_v35 = vsel %vm17558_vm10, %v3062_v0, %v3058_v63  ;;  %v9747_v18 = vld [vmem:[%s20209_s3 + $0x1a8] sm:$0xf0]  ;;  %v3187_v30 = vsub.f32 1.0, %v3186_v41  ;;  %v11233_v0 = vld [vmem:[%s20209_s3 + $0x114] sm:$0xf]  ;;  %v3284_v19 = vmul.f32 %v2913_v59, %v17145_v47  ;;  %vm3206_vm13 = vweird.f32 %v17541_v12  ;;  %vm17674_vm14 = vmor %vm3190_vm11, %vm3191_vm12 }
 0x2c4   :  { %v17563_v20 = vadd.f32 %v4444_v51, %v4412_v62  ;;  %v9691_v62 = vld [vmem:[%s20209_s3 + $0x138] sm:$0xf0]  ;;  %4819 = vmatpush.bf16.msra.mxu2 %v9894_v22  ;;  %v3202_v48 = vsub.f32 1.0, %v3201_v56  ;;  %v9686_v51 = vor.u32 %v11235_v43, %v9683_v9  ;;  %v9750_v25 = vor.u32 %v11251_v2, %v9747_v18 }
 0x2c5   :  { %v4383_v36 = vpop.f32.mrf.mxu3  ;;  %v9883_v41 = vld [vmem:[%s20209_s3 + $0x2b8] sm:$0xf0]  ;;  %v3294_v63 = vmul.f32 %v3063_v35, %v17186_v10  ;;  %v3188_v28 = vmul.f32 %v17535_v29, %v3187_v30  ;;  %v3194_v10 = vand.u32 2147483647, %v17449_v15  ;;  %v9678_v23 = vor.u32 %v11233_v0, %v9675_v31  ;;  %v20962_v0 = vld [vmem:[#allocation40_spill] sm:$0xff] }
 0x2c6   :  { %4664 = vmatmul.bf16.gmra.mxu0 %v20956_v60  ;;  %v4413_v33 = vpop.f32.mrf.mxu0  ;;  %v4384_v61 = vadd.f32 %v4383_v36, %v4351_v54  ;;  %v9694_v54 = vor.u32 %v11237_v5, %v9691_v62  ;;  %v11285_v60 = vld [vmem:[%s20209_s3 + $0x2b4] sm:$0xf]  ;;  %v3203_v5 = vmul.f32 %v17541_v12, %v3202_v48  ;;  %4755 = vmatpush.bf16.msra.mxu3 %v9750_v25  ;;  %v3196_v62 = vand.u32 2147483648, %v17449_v15  ;;  %v9819_v43 = vld [vmem:[%s20209_s3 + $0x238] sm:$0xf0] }
 0x2c7   :  { %4697 = vmatmul.bf16.gmra.mxu2 %v20957_v58  ;;  %v4352_v16 = vpop.f32.mrf.mxu1  ;;  %v4414_v3 = vadd.f32 %v4413_v33, %v4381_v21  ;;  %v11271_v21 = vld [vmem:[%s20209_s3 + $0x244] sm:$0xf]  ;;  %v9739_v58 = vld [vmem:[%s20209_s3 + $0x198] sm:$0xf0]  ;;  %v9886_v36 = vor.u32 %v11285_v60, %v9883_v41  ;;  %v17645_v47 = vpack.c.bf16 %v3294_v63, %v3284_v19  ;;  %v3189_v35 = vadd.f32 %v17535_v29, %v3188_v28 }
 0x2c8   :  { %v9830_v7 = vor.u32 %v11271_v21, %v9827_v45  ;;  %4721 = vmatpush.bf16.msra.mxu1 %v9694_v54  ;;  %v9742_v54 = vor.u32 %v11249_v17, %v9739_v58  ;;  %v11247_v21 = vld [vmem:[%s20209_s3 + $0x184] sm:$0xf]  ;;  %v9731_v45 = vld [vmem:[%s20209_s3 + $0x188] sm:$0xf0]  ;;  %v3209_v18 = vand.u32 2147483647, %v17476_v53  ;;  %vm3205_vm0 = vweird.f32 %v17476_v53 }
 0x2c9   :  { %4820 = vmatpush.bf16.msra.mxu2 %v9886_v36  ;;  %v3211_v30 = vand.u32 2147483648, %v17476_v53  ;;  %v3197_v59 = vor.u32 1.1754944e-38, %v3196_v62  ;;  %vm17683_vm15 = vmor %vm3205_vm0, %vm3206_vm13  ;;  %v3193_v41 = vsel %vm17674_vm14, %v17535_v29, %v3189_v35  ;;  %vm17693_vm1 = vcmp.eq.f32.partialorder %v3194_v10, 8.507059e+37  ;;  %v11283_v29 = vld [vmem:[%s20209_s3 + $0x2a4] sm:$0xf] }
 0x2ca   :  { %4786 = vmatpush.bf16.msra.mxu0 %v9830_v7  ;;  %v3204_v7 = vadd.f32 %v17541_v12, %v3203_v5  ;;  %4756 = vmatpush.bf16.msra.mxu3 %v9742_v54  ;;  %vm3210_vm2 = vcmp.eq.f32.partialorder %v3209_v18, 8.507059e+37  ;;  %v9875_v10 = vld [vmem:[%s20209_s3 + $0x2a8] sm:$0xf0]  ;;  %v11267_v5 = vld [vmem:[%s20209_s3 + $0x224] sm:$0xf]  ;;  %vm5074_vm3 = vcmask 1040384  }
 0x2cb   :  { %v4446_v56 = vpop.f32.mrf.mxu2  ;;  %v3212_v58 = vor.u32 1.1754944e-38, %v3211_v30  ;;  %v9878_v19 = vor.u32 %v11283_v29, %v9875_v10  ;;  %v3198_v62 = vsel %vm17693_vm1, %v3197_v59, %v3193_v41  ;;  %v9867_v54 = vld [vmem:[%s20209_s3 + $0x298] sm:$0xf0]  ;;  %v20966_v59 = vld [vmem:[#allocation21_spill] sm:$0xff]  ;;  %v20967_v41 = vld [vmem:[#allocation22_spill] sm:$0xff]  ;;  %vm5076_vm4 = vcmask 1041409  }
 0x2cc   :  { %v17635_v33 = vadd.f32 %v4446_v56, %v4414_v3  ;;  %4722 = vmatpush.bf16.msra.mxu1 %v9686_v51  ;;  %v9734_v51 = vor.u32 %v11247_v21, %v9731_v45  ;;  %v3208_v53 = vsel %vm17683_vm15, %v17541_v12, %v3204_v7  ;;  %v20965_v56 = vld [vmem:[#allocation10_spill] sm:$0xff]  ;;  %vm5079_vm5 = vcmask 1042434  }
 0x2cd   :  { %v4385_v16 = vpop.f32.mrf.mxu3  ;;  %4821 = vmatpush.bf16.msra.mxu2 %v9878_v19  ;;  %vm5082_vm6 = vcmask 1043459   ;;  %vm5085_vm8 = vcmask 1044484   ;;  %vm5088_vm7 = vcmask 1045509   ;;  %vm5091_vm9 = vcmask 1046534  }
 0x2ce   :  { %v4416_v22 = vpop.f32.mrf.mxu0  ;;  %4757 = vmatpush.bf16.msra.mxu3 %v9734_v51  ;;  %v9811_v16 = vld [vmem:[%s20209_s3 + $0x228] sm:$0xf0]  ;;  %vm5094_vm10 = vcmask 1046528   ;;  %vm5765_vm11 = vcmask 1041408   ;;  %vm5767_vm12 = vcmask 1043458   ;;  %vm5770_vm13 = vcmask 1045508  }
 0x2cf   :  { %v4417_v39 = vadd.f32 %v4416_v22, %v4384_v61  ;;  %v4462_v24 = vpop.f32.mrf.mxu1  ;;  %v9667_v61 = vld [vmem:[%s20209_s3 + $0x108] sm:$0xf0]  ;;  %v11265_v22 = vld [vmem:[%s20209_s3 + $0x214] sm:$0xf]  ;;  %vm5773_vm14 = vcmask 1045504   ;;  %vm5387_vm0 = vcmask 1042432  }
 0x2d0   :  { %v4463_v3 = vadd.f32 %v4462_v24, %v17149_v32  ;;  %v11269_v32 = vld [vmem:[%s20209_s3 + $0x234] sm:$0xf]  ;;  %4723 = vmatpush.bf16.msra.mxu1 %v9678_v23  ;;  %v9670_v48 = vor.u32 %v11231_v40, %v9667_v61  ;;  %v9814_v24 = vor.u32 %v11267_v5, %v9811_v16  ;;  %v3303_v61 = vmul.f32 %v3198_v62, %v16708_v14  ;;  %v11263_v14 = vld [vmem:[%s20209_s3 + $0x204] sm:$0xf] }
 0x2d1   :  { %v9822_v9 = vor.u32 %v11269_v32, %v9819_v43  ;;  %v11281_v23 = vld [vmem:[%s20209_s3 + $0x294] sm:$0xf]  ;;  %vm8865_vm15 = vcmask 66560  }
 0x2d2   :  { %v17730_v2 = vpack.c.bf16 %v3303_v61, %v3303_v61  ;;  %v20969_v62 = vld [vmem:[#allocation54_spill] sm:$0xff] }
 0x2d3   :  { %4608 = vmatmul.bf16.gmra.mxu1 %v17425_v6  ;;  %4641 = vmatmul.bf16.gmra.mxu3 %v17645_v47  ;;  %v4449_v25 = vpop.f32.mrf.mxu2  ;;  %v11309_v61 = vld [vmem:[%s20209_s3 + $0x374] sm:$0xf] }
 0x2d4   :  { %4787 = vmatpush.bf16.msra.mxu0 %v9822_v9  ;;  %v17688_v60 = vadd.f32 %v4449_v25, %v4417_v39  ;;  %4724 = vmatpush.bf16.msra.mxu1 %v9670_v48  ;;  %v3213_v39 = vsel %vm3210_vm2, %v3212_v58, %v3208_v53  ;;  %v11279_v48 = vld [vmem:[%s20209_s3 + $0x284] sm:$0xf] }
 0x2d5   :  { %v4495_v31 = vpop.f32.mrf.mxu3  ;;  %v3304_v21 = vmul.f32 %v3213_v39, %v17347_v27  ;;  %v9795_v27 = vld [vmem:[%s20209_s3 + $0x208] sm:$0xf0]  ;;  %v11325_v39 = vld [vmem:[%s20209_s3 + $0x3f4] sm:$0xf] }
 0x2d6   :  { %4669 = vmatmul.bf16.gmra.mxu0 %v20962_v0  ;;  %v4418_v17 = vpop.f32.mrf.mxu0  ;;  %v4496_v36 = vadd.f32 %v4495_v31, %v4463_v3  ;;  %v9870_v3 = vor.u32 %v11281_v23, %v9867_v54  ;;  %v9798_v25 = vor.u32 %v11263_v14, %v9795_v27  ;;  %v20970_v23 = vld [vmem:[#allocation44_spill] sm:$0xff]  ;;  %v11341_v27 = vld [vmem:[%s20209_s3 + $0x474] sm:$0xf] }
 0x2d7   :  { %4702 = vmatmul.bf16.gmra.mxu2 %v20965_v56  ;;  %v4464_v28 = vpop.f32.mrf.mxu1  ;;  %v17732_v18 = vpack.c.bf16 %v3304_v21, %v3304_v21  ;;  %v9979_v21 = vld [vmem:[%s20209_s3 + $0x378] sm:$0xf0] }
 0x2d8   :  { %v4465_v12 = vadd.f32 %v4464_v28, %v17229_v34  ;;  %v9803_v34 = vld [vmem:[%s20209_s3 + $0x218] sm:$0xf0]  ;;  %4788 = vmatpush.bf16.msra.mxu0 %v9814_v24  ;;  %4822 = vmatpush.bf16.msra.mxu2 %v9870_v3  ;;  %v20971_v3 = vld [vmem:[#allocation25_spill] sm:$0xff] }
 0x2d9   :  { %v9806_v40 = vor.u32 %v11265_v22, %v9803_v34  ;;  %v20968_v22 = vld [vmem:[#allocation36_spill] sm:$0xff] }
 0x2db   :  { %v4451_v45 = vpop.f32.mrf.mxu2 }
 0x2dc   :  { %4789 = vmatpush.bf16.msra.mxu0 %v9806_v40  ;;  %v11357_v45 = vld [vmem:[%s20209_s3 + $0x4f4] sm:$0xf] }
 0x2dd   :  { %v4497_v32 = vpop.f32.mrf.mxu3 }
 0x2de   :  { %v4528_v43 = vpop.f32.mrf.mxu0  ;;  %v4498_v35 = vadd.f32 %v4497_v32, %v4465_v12 }
 0x2df   :  { %v4467_v7 = vpop.f32.mrf.mxu1  ;;  %v4529_v9 = vadd.f32 %v4528_v43, %v4496_v36 }
 0x2e0   :  { %v4468_v30 = vadd.f32 %v4467_v7, %v17337_v8  ;;  %v9859_v8 = vld [vmem:[%s20209_s3 + $0x288] sm:$0xf0]  ;;  %4790 = vmatpush.bf16.msra.mxu0 %v9798_v25  ;;  %v9982_v7 = vor.u32 %v11309_v61, %v9979_v21 }
 0x2e1   :  { %v9862_v0 = vor.u32 %v11279_v48, %v9859_v8  ;;  %v10107_v48 = vld [vmem:[%s20209_s3 + $0x478] sm:$0xf0] }
 0x2e2   :  { %4849 = vmatpush.bf16.msrb.mxu1 %v9982_v7  ;;  %v10110_v8 = vor.u32 %v11341_v27, %v10107_v48  ;;  %v9963_v7 = vld [vmem:[%s20209_s3 + $0x358] sm:$0xf0]  ;;  %v11337_v27 = vld [vmem:[%s20209_s3 + $0x454] sm:$0xf] }
 0x2e3   :  { %4613 = vmatmul.bf16.gmra.mxu1 %v17730_v2  ;;  %4646 = vmatmul.bf16.gmra.mxu3 %v17732_v18  ;;  %v4561_v51 = vpop.f32.mrf.mxu2  ;;  %v10091_v48 = vld [vmem:[%s20209_s3 + $0x458] sm:$0xf0] }
 0x2e4   :  { %v17750_v15 = vadd.f32 %v4561_v51, %v4529_v9  ;;  %4823 = vmatpush.bf16.msra.mxu2 %v9862_v0  ;;  %v10171_v9 = vld [vmem:[%s20209_s3 + $0x4f8] sm:$0xf0]  ;;  %v11323_v51 = vld [vmem:[%s20209_s3 + $0x3e4] sm:$0xf]  ;;  %4915 = vmatpush.bf16.msrb.mxu0 %v10110_v8 }
 0x2e5   :  { %v4500_v63 = vpop.f32.mrf.mxu3  ;;  %v10174_v14 = vor.u32 %v11357_v45, %v10171_v9 }
 0x2e6   :  { %4674 = vmatmul.bf16.gmra.mxu0 %v20966_v59  ;;  %v4530_v53 = vpop.f32.mrf.mxu0  ;;  %v4501_v56 = vadd.f32 %v4500_v63, %v4468_v30 }
 0x2e7   :  { %4707 = vmatmul.bf16.gmra.mxu2 %v20967_v41  ;;  %v4469_v31 = vpop.f32.mrf.mxu1  ;;  %v4531_v17 = vadd.f32 %v4530_v53, %v4498_v35 }
 0x2e8   :  { %v4470_v58 = vadd.f32 %v4469_v31, %v17403_v49  ;;  %v10043_v49 = vld [vmem:[%s20209_s3 + $0x3f8] sm:$0xf0]  ;;  %4948 = vmatpush.bf16.msrb.mxu2 %v10174_v14 }
 0x2e9   :  { %v10046_v34 = vor.u32 %v11325_v39, %v10043_v49  ;;  %v11339_v39 = vld [vmem:[%s20209_s3 + $0x464] sm:$0xf]  ;;  %v10099_v49 = vld [vmem:[%s20209_s3 + $0x468] sm:$0xf0]  ;;  %v10155_v14 = vld [vmem:[%s20209_s3 + $0x4d8] sm:$0xf0] }
 0x2eb   :  { %v4563_v36 = vpop.f32.mrf.mxu2  ;;  %4882 = vmatpush.bf16.msrb.mxu3 %v10046_v34 }
 0x2ec   :  { %v17754_v28 = vadd.f32 %v4563_v36, %v4531_v17  ;;  %v20972_v17 = vld [vmem:[#allocation19_spill] sm:$0xff]  ;;  %v11307_v36 = vld [vmem:[%s20209_s3 + $0x364] sm:$0xf] }
 0x2ed   :  { %v4502_v29 = vpop.f32.mrf.mxu3 }
 0x2ee   :  { %v4533_v10 = vpop.f32.mrf.mxu0  ;;  %v4503_v12 = vadd.f32 %v4502_v29, %v4470_v58  ;;  %v20973_v58 = vld [vmem:[#allocation51_spill] sm:$0xff]  ;;  %v9971_v29 = vld [vmem:[%s20209_s3 + $0x368] sm:$0xf0] }
 0x2ef   :  { %v4472_v19 = vpop.f32.mrf.mxu1  ;;  %v4534_v5 = vadd.f32 %v4533_v10, %v4501_v56  ;;  %v11355_v10 = vld [vmem:[%s20209_s3 + $0x4e4] sm:$0xf] }
 0x2f0   :  { %v4473_v16 = vadd.f32 %v4472_v19, %v17452_v4  ;;  %v9974_v19 = vor.u32 %v11307_v36, %v9971_v29  ;;  %v11319_v36 = vld [vmem:[%s20209_s3 + $0x3c4] sm:$0xf]  ;;  %v20979_v29 = vld [vmem:[#allocation9_spill] sm:$0xff] }
 0x2f2   :  { %4850 = vmatpush.bf16.msrb.mxu1 %v9974_v19  ;;  %v11303_v19 = vld [vmem:[%s20209_s3 + $0x344] sm:$0xf] }
 0x2f3   :  { %4725 = vmatmul.bf16.vlgmr.msra.gmra.mxu1 %v20968_v22  ;;  %4758 = vmatmul.bf16.vlgmr.msra.gmra.mxu3 %v20969_v62  ;;  %v4566_v24 = vpop.f32.mrf.mxu2  ;;  %v20975_v22 = vld [vmem:[#allocation14_spill] sm:$0xff] }
 0x2f4   :  { %v17766_v54 = vadd.f32 %v4566_v24, %v4534_v5  ;;  %v11321_v24 = vld [vmem:[%s20209_s3 + $0x3d4] sm:$0xf] }
 0x2f5   :  { %v4505_v4 = vpop.f32.mrf.mxu3 }
 0x2f6   :  { %4679 = vmatmul.bf16.gmra.mxu0 %v20970_v23  ;;  %v4535_v40 = vpop.f32.mrf.mxu0  ;;  %v4506_v32 = vadd.f32 %v4505_v4, %v4473_v16  ;;  %v20974_v16 = vld [vmem:[#allocation11_spill] sm:$0xff] }
 0x2f7   :  { %4712 = vmatmul.bf16.gmra.mxu2 %v20971_v3  ;;  %v4474_v43 = vpop.f32.mrf.mxu1  ;;  %v4536_v35 = vadd.f32 %v4535_v40, %v4503_v12  ;;  %v10102_v3 = vor.u32 %v11339_v39, %v10099_v49  ;;  %v10027_v4 = vld [vmem:[%s20209_s3 + $0x3d8] sm:$0xf0]  ;;  %v10147_v39 = vld [vmem:[%s20209_s3 + $0x4c8] sm:$0xf0]  ;;  %v11301_v49 = vld [vmem:[%s20209_s3 + $0x334] sm:$0xf] }
 0x2f8   :  { %v4475_v30 = vadd.f32 %v4474_v43, %v17510_v1  ;;  %v10035_v1 = vld [vmem:[%s20209_s3 + $0x3e8] sm:$0xf0]  ;;  %v10030_v61 = vor.u32 %v11321_v24, %v10027_v4  ;;  %v9947_v24 = vld [vmem:[%s20209_s3 + $0x338] sm:$0xf0] }
 0x2f9   :  { %v10038_v0 = vor.u32 %v11323_v51, %v10035_v1  ;;  %4916 = vmatpush.bf16.msrb.mxu0 %v10102_v3  ;;  %v10094_v1 = vor.u32 %v11337_v27, %v10091_v48  ;;  %v10011_v3 = vld [vmem:[%s20209_s3 + $0x3b8] sm:$0xf0]  ;;  %v11315_v27 = vld [vmem:[%s20209_s3 + $0x3a4] sm:$0xf]  ;;  %v10003_v48 = vld [vmem:[%s20209_s3 + $0x3a8] sm:$0xf0] }
 0x2fb   :  { %v4568_v25 = vpop.f32.mrf.mxu2  ;;  %4883 = vmatpush.bf16.msrb.mxu3 %v10038_v0 }
 0x2fc   :  { %v17794_v59 = vadd.f32 %v4568_v25, %v4536_v35  ;;  %v11305_v35 = vld [vmem:[%s20209_s3 + $0x354] sm:$0xf] }
 0x2fd   :  { %v4507_v41 = vpop.f32.mrf.mxu3  ;;  %4917 = vmatpush.bf16.msrb.mxu0 %v10094_v1  ;;  %v11297_v1 = vld [vmem:[%s20209_s3 + $0x314] sm:$0xf] }
 0x2fe   :  { %v4508_v63 = vadd.f32 %v4507_v41, %v4475_v30  ;;  %v9966_v30 = vor.u32 %v11305_v35, %v9963_v7  ;;  %v11335_v35 = vld [vmem:[%s20209_s3 + $0x444] sm:$0xf]  ;;  %v10083_v7 = vld [vmem:[%s20209_s3 + $0x448] sm:$0xf0] }
 0x2ff   :  { %v4477_v53 = vpop.f32.mrf.mxu1  ;;  %4884 = vmatpush.bf16.msrb.mxu3 %v10030_v61 }
 0x300   :  { %v4478_v56 = vadd.f32 %v4477_v53, %v17563_v20  ;;  %v10163_v20 = vld [vmem:[%s20209_s3 + $0x4e8] sm:$0xf0]  ;;  %4851 = vmatpush.bf16.msrb.mxu1 %v9966_v30  ;;  %v10086_v30 = vor.u32 %v11335_v35, %v10083_v7 }
 0x301   :  { %v10166_v5 = vor.u32 %v11355_v10, %v10163_v20  ;;  %v9955_v20 = vld [vmem:[%s20209_s3 + $0x348] sm:$0xf0] }
 0x302   :  { %4918 = vmatpush.bf16.msrb.mxu0 %v10086_v30  ;;  %v10131_v30 = vld [vmem:[%s20209_s3 + $0x4a8] sm:$0xf0] }
 0x303   :  { %v4538_v31 = vpop.f32.mrf.mxu0  ;;  %4730 = vmatmul.bf16.gmra.mxu1 %v20972_v17  ;;  %4763 = vmatmul.bf16.gmra.mxu3 %v20973_v58  ;;  %v20978_v58 = vld [vmem:[#allocation7_spill] sm:$0xff] }
 0x304   :  { %v4539_v12 = vadd.f32 %v4538_v31, %v4506_v32  ;;  %4949 = vmatpush.bf16.msrb.mxu2 %v10166_v5  ;;  %v20977_v31 = vld [vmem:[#allocation33_spill] sm:$0xff]  ;;  %v11351_v5 = vld [vmem:[%s20209_s3 + $0x4c4] sm:$0xf] }
 0x306   :  { %4791 = vmatmul.bf16.vlgmr.msra.gmra.mxu0 %v20974_v16  ;;  %v4510_v62 = vpop.f32.mrf.mxu3 }
 0x307   :  { %4824 = vmatmul.bf16.vlgmr.msra.gmra.mxu2 %v20975_v22  ;;  %v4511_v34 = vadd.f32 %v4510_v62, %v4478_v56  ;;  %v4479_v23 = vpop.f32.mrf.mxu1  ;;  %v20976_v56 = vld [vmem:[#allocation47_spill] sm:$0xff]  ;;  %v9958_v62 = vor.u32 %v11303_v19, %v9955_v20 }
 0x308   :  { %v4480_v40 = vadd.f32 %v4479_v23, %v17635_v33  ;;  %v11353_v33 = vld [vmem:[%s20209_s3 + $0x4d4] sm:$0xf] }
 0x309   :  { %v10158_v8 = vor.u32 %v11353_v33, %v10155_v14  ;;  %v11317_v23 = vld [vmem:[%s20209_s3 + $0x3b4] sm:$0xf]  ;;  %4852 = vmatpush.bf16.msrb.mxu1 %v9958_v62  ;;  %v11299_v33 = vld [vmem:[%s20209_s3 + $0x324] sm:$0xf]  ;;  %v9939_v14 = vld [vmem:[%s20209_s3 + $0x328] sm:$0xf0] }
 0x30a   :  { %v4571_v21 = vpop.f32.mrf.mxu2  ;;  %v10014_v61 = vor.u32 %v11317_v23, %v10011_v3  ;;  %v9923_v62 = vld [vmem:[%s20209_s3 + $0x308] sm:$0xf0]  ;;  %v11333_v23 = vld [vmem:[%s20209_s3 + $0x434] sm:$0xf]  ;;  %v10075_v3 = vld [vmem:[%s20209_s3 + $0x438] sm:$0xf0] }
 0x30b   :  { %v17826_v45 = vadd.f32 %v4571_v21, %v4539_v12  ;;  %v4540_v32 = vpop.f32.mrf.mxu0  ;;  %4950 = vmatpush.bf16.msrb.mxu2 %v10158_v8  ;;  %v10006_v8 = vor.u32 %v11315_v27, %v10003_v48  ;;  %v10067_v48 = vld [vmem:[%s20209_s3 + $0x428] sm:$0xf0] }
 0x30c   :  { %v4541_v43 = vadd.f32 %v4540_v32, %v4508_v63 }
 0x30e   :  { %v4512_v9 = vpop.f32.mrf.mxu3 }
 0x30f   :  { %v4513_v51 = vadd.f32 %v4512_v9, %v4480_v40  ;;  %v4482_v25 = vpop.f32.mrf.mxu1  ;;  %v9950_v40 = vor.u32 %v11301_v49, %v9947_v24  ;;  %v20983_v49 = vld [vmem:[#allocation38_spill] sm:$0xff] }
 0x310   :  { %v4483_v0 = vadd.f32 %v4482_v25, %v17688_v60  ;;  %v10019_v60 = vld [vmem:[%s20209_s3 + $0x3c8] sm:$0xf0]  ;;  %v9942_v25 = vor.u32 %v11299_v33, %v9939_v14  ;;  %v11331_v14 = vld [vmem:[%s20209_s3 + $0x424] sm:$0xf] }
 0x311   :  { %v10022_v12 = vor.u32 %v11319_v36, %v10019_v60  ;;  %4853 = vmatpush.bf16.msrb.mxu1 %v9950_v40 }
 0x312   :  { %v4573_v41 = vpop.f32.mrf.mxu2 }
 0x313   :  { %v17847_v63 = vadd.f32 %v4573_v41, %v4541_v43  ;;  %v4543_v53 = vpop.f32.mrf.mxu0  ;;  %4735 = vmatmul.bf16.gmra.mxu1 %v20976_v56  ;;  %4768 = vmatmul.bf16.gmra.mxu3 %v20977_v31  ;;  %v11313_v41 = vld [vmem:[%s20209_s3 + $0x394] sm:$0xf]  ;;  %v9995_v56 = vld [vmem:[%s20209_s3 + $0x398] sm:$0xf0] }
 0x314   :  { %v4544_v17 = vadd.f32 %v4543_v53, %v4511_v34  ;;  %4885 = vmatpush.bf16.msrb.mxu3 %v10022_v12  ;;  %v10150_v34 = vor.u32 %v11351_v5, %v10147_v39  ;;  %v11349_v31 = vld [vmem:[%s20209_s3 + $0x4b4] sm:$0xf]  ;;  %v20981_v12 = vld [vmem:[#allocation8_spill] sm:$0xff]  ;;  %v9998_v19 = vor.u32 %v11313_v41, %v9995_v56  ;;  %v20982_v5 = vld [vmem:[#allocation15_spill] sm:$0xff] }
 0x315   :  { %4854 = vmatpush.bf16.msrb.mxu1 %v9942_v25  ;;  %v11311_v39 = vld [vmem:[%s20209_s3 + $0x384] sm:$0xf]  ;;  %v11345_v41 = vld [vmem:[%s20209_s3 + $0x494] sm:$0xf] }
 0x316   :  { %4796 = vmatmul.bf16.gmra.mxu0 %v20978_v58  ;;  %v4515_v10 = vpop.f32.mrf.mxu3  ;;  %4951 = vmatpush.bf16.msrb.mxu2 %v10150_v34  ;;  %v9987_v34 = vld [vmem:[%s20209_s3 + $0x388] sm:$0xf0] }
 0x317   :  { %4829 = vmatmul.bf16.gmra.mxu2 %v20979_v29  ;;  %v4516_v16 = vadd.f32 %v4515_v10, %v4483_v0  ;;  %v4484_v22 = vpop.f32.mrf.mxu1  ;;  %v9931_v0 = vld [vmem:[%s20209_s3 + $0x318] sm:$0xf0]  ;;  %v20980_v10 = vld [vmem:[#allocation29_spill] sm:$0xff] }
 0x318   :  { %4886 = vmatpush.bf16.msrb.mxu3 %v10014_v61  ;;  %v9934_v36 = vor.u32 %v11297_v1, %v9931_v0  ;;  %v11295_v22 = vld [vmem:[%s20209_s3 + $0x304] sm:$0xf]  ;;  %v9990_v61 = vor.u32 %v11311_v39, %v9987_v34  ;;  %v10070_v1 = vor.u32 %v11331_v14, %v10067_v48  ;;  %v10059_v0 = vld [vmem:[%s20209_s3 + $0x418] sm:$0xf0] }
 0x319   :  { %v20987_v48 = vld [vmem:[#allocation23_spill] sm:$0xff] }
 0x31a   :  { %v4576_v4 = vpop.f32.mrf.mxu2  ;;  %4855 = vmatpush.bf16.msrb.mxu1 %v9934_v36  ;;  %v20984_v36 = vld [vmem:[#allocation45_spill] sm:$0xff] }
 0x31b   :  { %v17883_v21 = vadd.f32 %v4576_v4, %v4544_v17  ;;  %v4545_v32 = vpop.f32.mrf.mxu0  ;;  %v10139_v17 = vld [vmem:[%s20209_s3 + $0x4b8] sm:$0xf0] }
 0x31c   :  { %v4546_v43 = vadd.f32 %v4545_v32, %v4513_v51  ;;  %4887 = vmatpush.bf16.msrb.mxu3 %v10006_v8  ;;  %v10142_v60 = vor.u32 %v11349_v31, %v10139_v17  ;;  %v10078_v32 = vor.u32 %v11333_v23, %v10075_v3  ;;  %v18008_v3 = vld [vmem:[%s20211_s5] sm:$0x3] }
 0x31e   :  { %v4517_v9 = vpop.f32.mrf.mxu3  ;;  %4952 = vmatpush.bf16.msrb.mxu2 %v10142_v60  ;;  %4919 = vmatpush.bf16.msrb.mxu0 %v10078_v32  ;;  %v20985_v60 = vld [vmem:[#allocation12_spill] sm:$0xff] }
 0x31f   :  { %v11347_v9 = vld [vmem:[%s20209_s3 + $0x4a4] sm:$0xf] }
 0x320   :  { %v4594_v51 = vpop.f32.mrf.mxu1  ;;  %4888 = vmatpush.bf16.msrb.mxu3 %v9998_v19  ;;  %v10134_v27 = vor.u32 %v11347_v9, %v10131_v30  ;;  %v10051_v19 = vld [vmem:[%s20209_s3 + $0x408] sm:$0xf0] }
 0x321   :  { %v4595_v53 = vadd.f32 %v4594_v51, %v17750_v15  ;;  %v11329_v51 = vld [vmem:[%s20209_s3 + $0x414] sm:$0xf] }
 0x322   :  { %v4578_v58 = vpop.f32.mrf.mxu2  ;;  %4953 = vmatpush.bf16.msrb.mxu2 %v10134_v27  ;;  %4920 = vmatpush.bf16.msrb.mxu0 %v10070_v1  ;;  %v20986_v27 = vld [vmem:[#allocation5_spill] sm:$0xff] }
 0x323   :  { %v17922_v29 = vadd.f32 %v4578_v58, %v4546_v43  ;;  %v4548_v15 = vpop.f32.mrf.mxu0  ;;  %4740 = vmatmul.bf16.gmra.mxu1 %v20980_v10  ;;  %4773 = vmatmul.bf16.gmra.mxu3 %v20981_v12  ;;  %v11947_v10 = vld [vmem:[%s20210_s4] sm:$0x3] }
 0x324   :  { %v4549_v20 = vadd.f32 %v4548_v15, %v4516_v16  ;;  %v9926_v16 = vor.u32 %v11295_v22, %v9923_v62  ;;  %4889 = vmatpush.bf16.msrb.mxu3 %v9990_v61  ;;  %v10062_v15 = vor.u32 %v11329_v51, %v10059_v0  ;;  %v17983_v12 = vperm.slane %v11947_v10, 1 }
 0x326   :  { %4801 = vmatmul.bf16.gmra.mxu0 %v20982_v5  ;;  %v4627_v24 = vpop.f32.mrf.mxu3  ;;  %4856 = vmatpush.bf16.msrb.mxu1 %v9926_v16 }
 0x327   :  { %4834 = vmatmul.bf16.gmra.mxu2 %v20983_v49  ;;  %v17946_v4 = vadd.f32 %v4627_v24, %v4595_v53  ;;  %v10123_v53 = vld [vmem:[%s20209_s3 + $0x498] sm:$0xf0]  ;;  %4921 = vmatpush.bf16.msrb.mxu0 %v10062_v15 }
 0x328   :  { %v4596_v40 = vpop.f32.mrf.mxu1  ;;  %v10126_v31 = vor.u32 %v11345_v41, %v10123_v53 }
 0x329   :  { %v4597_v43 = vadd.f32 %v4596_v40, %v17754_v28 }
 0x32a   :  { %v4581_v35 = vpop.f32.mrf.mxu2  ;;  %4954 = vmatpush.bf16.msrb.mxu2 %v10126_v31 }
 0x32b   :  { %v17949_v7 = vadd.f32 %v4581_v35, %v4549_v20  ;;  %v4550_v33 = vpop.f32.mrf.mxu0  ;;  %v11343_v20 = vld [vmem:[%s20209_s3 + $0x484] sm:$0xf] }
 0x32c   :  { %v18018_v33 = vperm.slane %v18008_v3, 0 }
 0x32e   :  { %v4629_v28 = vpop.f32.mrf.mxu3 }
 0x32f   :  { %v17966_v25 = vadd.f32 %v4629_v28, %v4597_v43  ;;  %v18013_v43 = vld [vmem:[%s20212_s6] sm:$0x3] }
 0x330   :  { %v4599_v8 = vpop.f32.mrf.mxu1  ;;  %v18025_v51 = vperm.slane %v18013_v43, 0 }
 0x331   :  { %v4600_v56 = vadd.f32 %v4599_v8, %v17766_v54  ;;  %v11327_v54 = vld [vmem:[%s20209_s3 + $0x404] sm:$0xf] }
 0x332   :  { %v4583_v17 = vpop.f32.mrf.mxu2  ;;  %v10054_v22 = vor.u32 %v11327_v54, %v10051_v19 }
 0x333   :  { %v4660_v58 = vpop.f32.mrf.mxu0  ;;  %4745 = vmatmul.bf16.gmra.mxu1 %v20984_v36  ;;  %4778 = vmatmul.bf16.gmra.mxu3 %v20985_v60 }
 0x334   :  { %v4661_v24 = vadd.f32 %v4660_v58, %v17983_v12  ;;  %4922 = vmatpush.bf16.msrb.mxu0 %v10054_v22 }
 0x336   :  { %4806 = vmatmul.bf16.gmra.mxu0 %v16821_v55  ;;  %v4632_v5 = vpop.f32.mrf.mxu3  ;;  %v10115_v55 = vld [vmem:[%s20209_s3 + $0x488] sm:$0xf0] }
 0x337   :  { %4839 = vmatmul.bf16.gmra.mxu2 %v16862_v11  ;;  %v17999_v62 = vadd.f32 %v4632_v5, %v4600_v56  ;;  %v10118_v49 = vor.u32 %v11343_v20, %v10115_v55  ;;  %v20988_v55 = vld [vmem:[#allocation53_spill] sm:$0xff] }
 0x338   :  { %v4601_v39 = vpop.f32.mrf.mxu1 }
 0x339   :  { %v4602_v16 = vadd.f32 %v4601_v39, %v17794_v59  ;;  %4955 = vmatpush.bf16.msrb.mxu2 %v10118_v49  ;;  %v20989_v39 = vld [vmem:[#allocation16_spill] sm:$0xff] }
 0x33a   :  { %v4693_v34 = vpop.f32.mrf.mxu2 }
 0x33b   :  { %v18003_v23 = vadd.f32 %v4693_v34, %v4661_v24  ;;  %v4662_v11 = vpop.f32.mrf.mxu0 }
 0x33c   :  { %v4663_v59 = vadd.f32 %v4662_v11, %v17983_v12 }
 0x33e   :  { %v4634_v40 = vpop.f32.mrf.mxu3 }
 0x33f   :  { %v4635_v61 = vadd.f32 %v4634_v40, %v4602_v16 }
 0x340   :  { %v4604_v32 = vpop.f32.mrf.mxu1 }
 0x341   :  { %v4605_v35 = vadd.f32 %v4604_v32, %v17826_v45  ;;  %v4987_v9 = vmax.f32 %v4635_v61, 0.0 }
 0x342   :  { %v4695_v30 = vpop.f32.mrf.mxu2 }
 0x343   :  { %v18020_v14 = vadd.f32 %v4695_v30, %v4663_v59  ;;  %v4665_v28 = vpop.f32.mrf.mxu0  ;;  %4857 = vmatmul.bf16.vlgmr.msrb.gmra.mxu1 %v20986_v27  ;;  %4890 = vmatmul.bf16.vlgmr.msrb.gmra.mxu3 %v20987_v48  ;;  %v5011_v8 = vmul.f32 %v18018_v33, %v4987_v9 }
 0x344   :  { %v4666_v53 = vadd.f32 %v4665_v28, %v17983_v12 }
 0x345   :  { %v18029_v1 = vadd.f32 %v18025_v51, %v5011_v8 }
 0x346   :  { %4811 = vmatmul.bf16.gmra.mxu0 %v20908_v42  ;;  %v4637_v45 = vpop.f32.mrf.mxu3 }
 0x347   :  { %4844 = vmatmul.bf16.gmra.mxu2 %v20913_v50  ;;  %v4638_v0 = vadd.f32 %v4637_v45, %v4605_v35 }
 0x348   :  { %v4606_v41 = vpop.f32.mrf.mxu1 }
 0x349   :  { %v4607_v56 = vadd.f32 %v4606_v41, %v17847_v63  ;;  %v4989_v31 = vmax.f32 %v4638_v0, 0.0 }
 0x34a   :  { %v4698_v17 = vpop.f32.mrf.mxu2 }
 0x34b   :  { %v18035_v58 = vadd.f32 %v4698_v17, %v4666_v53  ;;  %v4667_v36 = vpop.f32.mrf.mxu0  ;;  %v5013_v60 = vmul.f32 %v18018_v33, %v4989_v31  ;;  %v20990_v53 = vld [vmem:[#allocation26_spill] sm:$0xff] }
 0x34c   :  { %v4668_v15 = vadd.f32 %v4667_v36, %v17983_v12 }
 0x34d   :  { %v18040_v42 = vadd.f32 %v18025_v51, %v5013_v60 }
 0x34e   :  { %v4639_v50 = vpop.f32.mrf.mxu3 }
 0x34f   :  { %v4640_v10 = vadd.f32 %v4639_v50, %v4607_v56  ;;  %v20991_v56 = vld [vmem:[#allocation49_spill] sm:$0xff] }
 0x350   :  { %v4609_v54 = vpop.f32.mrf.mxu1 }
 0x351   :  { %v4610_v19 = vadd.f32 %v4609_v54, %v17883_v21  ;;  %v4991_v20 = vmax.f32 %v4640_v10, 0.0 }
 0x352   :  { %v4700_v5 = vpop.f32.mrf.mxu2 }
 0x353   :  { %v18043_v63 = vadd.f32 %v4700_v5, %v4668_v15  ;;  %v4670_v22 = vpop.f32.mrf.mxu0  ;;  %4862 = vmatmul.bf16.gmra.mxu1 %v20988_v55  ;;  %4895 = vmatmul.bf16.gmra.mxu3 %v20989_v39  ;;  %v5015_v49 = vmul.f32 %v18018_v33, %v4991_v20  ;;  %v20992_v39 = vld [vmem:[#allocation56_spill] sm:$0xff] }
 0x354   :  { %v4671_v24 = vadd.f32 %v4670_v22, %v17983_v12 }
 0x355   :  { %v18050_v16 = vadd.f32 %v18025_v51, %v5015_v49  ;;  %v20993_v49 = vld [vmem:[#allocation13_spill] sm:$0xff] }
 0x356   :  { %4923 = vmatmul.bf16.vlgmr.msrb.gmra.mxu0 %v16762_v44  ;;  %v4642_v21 = vpop.f32.mrf.mxu3 }
 0x357   :  { %4956 = vmatmul.bf16.vlgmr.msrb.gmra.mxu2 %v17076_v46  ;;  %v4643_v34 = vadd.f32 %v4642_v21, %v4610_v19 }
 0x358   :  { %v4611_v11 = vpop.f32.mrf.mxu1 }
 0x359   :  { %v4993_v40 = vmax.f32 %v4643_v34, 0.0  ;;  %v4612_v28 = vadd.f32 %v4611_v11, %v17922_v29 }
 0x35a   :  { %v4703_v61 = vpop.f32.mrf.mxu2 }
 0x35b   :  { %v18054_v32 = vadd.f32 %v4703_v61, %v4671_v24  ;;  %v4672_v59 = vpop.f32.mrf.mxu0  ;;  %v5017_v35 = vmul.f32 %v18018_v33, %v4993_v40 }
 0x35c   :  { %v4673_v9 = vadd.f32 %v4672_v59, %v17983_v12 }
 0x35d   :  { %v18059_v30 = vadd.f32 %v18025_v51, %v5017_v35 }
 0x35e   :  { %v4644_v44 = vpop.f32.mrf.mxu3 }
 0x35f   :  { %v4645_v27 = vadd.f32 %v4644_v44, %v4612_v28 }
 0x360   :  { %v4614_v46 = vpop.f32.mrf.mxu1 }
 0x361   :  { %v4615_v48 = vadd.f32 %v4614_v46, %v17949_v7  ;;  %v4995_v8 = vmax.f32 %v4645_v27, 0.0 }
 0x362   :  { %v4705_v45 = vpop.f32.mrf.mxu2 }
 0x363   :  { %v18063_v0 = vadd.f32 %v4705_v45, %v4673_v9  ;;  %v4675_v41 = vpop.f32.mrf.mxu0  ;;  %4867 = vmatmul.bf16.gmra.mxu1 %v20990_v53  ;;  %4900 = vmatmul.bf16.gmra.mxu3 %v20991_v56  ;;  %v5019_v31 = vmul.f32 %v18018_v33, %v4995_v8 }
 0x364   :  { %v4676_v17 = vadd.f32 %v4675_v41, %v17983_v12 }
 0x365   :  { %v18070_v29 = vadd.f32 %v18025_v51, %v5019_v31 }
 0x366   :  { %4928 = vmatmul.bf16.gmra.mxu0 %v17417_v26  ;;  %v4647_v7 = vpop.f32.mrf.mxu3 }
 0x367   :  { %4961 = vmatmul.bf16.gmra.mxu2 %v17423_v57  ;;  %v4648_v36 = vadd.f32 %v4647_v7, %v4615_v48 }
 0x368   :  { %v4616_v60 = vpop.f32.mrf.mxu1 }
 0x369   :  { %v4997_v15 = vmax.f32 %v4648_v36, 0.0 }
 0x36a   :  { %v4708_v50 = vpop.f32.mrf.mxu2 }
 0x36b   :  { %v4709_v10 = vadd.f32 %v4708_v50, %v4676_v17  ;;  %v18074_v54 = vpop.f32.mrf.mxu0  ;;  %v5021_v19 = vmul.f32 %v18018_v33, %v4997_v15 }
 0x36d   :  { %v18078_v20 = vadd.f32 %v18025_v51, %v5021_v19 }
 0x36e   :  { %v4649_v5 = vpop.f32.mrf.mxu3 }
 0x370   :  { %v4726_v22 = vpop.f32.mrf.mxu1 }
 0x371   :  { %v4727_v55 = vadd.f32 %v4726_v22, %v18003_v23 }
 0x372   :  { %v18081_v26 = vpop.f32.mrf.mxu2 }
 0x373   :  { %v4680_v57 = vpop.f32.mrf.mxu0  ;;  %4872 = vmatmul.bf16.gmra.mxu1 %v20992_v39  ;;  %4905 = vmatmul.bf16.gmra.mxu3 %v20993_v49 }
 0x374   :  { %v4681_v24 = vadd.f32 %v4680_v57, %v17983_v12 }
 0x376   :  { %4933 = vmatmul.bf16.gmra.mxu0 %v17258_v13  ;;  %v4759_v21 = vpop.f32.mrf.mxu3 }
 0x377   :  { %4966 = vmatmul.bf16.gmra.mxu2 %v17524_v38  ;;  %v4760_v34 = vadd.f32 %v4759_v21, %v4727_v55 }
 0x378   :  { %v18088_v11 = vpop.f32.mrf.mxu1 }
 0x37a   :  { %v4713_v40 = vpop.f32.mrf.mxu2 }
 0x37b   :  { %v4714_v61 = vadd.f32 %v4713_v40, %v4681_v24  ;;  %v4682_v23 = vpop.f32.mrf.mxu0 }
 0x37e   :  { %v18090_v59 = vpop.f32.mrf.mxu3 }
 0x380   :  { %v4731_v35 = vpop.f32.mrf.mxu1 }
 0x381   :  { %v4732_v9 = vadd.f32 %v4731_v35, %v18035_v58 }
 0x382   :  { %v4715_v28 = vpop.f32.mrf.mxu2 }
 0x383   :  { %v4792_v44 = vpop.f32.mrf.mxu0  ;;  %4877 = vmatmul.bf16.gmra.mxu1 %v20935_v52  ;;  %4910 = vmatmul.bf16.gmra.mxu3 %v16712_v37 }
 0x384   :  { %v4793_v13 = vadd.f32 %v4792_v44, %v4760_v34 }
 0x386   :  { %4938 = vmatmul.bf16.gmra.mxu0 %v17425_v6  ;;  %v4764_v38 = vpop.f32.mrf.mxu3 }
 0x387   :  { %4971 = vmatmul.bf16.gmra.mxu2 %v17645_v47  ;;  %v4765_v27 = vadd.f32 %v4764_v38, %v4732_v9 }
 0x388   :  { %v18097_v46 = vpop.f32.mrf.mxu1 }
 0x38a   :  { %v4825_v48 = vpop.f32.mrf.mxu2 }
 0x38b   :  { %v4826_v8 = vadd.f32 %v4825_v48, %v4793_v13  ;;  %v4794_v45 = vpop.f32.mrf.mxu0 }
 0x38e   :  { %v18099_v41 = vpop.f32.mrf.mxu3 }
 0x390   :  { %v4736_v58 = vpop.f32.mrf.mxu1 }
 0x391   :  { %v4737_v53 = vadd.f32 %v4736_v58, %v18054_v32 }
 0x392   :  { %v4827_v52 = vpop.f32.mrf.mxu2 }
 0x393   :  { %v4797_v56 = vpop.f32.mrf.mxu0 }
 0x394   :  { %v4798_v37 = vadd.f32 %v4797_v56, %v4765_v27 }
 0x396   :  { %4943 = vmatmul.bf16.gmra.mxu0 %v17730_v2  ;;  %v4769_v6 = vpop.f32.mrf.mxu3 }
 0x397   :  { %4976 = vmatmul.bf16.gmra.mxu2 %v17732_v18  ;;  %v4770_v47 = vadd.f32 %v4769_v6, %v4737_v53 }
 0x398   :  { %v18104_v31 = vpop.f32.mrf.mxu1 }
 0x39a   :  { %v4830_v17 = vpop.f32.mrf.mxu2 }
 0x39b   :  { %v18106_v7 = vadd.f32 %v4830_v17, %v4798_v37  ;;  %v18108_v36 = vpop.f32.mrf.mxu0 }
 0x39e   :  { %v18110_v60 = vpop.f32.mrf.mxu3 }
 0x3a0   :  { %v4741_v15 = vpop.f32.mrf.mxu1 }
 0x3a1   :  { %v4742_v32 = vadd.f32 %v4741_v15, %v4709_v10 }
 0x3a2   :  { %v18112_v50 = vpop.f32.mrf.mxu2 }
 0x3a3   :  { %v4802_v19 = vpop.f32.mrf.mxu0 }
 0x3a4   :  { %v4803_v5 = vadd.f32 %v4802_v19, %v4770_v47 }
 0x3a6   :  { %v4774_v2 = vpop.f32.mrf.mxu3 }
 0x3a7   :  { %v4775_v22 = vadd.f32 %v4774_v2, %v4742_v32  ;;  %v4729_v32 = vadd.f32 %v18088_v11, %v18020_v14  ;;  %v18141_v14 = vperm.slane %v18013_v43, 1 }
 0x3a8   :  { %v18114_v18 = vpop.f32.mrf.mxu1 }
 0x3a9   :  { %v4762_v2 = vadd.f32 %v18090_v59, %v4729_v32  ;;  %v4983_v32 = vmax.f32 %v17966_v25, 0.0 }
 0x3aa   :  { %v4835_v55 = vpop.f32.mrf.mxu2 }
 0x3ab   :  { %v18116_v57 = vadd.f32 %v4835_v55, %v4803_v5  ;;  %v18118_v39 = vpop.f32.mrf.mxu0  ;;  %v4981_v5 = vmax.f32 %v17946_v4, 0.0  ;;  %v4795_v55 = vadd.f32 %v4794_v45, %v4762_v2 }
 0x3ae   :  { %v18120_v49 = vpop.f32.mrf.mxu3 }
 0x3b0   :  { %v4746_v24 = vpop.f32.mrf.mxu1 }
 0x3b1   :  { %v4747_v21 = vadd.f32 %v4746_v24, %v4714_v61 }
 0x3b2   :  { %v18122_v34 = vpop.f32.mrf.mxu2 }
 0x3b3   :  { %v4807_v10 = vpop.f32.mrf.mxu0 }
 0x3b4   :  { %v4808_v40 = vadd.f32 %v4807_v10, %v4775_v22 }
 0x3b6   :  { %v4779_v23 = vpop.f32.mrf.mxu3 }
 0x3b7   :  { %v4780_v35 = vadd.f32 %v4779_v23, %v4747_v21  ;;  %v5005_v23 = vmul.f32 %v18018_v33, %v4981_v5 }
 0x3b8   :  { %v4748_v9 = vpop.f32.mrf.mxu1 }
 0x3b9   :  { %v5029_v45 = vadd.f32 %v18025_v51, %v5005_v23 }
 0x3ba   :  { %v4840_v28 = vpop.f32.mrf.mxu2 }
 0x3bb   :  { %v18124_v44 = vadd.f32 %v4840_v28, %v4808_v40  ;;  %v18126_v13 = vpop.f32.mrf.mxu0  ;;  %v18137_v40 = vperm.slane %v18008_v3, 1 }
 0x3be   :  { %v4781_v38 = vpop.f32.mrf.mxu3 }
 0x3c0   :  { %v4858_v37 = vpop.f32.mrf.mxu1 }
 0x3c1   :  { %v4859_v17 = vadd.f32 %v4858_v37, %v4826_v8  ;;  %v4828_v8 = vadd.f32 %v4827_v52, %v4795_v55 }
 0x3c2   :  { %v18128_v27 = vpop.f32.mrf.mxu2 }
 0x3c3   :  { %v4812_v48 = vpop.f32.mrf.mxu0 }
 0x3c4   :  { %v4813_v58 = vadd.f32 %v4812_v48, %v4780_v35 }
 0x3c6   :  { %v4891_v47 = vpop.f32.mrf.mxu3 }
 0x3c7   :  { %v4892_v19 = vadd.f32 %v4891_v47, %v4859_v17 }
 0x3c8   :  { %v4860_v21 = vpop.f32.mrf.mxu1 }
 0x3c9   :  { %v4861_v11 = vadd.f32 %v4860_v21, %v4828_v8 }
 0x3ca   :  { %v4845_v53 = vpop.f32.mrf.mxu2 }
 0x3cb   :  { %v18130_v56 = vadd.f32 %v4845_v53, %v4813_v58  ;;  %v4814_v61 = vpop.f32.mrf.mxu0 }
 0x3ce   :  { %v4893_v35 = vpop.f32.mrf.mxu3 }
 0x3cf   :  { %v4894_v28 = vadd.f32 %v4893_v35, %v4861_v11 }
 0x3d2   :  { %v4847_v6 = vpop.f32.mrf.mxu2 }
 0x3d3   :  { %v4924_v15 = vpop.f32.mrf.mxu0 }
 0x3d4   :  { %v4925_v22 = vadd.f32 %v4924_v15, %v4892_v19 }
 0x3da   :  { %v4957_v24 = vpop.f32.mrf.mxu2 }
 0x3db   :  { %v4958_v10 = vadd.f32 %v4957_v24, %v4925_v22  ;;  %v4926_v59 = vpop.f32.mrf.mxu0 }
 0x3dc   :  { %v4927_v3 = vadd.f32 %v4926_v59, %v4894_v28 }
 0x3dd   :  { %v4982_v9 = vmax.f32 %v4958_v10, 0.0  ;;  %v5007_v10 = vmul.f32 %v18018_v33, %v4983_v32 }
 0x3df   :  { %v5006_v4 = vmul.f32 %v18137_v40, %v4982_v9  ;;  %v5031_v35 = vadd.f32 %v18025_v51, %v5007_v10 }
 0x3e1   :  { %v5030_v38 = vadd.f32 %v18141_v14, %v5006_v4 }
 0x3e2   :  { %v4959_v52 = vpop.f32.mrf.mxu2 }
 0x3e3   :  { %v5065_v48 = vrot.slane %v5030_v38, 7  ;;  %v5756_v43 = vrot.slane %v5030_v38, 6  ;;  %v4960_v58 = vadd.f32 %v4959_v52, %v4927_v3 }
 0x3e5   :  { %v5075_v53 = vsel %vm5074_vm3, %v5029_v45, %v5065_v48  ;;  %v5077_v61 = vsel %vm5076_vm4, %v5029_v45, %v5065_v48  ;;  %v5080_v37 = vsel %vm5079_vm5, %v5029_v45, %v5065_v48  ;;  %v5083_v6 = vsel %vm5082_vm6, %v5029_v45, %v5065_v48 }
 0x3e6   :  { %v5078_v47 = vrot.slane %v5077_v61, 1  ;;  %v5081_v17 = vrot.slane %v5080_v37, 2  ;;  %v5086_v15 = vsel %vm5085_vm8, %v5029_v45, %v5065_v48  ;;  %5217 = vst [vmem:[#allocation1] ss:$9 sm:$0xff] %v5075_v53  ;;  %v5089_v19 = vsel %vm5088_vm7, %v5029_v45, %v5065_v48 }
 0x3e7   :  { %v5092_v5 = vsel %vm5091_vm9, %v5029_v45, %v5065_v48  ;;  %v5095_v2 = vsel %vm5094_vm10, %v5065_v48, %v5029_v45  ;;  %v18156_v22 = vsel %vm5765_vm11, %v5029_v45, %v5756_v43  ;;  %v18159_v55 = vsel %vm5767_vm12, %v5029_v45, %v5756_v43 }
 0x3e8   :  { %5219 = vst [vmem:[#allocation1 + $0x1] ss:$9 sm:$0xff] %v5078_v47  ;;  %v18162_v24 = vsel %vm5770_vm13, %v5029_v45, %v5756_v43  ;;  %v18165_v21 = vsel %vm5773_vm14, %v5756_v43, %v5029_v45  ;;  %v4984_v25 = vmax.f32 %v4960_v58, 0.0  ;;  %v5084_v9 = vrot.slane %v5083_v6, 3  ;;  %v4863_v58 = vpop.f32.mrf.mxu1  ;;  %v4896_v6 = vpop.f32.mrf.mxu3 }
 0x3e9   :  { %5221 = vst [vmem:[#allocation1 + $0x2] ss:$9 sm:$0xff] %v5081_v17  ;;  %v5087_v4 = vrot.slane %v5086_v15, 4  ;;  %v5090_v59 = vrot.slane %v5089_v19, 5  ;;  %v4864_v47 = vadd.f32 %v4863_v58, %v18106_v7  ;;  %v5093_v15 = vrot.slane %v5092_v5, 6  ;;  %v4929_v19 = vpop.f32.mrf.mxu0 }
 0x3ea   :  { %20994 = vst [vmem:[#allocation55_spill] sm:$0xff] %v18165_v21  ;;  %v5008_v23 = vmul.f32 %v18137_v40, %v4984_v25  ;;  %v5096_v25 = vrot.slane %v5095_v2, 7  ;;  %v4985_v2 = vmax.f32 %v17999_v62, 0.0 }
 0x3eb   :  { %v4897_v17 = vadd.f32 %v4896_v6, %v4864_v47 }
 0x3ec   :  { %v5032_v8 = vadd.f32 %v18141_v14, %v5008_v23  ;;  %v5009_v6 = vmul.f32 %v18018_v33, %v4985_v2 }
 0x3ee   :  { %v5066_v11 = vrot.slane %v5032_v8, 7  ;;  %v5757_v32 = vrot.slane %v5032_v8, 6 }
 0x3f0   :  { %v18171_v28 = vld [vmem:[#allocation1] sm:$0xff]  ;;  %v18173_v38 = vld [vmem:[#allocation1 + $0x9] sm:$0xff]  ;;  %v5097_v45 = vsel %vm5074_vm3, %v5031_v35, %v5066_v11  ;;  %v5098_v3 = vsel %vm5076_vm4, %v5031_v35, %v5066_v11  ;;  %v5100_v52 = vsel %vm5079_vm5, %v5031_v35, %v5066_v11  ;;  %v5102_v48 = vsel %vm5082_vm6, %v5031_v35, %v5066_v11 }
 0x3f1   :  { %5224 = vst [vmem:[#allocation1] ss:$9 sm:$0xff] %v5084_v9  ;;  %v5104_v43 = vsel %vm5085_vm8, %v5031_v35, %v5066_v11  ;;  %v5106_v53 = vsel %vm5088_vm7, %v5031_v35, %v5066_v11  ;;  %v5108_v61 = vsel %vm5091_vm9, %v5031_v35, %v5066_v11  ;;  %v18183_v37 = vsel %vm5094_vm10, %v5066_v11, %v5031_v35 }
 0x3f2   :  { %5225 = vst [vmem:[#allocation1 + $0x1] ss:$9 sm:$0xff] %v5087_v4  ;;  %v4930_v9 = vadd.f32 %v4929_v19, %v4897_v17  ;;  %v4962_v4 = vpop.f32.mrf.mxu2  ;;  %v18194_v11 = vsel %vm5767_vm12, %v5031_v35, %v5757_v32  ;;  %v18197_v7 = vsel %vm5770_vm13, %v5031_v35, %v5757_v32  ;;  %v18200_v5 = vsel %vm5773_vm14, %v5757_v32, %v5031_v35 }
 0x3f3   :  { %5226 = vst [vmem:[#allocation1 + $0x2] ss:$9 sm:$0xff] %v5090_v59  ;;  %v18191_v59 = vsel %vm5765_vm11, %v5031_v35, %v5757_v32  ;;  %v5099_v17 = vrot.slane %v5098_v3, 1  ;;  %v5101_v19 = vrot.slane %v5100_v52, 2  ;;  %v5033_v35 = vadd.f32 %v18025_v51, %v5009_v6 }
 0x3f4   :  { %20996 = vst [vmem:[#allocation31_spill] sm:$0xff] %v18194_v11  ;;  %v4963_v8 = vadd.f32 %v4962_v4, %v4930_v9  ;;  %v5103_v32 = vrot.slane %v5102_v48, 3  ;;  %v4734_v4 = vadd.f32 %v18097_v46, %v18043_v63 }
 0x3f5   :  { %20997 = vst [vmem:[#allocation32_spill] sm:$0xff] %v18200_v5  ;;  %v4898_v5 = vpop.f32.mrf.mxu3 }
 0x3f6   :  { %v4986_v58 = vmax.f32 %v4963_v8, 0.0  ;;  %v4767_v2 = vadd.f32 %v18099_v41, %v4734_v4  ;;  %v5105_v8 = vrot.slane %v5104_v43, 4  ;;  %v4931_v41 = vpop.f32.mrf.mxu0  ;;  %v5111_v43 = vrot.slane %v18183_v37, 7 }
 0x3f8   :  { %v5010_v47 = vmul.f32 %v18137_v40, %v4986_v58  ;;  %v5107_v58 = vrot.slane %v5106_v53, 5 }
 0x3fa   :  { %v18186_v10 = vld [vmem:[#allocation1] sm:$0xff]  ;;  %v18188_v23 = vld [vmem:[#allocation1 + $0x9] sm:$0xff]  ;;  %v4964_v4 = vpop.f32.mrf.mxu2 }
 0x3fb   :  { %20995 = vst [vmem:[#allocation37_spill] sm:$0xff] %v18188_v23 }
 0x3fc   :  { %5229 = vst [vmem:[#allocation1] ss:$9 sm:$0xff] %v5093_v15  ;;  %v5034_v15 = vadd.f32 %v18141_v14, %v5010_v47 }
 0x3fd   :  { %5230 = vst [vmem:[#allocation1 + $0x1] ss:$9 sm:$0xff] %v5096_v25 }
 0x3fe   :  { %5231 = vst [vmem:[#allocation1 + $0x2] ss:$9 sm:$0xff] %v5097_v45  ;;  %v5067_v62 = vrot.slane %v5034_v15, 7  ;;  %v5758_v46 = vrot.slane %v5034_v15, 6 }
 0x400   :  { %v5112_v45 = vsel %vm5074_vm3, %v5033_v35, %v5067_v62  ;;  %v5113_v33 = vsel %vm5076_vm4, %v5033_v35, %v5067_v62  ;;  %v5115_v3 = vsel %vm5079_vm5, %v5033_v35, %v5067_v62  ;;  %v5117_v25 = vsel %vm5082_vm6, %v5033_v35, %v5067_v62 }
 0x401   :  { %v5119_v52 = vsel %vm5085_vm8, %v5033_v35, %v5067_v62  ;;  %v18217_v9 = vsel %vm5088_vm7, %v5033_v35, %v5067_v62  ;;  %v18220_v51 = vsel %vm5091_vm9, %v5033_v35, %v5067_v62  ;;  %v18223_v48 = vsel %vm5094_vm10, %v5067_v62, %v5033_v35 }
 0x402   :  { %v5114_v37 = vrot.slane %v5113_v33, 1 }
 0x405   :  { %v18206_v11 = vld [vmem:[#allocation1] sm:$0xff]  ;;  %v18208_v21 = vld [vmem:[#allocation1 + $0x9] sm:$0xff] }
 0x406   :  { %5234 = vst [vmem:[#allocation1] ss:$9 sm:$0xff] %v5099_v17  ;;  %v4800_v17 = vadd.f32 %v18108_v36, %v4767_v2  ;;  %v18240_v36 = vsel %vm5765_vm11, %v5033_v35, %v5758_v46 }
 0x407   :  { %5235 = vst [vmem:[#allocation1 + $0x1] ss:$9 sm:$0xff] %v5101_v19  ;;  %v5109_v19 = vrot.slane %v5108_v61, 6  ;;  %v18243_v61 = vsel %vm5767_vm12, %v5033_v35, %v5758_v46 }
 0x408   :  { %5236 = vst [vmem:[#allocation1 + $0x2] ss:$9 sm:$0xff] %v5103_v32  ;;  %v4865_v32 = vpop.f32.mrf.mxu1  ;;  %v4833_v62 = vadd.f32 %v18112_v50, %v4800_v17  ;;  %v18246_v50 = vsel %vm5770_vm13, %v5033_v35, %v5758_v46  ;;  %v5118_v17 = vrot.slane %v5117_v25, 3 }
 0x409   :  { %21000 = vst [vmem:[#allocation42_spill] sm:$0xff] %v18243_v61 }
 0x40a   :  { %v4866_v23 = vadd.f32 %v4865_v32, %v4833_v62 }
 0x40c   :  { %v4899_v63 = vadd.f32 %v4898_v5, %v4866_v23  ;;  %v18249_v23 = vsel %vm5773_vm14, %v5758_v46, %v5033_v35 }
 0x40d   :  { %21001 = vst [vmem:[#allocation18_spill] sm:$0xff] %v18249_v23 }
 0x40e   :  { %v4932_v53 = vadd.f32 %v4931_v41, %v4899_v63  ;;  %v5120_v63 = vrot.slane %v5119_v52, 4 }
 0x40f   :  { %v18228_v6 = vld [vmem:[#allocation1] sm:$0xff]  ;;  %v18230_v47 = vld [vmem:[#allocation1 + $0x9] sm:$0xff] }
 0x410   :  { %20998 = vst [vmem:[#allocation48_spill] sm:$0xff] %v18228_v6  ;;  %v4965_v5 = vadd.f32 %v4964_v4, %v4932_v53  ;;  %v4868_v46 = vpop.f32.mrf.mxu1  ;;  %v4901_v53 = vpop.f32.mrf.mxu3 }
 0x411   :  { %20999 = vst [vmem:[#allocation34_spill] sm:$0xff] %v18230_v47  ;;  %v4869_v4 = vadd.f32 %v4868_v46, %v18116_v57 }
 0x412   :  { %5239 = vst [vmem:[#allocation1] ss:$9 sm:$0xff] %v5105_v8  ;;  %v4988_v15 = vmax.f32 %v4965_v5, 0.0  ;;  %v5122_v5 = vrot.slane %v18217_v9, 5 }
 0x413   :  { %5240 = vst [vmem:[#allocation1 + $0x1] ss:$9 sm:$0xff] %v5107_v58  ;;  %v5116_v58 = vrot.slane %v5115_v3, 2 }
 0x414   :  { %5241 = vst [vmem:[#allocation1 + $0x2] ss:$9 sm:$0xff] %v5109_v19  ;;  %v5012_v2 = vmul.f32 %v18137_v40, %v4988_v15  ;;  %v5124_v15 = vrot.slane %v18220_v51, 6 }
 0x416   :  { %v5036_v8 = vadd.f32 %v18141_v14, %v5012_v2 }
 0x418   :  { %v5068_v62 = vrot.slane %v5036_v8, 7 }
 0x41a   :  { %v5127_v35 = vsel %vm5074_vm3, %v18029_v1, %v5068_v62  ;;  %v5130_v33 = vsel %vm5079_vm5, %v18029_v1, %v5068_v62  ;;  %v5132_v3 = vsel %vm5082_vm6, %v18029_v1, %v5068_v62  ;;  %v5134_v25 = vsel %vm5085_vm8, %v18029_v1, %v5068_v62 }
 0x41b   :  { %v18235_v6 = vld [vmem:[#allocation1] sm:$0xff]  ;;  %v18237_v47 = vld [vmem:[#allocation1 + $0x9] sm:$0xff]  ;;  %v5136_v52 = vsel %vm5088_vm7, %v18029_v1, %v5068_v62  ;;  %v18271_v41 = vsel %vm5091_vm9, %v18029_v1, %v5068_v62 }
 0x41c   :  { %5244 = vst [vmem:[#allocation1] ss:$9 sm:$0xff] %v5111_v43  ;;  %v18275_v43 = vsel %vm5094_vm10, %v5068_v62, %v18029_v1 }
 0x41d   :  { %5245 = vst [vmem:[#allocation1 + $0x1] ss:$9 sm:$0xff] %v5112_v45  ;;  %v5128_v45 = vsel %vm5076_vm4, %v18029_v1, %v5068_v62  ;;  %v4967_v62 = vpop.f32.mrf.mxu2 }
 0x41e   :  { %5246 = vst [vmem:[#allocation1 + $0x2] ss:$9 sm:$0xff] %v5114_v37  ;;  %v4902_v37 = vadd.f32 %v4901_v53, %v4869_v4 }
 0x425   :  { %v18253_v19 = vld [vmem:[#allocation1] sm:$0xff]  ;;  %v18255_v32 = vld [vmem:[#allocation1 + $0x9] sm:$0xff] }
 0x426   :  { %21002 = vst [vmem:[#allocation6_spill] sm:$0xff] %v18253_v19 }
 0x427   :  { %21003 = vst [vmem:[#allocation35_spill] sm:$0xff] %v18255_v32  ;;  %v5126_v32 = vrot.slane %v18223_v48, 7 }
 0x428   :  { %5249 = vst [vmem:[#allocation1] ss:$9 sm:$0xff] %v5116_v58 }
 0x429   :  { %5250 = vst [vmem:[#allocation1 + $0x1] ss:$9 sm:$0xff] %v5118_v17  ;;  %v5759_v17 = vrot.slane %v5036_v8, 6 }
 0x42a   :  { %5251 = vst [vmem:[#allocation1 + $0x2] ss:$9 sm:$0xff] %v5120_v63  ;;  %v4934_v63 = vpop.f32.mrf.mxu0 }
 0x42b   :  { %v4935_v23 = vadd.f32 %v4934_v63, %v4902_v37  ;;  %v18287_v57 = vsel %vm5765_vm11, %v18029_v1, %v5759_v17  ;;  %v18291_v9 = vsel %vm5767_vm12, %v18029_v1, %v5759_v17  ;;  %v18295_v51 = vsel %vm5770_vm13, %v18029_v1, %v5759_v17 }
 0x42c   :  { %21006 = vst [vmem:[#allocation46_spill] sm:$0xff] %v18291_v9  ;;  %v18299_v8 = vsel %vm5773_vm14, %v5759_v17, %v18029_v1  ;;  %v5131_v63 = vrot.slane %v5130_v33, 2 }
 0x42d   :  { %21007 = vst [vmem:[#allocation24_spill] sm:$0xff] %v18299_v8  ;;  %v4968_v48 = vadd.f32 %v4967_v62, %v4935_v23 }
 0x42f   :  { %v4990_v46 = vmax.f32 %v4968_v48, 0.0  ;;  %v4739_v48 = vadd.f32 %v18104_v31, %v18063_v0  ;;  %v5139_v31 = vrot.slane %v18271_v41, 6 }
 0x431   :  { %v18280_v2 = vld [vmem:[#allocation1] sm:$0xff]  ;;  %v18282_v58 = vld [vmem:[#allocation1 + $0x9] sm:$0xff]  ;;  %v5014_v53 = vmul.f32 %v18137_v40, %v4990_v46  ;;  %v5133_v46 = vrot.slane %v5132_v3, 3 }
 0x432   :  { %21004 = vst [vmem:[#allocation39_spill] sm:$0xff] %v18280_v2  ;;  %v4903_v2 = vpop.f32.mrf.mxu3  ;;  %v4936_v3 = vpop.f32.mrf.mxu0 }
 0x433   :  { %21005 = vst [vmem:[#allocation28_spill] sm:$0xff] %v18282_v58  ;;  %v4870_v58 = vpop.f32.mrf.mxu1 }
 0x434   :  { %5254 = vst [vmem:[#allocation1] ss:$9 sm:$0xff] %v5122_v5  ;;  %v5129_v5 = vrot.slane %v5128_v45, 1 }
 0x435   :  { %5255 = vst [vmem:[#allocation1 + $0x1] ss:$9 sm:$0xff] %v5124_v15  ;;  %v5038_v15 = vadd.f32 %v18141_v14, %v5014_v53  ;;  %v4772_v53 = vadd.f32 %v18110_v60, %v4739_v48 }
 0x436   :  { %5256 = vst [vmem:[#allocation1 + $0x2] ss:$9 sm:$0xff] %v5126_v32 }
 0x437   :  { %v5069_v9 = vrot.slane %v5038_v15, 7  ;;  %v5760_v60 = vrot.slane %v5038_v15, 6 }
 0x439   :  { %v5142_v1 = vsel %vm5074_vm3, %v18040_v42, %v5069_v9  ;;  %v5143_v23 = vsel %vm5076_vm4, %v18040_v42, %v5069_v9  ;;  %v5145_v32 = vsel %vm5079_vm5, %v18040_v42, %v5069_v9  ;;  %v5147_v17 = vsel %vm5082_vm6, %v18040_v42, %v5069_v9 }
 0x43a   :  { %v18317_v45 = vsel %vm5085_vm8, %v18040_v42, %v5069_v9  ;;  %v18325_v33 = vsel %vm5091_vm9, %v18040_v42, %v5069_v9  ;;  %v18329_v62 = vsel %vm5094_vm10, %v5069_v9, %v18040_v42  ;;  %v18360_v41 = vsel %vm5773_vm14, %v5760_v60, %v18040_v42  ;;  %v4906_v15 = vpop.f32.mrf.mxu3 }
 0x43b   :  { %21014 = vst [vmem:[#allocation41_spill] sm:$0xff] %v18360_v41  ;;  %v5154_v41 = vrot.slane %v18325_v33, 6 }
 0x43d   :  { %v18302_v4 = vld [vmem:[#allocation1] sm:$0xff]  ;;  %v18304_v37 = vld [vmem:[#allocation1 + $0x9] sm:$0xff] }
 0x43e   :  { %21008 = vst [vmem:[#allocation43_spill] sm:$0xff] %v18302_v4  ;;  %v4805_v4 = vadd.f32 %v18118_v39, %v4772_v53  ;;  %v4969_v39 = vpop.f32.mrf.mxu2  ;;  %v5144_v53 = vrot.slane %v5143_v23, 1 }
 0x43f   :  { %21009 = vst [vmem:[#allocation30_spill] sm:$0xff] %v18304_v37  ;;  %v5137_v37 = vrot.slane %v5136_v52, 5 }
 0x440   :  { %5259 = vst [vmem:[#allocation1] ss:$9 sm:$0xff] %v5127_v35  ;;  %v18321_v35 = vsel %vm5088_vm7, %v18040_v42, %v5069_v9  ;;  %v4838_v9 = vadd.f32 %v18122_v34, %v4805_v4  ;;  %v18352_v34 = vsel %vm5767_vm12, %v18040_v42, %v5760_v60  ;;  %v4873_v4 = vpop.f32.mrf.mxu1 }
 0x441   :  { %5260 = vst [vmem:[#allocation1 + $0x1] ss:$9 sm:$0xff] %v5129_v5  ;;  %v5135_v5 = vrot.slane %v5134_v25, 4  ;;  %v5141_v25 = vrot.slane %v18275_v43, 7 }
 0x442   :  { %5261 = vst [vmem:[#allocation1 + $0x2] ss:$9 sm:$0xff] %v5131_v63  ;;  %v4871_v19 = vadd.f32 %v4870_v58, %v4838_v9  ;;  %v5146_v9 = vrot.slane %v5145_v32, 2 }
 0x443   :  { %21013 = vst [vmem:[#allocation20_spill] sm:$0xff] %v18352_v34  ;;  %v4874_v34 = vadd.f32 %v4873_v4, %v18124_v44 }
 0x444   :  { %v4904_v0 = vadd.f32 %v4903_v2, %v4871_v19  ;;  %v18356_v19 = vsel %vm5770_vm13, %v18040_v42, %v5760_v60 }
 0x449   :  { %v18334_v63 = vld [vmem:[#allocation1] sm:$0xff]  ;;  %v18336_v8 = vld [vmem:[#allocation1 + $0x9] sm:$0xff] }
 0x44a   :  { %21010 = vst [vmem:[#allocation50_spill] sm:$0xff] %v18336_v8  ;;  %v4972_v8 = vpop.f32.mrf.mxu2 }
 0x44b   :  { %5264 = vst [vmem:[#allocation1] ss:$9 sm:$0xff] %v5133_v46  ;;  %v4937_v46 = vadd.f32 %v4936_v3, %v4904_v0  ;;  %v5148_v3 = vrot.slane %v5147_v17, 3 }
 0x44c   :  { %5265 = vst [vmem:[#allocation1 + $0x1] ss:$9 sm:$0xff] %v5135_v5 }
 0x44d   :  { %5266 = vst [vmem:[#allocation1 + $0x2] ss:$9 sm:$0xff] %v5137_v37  ;;  %v18348_v37 = vsel %vm5765_vm11, %v18040_v42, %v5760_v60  ;;  %v4970_v43 = vadd.f32 %v4969_v39, %v4937_v46 }
 0x44f   :  { %v4992_v2 = vmax.f32 %v4970_v43, 0.0  ;;  %v4875_v43 = vpop.f32.mrf.mxu1 }
 0x451   :  { %v5016_v58 = vmul.f32 %v18137_v40, %v4992_v2  ;;  %v5150_v2 = vrot.slane %v18317_v45, 4  ;;  %v4678_v45 = vadd.f32 %v18074_v54, %v17983_v12 }
 0x453   :  { %v5040_v5 = vadd.f32 %v18141_v14, %v5016_v58  ;;  %v4908_v58 = vpop.f32.mrf.mxu3 }
 0x454   :  { %v18342_v48 = vld [vmem:[#allocation1] sm:$0xff]  ;;  %v18344_v52 = vld [vmem:[#allocation1 + $0x9] sm:$0xff] }
 0x455   :  { %21011 = vst [vmem:[#allocation52_spill] sm:$0xff] %v18342_v48  ;;  %v5070_v42 = vrot.slane %v5040_v5, 7 }
 0x456   :  { %21012 = vst [vmem:[#allocation17_spill] sm:$0xff] %v18344_v52  ;;  %v4939_v52 = vpop.f32.mrf.mxu0 }
 0x457   :  { %5269 = vst [vmem:[#allocation1] ss:$9 sm:$0xff] %v5139_v31  ;;  %v5158_v60 = vsel %vm5076_vm4, %v18050_v16, %v5070_v42  ;;  %v5160_v23 = vsel %vm5079_vm5, %v18050_v16, %v5070_v42  ;;  %v5162_v32 = vsel %vm5082_vm6, %v18050_v16, %v5070_v42  ;;  %v18382_v17 = vsel %vm5088_vm7, %v18050_v16, %v5070_v42 }
 0x458   :  { %5270 = vst [vmem:[#allocation1 + $0x1] ss:$9 sm:$0xff] %v5141_v25  ;;  %v18378_v25 = vsel %vm5085_vm8, %v18050_v16, %v5070_v42  ;;  %v18386_v46 = vsel %vm5091_vm9, %v18050_v16, %v5070_v42  ;;  %v18390_v39 = vsel %vm5094_vm10, %v5070_v42, %v18050_v16 }
 0x459   :  { %5271 = vst [vmem:[#allocation1 + $0x2] ss:$9 sm:$0xff] %v5142_v1  ;;  %v5157_v1 = vsel %vm5074_vm3, %v18050_v16, %v5070_v42  ;;  %v5761_v42 = vrot.slane %v5040_v5, 6 }
 0x45b   :  { %v18410_v44 = vsel %vm5765_vm11, %v18050_v16, %v5761_v42  ;;  %v18418_v12 = vsel %vm5770_vm13, %v18050_v16, %v5761_v42  ;;  %v18422_v54 = vsel %vm5773_vm14, %v5761_v42, %v18050_v16 }
 0x45c   :  { %21020 = vst [vmem:[#allocation36_spill] sm:$0xff] %v18422_v54 }
 0x460   :  { %v18364_v0 = vld [vmem:[#allocation1] sm:$0xff]  ;;  %v18366_v31 = vld [vmem:[#allocation1 + $0x9] sm:$0xff] }
 0x461   :  { %21015 = vst [vmem:[#allocation27_spill] sm:$0xff] %v18364_v0  ;;  %v4878_v0 = vpop.f32.mrf.mxu1 }
 0x462   :  { %21016 = vst [vmem:[#allocation40_spill] sm:$0xff] %v18366_v31  ;;  %v4907_v31 = vadd.f32 %v4906_v15, %v4874_v34  ;;  %v18414_v34 = vsel %vm5767_vm12, %v18050_v16, %v5761_v42 }
 0x463   :  { %5274 = vst [vmem:[#allocation1] ss:$9 sm:$0xff] %v5144_v53  ;;  %v5152_v53 = vrot.slane %v18321_v35, 5  ;;  %v5156_v35 = vrot.slane %v18329_v62, 7  ;;  %v5159_v62 = vrot.slane %v5158_v60, 1  ;;  %v5161_v60 = vrot.slane %v5160_v23, 2 }
 0x464   :  { %5275 = vst [vmem:[#allocation1 + $0x1] ss:$9 sm:$0xff] %v5146_v9  ;;  %v4940_v48 = vadd.f32 %v4939_v52, %v4907_v31 }
 0x465   :  { %5276 = vst [vmem:[#allocation1 + $0x2] ss:$9 sm:$0xff] %v5148_v3 }
 0x466   :  { %21019 = vst [vmem:[#allocation22_spill] sm:$0xff] %v18414_v34 }
 0x469   :  { %v4880_v31 = vpop.f32.mrf.mxu1 }
 0x46c   :  { %v18394_v9 = vld [vmem:[#allocation1] sm:$0xff]  ;;  %v18396_v3 = vld [vmem:[#allocation1 + $0x9] sm:$0xff] }
 0x46d   :  { %21017 = vst [vmem:[#allocation10_spill] sm:$0xff] %v18394_v9  ;;  %v4879_v9 = vadd.f32 %v4878_v0, %v18130_v56  ;;  %v4711_v56 = vadd.f32 %v18081_v26, %v4678_v45  ;;  %v4941_v45 = vpop.f32.mrf.mxu0 }
 0x46e   :  { %21018 = vst [vmem:[#allocation21_spill] sm:$0xff] %v18396_v3  ;;  %v4911_v3 = vpop.f32.mrf.mxu3 }
 0x46f   :  { %5279 = vst [vmem:[#allocation1] ss:$9 sm:$0xff] %v5150_v2  ;;  %v4912_v52 = vadd.f32 %v4911_v3, %v4879_v9  ;;  %v4744_v4 = vadd.f32 %v18114_v18, %v4711_v56  ;;  %v5163_v9 = vrot.slane %v5162_v32, 3 }
 0x470   :  { %5280 = vst [vmem:[#allocation1 + $0x1] ss:$9 sm:$0xff] %v5152_v53 }
 0x471   :  { %5281 = vst [vmem:[#allocation1 + $0x2] ss:$9 sm:$0xff] %v5154_v41  ;;  %v4973_v41 = vadd.f32 %v4972_v8, %v4940_v48  ;;  %v4777_v5 = vadd.f32 %v18120_v49, %v4744_v4  ;;  %v5165_v49 = vrot.slane %v18378_v25, 4 }
 0x473   :  { %v4994_v15 = vmax.f32 %v4973_v41, 0.0  ;;  %v4810_v53 = vadd.f32 %v18126_v13, %v4777_v5 }
 0x475   :  { %v5018_v0 = vmul.f32 %v18137_v40, %v4994_v15  ;;  %v4843_v26 = vadd.f32 %v18128_v27, %v4810_v53  ;;  %v5167_v53 = vrot.slane %v18382_v17, 5 }
 0x476   :  { %v4913_v16 = vpop.f32.mrf.mxu3 }
 0x477   :  { %v5042_v42 = vadd.f32 %v18141_v14, %v5018_v0  ;;  %v4876_v48 = vadd.f32 %v4875_v43, %v4843_v26  ;;  %v4944_v16 = vpop.f32.mrf.mxu0  ;;  %v5169_v26 = vrot.slane %v18386_v46, 6 }
 0x478   :  { %v18404_v33 = vld [vmem:[#allocation1] sm:$0xff]  ;;  %v18406_v2 = vld [vmem:[#allocation1 + $0x9] sm:$0xff] }
 0x479   :  { %5284 = vst [vmem:[#allocation1] ss:$9 sm:$0xff] %v5156_v35  ;;  %v5071_v18 = vrot.slane %v5042_v42, 7  ;;  %v5762_v3 = vrot.slane %v5042_v42, 6  ;;  %v4974_v35 = vpop.f32.mrf.mxu2  ;;  %v4909_v43 = vadd.f32 %v4908_v58, %v4876_v48  ;;  %v4945_v48 = vadd.f32 %v4944_v16, %v4912_v52 }
 0x47a   :  { %5285 = vst [vmem:[#allocation1 + $0x1] ss:$9 sm:$0xff] %v5157_v1 }
 0x47b   :  { %5286 = vst [vmem:[#allocation1 + $0x2] ss:$9 sm:$0xff] %v5159_v62  ;;  %v5172_v13 = vsel %vm5074_vm3, %v18059_v30, %v5071_v18  ;;  %v5173_v27 = vsel %vm5076_vm4, %v18059_v30, %v5071_v18  ;;  %v5175_v23 = vsel %vm5079_vm5, %v18059_v30, %v5071_v18  ;;  %v18444_v32 = vsel %vm5082_vm6, %v18059_v30, %v5071_v18 }
 0x47c   :  { %v18448_v25 = vsel %vm5085_vm8, %v18059_v30, %v5071_v18  ;;  %v18452_v56 = vsel %vm5088_vm7, %v18059_v30, %v5071_v18  ;;  %v18456_v62 = vsel %vm5091_vm9, %v18059_v30, %v5071_v18  ;;  %v18460_v41 = vsel %vm5094_vm10, %v5071_v18, %v18059_v30 }
 0x47d   :  { %v18464_v4 = vsel %vm5765_vm11, %v18059_v30, %v5762_v3  ;;  %v18468_v15 = vsel %vm5767_vm12, %v18059_v30, %v5762_v3  ;;  %v18472_v58 = vsel %vm5770_vm13, %v18059_v30, %v5762_v3  ;;  %v18476_v5 = vsel %vm5773_vm14, %v5762_v3, %v18059_v30 }
 0x47e   :  { %21022 = vst [vmem:[#allocation44_spill] sm:$0xff] %v18468_v15  ;;  %v4942_v0 = vadd.f32 %v4941_v45, %v4909_v43  ;;  %v5182_v54 = vrot.slane %v18452_v56, 5  ;;  %v5184_v34 = vrot.slane %v18456_v62, 6 }
 0x47f   :  { %21023 = vst [vmem:[#allocation25_spill] sm:$0xff] %v18476_v5 }
 0x480   :  { %v4975_v31 = vadd.f32 %v4974_v35, %v4942_v0  ;;  %v4946_v0 = vpop.f32.mrf.mxu0 }
 0x481   :  { %v4977_v42 = vpop.f32.mrf.mxu2 }
 0x482   :  { %v18431_v1 = vld [vmem:[#allocation1] sm:$0xff]  ;;  %v18433_v8 = vld [vmem:[#allocation1 + $0x9] sm:$0xff]  ;;  %v4996_v18 = vmax.f32 %v4975_v31, 0.0  ;;  %v4978_v3 = vadd.f32 %v4977_v42, %v4945_v48 }
 0x483   :  { %21021 = vst [vmem:[#allocation54_spill] sm:$0xff] %v18433_v8 }
 0x484   :  { %5289 = vst [vmem:[#allocation1] ss:$9 sm:$0xff] %v5161_v60  ;;  %v5020_v30 = vmul.f32 %v18137_v40, %v4996_v18  ;;  %v4998_v45 = vmax.f32 %v4978_v3, 0.0 }
 0x485   :  { %5290 = vst [vmem:[#allocation1 + $0x1] ss:$9 sm:$0xff] %v5163_v9 }
 0x486   :  { %5291 = vst [vmem:[#allocation1 + $0x2] ss:$9 sm:$0xff] %v5165_v49  ;;  %v5171_v49 = vrot.slane %v18390_v39, 7  ;;  %v5044_v17 = vadd.f32 %v18141_v14, %v5020_v30  ;;  %v5022_v46 = vmul.f32 %v18137_v40, %v4998_v45 }
 0x488   :  { %v5072_v35 = vrot.slane %v5044_v17, 7  ;;  %v5763_v43 = vrot.slane %v5044_v17, 6 }
 0x489   :  { %v4979_v5 = vpop.f32.mrf.mxu2 }
 0x48a   :  { %v5187_v52 = vsel %vm5074_vm3, %v18070_v29, %v5072_v35  ;;  %v5188_v39 = vsel %vm5076_vm4, %v18070_v29, %v5072_v35  ;;  %v5190_v31 = vsel %vm5079_vm5, %v18070_v29, %v5072_v35  ;;  %v5194_v16 = vsel %vm5085_vm8, %v18070_v29, %v5072_v35 }
 0x48b   :  { %v5174_v5 = vrot.slane %v5173_v27, 1  ;;  %v5198_v18 = vsel %vm5091_vm9, %v18070_v29, %v5072_v35  ;;  %v5200_v48 = vsel %vm5094_vm10, %v5072_v35, %v18070_v29  ;;  %v18510_v30 = vsel %vm5765_vm11, %v18070_v29, %v5763_v43 }
 0x48c   :  { %21026 = vst [vmem:[#allocation11_spill] sm:$0xff] %v18510_v30  ;;  %v18514_v3 = vsel %vm5767_vm12, %v18070_v29, %v5763_v43  ;;  %v18518_v27 = vsel %vm5770_vm13, %v18070_v29, %v5763_v43  ;;  %v18522_v17 = vsel %vm5773_vm14, %v5763_v43, %v18070_v29  ;;  %v5186_v30 = vrot.slane %v18460_v41, 7 }
 0x48d   :  { %v18480_v60 = vld [vmem:[#allocation1] sm:$0xff]  ;;  %v18482_v9 = vld [vmem:[#allocation1 + $0x9] sm:$0xff]  ;;  %21027 = vst [vmem:[#allocation14_spill] sm:$0xff] %v18514_v3 }
 0x48e   :  { %5294 = vst [vmem:[#allocation1] ss:$9 sm:$0xff] %v5167_v53  ;;  %v5192_v53 = vsel %vm5082_vm6, %v18070_v29, %v5072_v35 }
 0x48f   :  { %5295 = vst [vmem:[#allocation1 + $0x1] ss:$9 sm:$0xff] %v5169_v26  ;;  %v5196_v26 = vsel %vm5088_vm7, %v18070_v29, %v5072_v35  ;;  %v5193_v56 = vrot.slane %v5192_v53, 3 }
 0x490   :  { %5296 = vst [vmem:[#allocation1 + $0x2] ss:$9 sm:$0xff] %v5171_v49  ;;  %v5176_v49 = vrot.slane %v5175_v23, 2  ;;  %v5046_v23 = vadd.f32 %v18141_v14, %v5022_v46  ;;  %v5197_v62 = vrot.slane %v5196_v26, 5 }
 0x491   :  { %21028 = vst [vmem:[#allocation47_spill] sm:$0xff] %v18518_v27 }
 0x492   :  { %21029 = vst [vmem:[#allocation33_spill] sm:$0xff] %v18522_v17  ;;  %v5180_v17 = vrot.slane %v18448_v25, 4  ;;  %v5191_v25 = vrot.slane %v5190_v31, 2 }
 0x497   :  { %v18498_v42 = vld [vmem:[#allocation1] sm:$0xff]  ;;  %v18500_v40 = vld [vmem:[#allocation1 + $0x9] sm:$0xff] }
 0x498   :  { %21024 = vst [vmem:[#allocation19_spill] sm:$0xff] %v18498_v42 }
 0x499   :  { %21025 = vst [vmem:[#allocation51_spill] sm:$0xff] %v18500_v40 }
 0x49a   :  { %5299 = vst [vmem:[#allocation1] ss:$9 sm:$0xff] %v5172_v13  ;;  %v5073_v13 = vrot.slane %v5046_v23, 7 }
 0x49b   :  { %5300 = vst [vmem:[#allocation1 + $0x1] ss:$9 sm:$0xff] %v5174_v5 }
 0x49c   :  { %5301 = vst [vmem:[#allocation1 + $0x2] ss:$9 sm:$0xff] %v5176_v49  ;;  %v5202_v45 = vsel %vm5074_vm3, %v18078_v20, %v5073_v13  ;;  %v5203_v35 = vsel %vm5076_vm4, %v18078_v20, %v5073_v13  ;;  %v5205_v0 = vsel %vm5079_vm5, %v18078_v20, %v5073_v13  ;;  %v5207_v5 = vsel %vm5082_vm6, %v18078_v20, %v5073_v13 }
 0x49d   :  { %v5209_v29 = vsel %vm5085_vm8, %v18078_v20, %v5073_v13  ;;  %v5211_v14 = vsel %vm5088_vm7, %v18078_v20, %v5073_v13  ;;  %v5213_v43 = vsel %vm5091_vm9, %v18078_v20, %v5073_v13  ;;  %v5215_v46 = vsel %vm5094_vm10, %v5073_v13, %v18078_v20 }
 0x49e   :  { %v5178_v49 = vrot.slane %v18444_v32, 3  ;;  %v5189_v32 = vrot.slane %v5188_v39, 1 }
 0x4a3   :  { %v18543_v3 = vld [vmem:[#allocation1] sm:$0xff]  ;;  %v18545_v15 = vld [vmem:[#allocation1 + $0x9] sm:$0xff] }
 0x4a4   :  { %5304 = vst [vmem:[#allocation1] ss:$9 sm:$0xff] %v5178_v49  ;;  %v5199_v49 = vrot.slane %v5198_v18, 6 }
 0x4a5   :  { %5305 = vst [vmem:[#allocation1 + $0x1] ss:$9 sm:$0xff] %v5180_v17 }
 0x4a6   :  { %5306 = vst [vmem:[#allocation1 + $0x2] ss:$9 sm:$0xff] %v5182_v54  ;;  %v5195_v54 = vrot.slane %v5194_v16, 4 }
 0x4ad   :  { %v18550_v40 = vld [vmem:[#allocation1] sm:$0xff]  ;;  %v18552_v13 = vld [vmem:[#allocation1 + $0x9] sm:$0xff] }
 0x4ae   :  { %5309 = vst [vmem:[#allocation1] ss:$9 sm:$0xff] %v5184_v34  ;;  %v5764_v34 = vrot.slane %v5046_v23, 6  ;;  %v5208_v23 = vrot.slane %v5207_v5, 3 }
 0x4af   :  { %5310 = vst [vmem:[#allocation1 + $0x1] ss:$9 sm:$0xff] %v5186_v30  ;;  %v5206_v30 = vrot.slane %v5205_v0, 2 }
 0x4b0   :  { %5311 = vst [vmem:[#allocation1 + $0x2] ss:$9 sm:$0xff] %v5187_v52  ;;  %v5201_v52 = vrot.slane %v5200_v48, 7  ;;  %v18568_v53 = vsel %vm5765_vm11, %v18078_v20, %v5764_v34  ;;  %v18572_v16 = vsel %vm5767_vm12, %v18078_v20, %v5764_v34  ;;  %v18576_v26 = vsel %vm5770_vm13, %v18078_v20, %v5764_v34 }
 0x4b1   :  { %21031 = vst [vmem:[#allocation9_spill] sm:$0xff] %v18568_v53  ;;  %v18580_v18 = vsel %vm5773_vm14, %v5764_v34, %v18078_v20  ;;  %v5204_v48 = vrot.slane %v5203_v35, 1  ;;  %v5216_v35 = vrot.slane %v5215_v46, 7  ;;  %v21060_v53 = vld [vmem:[#allocation6_spill] sm:$0xff] }
 0x4b2   :  { %21032 = vst [vmem:[#allocation29_spill] sm:$0xff] %v18572_v16 }
 0x4b3   :  { %21033 = vst [vmem:[#allocation8_spill] sm:$0xff] %v18580_v18 }
 0x4b7   :  { %v18554_v8 = vld [vmem:[#allocation1] sm:$0xff]  ;;  %v18556_v42 = vld [vmem:[#allocation1 + $0x9] sm:$0xff] }
 0x4b8   :  { %5314 = vst [vmem:[#allocation1] ss:$9 sm:$0xff] %v5189_v32 }
 0x4b9   :  { %5315 = vst [vmem:[#allocation1 + $0x1] ss:$9 sm:$0xff] %v5191_v25 }
 0x4ba   :  { %5316 = vst [vmem:[#allocation1 + $0x2] ss:$9 sm:$0xff] %v5193_v56  ;;  %v5210_v56 = vrot.slane %v5209_v29, 4  ;;  %v5772_v29 = vrot.slane %v18162_v24, 4 }
 0x4c1   :  { %v18558_v41 = vld [vmem:[#allocation1] sm:$0xff]  ;;  %v18560_v17 = vld [vmem:[#allocation1 + $0x9] sm:$0xff] }
 0x4c2   :  { %21030 = vst [vmem:[#allocation7_spill] sm:$0xff] %v18560_v17 }
 0x4c3   :  { %5319 = vst [vmem:[#allocation1] ss:$9 sm:$0xff] %v5195_v54  ;;  %v5212_v54 = vrot.slane %v5211_v14, 5 }
 0x4c4   :  { %5320 = vst [vmem:[#allocation1 + $0x1] ss:$9 sm:$0xff] %v5197_v62  ;;  %v5214_v62 = vrot.slane %v5213_v43, 6 }
 0x4c5   :  { %5321 = vst [vmem:[#allocation1 + $0x2] ss:$9 sm:$0xff] %v5199_v49 }
 0x4cc   :  { %v18562_v39 = vld [vmem:[#allocation1] sm:$0xff]  ;;  %v18564_v31 = vld [vmem:[#allocation1 + $0x9] sm:$0xff] }
 0x4cd   :  { %5324 = vst [vmem:[#allocation1] ss:$9 sm:$0xff] %v5201_v52 }
 0x4ce   :  { %5325 = vst [vmem:[#allocation1 + $0x1] ss:$9 sm:$0xff] %v5202_v45  ;;  %v5769_v45 = vrot.slane %v18159_v55, 2  ;;  %v5780_v55 = vrot.slane %v18197_v7, 4  ;;  %v5416_v7 = vsel %vm5387_vm0, %v18206_v11, -inf }
 0x4cf   :  { %5326 = vst [vmem:[#allocation1 + $0x2] ss:$9 sm:$0xff] %v5204_v48 }
 0x4d6   :  { %v18582_v32 = vld [vmem:[#allocation1] sm:$0xff]  ;;  %v18584_v25 = vld [vmem:[#allocation1 + $0x9] sm:$0xff] }
 0x4d7   :  { %21034 = vst [vmem:[#allocation15_spill] sm:$0xff] %v18582_v32 }
 0x4d8   :  { %21035 = vst [vmem:[#allocation38_spill] sm:$0xff] %v18584_v25 }
 0x4d9   :  { %5329 = vst [vmem:[#allocation1] ss:$9 sm:$0xff] %v5206_v30  ;;  %v5787_v30 = vrot.slane %v18246_v50, 4  ;;  %v5423_v50 = vsel %vm5387_vm0, %v18208_v21, -inf }
 0x4da   :  { %5330 = vst [vmem:[#allocation1 + $0x1] ss:$9 sm:$0xff] %v5208_v23 }
 0x4db   :  { %5331 = vst [vmem:[#allocation1 + $0x2] ss:$9 sm:$0xff] %v5210_v56 }
 0x4e2   :  { %v18586_v49 = vld [vmem:[#allocation1] sm:$0xff]  ;;  %v18588_v20 = vld [vmem:[#allocation1 + $0x9] sm:$0xff] }
 0x4e3   :  { %21036 = vst [vmem:[#allocation45_spill] sm:$0xff] %v18586_v49 }
 0x4e4   :  { %21037 = vst [vmem:[#allocation12_spill] sm:$0xff] %v18588_v20  ;;  %v5458_v20 = vsel %vm5387_vm0, %v21060_v53, -inf }
 0x4e5   :  { %5334 = vst [vmem:[#allocation1] ss:$9 sm:$0xff] %v5212_v54  ;;  %v5395_v54 = vsel %vm5387_vm0, %v18173_v38, -inf }
 0x4e6   :  { %5335 = vst [vmem:[#allocation1 + $0x1] ss:$9 sm:$0xff] %v5214_v62 }
 0x4e7   :  { %5336 = vst [vmem:[#allocation1 + $0x2] ss:$9 sm:$0xff] %v5216_v35  ;;  %v5417_v35 = vrot.slane %v5416_v7, 4 }
 0x4e8   :  { %5836 = vst [vmem:[#allocation1 + $0x20] ss:$4 sm:$0xff] %v5769_v45  ;;  %v5396_v45 = vrot.slane %v5395_v54, 4 }
 0x4e9   :  { %v5418_v38 = vmax.f32 %v5416_v7, %v5417_v35 }
 0x4eb   :  { %v5419_v7 = vrot.slane %v5418_v38, 2 }
 0x4ee   :  { %v18591_v0 = vld [vmem:[#allocation1] sm:$0xff]  ;;  %v18593_v5 = vld [vmem:[#allocation1 + $0x9] sm:$0xff] }
 0x4ef   :  { %21038 = vst [vmem:[#allocation5_spill] sm:$0xff] %v18591_v0 }
 0x4f0   :  { %21039 = vst [vmem:[#allocation23_spill] sm:$0xff] %v18593_v5 }
 0x4f1   :  { %5832 = vst [vmem:[#allocation1] ss:$4 sm:$0xff] %v18156_v22 }
 0x4f8   :  { %v18597_v14 = vld.sshfl [vmem:[#allocation1] sm:$0xff pattern:$0x73625140]  ;;  %v18599_v43 = vld.sshfl [vmem:[#allocation1 + $0x8] sm:$0xff pattern:$0x73625140] }
 0x4f9   :  { %21040 = vst [vmem:[#allocation53_spill] sm:$0xff] %v18597_v14  ;;  %v5420_v14 = vmax.f32 %v5418_v38, %v5419_v7 }
 0x4fa   :  { %21041 = vst [vmem:[#allocation16_spill] sm:$0xff] %v18599_v43 }
 0x4fb   :  { %5839 = vst [vmem:[#allocation1] ss:$4 sm:$0xff] %v5772_v29  ;;  %v5421_v7 = vrot.slane %v5420_v14, 1 }
 0x502   :  { %v18601_v46 = vld.sshfl [vmem:[#allocation1] sm:$0xff pattern:$0x73625140]  ;;  %v18603_v34 = vld.sshfl [vmem:[#allocation1 + $0x8] sm:$0xff pattern:$0x73625140] }
 0x503   :  { %21042 = vst [vmem:[#allocation26_spill] sm:$0xff] %v18601_v46 }
 0x504   :  { %21043 = vst [vmem:[#allocation49_spill] sm:$0xff] %v18603_v34  ;;  %v21054_v34 = vld [vmem:[#allocation48_spill] sm:$0xff] }
 0x505   :  { %5845 = vst [vmem:[#allocation1] ss:$4 sm:$0xff] %v18191_v59  ;;  %v5388_v59 = vsel %vm5387_vm0, %v18171_v28, -inf }
 0x506   :  { %v5389_v62 = vrot.slane %v5388_v59, 4 }
 0x50c   :  { %v18607_v52 = vld.sshfl [vmem:[#allocation1] sm:$0xff pattern:$0x73625140]  ;;  %v18609_v48 = vld.sshfl [vmem:[#allocation1 + $0x8] sm:$0xff pattern:$0x73625140] }
 0x50d   :  { %21044 = vst [vmem:[#allocation56_spill] sm:$0xff] %v18607_v52  ;;  %v21055_v52 = vld [vmem:[#allocation34_spill] sm:$0xff] }
 0x50e   :  { %21045 = vst [vmem:[#allocation13_spill] sm:$0xff] %v18609_v48  ;;  %v5430_v48 = vsel %vm5387_vm0, %v21054_v34, -inf }
 0x50f   :  { %5851 = vst [vmem:[#allocation1] ss:$4 sm:$0xff] %v5780_v55  ;;  %v5424_v55 = vrot.slane %v5423_v50, 4  ;;  %v5431_v34 = vrot.slane %v5430_v48, 4 }
 0x511   :  { %v5425_v21 = vmax.f32 %v5423_v50, %v5424_v55  ;;  %v5794_v55 = vrot.slane %v18295_v51, 4  ;;  %v5432_v0 = vmax.f32 %v5430_v48, %v5431_v34  ;;  %v5459_v48 = vrot.slane %v5458_v20, 4  ;;  %v11390_v34 = vld [vmem:[%s20213_s7 + $0xf8] sm:$0xff] }
 0x512   :  { %v5563_v51 = vsel %vm5387_vm0, %v18406_v2, -inf  ;;  %8540 = vmatpush.bf16.msra.mxu2 %v11390_v34 }
 0x516   :  { %v18611_v22 = vld.sshfl [vmem:[#allocation1] sm:$0xff pattern:$0x73625140]  ;;  %v18613_v24 = vld.sshfl [vmem:[#allocation1 + $0x8] sm:$0xff pattern:$0x73625140] }
 0x517   :  { %21046 = vst [vmem:[#allocation57_spill] sm:$0xff] %v18611_v22  ;;  %v21053_v22 = vld [vmem:[#allocation55_spill] sm:$0xff] }
 0x518   :  { %21047 = vst [vmem:[#allocation58_spill] sm:$0xff] %v18613_v24 }
 0x519   :  { %5857 = vst [vmem:[#allocation1] ss:$4 sm:$0xff] %v18240_v36  ;;  %v5402_v36 = vsel %vm5387_vm0, %v18186_v10, -inf  ;;  %v5397_v10 = vmax.f32 %v5395_v54, %v5396_v45  ;;  %v5426_v45 = vrot.slane %v5425_v21, 2 }
 0x51a   :  { %v5403_v29 = vrot.slane %v5402_v36, 4 }
 0x51b   :  { %v5398_v54 = vrot.slane %v5397_v10, 2  ;;  %v5427_v35 = vmax.f32 %v5425_v21, %v5426_v45 }
 0x51d   :  { %v5399_v5 = vmax.f32 %v5397_v10, %v5398_v54  ;;  %v5428_v53 = vrot.slane %v5427_v35, 1 }
 0x51f   :  { %v5400_v38 = vrot.slane %v5399_v5, 1  ;;  %v18691_v2 = vmax.f32 %v5427_v35, %v5428_v53  ;;  %v21068_v53 = vld [vmem:[#allocation39_spill] sm:$0xff] }
 0x520   :  { %v18617_v23 = vld.sshfl [vmem:[#allocation1] sm:$0xff pattern:$0x73625140]  ;;  %v18619_v56 = vld.sshfl [vmem:[#allocation1 + $0x8] sm:$0xff pattern:$0x73625140] }
 0x521   :  { %21048 = vst [vmem:[#allocation59_spill] sm:$0xff] %v18617_v23  ;;  %v5404_v23 = vmax.f32 %v5402_v36, %v5403_v29 }
 0x522   :  { %21049 = vst [vmem:[#allocation60_spill] sm:$0xff] %v18619_v56  ;;  %v5390_v56 = vmax.f32 %v5388_v59, %v5389_v62  ;;  %v5444_v59 = vsel %vm5387_vm0, %v18235_v6, -inf }
 0x523   :  { %5863 = vst [vmem:[#allocation1] ss:$4 sm:$0xff] %v5787_v30  ;;  %v21050_v30 = vld [vmem:[#allocation37_spill] sm:$0xff]  ;;  %v5405_v36 = vrot.slane %v5404_v23, 2 }
 0x524   :  { %v5409_v28 = vsel %vm5387_vm0, %v21050_v30, -inf  ;;  %v5437_v30 = vsel %vm5387_vm0, %v21055_v52, -inf  ;;  %v5391_v43 = vrot.slane %v5390_v56, 2 }
 0x525   :  { %v5410_v24 = vrot.slane %v5409_v28, 4  ;;  %v5438_v29 = vrot.slane %v5437_v30, 4 }
 0x527   :  { %v5411_v50 = vmax.f32 %v5409_v28, %v5410_v24  ;;  %v5406_v24 = vmax.f32 %v5404_v23, %v5405_v36  ;;  %v5439_v52 = vmax.f32 %v5437_v30, %v5438_v29  ;;  %v5433_v30 = vrot.slane %v5432_v0, 2 }
 0x528   :  { %v5460_v29 = vmax.f32 %v5458_v20, %v5459_v48  ;;  %v11389_v20 = vld [vmem:[%s20213_s7 + $0xf0] sm:$0xff]  ;;  %v18689_v48 = vmax.f32 %v5420_v14, %v5421_v7 }
 0x529   :  { %v5412_v28 = vrot.slane %v5411_v50, 2  ;;  %v5407_v10 = vrot.slane %v5406_v24, 1  ;;  %v5440_v54 = vrot.slane %v5439_v52, 2  ;;  %8541 = vmatpush.bf16.msra.mxu2 %v11389_v20 }
 0x52a   :  { %v18633_v18 = vld.sshfl [vmem:[#allocation1] sm:$0xff pattern:$0x73625140]  ;;  %v18635_v11 = vld.sshfl [vmem:[#allocation1 + $0x8] sm:$0xff pattern:$0x73625140] }
 0x52b   :  { %21051 = vst [vmem:[#allocation37_spill] sm:$0xff] %v18633_v18  ;;  %v5445_v18 = vrot.slane %v5444_v59, 4  ;;  %v5413_v21 = vmax.f32 %v5411_v50, %v5412_v28  ;;  %v11382_v50 = vld [vmem:[%s20213_s7 + $0xb8] sm:$0xff] }
 0x52c   :  { %21052 = vst [vmem:[#allocation61_spill] sm:$0xff] %v18635_v11  ;;  %8527 = vmatpush.bf16.msra.mxu0 %v11382_v50 }
 0x52d   :  { %5869 = vst [vmem:[#allocation1] ss:$4 sm:$0xff] %v18287_v57  ;;  %v5451_v57 = vsel %vm5387_vm0, %v18237_v47, -inf  ;;  %v5392_v47 = vmax.f32 %v5390_v56, %v5391_v43  ;;  %v5446_v62 = vmax.f32 %v5444_v59, %v5445_v18  ;;  %v5584_v18 = vsel %vm5387_vm0, %v18480_v60, -inf }
 0x52e   :  { %v5452_v16 = vrot.slane %v5451_v57, 4  ;;  %v5591_v59 = vsel %vm5387_vm0, %v18482_v9, -inf  ;;  %v5556_v60 = vsel %vm5387_vm0, %v18404_v33, -inf  ;;  %v5585_v28 = vrot.slane %v5584_v18, 4  ;;  %v11381_v33 = vld [vmem:[%s20213_s7 + $0xb0] sm:$0xff] }
 0x52f   :  { %v5393_v23 = vrot.slane %v5392_v47, 1  ;;  %v5447_v36 = vrot.slane %v5446_v62, 2  ;;  %v5441_v56 = vmax.f32 %v5439_v52, %v5440_v54  ;;  %v5592_v49 = vrot.slane %v5591_v59, 4 }
 0x530   :  { %v5586_v54 = vmax.f32 %v5584_v18, %v5585_v28  ;;  %8528 = vmatpush.bf16.msra.mxu0 %v11381_v33  ;;  %v5472_v18 = vsel %vm5387_vm0, %v21068_v53, -inf }
 0x531   :  { %v5448_v43 = vmax.f32 %v5446_v62, %v5447_v36  ;;  %v5394_v52 = vmax.f32 %v5392_v47, %v5393_v23  ;;  %v5564_v62 = vrot.slane %v5563_v51, 4  ;;  %v18693_v36 = vmax.f32 %v5406_v24, %v5407_v10  ;;  %v11388_v10 = vld [vmem:[%s20213_s7 + $0xe8] sm:$0xff] }
 0x532   :  { %v5442_v50 = vrot.slane %v5441_v56, 1  ;;  %v5593_v61 = vmax.f32 %v5591_v59, %v5592_v49  ;;  %v11380_v49 = vld [vmem:[%s20213_s7 + $0xa8] sm:$0xff]  ;;  %8542 = vmatpush.bf16.msra.mxu2 %v11388_v10  ;;  %v5612_v10 = vsel %vm5387_vm0, %v18543_v3, -inf }
 0x533   :  { %v5449_v34 = vrot.slane %v5448_v43, 1  ;;  %v21069_v59 = vld [vmem:[#allocation28_spill] sm:$0xff]  ;;  %v5613_v3 = vrot.slane %v5612_v10, 4 }
 0x534   :  { %v18651_v11 = vld.sshfl [vmem:[#allocation1] sm:$0xff pattern:$0x73625140]  ;;  %v18653_v6 = vld.sshfl [vmem:[#allocation1 + $0x8] sm:$0xff pattern:$0x73625140]  ;;  %v18723_v33 = vmax.f32 %v5441_v56, %v5442_v50  ;;  %8529 = vmatpush.bf16.msra.mxu0 %v11380_v49 }
 0x535   :  { %21058 = vst [vmem:[#allocation55_spill] sm:$0xff] %v18651_v11  ;;  %v5453_v11 = vmax.f32 %v5451_v57, %v5452_v16  ;;  %v5450_v20 = vmax.f32 %v5448_v43, %v5449_v34  ;;  %v21072_v50 = vld [vmem:[#allocation52_spill] sm:$0xff] }
 0x536   :  { %21059 = vst [vmem:[#allocation48_spill] sm:$0xff] %v18653_v6  ;;  %v5514_v34 = vsel %vm5387_vm0, %v21072_v50, -inf }
 0x537   :  { %5875 = vst [vmem:[#allocation1] ss:$4 sm:$0xff] %v5794_v55  ;;  %v5454_v16 = vrot.slane %v5453_v11, 2  ;;  %v21064_v55 = vld [vmem:[#allocation35_spill] sm:$0xff] }
 0x538   :  { %v5465_v9 = vsel %vm5387_vm0, %v21064_v55, -inf  ;;  %v5557_v55 = vrot.slane %v5556_v60, 4 }
 0x539   :  { %v5455_v6 = vmax.f32 %v5453_v11, %v5454_v16  ;;  %v5461_v11 = vrot.slane %v5460_v29, 2 }
 0x53a   :  { %v5558_v47 = vmax.f32 %v5556_v60, %v5557_v55  ;;  %v21070_v55 = vld [vmem:[#allocation50_spill] sm:$0xff] }
 0x53b   :  { %v18717_v60 = vmax.f32 %v5460_v29, %v5461_v11  ;;  %v11379_v29 = vld [vmem:[%s20213_s7 + $0xa0] sm:$0xff] }
 0x53c   :  { %8530 = vmatpush.bf16.msra.mxu0 %v11379_v29 }
 0x53e   :  { %v18666_v57 = vld.sshfl [vmem:[#allocation1] sm:$0xff pattern:$0x73625140]  ;;  %v18668_v45 = vld.sshfl [vmem:[#allocation1 + $0x8] sm:$0xff pattern:$0x73625140] }
 0x53f   :  { %21062 = vst [vmem:[#allocation34_spill] sm:$0xff] %v18666_v57  ;;  %v5456_v57 = vrot.slane %v5455_v6, 1 }
 0x540   :  { %21063 = vst [vmem:[#allocation6_spill] sm:$0xff] %v18668_v45  ;;  %v5414_v45 = vrot.slane %v5413_v21, 1 }
 0x541   :  { %5881 = vst [vmem:[#allocation1] ss:$4 sm:$0xff] %v18348_v37  ;;  %v5434_v37 = vmax.f32 %v5432_v0, %v5433_v30  ;;  %v5466_v0 = vrot.slane %v5465_v9, 4  ;;  %v5401_v30 = vmax.f32 %v5399_v5, %v5400_v38  ;;  %v5724_v5 = vmax.f32 %v5394_v52, %v18689_v48 }
 0x542   :  { %v18695_v14 = vmax.f32 %v5413_v21, %v5414_v45  ;;  %v21067_v38 = vrot.slane %v18356_v19, 4  ;;  %v5565_v21 = vmax.f32 %v5563_v51, %v5564_v62  ;;  %v5479_v45 = vsel %vm5387_vm0, %v21069_v59, -inf }
 0x543   :  { %v5435_v16 = vrot.slane %v5434_v37, 1  ;;  %v5726_v23 = vmax.f32 %v5401_v30, %v18691_v2  ;;  %v18703_v24 = vmax.f32 %v5465_v9, %v5466_v0  ;;  %v5587_v9 = vrot.slane %v5586_v54, 2 }
 0x544   :  { %v5500_v19 = vsel %vm5387_vm0, %v18334_v63, -inf  ;;  %v5457_v51 = vmax.f32 %v5455_v6, %v5456_v57  ;;  %v5594_v48 = vrot.slane %v5593_v61, 2  ;;  %v5507_v2 = vsel %vm5387_vm0, %v21070_v55, -inf  ;;  %v11387_v63 = vld [vmem:[%s20213_s7 + $0xe0] sm:$0xff]  ;;  %v21074_v55 = vld [vmem:[#allocation17_spill] sm:$0xff] }
 0x545   :  { %v18721_v28 = vmax.f32 %v5434_v37, %v5435_v16  ;;  %v5559_v37 = vrot.slane %v5558_v47, 2  ;;  %v5473_v0 = vrot.slane %v5472_v18, 4  ;;  %v5480_v56 = vrot.slane %v5479_v45, 4  ;;  %v21071_v57 = vld [vmem:[#allocation43_spill] sm:$0xff]  ;;  %8543 = vmatpush.bf16.msra.mxu2 %v11387_v63 }
 0x546   :  { %v5468_v52 = vrot.slane %v18703_v24, 2  ;;  %v5566_v30 = vrot.slane %v5565_v21, 2  ;;  %v5501_v43 = vrot.slane %v5500_v19, 4  ;;  %v5486_v62 = vsel %vm5387_vm0, %v21071_v57, -inf }
 0x547   :  { %v5588_v11 = vmax.f32 %v5586_v54, %v5587_v9  ;;  %v5508_v16 = vrot.slane %v5507_v2, 4  ;;  %v5595_v53 = vmax.f32 %v5593_v61, %v5594_v48  ;;  %v5619_v59 = vsel %vm5387_vm0, %v18545_v15, -inf  ;;  %v11378_v61 = vld [vmem:[%s20213_s7 + $0x98] sm:$0xff] }
 0x548   :  { %v18697_v7 = vld.sshfl [vmem:[#allocation1] sm:$0xff pattern:$0x73625140]  ;;  %v18699_v35 = vld.sshfl [vmem:[#allocation1 + $0x8] sm:$0xff pattern:$0x73625140]  ;;  %v5560_v50 = vmax.f32 %v5558_v47, %v5559_v37  ;;  %v18751_v6 = vmax.f32 %v5724_v5, %v5450_v20  ;;  %v18755_v29 = vmax.f32 %v5472_v18, %v5473_v0  ;;  %v5567_v48 = vmax.f32 %v5565_v21, %v5566_v30  ;;  %8531 = vmatpush.bf16.msra.mxu0 %v11378_v61 }
 0x549   :  { %21065 = vst [vmem:[#allocation35_spill] sm:$0xff] %v18697_v7  ;;  %v5521_v57 = vsel %vm5387_vm0, %v21074_v55, -inf  ;;  %v11386_v15 = vld [vmem:[%s20213_s7 + $0xd8] sm:$0xff]  ;;  %v5620_v63 = vrot.slane %v5619_v59, 4  ;;  %v5502_v47 = vmax.f32 %v5500_v19, %v5501_v43  ;;  %v5589_v5 = vrot.slane %v5588_v11, 1  ;;  %v11377_v55 = vld [vmem:[%s20213_s7 + $0x90] sm:$0xff] }
 0x54a   :  { %21066 = vst [vmem:[#allocation62_spill] sm:$0xff] %v18699_v35  ;;  %v5481_v20 = vmax.f32 %v5479_v45, %v5480_v56  ;;  %8544 = vmatpush.bf16.msra.mxu2 %v11386_v15  ;;  %v5614_v18 = vmax.f32 %v5612_v10, %v5613_v3  ;;  %v5509_v0 = vmax.f32 %v5507_v2, %v5508_v16  ;;  %v11385_v21 = vld [vmem:[%s20213_s7 + $0xd0] sm:$0xff]  ;;  %v5561_v30 = vrot.slane %v5560_v50, 1 }
 0x54b   :  { %5887 = vst [vmem:[#allocation1] ss:$4 sm:$0xff] %v21067_v38  ;;  %v21073_v38 = vld [vmem:[#allocation30_spill] sm:$0xff]  ;;  %v5621_v37 = vmax.f32 %v5619_v59, %v5620_v63  ;;  %v5475_v19 = vrot.slane %v18755_v29, 2  ;;  %v5522_v56 = vrot.slane %v5521_v57, 4  ;;  %v5568_v61 = vrot.slane %v5567_v48, 1 }
 0x54c   :  { %v5493_v49 = vsel %vm5387_vm0, %v21073_v38, -inf  ;;  %v18753_v38 = vmax.f32 %v5726_v23, %v5457_v51  ;;  %v5487_v23 = vrot.slane %v5486_v62, 4  ;;  %v5515_v51 = vrot.slane %v5514_v34, 4  ;;  %8532 = vmatpush.bf16.msra.mxu0 %v11377_v55 }
 0x54d   :  { %v5494_v45 = vrot.slane %v5493_v49, 4  ;;  %v5615_v43 = vrot.slane %v5614_v18, 2  ;;  %v5622_v15 = vrot.slane %v5621_v37, 2  ;;  %v5503_v10 = vrot.slane %v5502_v47, 2 }
 0x54e   :  { %v5590_v3 = vmax.f32 %v5588_v11, %v5589_v5  ;;  %v5482_v59 = vrot.slane %v5481_v20, 2  ;;  %v5488_v2 = vmax.f32 %v5486_v62, %v5487_v23  ;;  %v5516_v16 = vmax.f32 %v5514_v34, %v5515_v51  ;;  %8545 = vmatpush.bf16.msra.mxu2 %v11385_v21  ;;  %v11376_v62 = vld [vmem:[%s20213_s7 + $0x88] sm:$0xff] }
 0x54f   :  { %v5616_v63 = vmax.f32 %v5614_v18, %v5615_v43  ;;  %v5623_v7 = vmax.f32 %v5621_v37, %v5622_v15  ;;  %v5562_v17 = vmax.f32 %v5560_v50, %v5561_v30  ;;  %v5469_v27 = vmax.f32 %v18703_v24, %v5468_v52  ;;  %v11384_v34 = vld [vmem:[%s20213_s7 + $0xc8] sm:$0xff]  ;;  %v21080_v18 = vld [vmem:[#allocation27_spill] sm:$0xff] }
 0x550   :  { %v5495_v32 = vmax.f32 %v5493_v49, %v5494_v45  ;;  %v5523_v46 = vmax.f32 %v5521_v57, %v5522_v56  ;;  %v21079_v11 = vrot.slane %v18418_v12, 4  ;;  %v5569_v5 = vmax.f32 %v5567_v48, %v5568_v61  ;;  %v21081_v52 = vld [vmem:[#allocation40_spill] sm:$0xff]  ;;  %8533 = vmatpush.bf16.msra.mxu0 %v11376_v62 }
 0x551   :  { %v5624_v23 = vrot.slane %v5623_v7, 1  ;;  %v5504_v51 = vmax.f32 %v5502_v47, %v5503_v10  ;;  %v5740_v50 = vmax.f32 %v5562_v17, %v5590_v3  ;;  %v5528_v24 = vsel %vm5387_vm0, %v21080_v18, -inf  ;;  %v11375_v48 = vld [vmem:[%s20213_s7 + $0x80] sm:$0xff] }
 0x552   :  { %v18747_v54 = vld.sshfl [vmem:[#allocation1] sm:$0xff pattern:$0x73625140]  ;;  %v18749_v9 = vld.sshfl [vmem:[#allocation1 + $0x8] sm:$0xff pattern:$0x73625140]  ;;  %8546 = vmatpush.bf16.msra.mxu2 %v11384_v34  ;;  %v5476_v47 = vmax.f32 %v18755_v29, %v5475_v19  ;;  %v5483_v61 = vmax.f32 %v5481_v20, %v5482_v59 }
 0x553   :  { %21075 = vst [vmem:[#allocation39_spill] sm:$0xff] %v18747_v54  ;;  %v5535_v12 = vsel %vm5387_vm0, %v21081_v52, -inf  ;;  %v5517_v49 = vrot.slane %v5516_v16, 2  ;;  %v5489_v55 = vrot.slane %v5488_v2, 2  ;;  %v11383_v17 = vld [vmem:[%s20213_s7 + $0xc0] sm:$0xff]  ;;  %v5470_v21 = vrot.slane %v5469_v27, 1 }
 0x554   :  { %21076 = vst [vmem:[#allocation28_spill] sm:$0xff] %v18749_v9  ;;  %v5510_v9 = vrot.slane %v5509_v0, 2  ;;  %v5496_v30 = vrot.slane %v5495_v32, 2  ;;  %v5524_v45 = vrot.slane %v5523_v46, 2  ;;  %v21082_v10 = vrot.slane %v18717_v60, 1  ;;  %8534 = vmatpush.bf16.msra.mxu0 %v11375_v48 }
 0x555   :  { %5893 = vst [vmem:[#allocation1] ss:$4 sm:$0xff] %v18410_v44  ;;  %v5596_v44 = vrot.slane %v5595_v53, 1  ;;  %v5490_v62 = vmax.f32 %v5488_v2, %v5489_v55  ;;  %v11366_v2 = vld [vmem:[%s20213_s7 + $0x38] sm:$0xff] }
 0x556   :  { %v5511_v15 = vmax.f32 %v5509_v0, %v5510_v9  ;;  %v5464_v3 = vmax.f32 %v18717_v60, %v21082_v10  ;;  %8547 = vmatpush.bf16.msra.mxu2 %v11383_v17  ;;  %v5497_v60 = vmax.f32 %v5495_v32, %v5496_v30  ;;  %v5525_v59 = vmax.f32 %v5523_v46, %v5524_v45  ;;  %v11373_v45 = vld [vmem:[%s20213_s7 + $0x70] sm:$0xff] }
 0x557   :  { %v5597_v35 = vmax.f32 %v5595_v53, %v5596_v44  ;;  %v5617_v53 = vrot.slane %v5616_v63, 1  ;;  %v5625_v44 = vmax.f32 %v5623_v7, %v5624_v23  ;;  %v5529_v7 = vrot.slane %v5528_v24, 4  ;;  %8501 = vmatpush.bf16.msra.mxu1 %v11366_v2 }
 0x558   :  { %v5728_v23 = vmax.f32 %v18693_v36, %v18721_v28  ;;  %v5484_v32 = vrot.slane %v5483_v61, 1  ;;  %v5512_v46 = vrot.slane %v5511_v15, 1  ;;  %v5491_v52 = vrot.slane %v5490_v62, 1  ;;  %v21086_v36 = vld [vmem:[#allocation21_spill] sm:$0xff] }
 0x559   :  { %v5618_v57 = vmax.f32 %v5616_v63, %v5617_v53  ;;  %v5742_v37 = vmax.f32 %v5569_v5, %v5597_v35  ;;  %v5536_v35 = vrot.slane %v5535_v12, 4  ;;  %v5518_v63 = vmax.f32 %v5516_v16, %v5517_v49 }
 0x55a   :  { %v5477_v16 = vrot.slane %v5476_v47, 1  ;;  %v5530_v53 = vmax.f32 %v5528_v24, %v5529_v7  ;;  %v5549_v28 = vsel %vm5387_vm0, %v21086_v36, -inf  ;;  %v5526_v55 = vrot.slane %v5525_v59, 1 }
 0x55b   :  { %v18795_v56 = vmax.f32 %v5740_v50, %v5618_v57  ;;  %v18797_v43 = vmax.f32 %v5742_v37, %v5625_v44  ;;  %v5537_v5 = vmax.f32 %v5535_v12, %v5536_v35  ;;  %v11374_v50 = vld [vmem:[%s20213_s7 + $0x78] sm:$0xff]  ;;  %v5519_v18 = vrot.slane %v5518_v63, 1 }
 0x55c   :  { %v18771_v54 = vld.sshfl [vmem:[#allocation1] sm:$0xff pattern:$0x73625140]  ;;  %v18773_v25 = vld.sshfl [vmem:[#allocation1 + $0x8] sm:$0xff pattern:$0x73625140]  ;;  %v18823_v12 = vmax.f32 %v5469_v27, %v5470_v21  ;;  %8514 = vmatpush.bf16.msra.mxu3 %v11374_v50  ;;  %v18831_v44 = vmax.f32 %v5728_v23, %v5464_v3  ;;  %v18833_v48 = vmax.f32 %v5476_v47, %v5477_v16  ;;  %v18841_v7 = vmax.f32 %v5483_v61, %v5484_v32 }
 0x55d   :  { %21077 = vst [vmem:[#allocation50_spill] sm:$0xff] %v18771_v54  ;;  %v6577_v29 = vsel %vm5076_vm4, %v18795_v56, %v18751_v6  ;;  %v6578_v19 = vsel %vm5076_vm4, %v18797_v43, %v18753_v38  ;;  %v5498_v37 = vrot.slane %v5497_v60, 1  ;;  %v5531_v17 = vrot.slane %v5530_v53, 2  ;;  %v11365_v21 = vld [vmem:[%s20213_s7 + $0x30] sm:$0xff]  ;;  %v21092_v32 = vld [vmem:[#allocation51_spill] sm:$0xff] }
 0x55e   :  { %21078 = vst [vmem:[#allocation43_spill] sm:$0xff] %v18773_v25  ;;  %v6679_v20 = vpack.c.bf16 %v6577_v29, %v6577_v29  ;;  %v6680_v0 = vpack.c.bf16 %v6578_v19, %v6578_v19  ;;  %v5538_v30 = vrot.slane %v5537_v5, 2  ;;  %v18845_v35 = vmax.f32 %v5518_v63, %v5519_v18  ;;  %v21087_v29 = vld [vmem:[#allocation19_spill] sm:$0xff]  ;;  %8502 = vmatpush.bf16.msra.mxu1 %v11365_v21  ;;  %v18875_v18 = vld.sshfl [vmem:[#allocation1 + $0x28] sm:$0xff pattern:$0x73625140] }
 0x55f   :  { %5899 = vst [vmem:[#allocation1] ss:$4 sm:$0xff] %v21079_v11  ;;  %v5505_v11 = vrot.slane %v5504_v51, 1  ;;  %v5550_v10 = vrot.slane %v5549_v28, 4  ;;  %v18847_v47 = vmax.f32 %v5490_v62, %v5491_v52  ;;  %v5570_v3 = vsel %vm5387_vm0, %v18431_v1, -inf }
 0x560   :  { %8535 = vmatmul.bf16.vlgmr.msra.gmra.mxu0 %v6679_v20  ;;  %8548 = vmatmul.bf16.vlgmr.msra.gmra.mxu2 %v6680_v0  ;;  %v5598_v19 = vsel %vm5387_vm0, %v21087_v29, -inf  ;;  %v18861_v63 = vmax.f32 %v5497_v60, %v5498_v37  ;;  %v18863_v62 = vmax.f32 %v5525_v59, %v5526_v55  ;;  %v21091_v1 = vrot.slane %v18472_v58, 4  ;;  %v18867_v16 = vld.sshfl [vmem:[#allocation1 + $0x20] sm:$0xff pattern:$0x73625140]  ;;  %v11364_v60 = vld [vmem:[%s20213_s7 + $0x28] sm:$0xff] }
 0x561   :  { %v18829_v57 = vmax.f32 %v5504_v51, %v5505_v11  ;;  %v18843_v51 = vmax.f32 %v5511_v15, %v5512_v46  ;;  %v21088_v11 = vld [vmem:[#allocation54_spill] sm:$0xff]  ;;  %8515 = vmatpush.bf16.msra.mxu3 %v11373_v45  ;;  %v18869_v23 = vmax.f32 %v5530_v53, %v5531_v17  ;;  %v18871_v2 = vmax.f32 %v5537_v5, %v5538_v30  ;;  %v11372_v58 = vld [vmem:[%s20213_s7 + $0x68] sm:$0xff]  ;;  %v21096_v15 = vld [vmem:[#allocation11_spill] sm:$0xff] }
 0x562   :  { %v5577_v20 = vsel %vm5387_vm0, %v21088_v11, -inf  ;;  %v5605_v46 = vsel %vm5387_vm0, %v21092_v32, -inf  ;;  %v5626_v53 = vsel %vm5387_vm0, %v18550_v40, -inf  ;;  %v5640_v52 = vsel %vm5387_vm0, %v18554_v8, -inf  ;;  %8503 = vmatpush.bf16.msra.mxu1 %v11364_v60 }
 0x563   :  { %v5647_v36 = vsel %vm5387_vm0, %v18556_v42, -inf  ;;  %v5571_v37 = vrot.slane %v5570_v3, 4  ;;  %v5633_v55 = vsel %vm5387_vm0, %v18552_v13, -inf  ;;  %v5599_v40 = vrot.slane %v5598_v19, 4  ;;  %v11363_v42 = vld [vmem:[%s20213_s7 + $0x20] sm:$0xff] }
 0x564   :  { %v5578_v17 = vrot.slane %v5577_v20, 4  ;;  %v5606_v30 = vrot.slane %v5605_v46, 4  ;;  %v5627_v21 = vrot.slane %v5626_v53, 4  ;;  %v11371_v13 = vld [vmem:[%s20213_s7 + $0x60] sm:$0xff]  ;;  %v5641_v45 = vrot.slane %v5640_v52, 4 }
 0x565   :  { %8516 = vmatpush.bf16.msra.mxu3 %v11372_v58  ;;  %v5634_v11 = vrot.slane %v5633_v55, 4  ;;  %v5675_v32 = vsel %vm5387_vm0, %v18564_v31, -inf  ;;  %v5572_v60 = vmax.f32 %v5570_v3, %v5571_v37  ;;  %v18913_v58 = vsel %vm5387_vm0, %v18558_v41, -inf  ;;  %v11422_v41 = vld [vmem:[%s20213_s7 + $0x1f8] sm:$0xff] }
 0x566   :  { %v18808_v34 = vld.sshfl [vmem:[#allocation1] sm:$0xff pattern:$0x73625140]  ;;  %v18810_v9 = vld.sshfl [vmem:[#allocation1 + $0x8] sm:$0xff pattern:$0x73625140]  ;;  %8504 = vmatpush.bf16.msra.mxu1 %v11363_v42  ;;  %v5579_v5 = vmax.f32 %v5577_v20, %v5578_v17  ;;  %v5607_v59 = vmax.f32 %v5605_v46, %v5606_v30  ;;  %v5642_v20 = vmax.f32 %v5640_v52, %v5641_v45  ;;  %8592 = vmatpush.bf16.msrb.mxu2 %v11422_v41 }
 0x567   :  { %21083 = vst [vmem:[#allocation52_spill] sm:$0xff] %v18808_v34  ;;  %v5676_v3 = vrot.slane %v5675_v32, 4  ;;  %v21097_v30 = vld [vmem:[#allocation31_spill] sm:$0xff]  ;;  %v11361_v41 = vld [vmem:[%s20213_s7 + $0x10] sm:$0xff] }
 0x568   :  { %21084 = vst [vmem:[#allocation30_spill] sm:$0xff] %v18810_v9  ;;  %v21114_v34 = vld [vmem:[#allocation9_spill] sm:$0xff] }
 0x569   :  { %5905 = vst [vmem:[#allocation1] ss:$4 sm:$0xff] %v18464_v4  ;;  %v21085_v4 = vld [vmem:[#allocation10_spill] sm:$0xff]  ;;  %8517 = vmatpush.bf16.msra.mxu3 %v11371_v13  ;;  %v21098_v13 = vrot.slane %v21097_v30, 2 }
 0x56a   :  { %v5542_v24 = vsel %vm5387_vm0, %v21085_v4, -inf  ;;  %v5551_v4 = vmax.f32 %v5549_v28, %v5550_v10  ;;  %v5648_v10 = vrot.slane %v5647_v36, 4  ;;  %v5600_v28 = vmax.f32 %v5598_v19, %v5599_v40 }
 0x56b   :  { %v5543_v27 = vrot.slane %v5542_v24, 4  ;;  %v5635_v40 = vmax.f32 %v5633_v55, %v5634_v11  ;;  %v11413_v55 = vld [vmem:[%s20213_s7 + $0x1b0] sm:$0xff] }
 0x56c   :  { %v5552_v29 = vrot.slane %v5551_v4, 2  ;;  %v5649_v46 = vmax.f32 %v5647_v36, %v5648_v10  ;;  %v5677_v36 = vmax.f32 %v5675_v32, %v5676_v3  ;;  %v5601_v45 = vrot.slane %v5600_v28, 2 }
 0x56d   :  { %v5544_v50 = vmax.f32 %v5542_v24, %v5543_v27  ;;  %v21093_v24 = vrot.slane %v21053_v22, 6  ;;  %v5533_v22 = vrot.slane %v18869_v23, 1  ;;  %v5540_v27 = vrot.slane %v18871_v2, 1 }
 0x56e   :  { %v5580_v10 = vrot.slane %v5579_v5, 2  ;;  %v5650_v3 = vrot.slane %v5649_v46, 2  ;;  %v5636_v30 = vrot.slane %v5635_v40, 2  ;;  %v18975_v25 = vmax.f32 %v5600_v28, %v5601_v45  ;;  %v21106_v28 = vld [vmem:[#allocation38_spill] sm:$0xff] }
 0x56f   :  { %5842 = vst [vmem:[#allocation1 + $0x20] ss:$4 sm:$0xff] %v21093_v24  ;;  %v5545_v8 = vrot.slane %v5544_v50, 2  ;;  %v18951_v11 = vmax.f32 %v18871_v2, %v5540_v27  ;;  %v5678_v2 = vrot.slane %v5677_v36, 2 }
 0x570   :  { %v18855_v0 = vld.sshfl [vmem:[#allocation1] sm:$0xff pattern:$0x73625140]  ;;  %v18857_v61 = vld.sshfl [vmem:[#allocation1 + $0x8] sm:$0xff pattern:$0x73625140] }
 0x571   :  { %21089 = vst [vmem:[#allocation17_spill] sm:$0xff] %v18855_v0  ;;  %v18926_v37 = vmax.f32 %v5544_v50, %v5545_v8  ;;  %v11362_v50 = vld [vmem:[%s20213_s7 + $0x18] sm:$0xff]  ;;  %v11421_v8 = vld [vmem:[%s20213_s7 + $0x1f0] sm:$0xff] }
 0x572   :  { %21090 = vst [vmem:[#allocation27_spill] sm:$0xff] %v18857_v61  ;;  %8505 = vmatpush.bf16.msra.mxu1 %v11362_v50  ;;  %8593 = vmatpush.bf16.msrb.mxu2 %v11421_v8  ;;  %v21102_v61 = vmax.f32 %v18833_v48, %v18829_v57  ;;  %v11420_v57 = vld [vmem:[%s20213_s7 + $0x1e8] sm:$0xff] }
 0x573   :  { %5911 = vst [vmem:[#allocation1] ss:$4 sm:$0xff] %v21091_v1  ;;  %v5668_v1 = vsel %vm5387_vm0, %v18562_v39, -inf  ;;  %v11414_v39 = vld [vmem:[%s20213_s7 + $0x1b8] sm:$0xff] }
 0x574   :  { %v5669_v31 = vrot.slane %v5668_v1, 4  ;;  %8579 = vmatpush.bf16.msrb.mxu0 %v11414_v39  ;;  %v5655_v39 = vrot.slane %v18913_v58, 4 }
 0x576   :  { %v18928_v42 = vld.sshfl [vmem:[#allocation1 + $0x20] sm:$0xff pattern:$0x73625140]  ;;  %v18930_v19 = vld.sshfl [vmem:[#allocation1 + $0x28] sm:$0xff pattern:$0x73625140]  ;;  %v5670_v52 = vmax.f32 %v5668_v1, %v5669_v31  ;;  %8506 = vmatpush.bf16.msra.mxu1 %v11361_v41  ;;  %8594 = vmatpush.bf16.msrb.mxu2 %v11420_v57 }
 0x577   :  { %5848 = vst [vmem:[#allocation1 + $0x20] ss:$4 sm:$0xff] %v21098_v13  ;;  %v5547_v1 = vrot.slane %v18926_v37, 1  ;;  %v21099_v13 = vld [vmem:[#allocation15_spill] sm:$0xff] }
 0x578   :  { %v5671_v31 = vrot.slane %v5670_v52, 2  ;;  %8580 = vmatpush.bf16.msrb.mxu0 %v11413_v55  ;;  %v5682_v50 = vsel %vm5387_vm0, %v21099_v13, -inf  ;;  %v18977_v55 = vmax.f32 %v5579_v5, %v5580_v10  ;;  %v11412_v13 = vld [vmem:[%s20213_s7 + $0x1a8] sm:$0xff]  ;;  %v21105_v5 = vld [vmem:[#allocation7_spill] sm:$0xff] }
 0x579   :  { %v11359_v57 = vld [vmem:[%s20213_s7] sm:$0xff] }
 0x57a   :  { %v18915_v24 = vld.sshfl [vmem:[#allocation1] sm:$0xff pattern:$0x73625140]  ;;  %v18917_v49 = vld.sshfl [vmem:[#allocation1 + $0x8] sm:$0xff pattern:$0x73625140]  ;;  %v19002_v41 = vmax.f32 %v5670_v52, %v5671_v31 }
 0x57b   :  { %21094 = vst [vmem:[#allocation40_spill] sm:$0xff] %v18915_v24  ;;  %v5683_v52 = vrot.slane %v5682_v50, 4  ;;  %v11411_v31 = vld [vmem:[%s20213_s7 + $0x1a0] sm:$0xff] }
 0x57c   :  { %21095 = vst [vmem:[#allocation10_spill] sm:$0xff] %v18917_v49  ;;  %v5628_v49 = vmax.f32 %v5626_v53, %v5627_v21  ;;  %v11370_v53 = vld [vmem:[%s20213_s7 + $0x58] sm:$0xff]  ;;  %v5534_v21 = vmax.f32 %v18869_v23, %v5533_v22  ;;  %v11369_v23 = vld [vmem:[%s20213_s7 + $0x50] sm:$0xff]  ;;  %v5643_v22 = vrot.slane %v5642_v20, 2  ;;  %8581 = vmatpush.bf16.msrb.mxu0 %v11412_v13 }
 0x57d   :  { %5917 = vst [vmem:[#allocation1] ss:$4 sm:$0xff] %v21096_v15  ;;  %v18932_v15 = vmax.f32 %v5551_v4, %v5552_v29  ;;  %v5573_v4 = vrot.slane %v5572_v60, 2  ;;  %v5608_v29 = vrot.slane %v5607_v59, 2  ;;  %8518 = vmatpush.bf16.msra.mxu3 %v11370_v53 }
 0x57e   :  { %v5629_v32 = vrot.slane %v5628_v49, 2  ;;  %v18973_v0 = vmax.f32 %v21102_v61, %v5534_v21  ;;  %v5656_v61 = vmax.f32 %v18913_v58, %v5655_v39  ;;  %v5689_v21 = vsel %vm5387_vm0, %v21106_v28, -inf  ;;  %v18996_v45 = vld.sshfl [vmem:[#allocation1 + $0x20] sm:$0xff pattern:$0x73625140]  ;;  %v11360_v39 = vld [vmem:[%s20213_s7 + $0x8] sm:$0xff] }
 0x57f   :  { %v18961_v27 = vmax.f32 %v5572_v60, %v5573_v4  ;;  %v5554_v53 = vrot.slane %v18932_v15, 1  ;;  %v18979_v60 = vmax.f32 %v5607_v59, %v5608_v29  ;;  %v21103_v4 = vld [vmem:[#allocation47_spill] sm:$0xff]  ;;  %v5661_v59 = vsel %vm5387_vm0, %v21105_v5, -inf  ;;  %v18998_v10 = vld.sshfl [vmem:[#allocation1 + $0x28] sm:$0xff pattern:$0x73625140]  ;;  %8507 = vmatpush.bf16.msra.mxu1 %v11360_v39 }
 0x580   :  { %v21104_v8 = vrot.slane %v21103_v4, 4  ;;  %v18989_v48 = vmax.f32 %v5628_v49, %v5629_v32  ;;  %v19000_v29 = vmax.f32 %v5642_v20, %v5643_v22  ;;  %v19006_v49 = vmax.f32 %v5635_v40, %v5636_v30  ;;  %v21107_v32 = vld [vmem:[#allocation32_spill] sm:$0xff]  ;;  %8582 = vmatpush.bf16.msrb.mxu0 %v11411_v31 }
 0x581   :  { %8519 = vmatpush.bf16.msra.mxu3 %v11369_v23  ;;  %v19004_v23 = vmax.f32 %v5649_v46, %v5650_v3  ;;  %v21108_v58 = vrot.slane %v21107_v32, 6  ;;  %v11368_v20 = vld [vmem:[%s20213_s7 + $0x48] sm:$0xff]  ;;  %v19016_v22 = vmax.f32 %v5677_v36, %v5678_v2  ;;  %v5548_v46 = vmax.f32 %v18926_v37, %v5547_v1  ;;  %v11419_v3 = vld [vmem:[%s20213_s7 + $0x1e0] sm:$0xff] }
 0x582   :  { %v5575_v40 = vrot.slane %v18961_v27, 1  ;;  %v5603_v30 = vrot.slane %v18975_v25, 1  ;;  %v5690_v36 = vrot.slane %v5689_v21, 4  ;;  %v5657_v1 = vrot.slane %v5656_v61, 2  ;;  %v11367_v5 = vld [vmem:[%s20213_s7 + $0x40] sm:$0xff]  ;;  %8595 = vmatpush.bf16.msrb.mxu2 %v11419_v3 }
 0x583   :  { %5854 = vst [vmem:[#allocation1 + $0x20] ss:$4 sm:$0xff] %v21108_v58  ;;  %v5684_v2 = vmax.f32 %v5682_v50, %v5683_v52  ;;  %v5610_v13 = vrot.slane %v18979_v60, 1  ;;  %v5673_v32 = vrot.slane %v19002_v41, 1  ;;  %v11398_v50 = vld [vmem:[%s20213_s7 + $0x138] sm:$0xff]  ;;  %v21109_v52 = vld [vmem:[#allocation45_spill] sm:$0xff]  ;;  %v21113_v3 = vmax.f32 %v18841_v7, %v18843_v51  ;;  %8508 = vmatpush.bf16.msra.mxu1 %v11359_v57 }
 0x584   :  { %v18966_v17 = vld.sshfl [vmem:[#allocation1] sm:$0xff pattern:$0x73625140]  ;;  %v18968_v24 = vld.sshfl [vmem:[#allocation1 + $0x8] sm:$0xff pattern:$0x73625140]  ;;  %v19062_v54 = vmax.f32 %v18932_v15, %v5554_v53  ;;  %v5691_v9 = vmax.f32 %v5689_v21, %v5690_v36  ;;  %v21115_v15 = vmax.f32 %v18847_v47, %v18845_v35  ;;  %v19083_v21 = vmax.f32 %v18961_v27, %v5575_v40 }
 0x585   :  { %21100 = vst [vmem:[#allocation21_spill] sm:$0xff] %v18966_v17  ;;  %8520 = vmatpush.bf16.msra.mxu3 %v11368_v20  ;;  %v11406_v20 = vld [vmem:[%s20213_s7 + $0x178] sm:$0xff]  ;;  %v5696_v37 = vsel %vm5387_vm0, %v21109_v52, -inf  ;;  %v5680_v4 = vrot.slane %v19016_v22, 1  ;;  %v21110_v28 = vld [vmem:[#allocation12_spill] sm:$0xff]  ;;  %v19059_v17 = vmax.f32 %v21113_v3, %v18951_v11  ;;  %v19071_v11 = vmax.f32 %v5656_v61, %v5657_v1  ;;  %v11397_v35 = vld [vmem:[%s20213_s7 + $0x130] sm:$0xff] }
 0x586   :  { %21101 = vst [vmem:[#allocation19_spill] sm:$0xff] %v18968_v24  ;;  %v5703_v58 = vsel %vm5387_vm0, %v21110_v28, -inf  ;;  %v5685_v24 = vrot.slane %v5684_v2, 2  ;;  %v11410_v28 = vld [vmem:[%s20213_s7 + $0x198] sm:$0xff]  ;;  %v5697_v7 = vrot.slane %v5696_v37, 4  ;;  %v19076_v53 = vmax.f32 %v21115_v15, %v5548_v46  ;;  %v11405_v47 = vld [vmem:[%s20213_s7 + $0x170] sm:$0xff] }
 0x587   :  { %5923 = vst [vmem:[#allocation1] ss:$4 sm:$0xff] %v21104_v8  ;;  %v5662_v8 = vrot.slane %v5661_v59, 4  ;;  %v5704_v51 = vrot.slane %v5703_v58, 4  ;;  %8553 = vmatpush.bf16.msrb.mxu1 %v11398_v50  ;;  %v19089_v61 = vmax.f32 %v18979_v60, %v5610_v13  ;;  %v21116_v36 = vld [vmem:[#allocation42_spill] sm:$0xff]  ;;  %8583 = vmatpush.bf16.msrb.mxu0 %v11410_v28  ;;  %v21119_v50 = vld [vmem:[#allocation23_spill] sm:$0xff] }
 0x588   :  { %v21117_v1 = vrot.slane %v21116_v36, 2  ;;  %v5698_v27 = vmax.f32 %v5696_v37, %v5697_v7  ;;  %v5686_v46 = vmax.f32 %v5684_v2, %v5685_v24  ;;  %v11417_v40 = vld [vmem:[%s20213_s7 + $0x1d0] sm:$0xff]  ;;  %v11396_v24 = vld [vmem:[%s20213_s7 + $0x128] sm:$0xff]  ;;  %v5674_v2 = vmax.f32 %v19002_v41, %v5673_v32 }
 0x589   :  { %v5663_v52 = vmax.f32 %v5661_v59, %v5662_v8  ;;  %8521 = vmatpush.bf16.msra.mxu3 %v11367_v5  ;;  %v19086_v8 = vmax.f32 %v18975_v25, %v5603_v30  ;;  %v11409_v25 = vld [vmem:[%s20213_s7 + $0x190] sm:$0xff]  ;;  %v5705_v60 = vmax.f32 %v5703_v58, %v5704_v51  ;;  %v5692_v5 = vrot.slane %v5691_v9, 2  ;;  %v11404_v37 = vld [vmem:[%s20213_s7 + $0x168] sm:$0xff] }
 0x58a   :  { %v19080_v59 = vld.sshfl [vmem:[#allocation1 + $0x28] sm:$0xff pattern:$0x73625140]  ;;  %v5681_v58 = vmax.f32 %v19016_v22, %v5680_v4  ;;  %v21123_v4 = vrot.slane %v19004_v23, 1 }
 0x58b   :  { %v21118_v30 = vld [vmem:[#allocation5_spill] sm:$0xff]  ;;  %v5664_v57 = vrot.slane %v5663_v52, 2  ;;  %v5706_v3 = vrot.slane %v5705_v60, 2  ;;  %8554 = vmatpush.bf16.msrb.mxu1 %v11397_v35  ;;  %v5693_v7 = vmax.f32 %v5691_v9, %v5692_v5  ;;  %8584 = vmatpush.bf16.msrb.mxu0 %v11409_v25  ;;  %v21122_v9 = vrot.slane %v19000_v29, 1 }
 0x58c   :  { %v5710_v13 = vsel %vm5387_vm0, %v21118_v30, -inf  ;;  %v11408_v36 = vld [vmem:[%s20213_s7 + $0x188] sm:$0xff]  ;;  %v5687_v30 = vrot.slane %v5686_v46, 1  ;;  %v5653_v32 = vmax.f32 %v19004_v23, %v21123_v4  ;;  %v21124_v5 = vrot.slane %v18576_v26, 4 }
 0x58d   :  { %8566 = vmatpush.bf16.msrb.mxu3 %v11406_v20  ;;  %v5717_v20 = vsel %vm5387_vm0, %v21119_v50, -inf  ;;  %v5711_v15 = vrot.slane %v5710_v13, 4  ;;  %v5646_v22 = vmax.f32 %v19000_v29, %v21122_v9  ;;  %v5665_v25 = vmax.f32 %v5663_v52, %v5664_v57  ;;  %v21127_v9 = vld [vmem:[#allocation18_spill] sm:$0xff] }
 0x58e   :  { %v19051_v39 = vld.sshfl [vmem:[#allocation1] sm:$0xff pattern:$0x73625140]  ;;  %v19053_v31 = vld.sshfl [vmem:[#allocation1 + $0x8] sm:$0xff pattern:$0x73625140]  ;;  %v21126_v23 = vmax.f32 %v18861_v63, %v18863_v62 }
 0x58f   :  { %21111 = vst [vmem:[#allocation54_spill] sm:$0xff] %v19051_v39  ;;  %v5718_v51 = vrot.slane %v5717_v20, 4  ;;  %v5712_v50 = vmax.f32 %v5710_v13, %v5711_v15  ;;  %v21125_v29 = vrot.slane %v18977_v55, 1  ;;  %8555 = vmatpush.bf16.msrb.mxu1 %v11396_v24  ;;  %v5750_v15 = vmax.f32 %v5653_v32, %v5681_v58  ;;  %8585 = vmatpush.bf16.msrb.mxu0 %v11408_v36  ;;  %v11415_v63 = vld [vmem:[%s20213_s7 + $0x1c0] sm:$0xff] }
 0x590   :  { %21112 = vst [vmem:[#allocation51_spill] sm:$0xff] %v19053_v31  ;;  %v11418_v31 = vld [vmem:[%s20213_s7 + $0x1d8] sm:$0xff]  ;;  %v19149_v26 = vmax.f32 %v21126_v23, %v19062_v54  ;;  %v21128_v4 = vrot.slane %v21127_v9, 6  ;;  %v11407_v54 = vld [vmem:[%s20213_s7 + $0x180] sm:$0xff]  ;;  %v5688_v32 = vmax.f32 %v5686_v46, %v5687_v30  ;;  %v11393_v9 = vld [vmem:[%s20213_s7 + $0x110] sm:$0xff] }
 0x591   :  { %5929 = vst [vmem:[#allocation1] ss:$4 sm:$0xff] %v21114_v34  ;;  %v19078_v34 = vld.sshfl [vmem:[#allocation1 + $0x20] sm:$0xff pattern:$0x73625140]  ;;  %8596 = vmatpush.bf16.msrb.mxu2 %v11418_v31  ;;  %v5699_v31 = vrot.slane %v5698_v27, 2  ;;  %8567 = vmatpush.bf16.msrb.mxu3 %v11405_v47  ;;  %v5707_v47 = vmax.f32 %v5705_v60, %v5706_v3  ;;  %v5583_v3 = vmax.f32 %v18977_v55, %v21125_v29 }
 0x592   :  { %5860 = vst [vmem:[#allocation1 + $0x20] ss:$4 sm:$0xff] %v21117_v1  ;;  %v11416_v1 = vld [vmem:[%s20213_s7 + $0x1c8] sm:$0xff]  ;;  %v11403_v60 = vld [vmem:[%s20213_s7 + $0x160] sm:$0xff]  ;;  %v5713_v24 = vrot.slane %v5712_v50, 2  ;;  %v21130_v29 = vld [vmem:[#allocation46_spill] sm:$0xff] }
 0x593   :  { %v5700_v35 = vmax.f32 %v5698_v27, %v5699_v31  ;;  %v11395_v27 = vld [vmem:[%s20213_s7 + $0x120] sm:$0xff]  ;;  %v5708_v31 = vrot.slane %v5707_v47, 1  ;;  %v5746_v36 = vmax.f32 %v5583_v3, %v19089_v61  ;;  %v5792_v23 = vrot.slane %v21130_v29, 2  ;;  %8586 = vmatpush.bf16.msrb.mxu0 %v11407_v54 }
 0x594   :  { %8556 = vmatpush.bf16.msrb.mxu1 %v11395_v27 }
 0x595   :  { %8597 = vmatpush.bf16.msrb.mxu2 %v11417_v40  ;;  %v5719_v40 = vmax.f32 %v5717_v20, %v5718_v51  ;;  %v5701_v13 = vrot.slane %v5700_v35, 1  ;;  %8568 = vmatpush.bf16.msrb.mxu3 %v11404_v37  ;;  %v5748_v20 = vmax.f32 %v5646_v22, %v5674_v2  ;;  %v5744_v51 = vmax.f32 %v19083_v21, %v19086_v8 }
 0x596   :  { %v5709_v55 = vmax.f32 %v5707_v47, %v5708_v31  ;;  %v5694_v37 = vrot.slane %v5693_v7, 1  ;;  %v21129_v2 = vrot.slane %v18989_v48, 1  ;;  %v5666_v8 = vrot.slane %v5665_v25, 1 }
 0x597   :  { %v5702_v62 = vmax.f32 %v5700_v35, %v5701_v13  ;;  %v5720_v58 = vrot.slane %v5719_v40, 2  ;;  %v11394_v35 = vld [vmem:[%s20213_s7 + $0x118] sm:$0xff]  ;;  %v21131_v47 = vrot.slane %v19006_v49, 1 }
 0x598   :  { %v19124_v28 = vld.sshfl [vmem:[#allocation1] sm:$0xff pattern:$0x73625140]  ;;  %v19126_v41 = vld.sshfl [vmem:[#allocation1 + $0x8] sm:$0xff pattern:$0x73625140]  ;;  %v5632_v21 = vmax.f32 %v18989_v48, %v21129_v2  ;;  %v19169_v22 = vmax.f32 %v5750_v15, %v5709_v55  ;;  %v5695_v13 = vmax.f32 %v5693_v7, %v5694_v37  ;;  %v5667_v3 = vmax.f32 %v5665_v25, %v5666_v8  ;;  %8557 = vmatpush.bf16.msrb.mxu1 %v11394_v35 }
 0x599   :  { %21120 = vst [vmem:[#allocation11_spill] sm:$0xff] %v19124_v28  ;;  %v19151_v52 = vld.sshfl [vmem:[#allocation1 + $0x20] sm:$0xff pattern:$0x73625140]  ;;  %8598 = vmatpush.bf16.msrb.mxu2 %v11416_v1  ;;  %v5749_v1 = vmax.f32 %v5748_v20, %v5702_v62  ;;  %8569 = vmatpush.bf16.msrb.mxu3 %v11403_v60  ;;  %v11402_v48 = vld [vmem:[%s20213_s7 + $0x158] sm:$0xff]  ;;  %v5639_v61 = vmax.f32 %v19006_v49, %v21131_v47  ;;  %v11444_v35 = vld [vmem:[%s20213_s7 + $0x2a8] sm:$0xff] }
 0x59a   :  { %21121 = vst [vmem:[#allocation31_spill] sm:$0xff] %v19126_v41  ;;  %v19153_v57 = vld.sshfl [vmem:[#allocation1 + $0x28] sm:$0xff pattern:$0x73625140]  ;;  %v5721_v31 = vmax.f32 %v5719_v40, %v5720_v58  ;;  %v6594_v30 = vsel %vm5076_vm4, %v19169_v22, %v19059_v17  ;;  %v11446_v49 = vld [vmem:[%s20213_s7 + $0x2b8] sm:$0xff]  ;;  %v19201_v54 = vmax.f32 %v5744_v51, %v5632_v21  ;;  %v21133_v25 = vmax.f32 %v18695_v14, %v18723_v33  ;;  %v11445_v33 = vld [vmem:[%s20213_s7 + $0x2b0] sm:$0xff] }
 0x59b   :  { %5935 = vst [vmem:[#allocation1] ss:$4 sm:$0xff] %v21124_v5  ;;  %v5714_v5 = vmax.f32 %v5712_v50, %v5713_v24  ;;  %v6593_v46 = vsel %vm5076_vm4, %v5749_v1, %v18973_v0  ;;  %v21132_v50 = vrot.slane %v19071_v11, 1  ;;  %v6684_v40 = vpack.c.bf16 %v6594_v30, %v6594_v30  ;;  %v11454_v15 = vld [vmem:[%s20213_s7 + $0x2f8] sm:$0xff]  ;;  %8631 = vmatpush.bf16.msra.mxu0 %v11446_v49  ;;  %v11453_v58 = vld [vmem:[%s20213_s7 + $0x2f0] sm:$0xff] }
 0x59c   :  { %5866 = vst [vmem:[#allocation1 + $0x20] ss:$4 sm:$0xff] %v21128_v4  ;;  %v6683_v7 = vpack.c.bf16 %v6593_v46, %v6593_v46  ;;  %v5722_v20 = vrot.slane %v5721_v31, 1  ;;  %v19207_v62 = vmax.f32 %v21133_v25, %v18823_v12  ;;  %v19213_v2 = vmax.f32 %v5746_v36, %v5639_v61  ;;  %8558 = vmatpush.bf16.msrb.mxu1 %v11393_v9  ;;  %v11452_v61 = vld [vmem:[%s20213_s7 + $0x2e8] sm:$0xff]  ;;  %v11430_v46 = vld [vmem:[%s20213_s7 + $0x238] sm:$0xff] }
 0x59d   :  { %8599 = vmatpush.bf16.msrb.mxu2 %v11415_v63  ;;  %v5660_v27 = vmax.f32 %v19071_v11, %v21132_v50  ;;  %v5715_v60 = vrot.slane %v5714_v5, 1  ;;  %v11401_v11 = vld [vmem:[%s20213_s7 + $0x150] sm:$0xff]  ;;  %8570 = vmatpush.bf16.msrb.mxu3 %v11402_v48  ;;  %v5754_v8 = vmax.f32 %v5667_v3, %v5695_v13  ;;  %v6555_v14 = vmax.f32 %v18973_v0, %v19076_v53  ;;  %v11438_v3 = vld [vmem:[%s20213_s7 + $0x278] sm:$0xff]  ;;  %v21136_v9 = vld [vmem:[#allocation16_spill] sm:$0xff] }
 0x59e   :  { %v5723_v37 = vmax.f32 %v5721_v31, %v5722_v20  ;;  %8587 = vmatmul.bf16.vlgmr.msrb.gmra.mxu0 %v6683_v7  ;;  %v6556_v21 = vmax.f32 %v19059_v17, %v19149_v26  ;;  %v6553_v36 = vmax.f32 %v18751_v6, %v18831_v44  ;;  %v6557_v0 = vmax.f32 %v18795_v56, %v19201_v54  ;;  %v11392_v17 = vld [vmem:[%s20213_s7 + $0x108] sm:$0xff]  ;;  %v11399_v31 = vld [vmem:[%s20213_s7 + $0x140] sm:$0xff] }
 0x59f   :  { %v5716_v4 = vmax.f32 %v5714_v5, %v5715_v60  ;;  %v5752_v63 = vmax.f32 %v5660_v27, %v5688_v32  ;;  %8632 = vmatpush.bf16.msra.mxu0 %v11445_v33  ;;  %v11400_v5 = vld [vmem:[%s20213_s7 + $0x148] sm:$0xff]  ;;  %v6554_v29 = vmax.f32 %v18753_v38, %v19207_v62  ;;  %v6558_v6 = vmax.f32 %v18797_v43, %v19213_v2  ;;  %v11443_v20 = vld [vmem:[%s20213_s7 + $0x2a0] sm:$0xff] }
 0x5a0   :  { %8600 = vmatmul.bf16.vlgmr.msrb.gmra.mxu2 %v6684_v40  ;;  %v19222_v12 = vmax.f32 %v5754_v8, %v5723_v37  ;;  %v21134_v38 = vld [vmem:[#allocation24_spill] sm:$0xff]  ;;  %v21135_v30 = vld [vmem:[#allocation53_spill] sm:$0xff]  ;;  %8559 = vmatpush.bf16.msrb.mxu1 %v11392_v17  ;;  %v6062_v25 = vsel %vm5765_vm11, %v18930_v19, -inf  ;;  %v6034_v33 = vsel %vm5765_vm11, %v18875_v18, -inf }
 0x5a1   :  { %v19215_v51 = vmax.f32 %v5752_v63, %v5716_v4  ;;  %8644 = vmatpush.bf16.msra.mxu2 %v11454_v15  ;;  %8571 = vmatpush.bf16.msrb.mxu3 %v11401_v11  ;;  %v6562_v48 = vmax.f32 %v6554_v29, %v6556_v21  ;;  %v5796_v13 = vrot.slane %v21134_v38, 6  ;;  %v6013_v50 = vsel %vm5765_vm11, %v21135_v30, -inf  ;;  %v11451_v4 = vld [vmem:[%s20213_s7 + $0x2e0] sm:$0xff]  ;;  %v11429_v19 = vld [vmem:[%s20213_s7 + $0x230] sm:$0xff] }
 0x5a2   :  { %v6560_v56 = vmax.f32 %v19169_v22, %v19222_v12  ;;  %v11391_v22 = vld [vmem:[%s20213_s7 + $0x100] sm:$0xff]  ;;  %v6055_v15 = vsel %vm5765_vm11, %v18928_v42, -inf  ;;  %v6020_v11 = vsel %vm5765_vm11, %v21136_v9, -inf  ;;  %v6014_v63 = vrot.slane %v6013_v50, 4  ;;  %v11442_v42 = vld [vmem:[%s20213_s7 + $0x298] sm:$0xff]  ;;  %v11437_v21 = vld [vmem:[%s20213_s7 + $0x270] sm:$0xff] }
 0x5a3   :  { %v19209_v55 = vld.sshfl [vmem:[#allocation1 + $0x20] sm:$0xff pattern:$0x73625140]  ;;  %v19211_v24 = vld.sshfl [vmem:[#allocation1 + $0x28] sm:$0xff pattern:$0x73625140]  ;;  %v6559_v32 = vmax.f32 %v5749_v1, %v19215_v51  ;;  %v6561_v1 = vmax.f32 %v6553_v36, %v6555_v14  ;;  %8633 = vmatpush.bf16.msra.mxu0 %v11444_v35 }
 0x5a4   :  { %5872 = vst [vmem:[#allocation1 + $0x20] ss:$4 sm:$0xff] %v5792_v23  ;;  %v6564_v47 = vmax.f32 %v6558_v6, %v6560_v56  ;;  %8560 = vmatpush.bf16.msrb.mxu1 %v11391_v22  ;;  %v6056_v37 = vrot.slane %v6055_v15, 4  ;;  %v6021_v8 = vrot.slane %v6020_v11, 4  ;;  %v6027_v14 = vsel %vm5765_vm11, %v18867_v16, -inf  ;;  %v11441_v18 = vld [vmem:[%s20213_s7 + $0x290] sm:$0xff] }
 0x5a5   :  { %v6563_v23 = vmax.f32 %v6557_v0, %v6559_v32  ;;  %8645 = vmatpush.bf16.msra.mxu2 %v11453_v58  ;;  %8572 = vmatpush.bf16.msrb.mxu3 %v11400_v5  ;;  %v11450_v58 = vld [vmem:[%s20213_s7 + $0x2d8] sm:$0xff]  ;;  %v6015_v36 = vmax.f32 %v6013_v50, %v6014_v63  ;;  %v6063_v16 = vrot.slane %v6062_v25, 4  ;;  %v21137_v0 = vld [vmem:[#allocation20_spill] sm:$0xff]  ;;  %v6028_v17 = vrot.slane %v6027_v14, 4 }
 0x5a6   :  { %v6570_v7 = vsel %vm5076_vm4, %v6564_v47, %v6562_v48  ;;  %v5799_v32 = vrot.slane %v21137_v0, 2  ;;  %v6035_v5 = vrot.slane %v6034_v33, 4  ;;  %v6057_v56 = vmax.f32 %v6055_v15, %v6056_v37  ;;  %v11436_v35 = vld [vmem:[%s20213_s7 + $0x268] sm:$0xff]  ;;  %v11449_v48 = vld [vmem:[%s20213_s7 + $0x2d0] sm:$0xff] }
 0x5a7   :  { %v6569_v43 = vsel %vm5076_vm4, %v6563_v23, %v6561_v1  ;;  %v6678_v40 = vpack.c.bf16 %v6570_v7, %v6570_v7  ;;  %8634 = vmatpush.bf16.msra.mxu0 %v11443_v20  ;;  %v6022_v1 = vmax.f32 %v6020_v11, %v6021_v8  ;;  %v11428_v23 = vld [vmem:[%s20213_s7 + $0x228] sm:$0xff]  ;;  %v6016_v47 = vrot.slane %v6015_v36, 2  ;;  %v21138_v38 = vld [vmem:[#allocation26_spill] sm:$0xff] }
 0x5a8   :  { %v6677_v49 = vpack.c.bf16 %v6569_v43, %v6569_v43  ;;  %v21139_v43 = vld [vmem:[#allocation41_spill] sm:$0xff]  ;;  %v6029_v30 = vmax.f32 %v6027_v14, %v6028_v17  ;;  %v6036_v50 = vmax.f32 %v6034_v33, %v6035_v5  ;;  %v21142_v9 = vld [vmem:[#allocation22_spill] sm:$0xff]  ;;  %v6586_v14 = vsel %vm5076_vm4, %v19213_v2, %v19207_v62 }
 0x5a9   :  { %8646 = vmatpush.bf16.msra.mxu2 %v11452_v61  ;;  %8522 = vmatmul.bf16.vlgmr.msra.gmra.mxu3 %v6678_v40  ;;  %v6064_v61 = vmax.f32 %v6062_v25, %v6063_v16  ;;  %v6023_v7 = vrot.slane %v6022_v1, 2  ;;  %v21140_v40 = vld [vmem:[#allocation56_spill] sm:$0xff]  ;;  %v21141_v20 = vld [vmem:[#allocation13_spill] sm:$0xff]  ;;  %v11478_v62 = vld [vmem:[%s20213_s7 + $0x3b8] sm:$0xff] }
 0x5aa   :  { %8509 = vmatmul.bf16.vlgmr.msra.gmra.mxu1 %v6677_v49  ;;  %8573 = vmatpush.bf16.msrb.mxu3 %v11399_v31  ;;  %v6585_v31 = vsel %vm5076_vm4, %v19201_v54, %v18831_v44  ;;  %v6058_v49 = vrot.slane %v6057_v56, 2  ;;  %v6076_v15 = vsel %vm5765_vm11, %v21141_v20, -inf  ;;  %v21144_v44 = vld [vmem:[#allocation44_spill] sm:$0xff]  ;;  %v6030_v16 = vrot.slane %v6029_v30, 2 }
 0x5ab   :  { %v19265_v27 = vld.sshfl [vmem:[#allocation1 + $0x20] sm:$0xff pattern:$0x73625140]  ;;  %v19267_v60 = vld.sshfl [vmem:[#allocation1 + $0x28] sm:$0xff pattern:$0x73625140]  ;;  %8605 = vmatpush.bf16.msra.mxu1 %v11430_v46  ;;  %8635 = vmatpush.bf16.msra.mxu0 %v11442_v42  ;;  %v6681_v8 = vpack.c.bf16 %v6585_v31, %v6585_v31  ;;  %v6024_v17 = vmax.f32 %v6022_v1, %v6023_v7  ;;  %v6682_v31 = vpack.c.bf16 %v6586_v14, %v6586_v14 }
 0x5ac   :  { %5878 = vst [vmem:[#allocation1 + $0x20] ss:$4 sm:$0xff] %v5796_v13  ;;  %v6041_v13 = vsel %vm5765_vm11, %v21138_v38, -inf  ;;  %v11440_v46 = vld [vmem:[%s20213_s7 + $0x288] sm:$0xff]  ;;  %v11427_v25 = vld [vmem:[%s20213_s7 + $0x220] sm:$0xff]  ;;  %v6059_v2 = vmax.f32 %v6057_v56, %v6058_v49  ;;  %v6037_v5 = vrot.slane %v6036_v50, 2 }
 0x5ad   :  { %8647 = vmatpush.bf16.msra.mxu2 %v11451_v4  ;;  %v21143_v4 = vld [vmem:[#allocation36_spill] sm:$0xff]  ;;  %v6042_v37 = vrot.slane %v6041_v13, 4  ;;  %v11434_v56 = vld [vmem:[%s20213_s7 + $0x258] sm:$0xff] }
 0x5ae   :  { %8618 = vmatpush.bf16.msra.mxu3 %v11438_v3  ;;  %v6069_v3 = vsel %vm5765_vm11, %v21140_v40, -inf  ;;  %v11435_v42 = vld [vmem:[%s20213_s7 + $0x260] sm:$0xff]  ;;  %v11448_v33 = vld [vmem:[%s20213_s7 + $0x2c8] sm:$0xff]  ;;  %v6060_v14 = vrot.slane %v6059_v2, 1 }
 0x5af   :  { %8606 = vmatpush.bf16.msra.mxu1 %v11429_v19  ;;  %8636 = vmatpush.bf16.msra.mxu0 %v11441_v18  ;;  %v6017_v19 = vmax.f32 %v6015_v36, %v6016_v47  ;;  %v6070_v0 = vrot.slane %v6069_v3, 4  ;;  %v6083_v18 = vsel %vm5765_vm11, %v18996_v45, -inf  ;;  %v21145_v36 = vld [vmem:[#allocation49_spill] sm:$0xff]  ;;  %v21147_v47 = vld [vmem:[#allocation14_spill] sm:$0xff]  ;;  %v6043_v1 = vmax.f32 %v6041_v13, %v6042_v37  ;;  %v11447_v49 = vld [vmem:[%s20213_s7 + $0x2c0] sm:$0xff] }
 0x5b0   :  { %v11426_v45 = vld [vmem:[%s20213_s7 + $0x218] sm:$0xff]  ;;  %v6084_v20 = vrot.slane %v6083_v18, 4 }
 0x5b1   :  { %8648 = vmatpush.bf16.msra.mxu2 %v11450_v58  ;;  %v11439_v58 = vld [vmem:[%s20213_s7 + $0x280] sm:$0xff]  ;;  %v6018_v7 = vrot.slane %v6017_v19, 1  ;;  %v11486_v13 = vld [vmem:[%s20213_s7 + $0x3f8] sm:$0xff]  ;;  %v6071_v37 = vmax.f32 %v6069_v3, %v6070_v0  ;;  %v11433_v3 = vld [vmem:[%s20213_s7 + $0x250] sm:$0xff] }
 0x5b2   :  { %8619 = vmatpush.bf16.msra.mxu3 %v11437_v21  ;;  %v6065_v21 = vrot.slane %v6064_v61, 2 }
 0x5b3   :  { %v19305_v29 = vld.sshfl [vmem:[#allocation1 + $0x20] sm:$0xff pattern:$0x73625140]  ;;  %v19307_v6 = vld.sshfl [vmem:[#allocation1 + $0x28] sm:$0xff pattern:$0x73625140]  ;;  %8607 = vmatpush.bf16.msra.mxu1 %v11428_v23  ;;  %8637 = vmatpush.bf16.msra.mxu0 %v11440_v46  ;;  %v19367_v46 = vsel %vm5076_vm4, %v19215_v51, %v19076_v53 }
 0x5b4   :  { %5884 = vst [vmem:[#allocation1 + $0x20] ss:$4 sm:$0xff] %v5799_v32  ;;  %v6077_v32 = vrot.slane %v6076_v15, 4  ;;  %v6048_v23 = vsel %vm5765_vm11, %v21145_v36, -inf  ;;  %v6066_v40 = vmax.f32 %v6064_v61, %v6065_v21  ;;  %v11477_v51 = vld [vmem:[%s20213_s7 + $0x3b0] sm:$0xff]  ;;  %v6031_v61 = vmax.f32 %v6029_v30, %v6030_v16 }
 0x5b5   :  { %8649 = vmatpush.bf16.msra.mxu2 %v11449_v48  ;;  %v6049_v53 = vrot.slane %v6048_v23, 4  ;;  %v6038_v21 = vmax.f32 %v6036_v50, %v6037_v5  ;;  %v19391_v30 = vsel %vm5076_vm4, %v19222_v12, %v19149_v26  ;;  %v6044_v50 = vrot.slane %v6043_v1, 2  ;;  %v11485_v5 = vld [vmem:[%s20213_s7 + $0x3f0] sm:$0xff]  ;;  %v11476_v12 = vld [vmem:[%s20213_s7 + $0x3a8] sm:$0xff] }
 0x5b6   :  { %8620 = vmatpush.bf16.msra.mxu3 %v11436_v35  ;;  %v21146_v35 = vld [vmem:[#allocation25_spill] sm:$0xff]  ;;  %v19393_v16 = vmax.f32 %v6017_v19, %v6018_v7  ;;  %v6067_v0 = vrot.slane %v6066_v40, 1  ;;  %v19405_v19 = vmax.f32 %v6059_v2, %v6060_v14  ;;  %v6139_v2 = vsel %vm5765_vm11, %v19151_v52, -inf }
 0x5b7   :  { %8608 = vmatpush.bf16.msra.mxu1 %v11427_v25  ;;  %v21148_v25 = vld [vmem:[#allocation33_spill] sm:$0xff]  ;;  %8638 = vmatpush.bf16.msra.mxu0 %v11439_v58 }
 0x5b8   :  { %v11425_v58 = vld [vmem:[%s20213_s7 + $0x210] sm:$0xff]  ;;  %v11432_v7 = vld [vmem:[%s20213_s7 + $0x248] sm:$0xff] }
 0x5b9   :  { %8650 = vmatpush.bf16.msra.mxu2 %v11448_v33  ;;  %8574 = vmatmul.bf16.vlgmr.msrb.gmra.mxu3 %v6682_v31  ;;  %v6025_v33 = vrot.slane %v6024_v17, 1  ;;  %v6072_v31 = vrot.slane %v6071_v37, 2 }
 0x5ba   :  { %8621 = vmatpush.bf16.msra.mxu3 %v11435_v42  ;;  %8561 = vmatmul.bf16.vlgmr.msrb.gmra.mxu1 %v6681_v8  ;;  %v6078_v8 = vmax.f32 %v6076_v15, %v6077_v32  ;;  %v6685_v15 = vpack.c.bf16 %v19367_v46, %v19367_v46  ;;  %v6085_v32 = vmax.f32 %v6083_v18, %v6084_v20  ;;  %v21150_v42 = vld [vmem:[#allocation57_spill] sm:$0xff] }
 0x5bb   :  { %8683 = vmatpush.bf16.msrb.mxu0 %v11478_v62  ;;  %8609 = vmatpush.bf16.msra.mxu1 %v11426_v45  ;;  %v6090_v62 = vsel %vm5765_vm11, %v18998_v10, -inf  ;;  %v6097_v26 = vsel %vm5765_vm11, %v21150_v42, -inf  ;;  %v19407_v18 = vmax.f32 %v6024_v17, %v6025_v33  ;;  %v6032_v10 = vrot.slane %v6031_v61, 1  ;;  %v11460_v46 = vld [vmem:[%s20213_s7 + $0x328] sm:$0xff] }
 0x5bc   :  { %v6079_v45 = vrot.slane %v6078_v8, 2  ;;  %v6045_v20 = vmax.f32 %v6043_v1, %v6044_v50  ;;  %v6091_v42 = vrot.slane %v6090_v62, 4  ;;  %v6098_v14 = vrot.slane %v6097_v26, 4  ;;  %v11484_v1 = vld [vmem:[%s20213_s7 + $0x3e8] sm:$0xff] }
 0x5bd   :  { %8651 = vmatpush.bf16.msra.mxu2 %v11447_v49  ;;  %v6039_v49 = vrot.slane %v6038_v21, 1  ;;  %v6111_v33 = vsel %vm5765_vm11, %v19078_v34, -inf  ;;  %v6140_v34 = vrot.slane %v6139_v2, 4 }
 0x5be   :  { %8622 = vmatpush.bf16.msra.mxu3 %v11434_v56  ;;  %v6050_v56 = vmax.f32 %v6048_v23, %v6049_v53  ;;  %v11424_v23 = vld [vmem:[%s20213_s7 + $0x208] sm:$0xff]  ;;  %v19419_v53 = vmax.f32 %v6066_v40, %v6067_v0  ;;  %v19430_v52 = vmax.f32 %v6078_v8, %v6079_v45  ;;  %v11475_v40 = vld [vmem:[%s20213_s7 + $0x3a0] sm:$0xff]  ;;  %v19435_v0 = vmax.f32 %v6031_v61, %v6032_v10 }
 0x5bf   :  { %8684 = vmatpush.bf16.msrb.mxu0 %v11477_v51  ;;  %8610 = vmatpush.bf16.msra.mxu1 %v11425_v58  ;;  %v6086_v51 = vrot.slane %v6085_v32, 2  ;;  %v6686_v58 = vpack.c.bf16 %v19391_v30, %v19391_v30  ;;  %v6146_v30 = vsel %vm5765_vm11, %v19153_v57, -inf  ;;  %v11431_v8 = vld [vmem:[%s20213_s7 + $0x240] sm:$0xff]  ;;  %v6092_v61 = vmax.f32 %v6090_v62, %v6091_v42  ;;  %v11470_v57 = vld [vmem:[%s20213_s7 + $0x378] sm:$0xff] }
 0x5c0   :  { %v6051_v50 = vrot.slane %v6050_v56, 2  ;;  %v6112_v45 = vrot.slane %v6111_v33, 4  ;;  %v11483_v62 = vld [vmem:[%s20213_s7 + $0x3e0] sm:$0xff]  ;;  %v6081_v42 = vrot.slane %v19430_v52, 1  ;;  %v6147_v48 = vrot.slane %v6146_v30, 4 }
 0x5c1   :  { %8696 = vmatpush.bf16.msrb.mxu2 %v11486_v13  ;;  %v21151_v13 = vld [vmem:[#allocation58_spill] sm:$0xff]  ;;  %v6141_v54 = vmax.f32 %v6139_v2, %v6140_v34  ;;  %v6118_v10 = vsel %vm5765_vm11, %v19080_v59, -inf  ;;  %v6167_v2 = vsel %vm5765_vm11, %v19209_v55, -inf  ;;  %v21154_v34 = vld [vmem:[#allocation60_spill] sm:$0xff] }
 0x5c2   :  { %8623 = vmatpush.bf16.msra.mxu3 %v11433_v3  ;;  %v6104_v17 = vsel %vm5765_vm11, %v21151_v13, -inf  ;;  %v19428_v3 = vmax.f32 %v6071_v37, %v6072_v31  ;;  %v11423_v37 = vld [vmem:[%s20213_s7 + $0x200] sm:$0xff]  ;;  %v6046_v31 = vrot.slane %v6045_v20, 1  ;;  %v6052_v38 = vmax.f32 %v6050_v56, %v6051_v50  ;;  %v11461_v59 = vld [vmem:[%s20213_s7 + $0x330] sm:$0xff]  ;;  %v11482_v55 = vld [vmem:[%s20213_s7 + $0x3d8] sm:$0xff] }
 0x5c3   :  { %8685 = vmatpush.bf16.msrb.mxu0 %v11476_v12  ;;  %v6105_v13 = vrot.slane %v6104_v17, 4  ;;  %8611 = vmatpush.bf16.msra.mxu1 %v11424_v23  ;;  %v11462_v12 = vld [vmem:[%s20213_s7 + $0x338] sm:$0xff]  ;;  %v6113_v56 = vmax.f32 %v6111_v33, %v6112_v45  ;;  %v6132_v33 = vsel %vm5765_vm11, %v21154_v34, -inf }
 0x5c4   :  { %v21152_v23 = vld [vmem:[#allocation59_spill] sm:$0xff] }
 0x5c5   :  { %8697 = vmatpush.bf16.msrb.mxu2 %v11485_v5  ;;  %v19445_v5 = vmax.f32 %v6038_v21, %v6039_v49  ;;  %v6099_v21 = vmax.f32 %v6097_v26, %v6098_v14  ;;  %v6074_v49 = vrot.slane %v19428_v3, 1  ;;  %v6106_v63 = vmax.f32 %v6104_v17, %v6105_v13  ;;  %v11474_v26 = vld [vmem:[%s20213_s7 + $0x398] sm:$0xff]  ;;  %v11469_v17 = vld [vmem:[%s20213_s7 + $0x370] sm:$0xff] }
 0x5c6   :  { %8624 = vmatpush.bf16.msra.mxu3 %v11432_v7  ;;  %v6087_v7 = vmax.f32 %v6085_v32, %v6086_v51  ;;  %v6125_v32 = vsel %vm5765_vm11, %v21152_v23, -inf  ;;  %v19469_v51 = vmax.f32 %v6045_v20, %v6046_v31  ;;  %v6093_v14 = vrot.slane %v6092_v61, 2 }
 0x5c7   :  { %8686 = vmatpush.bf16.msrb.mxu0 %v11475_v40  ;;  %8612 = vmatpush.bf16.msra.mxu1 %v11423_v37  ;;  %v6100_v50 = vrot.slane %v6099_v21, 2  ;;  %v21153_v40 = vld [vmem:[#allocation37_spill] sm:$0xff]  ;;  %v6148_v13 = vmax.f32 %v6146_v30, %v6147_v48  ;;  %v6119_v37 = vrot.slane %v6118_v10, 4  ;;  %v6126_v45 = vrot.slane %v6125_v32, 4 }
 0x5c8   :  { %v6153_v20 = vsel %vm5765_vm11, %v21153_v40, -inf  ;;  %v6107_v23 = vrot.slane %v6106_v63, 2  ;;  %v6168_v40 = vrot.slane %v6167_v2, 4  ;;  %v19495_v48 = vmax.f32 %v19428_v3, %v6074_v49 }
 0x5c9   :  { %8698 = vmatpush.bf16.msrb.mxu2 %v11484_v1  ;;  %v6088_v1 = vrot.slane %v6087_v7, 1  ;;  %v19498_v30 = vmax.f32 %v19430_v52, %v6081_v42  ;;  %v6154_v34 = vrot.slane %v6153_v20, 4  ;;  %v6114_v3 = vrot.slane %v6113_v56, 2  ;;  %v11481_v52 = vld [vmem:[%s20213_s7 + $0x3d0] sm:$0xff] }
 0x5ca   :  { %8625 = vmatpush.bf16.msra.mxu3 %v11431_v8  ;;  %v21155_v8 = vld [vmem:[#allocation61_spill] sm:$0xff]  ;;  %8613 = vmatmul.bf16.vlgmr.msra.gmra.mxu1 %v6685_v15  ;;  %v6101_v42 = vmax.f32 %v6099_v21, %v6100_v50  ;;  %v6127_v11 = vmax.f32 %v6125_v32, %v6126_v45  ;;  %v6108_v28 = vmax.f32 %v6106_v63, %v6107_v23  ;;  %v11467_v63 = vld [vmem:[%s20213_s7 + $0x360] sm:$0xff] }
 0x5cb   :  { %8657 = vmatpush.bf16.msrb.mxu1 %v11462_v12  ;;  %v6160_v31 = vsel %vm5765_vm11, %v21155_v8, -inf  ;;  %v6053_v12 = vrot.slane %v6052_v38, 1  ;;  %8687 = vmatpush.bf16.msrb.mxu0 %v11474_v26  ;;  %v6133_v8 = vrot.slane %v6132_v33, 4  ;;  %v11468_v15 = vld [vmem:[%s20213_s7 + $0x368] sm:$0xff]  ;;  %v6094_v26 = vmax.f32 %v6092_v61, %v6093_v14  ;;  %v21156_v23 = vld [vmem:[#allocation39_spill] sm:$0xff] }
 0x5cc   :  { %v6161_v49 = vrot.slane %v6160_v31, 4  ;;  %v6169_v39 = vmax.f32 %v6167_v2, %v6168_v40  ;;  %v6115_v21 = vmax.f32 %v6113_v56, %v6114_v3  ;;  %v6102_v2 = vrot.slane %v6101_v42, 1  ;;  %v11458_v56 = vld [vmem:[%s20213_s7 + $0x318] sm:$0xff] }
 0x5cd   :  { %8699 = vmatpush.bf16.msrb.mxu2 %v11483_v62  ;;  %8626 = vmatmul.bf16.vlgmr.msra.gmra.mxu3 %v6686_v58  ;;  %v11473_v62 = vld [vmem:[%s20213_s7 + $0x390] sm:$0xff]  ;;  %v19506_v58 = vmax.f32 %v6087_v7, %v6088_v1  ;;  %v19511_v22 = vmax.f32 %v6052_v38, %v6053_v12  ;;  %v6155_v7 = vmax.f32 %v6153_v20, %v6154_v34  ;;  %v6174_v1 = vsel %vm5765_vm11, %v19211_v24, -inf  ;;  %v11472_v24 = vld [vmem:[%s20213_s7 + $0x388] sm:$0xff] }
 0x5ce   :  { %8670 = vmatpush.bf16.msrb.mxu3 %v11470_v57  ;;  %v6142_v57 = vrot.slane %v6141_v54, 2  ;;  %v6134_v14 = vmax.f32 %v6132_v33, %v6133_v8  ;;  %v6095_v38 = vrot.slane %v6094_v26, 1  ;;  %v6162_v32 = vmax.f32 %v6160_v31, %v6161_v49  ;;  %v11466_v31 = vld [vmem:[%s20213_s7 + $0x358] sm:$0xff] }
 0x5cf   :  { %8658 = vmatpush.bf16.msrb.mxu1 %v11461_v59  ;;  %v6149_v59 = vrot.slane %v6148_v13, 2  ;;  %8688 = vmatpush.bf16.msrb.mxu0 %v11473_v62  ;;  %v6128_v33 = vrot.slane %v6127_v11, 2  ;;  %v6109_v45 = vrot.slane %v6108_v28, 1  ;;  %v6170_v12 = vrot.slane %v6169_v39, 2 }
 0x5d0   :  { %v6143_v41 = vmax.f32 %v6141_v54, %v6142_v57  ;;  %v6175_v57 = vrot.slane %v6174_v1, 4  ;;  %v6265_v40 = vsel %vm5765_vm11, %v21156_v23, -inf  ;;  %v6156_v34 = vrot.slane %v6155_v7, 2 }
 0x5d1   :  { %8700 = vmatpush.bf16.msrb.mxu2 %v11482_v55  ;;  %v6150_v50 = vmax.f32 %v6148_v13, %v6149_v59  ;;  %v11480_v55 = vld [vmem:[%s20213_s7 + $0x3c8] sm:$0xff]  ;;  %v11471_v13 = vld [vmem:[%s20213_s7 + $0x380] sm:$0xff]  ;;  %v6135_v8 = vrot.slane %v6134_v14, 2  ;;  %v19546_v3 = vmax.f32 %v6094_v26, %v6095_v38  ;;  %v6116_v49 = vrot.slane %v6115_v21, 1 }
 0x5d2   :  { %8671 = vmatpush.bf16.msrb.mxu3 %v11469_v17  ;;  %v6120_v17 = vmax.f32 %v6118_v10, %v6119_v37  ;;  %v11459_v10 = vld [vmem:[%s20213_s7 + $0x320] sm:$0xff]  ;;  %v6144_v37 = vrot.slane %v6143_v41, 1  ;;  %v19553_v23 = vmax.f32 %v6101_v42, %v6102_v2  ;;  %v19559_v26 = vmax.f32 %v6108_v28, %v6109_v45  ;;  %v11457_v28 = vld [vmem:[%s20213_s7 + $0x310] sm:$0xff] }
 0x5d3   :  { %8659 = vmatpush.bf16.msrb.mxu1 %v11460_v46  ;;  %8689 = vmatpush.bf16.msrb.mxu0 %v11472_v24  ;;  %v19544_v46 = vld.sshfl [vmem:[#allocation1 + $0x20] sm:$0xff pattern:$0x73625140]  ;;  %v19551_v24 = vld.sshfl [vmem:[#allocation1 + $0x28] sm:$0xff pattern:$0x73625140]  ;;  %v19561_v38 = vmax.f32 %v6169_v39, %v6170_v12  ;;  %v19563_v36 = vmax.f32 %v6134_v14, %v6135_v8 }
 0x5d4   :  { %v6121_v20 = vrot.slane %v6120_v17, 2  ;;  %21157 = vst [vmem:[#allocation15_spill] sm:$0xff] %v19544_v46  ;;  %v11479_v59 = vld [vmem:[%s20213_s7 + $0x3c0] sm:$0xff]  ;;  %v6151_v62 = vrot.slane %v6150_v50, 1  ;;  %v19557_v61 = vmax.f32 %v6143_v41, %v6144_v37  ;;  %v6157_v46 = vmax.f32 %v6155_v7, %v6156_v34  ;;  %v11465_v39 = vld [vmem:[%s20213_s7 + $0x350] sm:$0xff] }
 0x5d5   :  { %8701 = vmatpush.bf16.msrb.mxu2 %v11481_v52  ;;  %v6163_v52 = vrot.slane %v6162_v32, 2  ;;  %21158 = vst [vmem:[#allocation47_spill] sm:$0xff] %v19551_v24  ;;  %v21160_v24 = vld [vmem:[#allocation55_spill] sm:$0xff]  ;;  %v6223_v14 = vsel %vm5765_vm11, %v19305_v29, -inf  ;;  %v19585_v37 = vmax.f32 %v6115_v21, %v6116_v49  ;;  %v11456_v29 = vld [vmem:[%s20213_s7 + $0x308] sm:$0xff] }
 0x5d6   :  { %8672 = vmatpush.bf16.msrb.mxu3 %v11468_v15  ;;  %v6266_v15 = vrot.slane %v6265_v40, 4  ;;  %v6122_v54 = vmax.f32 %v6120_v17, %v6121_v20  ;;  %v6181_v42 = vsel %vm5765_vm11, %v21160_v24, -inf  ;;  %v21164_v24 = vrot.slane %v21142_v9, 2  ;;  %v11455_v9 = vld [vmem:[%s20213_s7 + $0x300] sm:$0xff] }
 0x5d7   :  { %8660 = vmatpush.bf16.msrb.mxu1 %v11459_v10  ;;  %v6129_v10 = vmax.f32 %v6127_v11, %v6128_v33  ;;  %8690 = vmatpush.bf16.msrb.mxu0 %v11471_v13  ;;  %v19569_v11 = vsel %vm5765_vm11, %v19265_v27, -inf  ;;  %v6164_v7 = vmax.f32 %v6162_v32, %v6163_v52  ;;  %v6182_v12 = vrot.slane %v6181_v42, 4  ;;  %v21170_v33 = vld [vmem:[#allocation52_spill] sm:$0xff] }
 0x5d8   :  { %v6267_v41 = vmax.f32 %v6265_v40, %v6266_v15  ;;  %v6123_v2 = vrot.slane %v6122_v54, 1  ;;  %v6224_v32 = vrot.slane %v6223_v14, 4  ;;  %v6158_v13 = vrot.slane %v6157_v46, 1 }
 0x5d9   :  { %8702 = vmatpush.bf16.msrb.mxu2 %v11480_v55  ;;  %v6176_v55 = vmax.f32 %v6174_v1, %v6175_v57  ;;  %v19581_v1 = vmax.f32 %v6150_v50, %v6151_v62  ;;  %v6130_v20 = vrot.slane %v6129_v10, 1  ;;  %v11464_v50 = vld [vmem:[%s20213_s7 + $0x348] sm:$0xff]  ;;  %v6165_v40 = vrot.slane %v6164_v7, 1 }
 0x5da   :  { %8673 = vmatpush.bf16.msrb.mxu3 %v11467_v63  ;;  %v21159_v63 = vrot.slane %v21139_v43, 6  ;;  %v21161_v43 = vld [vmem:[#allocation28_spill] sm:$0xff]  ;;  %v6268_v21 = vrot.slane %v6267_v41, 2  ;;  %v6137_v62 = vrot.slane %v19563_v36, 1  ;;  %v19600_v52 = vmax.f32 %v6122_v54, %v6123_v2 }
 0x5db   :  { %8661 = vmatpush.bf16.msrb.mxu1 %v11458_v56  ;;  %v6272_v17 = vsel %vm5765_vm11, %v21161_v43, -inf  ;;  %v6177_v45 = vrot.slane %v6176_v55, 2  ;;  %v6172_v56 = vrot.slane %v19561_v38, 1  ;;  %v21165_v43 = vld [vmem:[#allocation48_spill] sm:$0xff]  ;;  %v19614_v49 = vmax.f32 %v6223_v14, %v6224_v32  ;;  %v11494_v14 = vld [vmem:[%s20213_s7 + $0x438] sm:$0xff] }
 0x5dc   :  { %5890 = vst [vmem:[#allocation1 + $0x20] ss:$4 sm:$0xff] %v21159_v63  ;;  %v6273_v27 = vrot.slane %v6272_v17, 4  ;;  %v19618_v54 = vsel %vm5765_vm11, %v19307_v6, -inf  ;;  %v11502_v6 = vld [vmem:[%s20213_s7 + $0x478] sm:$0xff] }
 0x5dd   :  { %8703 = vmatpush.bf16.msrb.mxu2 %v11479_v59  ;;  %21162 = vst [vmem:[#allocation7_spill] sm:$0xff] %v19600_v52  ;;  %v19602_v59 = vmax.f32 %v6129_v10, %v6130_v20  ;;  %v11463_v10 = vld [vmem:[%s20213_s7 + $0x340] sm:$0xff] }
 0x5de   :  { %8674 = vmatpush.bf16.msrb.mxu3 %v11466_v31  ;;  %v6274_v57 = vmax.f32 %v6272_v17, %v6273_v27  ;;  %v6188_v17 = vsel %vm5765_vm11, %v21165_v43, -inf }
 0x5df   :  { %8662 = vmatpush.bf16.msrb.mxu1 %v11457_v28  ;;  %21163 = vst [vmem:[#allocation38_spill] sm:$0xff] %v19602_v59  ;;  %v19606_v28 = vmax.f32 %v6176_v55, %v6177_v45  ;;  %v6269_v55 = vmax.f32 %v6267_v41, %v6268_v21  ;;  %v19632_v45 = vmax.f32 %v6157_v46, %v6158_v13  ;;  %v6189_v32 = vrot.slane %v6188_v17, 4 }
 0x5e0   :  { %v6275_v63 = vrot.slane %v6274_v57, 2  ;;  %v19644_v21 = vmax.f32 %v19563_v36, %v6137_v62 }
 0x5e1   :  { %v6270_v36 = vrot.slane %v6269_v55, 1  ;;  %v19660_v43 = vmax.f32 %v6188_v17, %v6189_v32 }
 0x5e2   :  { %8675 = vmatpush.bf16.msrb.mxu3 %v11465_v39  ;;  %v19608_v39 = vmax.f32 %v6181_v42, %v6182_v12  ;;  %v6276_v42 = vmax.f32 %v6274_v57, %v6275_v63  ;;  %v19634_v12 = vmax.f32 %v6164_v7, %v6165_v40  ;;  %21168 = vst [vmem:[#allocation12_spill] sm:$0xff] %v19644_v21  ;;  %v6321_v7 = vsel %vm5765_vm11, %v21170_v33, -inf  ;;  %v21172_v33 = vld [vmem:[#allocation50_spill] sm:$0xff] }
 0x5e3   :  { %v5891_v34 = vld.sshfl [vmem:[#allocation1 + $0x20] sm:$0xff pattern:$0x73625140]  ;;  %v5892_v8 = vld.sshfl [vmem:[#allocation1 + $0x28] sm:$0xff pattern:$0x73625140]  ;;  %8663 = vmatpush.bf16.msrb.mxu1 %v11456_v29 }
 0x5e4   :  { %5896 = vst [vmem:[#allocation1 + $0x20] ss:$4 sm:$0xff] %v21164_v24  ;;  %v6279_v27 = vsel %vm5765_vm11, %v5891_v34, -inf  ;;  %v6286_v15 = vsel %vm5765_vm11, %v5892_v8, -inf  ;;  %v19638_v29 = vsel %vm5765_vm11, %v19267_v60, -inf  ;;  %v11493_v60 = vld [vmem:[%s20213_s7 + $0x430] sm:$0xff]  ;;  %v19680_v34 = vpop.f32.mrf.mxu0 }
 0x5e5   :  { %v6280_v2 = vrot.slane %v6279_v27, 4  ;;  %v6287_v20 = vrot.slane %v6286_v15, 4  ;;  %21166 = vst [vmem:[#allocation32_spill] sm:$0xff] %v19634_v12  ;;  %v21171_v24 = vld [vmem:[#allocation30_spill] sm:$0xff]  ;;  %v6322_v17 = vrot.slane %v6321_v7, 4 }
 0x5e6   :  { %8676 = vmatpush.bf16.msrb.mxu3 %v11464_v50  ;;  %v19641_v50 = vmax.f32 %v19561_v38, %v6172_v56  ;;  %v11501_v38 = vld [vmem:[%s20213_s7 + $0x470] sm:$0xff]  ;;  %v6277_v56 = vrot.slane %v6276_v42, 1  ;;  %v6328_v13 = vsel %vm5765_vm11, %v21171_v24, -inf  ;;  %v6271_v24 = vmax.f32 %v6269_v55, %v6270_v36  ;;  %21174 = vst [vmem:[#allocation9_spill] sm:$0xff] %v19680_v34 }
 0x5e7   :  { %v6281_v41 = vmax.f32 %v6279_v27, %v6280_v2  ;;  %v6288_v57 = vmax.f32 %v6286_v15, %v6287_v20  ;;  %8664 = vmatpush.bf16.msrb.mxu1 %v11455_v9  ;;  %v6329_v46 = vrot.slane %v6328_v13, 4  ;;  %v21175_v34 = vrot.slane %v21144_v44, 2  ;;  %v11490_v44 = vld [vmem:[%s20213_s7 + $0x418] sm:$0xff] }
 0x5e8   :  { %21167 = vst [vmem:[#allocation45_spill] sm:$0xff] %v19641_v50 }
 0x5e9   :  { %v6282_v40 = vrot.slane %v6281_v41, 2  ;;  %v6289_v62 = vrot.slane %v6288_v57, 2 }
 0x5ea   :  { %8677 = vmatpush.bf16.msrb.mxu3 %v11463_v10  ;;  %v21169_v10 = vrot.slane %v21143_v4, 6  ;;  %v11492_v4 = vld [vmem:[%s20213_s7 + $0x428] sm:$0xff] }
 0x5eb   :  { %8709 = vmatpush.bf16.msra.mxu1 %v11494_v14  ;;  %v5897_v8 = vld.sshfl [vmem:[#allocation1 + $0x20] sm:$0xff pattern:$0x73625140]  ;;  %v5898_v15 = vld.sshfl [vmem:[#allocation1 + $0x28] sm:$0xff pattern:$0x73625140]  ;;  %v6283_v2 = vmax.f32 %v6281_v41, %v6282_v40  ;;  %v6290_v20 = vmax.f32 %v6288_v57, %v6289_v62 }
 0x5ec   :  { %v6307_v27 = vsel %vm5765_vm11, %v5897_v8, -inf  ;;  %v6314_v9 = vsel %vm5765_vm11, %v5898_v15, -inf  ;;  %5902 = vst [vmem:[#allocation1 + $0x20] ss:$4 sm:$0xff] %v21169_v10  ;;  %v11500_v41 = vld [vmem:[%s20213_s7 + $0x468] sm:$0xff]  ;;  %v6293_v62 = vsel %vm5765_vm11, %v21172_v33, -inf  ;;  %v6278_v10 = vmax.f32 %v6276_v42, %v6277_v56 }
 0x5ed   :  { %v6308_v14 = vrot.slane %v6307_v27, 4  ;;  %v6284_v63 = vrot.slane %v6283_v2, 1  ;;  %v6291_v32 = vrot.slane %v6290_v20, 1  ;;  %v21173_v8 = vld [vmem:[#allocation43_spill] sm:$0xff]  ;;  %v6294_v59 = vrot.slane %v6293_v62, 4 }
 0x5ee   :  { %8722 = vmatpush.bf16.msra.mxu3 %v11502_v6  ;;  %v6315_v6 = vrot.slane %v6314_v9, 4  ;;  %v6300_v15 = vsel %vm5765_vm11, %v21173_v8, -inf }
 0x5ef   :  { %8710 = vmatpush.bf16.msra.mxu1 %v11493_v60  ;;  %v6309_v57 = vmax.f32 %v6307_v27, %v6308_v14  ;;  %v6323_v60 = vmax.f32 %v6321_v7, %v6322_v17  ;;  %v6301_v50 = vrot.slane %v6300_v15, 4  ;;  %v11491_v27 = vld [vmem:[%s20213_s7 + $0x420] sm:$0xff]  ;;  %v6285_v14 = vmax.f32 %v6283_v2, %v6284_v63 }
 0x5f0   :  { %v6316_v40 = vmax.f32 %v6314_v9, %v6315_v6  ;;  %v11499_v9 = vld [vmem:[%s20213_s7 + $0x460] sm:$0xff]  ;;  %v6292_v55 = vmax.f32 %v6290_v20, %v6291_v32  ;;  %v6295_v36 = vmax.f32 %v6293_v62, %v6294_v59 }
 0x5f1   :  { %v6310_v31 = vrot.slane %v6309_v57, 2  ;;  %v6324_v6 = vrot.slane %v6323_v60, 2  ;;  %v6302_v12 = vmax.f32 %v6300_v15, %v6301_v50  ;;  %v11498_v50 = vld [vmem:[%s20213_s7 + $0x458] sm:$0xff] }
 0x5f2   :  { %8723 = vmatpush.bf16.msra.mxu3 %v11501_v38  ;;  %v6330_v38 = vmax.f32 %v6328_v13, %v6329_v46  ;;  %v6317_v21 = vrot.slane %v6316_v40, 2  ;;  %v6296_v2 = vrot.slane %v6295_v36, 2 }
 0x5f3   :  { %8711 = vmatpush.bf16.msra.mxu1 %v11492_v4  ;;  %v6311_v46 = vmax.f32 %v6309_v57, %v6310_v31  ;;  %v5903_v13 = vld.sshfl [vmem:[#allocation1 + $0x20] sm:$0xff pattern:$0x73625140]  ;;  %v5904_v56 = vld.sshfl [vmem:[#allocation1 + $0x28] sm:$0xff pattern:$0x73625140]  ;;  %v6325_v17 = vmax.f32 %v6323_v60, %v6324_v6  ;;  %v8538_v6 = vpop.f32.mrf.mxu0 }
 0x5f4   :  { %v6331_v42 = vrot.slane %v6330_v38, 2  ;;  %v6318_v7 = vmax.f32 %v6316_v40, %v6317_v21  ;;  %v6335_v8 = vsel %vm5765_vm11, %v5903_v13, -inf  ;;  %5908 = vst [vmem:[#allocation1 + $0x20] ss:$4 sm:$0xff] %v21175_v34  ;;  %v6342_v31 = vsel %vm5765_vm11, %v5904_v56, -inf  ;;  %v19692_v21 = vpop.f32.mrf.mxu2 }
 0x5f5   :  { %v6312_v52 = vrot.slane %v6311_v46, 1  ;;  %v6336_v20 = vrot.slane %v6335_v8, 4  ;;  %v6326_v32 = vrot.slane %v6325_v17, 1  ;;  %v6297_v34 = vmax.f32 %v6295_v36, %v6296_v2 }
 0x5f6   :  { %8724 = vmatpush.bf16.msra.mxu3 %v11500_v41  ;;  %v6332_v33 = vmax.f32 %v6330_v38, %v6331_v42  ;;  %v6319_v63 = vrot.slane %v6318_v7, 1  ;;  %v6303_v41 = vrot.slane %v6302_v12, 2  ;;  %v6343_v40 = vrot.slane %v6342_v31, 4 }
 0x5f7   :  { %8712 = vmatpush.bf16.msra.mxu1 %v11491_v27  ;;  %v6313_v59 = vmax.f32 %v6311_v46, %v6312_v52  ;;  %v6327_v62 = vmax.f32 %v6325_v17, %v6326_v32  ;;  %v6337_v60 = vmax.f32 %v6335_v8, %v6336_v20  ;;  %v11510_v46 = vld [vmem:[%s20213_s7 + $0x4b8] sm:$0xff]  ;;  %v21178_v2 = vrot.slane %v19569_v11, 4 }
 0x5f8   :  { %v6333_v4 = vrot.slane %v6332_v33, 1  ;;  %v6320_v57 = vmax.f32 %v6318_v7, %v6319_v63  ;;  %v6304_v38 = vmax.f32 %v6302_v12, %v6303_v41  ;;  %v6344_v52 = vmax.f32 %v6342_v31, %v6343_v40  ;;  %v11518_v7 = vld [vmem:[%s20213_s7 + $0x4f8] sm:$0xff] }
 0x5f9   :  { %v6535_v42 = vmax.f32 %v6271_v24, %v6313_v59  ;;  %v6537_v13 = vmax.f32 %v6285_v14, %v6327_v62  ;;  %v6338_v56 = vrot.slane %v6337_v60, 2  ;;  %v21176_v12 = vmax.f32 %v19393_v16, %v19405_v19  ;;  %v11489_v16 = vld [vmem:[%s20213_s7 + $0x410] sm:$0xff] }
 0x5fa   :  { %8725 = vmatpush.bf16.msra.mxu3 %v11499_v9  ;;  %v6334_v15 = vmax.f32 %v6332_v33, %v6333_v4  ;;  %v6536_v27 = vmax.f32 %v6278_v10, %v6320_v57  ;;  %v6298_v9 = vrot.slane %v6297_v34, 1  ;;  %v6305_v17 = vrot.slane %v6304_v38, 1  ;;  %v11497_v19 = vld [vmem:[%s20213_s7 + $0x450] sm:$0xff] }
 0x5fb   :  { %v6609_v24 = vsel %vm5076_vm4, %v6535_v42, %v21176_v12  ;;  %v21177_v10 = vmax.f32 %v19407_v18, %v19419_v53  ;;  %8713 = vmatpush.bf16.msra.mxu1 %v11490_v44  ;;  %v5909_v8 = vld.sshfl [vmem:[#allocation1 + $0x20] sm:$0xff pattern:$0x73625140]  ;;  %v5910_v63 = vld.sshfl [vmem:[#allocation1 + $0x28] sm:$0xff pattern:$0x73625140]  ;;  %v19717_v14 = vmax.f32 %v19569_v11, %v21178_v2  ;;  %v21179_v18 = vmax.f32 %v19435_v0, %v19495_v48 }
 0x5fc   :  { %v6538_v36 = vmax.f32 %v6292_v55, %v6334_v15  ;;  %v6687_v55 = vpack.c.bf16 %v6609_v24, %v6609_v24  ;;  %v21180_v32 = vmax.f32 %v19445_v5, %v19498_v30  ;;  %v21181_v4 = vrot.slane %v21146_v35, 6  ;;  %v21183_v48 = vld [vmem:[#allocation27_spill] sm:$0xff]  ;;  %v8551_v30 = vpop.f32.mrf.mxu2  ;;  %v11509_v35 = vld [vmem:[%s20213_s7 + $0x4b0] sm:$0xff]  ;;  %v11488_v42 = vld [vmem:[%s20213_s7 + $0x408] sm:$0xff] }
 0x5fd   :  { %v6610_v33 = vsel %vm5076_vm4, %v6536_v27, %v21177_v10  ;;  %v6617_v53 = vsel %vm5076_vm4, %v6537_v13, %v21179_v18  ;;  %v6299_v59 = vmax.f32 %v6297_v34, %v6298_v9  ;;  %v6339_v57 = vmax.f32 %v6337_v60, %v6338_v56  ;;  %v11517_v34 = vld [vmem:[%s20213_s7 + $0x4f0] sm:$0xff]  ;;  %v11496_v27 = vld [vmem:[%s20213_s7 + $0x448] sm:$0xff] }
 0x5fe   :  { %8726 = vmatpush.bf16.msra.mxu3 %v11498_v50  ;;  %v6688_v20 = vpack.c.bf16 %v6610_v33, %v6610_v33  ;;  %v6618_v11 = vsel %vm5076_vm4, %v6538_v36, %v21180_v32  ;;  %5914 = vst [vmem:[#allocation1 + $0x20] ss:$4 sm:$0xff] %v21181_v4  ;;  %v6689_v41 = vpack.c.bf16 %v6617_v53, %v6617_v53  ;;  %v6345_v44 = vrot.slane %v6344_v52, 2  ;;  %v21182_v50 = vld [vmem:[#allocation17_spill] sm:$0xff] }
 0x5ff   :  { %v6690_v31 = vpack.c.bf16 %v6618_v11, %v6618_v11  ;;  %8639 = vmatmul.bf16.vlgmr.msra.gmra.mxu0 %v6687_v55  ;;  %v6349_v0 = vsel %vm5765_vm11, %v21182_v50, -inf  ;;  %v6356_v40 = vsel %vm5765_vm11, %v21183_v48, -inf  ;;  %v6363_v5 = vsel %vm5765_vm11, %v5909_v8, -inf  ;;  %8714 = vmatpush.bf16.msra.mxu1 %v11489_v16  ;;  %v11487_v55 = vld [vmem:[%s20213_s7 + $0x400] sm:$0xff] }
 0x600   :  { %8652 = vmatmul.bf16.vlgmr.msra.gmra.mxu2 %v6688_v20  ;;  %8735 = vmatpush.bf16.msra.mxu0 %v11510_v46  ;;  %v6340_v62 = vrot.slane %v6339_v57, 1  ;;  %v6350_v15 = vrot.slane %v6349_v0, 4  ;;  %v6357_v60 = vrot.slane %v6356_v40, 4  ;;  %v6364_v6 = vrot.slane %v6363_v5, 4 }
 0x601   :  { %8748 = vmatpush.bf16.msra.mxu2 %v11518_v7  ;;  %v6346_v9 = vmax.f32 %v6344_v52, %v6345_v44  ;;  %v6370_v46 = vsel %vm5765_vm11, %v5910_v63, -inf  ;;  %v21184_v7 = vrot.slane %v19606_v28, 1  ;;  %v21185_v36 = vrot.slane %v19608_v39, 2  ;;  %8665 = vmatmul.bf16.vlgmr.msrb.gmra.mxu1 %v6689_v41  ;;  %v11508_v52 = vld [vmem:[%s20213_s7 + $0x4a8] sm:$0xff] }
 0x602   :  { %8727 = vmatpush.bf16.msra.mxu3 %v11497_v19  ;;  %v6341_v12 = vmax.f32 %v6339_v57, %v6340_v62  ;;  %v6351_v24 = vmax.f32 %v6349_v0, %v6350_v15  ;;  %v6358_v10 = vmax.f32 %v6356_v40, %v6357_v60  ;;  %v6371_v33 = vrot.slane %v6370_v46, 4 }
 0x603   :  { %v19756_v13 = vmax.f32 %v19606_v28, %v21184_v7  ;;  %v19761_v56 = vmax.f32 %v19608_v39, %v21185_v36  ;;  %8678 = vmatmul.bf16.vlgmr.msrb.gmra.mxu3 %v6690_v31  ;;  %v11516_v28 = vld [vmem:[%s20213_s7 + $0x4e8] sm:$0xff]  ;;  %v6306_v8 = vmax.f32 %v6304_v38, %v6305_v17  ;;  %v6347_v63 = vrot.slane %v6346_v9, 1  ;;  %8715 = vmatpush.bf16.msra.mxu1 %v11488_v42  ;;  %v11495_v38 = vld [vmem:[%s20213_s7 + $0x440] sm:$0xff] }
 0x604   :  { %v6365_v2 = vmax.f32 %v6363_v5, %v6364_v6  ;;  %v6203_v39 = vrot.slane %v19638_v29, 4  ;;  %8736 = vmatpush.bf16.msra.mxu0 %v11509_v35  ;;  %v6539_v20 = vmax.f32 %v6299_v59, %v6341_v12  ;;  %v6352_v19 = vrot.slane %v6351_v24, 2  ;;  %v11526_v59 = vld [vmem:[%s20213_s7 + $0x538] sm:$0xff] }
 0x605   :  { %8749 = vmatpush.bf16.msra.mxu2 %v11517_v34  ;;  %v5915_v16 = vld.sshfl [vmem:[#allocation1 + $0x20] sm:$0xff pattern:$0x73625140]  ;;  %v6359_v18 = vrot.slane %v6358_v10, 2  ;;  %v21186_v53 = vrot.slane %v19618_v54, 4  ;;  %v6348_v17 = vmax.f32 %v6346_v9, %v6347_v63  ;;  %v6372_v31 = vmax.f32 %v6370_v46, %v6371_v33  ;;  %v21191_v9 = vld [vmem:[#allocation21_spill] sm:$0xff] }
 0x606   :  { %8728 = vmatpush.bf16.msra.mxu3 %v11496_v27  ;;  %v6391_v11 = vsel %vm5765_vm11, %v5915_v16, -inf  ;;  %v5916_v4 = vld.sshfl [vmem:[#allocation1 + $0x28] sm:$0xff pattern:$0x73625140]  ;;  %v6366_v41 = vrot.slane %v6365_v2, 2  ;;  %v6353_v57 = vmax.f32 %v6351_v24, %v6352_v19  ;;  %v21187_v0 = vrot.slane %v21147_v47, 2 }
 0x607   :  { %v19776_v32 = vmax.f32 %v19618_v54, %v21186_v53  ;;  %v11534_v54 = vld [vmem:[%s20213_s7 + $0x578] sm:$0xff]  ;;  %v6392_v44 = vrot.slane %v6391_v11, 4  ;;  %v6360_v50 = vmax.f32 %v6358_v10, %v6359_v18  ;;  %v21188_v48 = vrot.slane %v19614_v49, 2  ;;  %v11507_v47 = vld [vmem:[%s20213_s7 + $0x4a0] sm:$0xff]  ;;  %8716 = vmatpush.bf16.msra.mxu1 %v11487_v55  ;;  %v11525_v24 = vld [vmem:[%s20213_s7 + $0x530] sm:$0xff] }
 0x608   :  { %5920 = vst [vmem:[#allocation1 + $0x20] ss:$4 sm:$0xff] %v21187_v0  ;;  %v21189_v5 = vmax.f32 %v19469_v51, %v19506_v58  ;;  %v6540_v35 = vmax.f32 %v6306_v8, %v6348_v17  ;;  %v6398_v34 = vsel %vm5765_vm11, %v5916_v4, -inf  ;;  %v6367_v62 = vmax.f32 %v6365_v2, %v6366_v41  ;;  %8737 = vmatpush.bf16.msra.mxu0 %v11508_v52  ;;  %v11533_v10 = vld [vmem:[%s20213_s7 + $0x570] sm:$0xff]  ;;  %v11506_v63 = vld [vmem:[%s20213_s7 + $0x498] sm:$0xff]  ;;  %v21193_v19 = vld [vmem:[#allocation40_spill] sm:$0xff] }
 0x609   :  { %v19793_v40 = vmax.f32 %v19614_v49, %v21188_v48  ;;  %8750 = vmatpush.bf16.msra.mxu2 %v11516_v28  ;;  %v11515_v49 = vld [vmem:[%s20213_s7 + $0x4e0] sm:$0xff]  ;;  %v6354_v15 = vrot.slane %v6353_v57, 1  ;;  %v6393_v60 = vmax.f32 %v6391_v11, %v6392_v44  ;;  %v6399_v6 = vrot.slane %v6398_v34, 4  ;;  %v11514_v2 = vld [vmem:[%s20213_s7 + $0x4d8] sm:$0xff]  ;;  %v11524_v17 = vld [vmem:[%s20213_s7 + $0x528] sm:$0xff] }
 0x60a   :  { %v6625_v30 = vsel %vm5076_vm4, %v6539_v20, %v21189_v5  ;;  %v6191_v51 = vrot.slane %v19660_v43, 2  ;;  %8729 = vmatpush.bf16.msra.mxu3 %v11495_v38  ;;  %v21190_v58 = vmax.f32 %v19511_v22, %v19546_v3  ;;  %v6361_v27 = vrot.slane %v6360_v50, 1  ;;  %v21192_v20 = vld [vmem:[#allocation19_spill] sm:$0xff]  ;;  %v21194_v53 = vld [vmem:[#allocation10_spill] sm:$0xff]  ;;  %v11532_v11 = vld [vmem:[%s20213_s7 + $0x568] sm:$0xff] }
 0x60b   :  { %v6405_v46 = vsel %vm5765_vm11, %v21191_v9, -inf  ;;  %v6373_v7 = vrot.slane %v6372_v31, 2  ;;  %8761 = vmatpush.bf16.msrb.mxu1 %v11526_v59  ;;  %v6691_v36 = vpack.c.bf16 %v6625_v30, %v6625_v30  ;;  %v6394_v22 = vrot.slane %v6393_v60, 2 }
 0x60c   :  { %v6626_v42 = vsel %vm5076_vm4, %v6540_v35, %v21190_v58  ;;  %v6368_v3 = vrot.slane %v6367_v62, 1  ;;  %v19819_v33 = vmax.f32 %v6353_v57, %v6354_v15  ;;  %v6400_v52 = vmax.f32 %v6398_v34, %v6399_v6  ;;  %8738 = vmatpush.bf16.msra.mxu0 %v11507_v47  ;;  %v11505_v47 = vld [vmem:[%s20213_s7 + $0x490] sm:$0xff] }
 0x60d   :  { %v6692_v12 = vpack.c.bf16 %v6626_v42, %v6626_v42  ;;  %v6406_v28 = vrot.slane %v6405_v46, 4  ;;  %v19821_v8 = vmax.f32 %v6372_v31, %v6373_v7  ;;  %8751 = vmatpush.bf16.msra.mxu2 %v11515_v49  ;;  %v6395_v55 = vmax.f32 %v6393_v60, %v6394_v22  ;;  %v11523_v7 = vld [vmem:[%s20213_s7 + $0x520] sm:$0xff] }
 0x60e   :  { %8774 = vmatpush.bf16.msrb.mxu3 %v11534_v54  ;;  %v6412_v16 = vsel %vm5765_vm11, %v21192_v20, -inf  ;;  %v6377_v18 = vsel %vm5765_vm11, %v21193_v19, -inf  ;;  %v6384_v38 = vsel %vm5765_vm11, %v21194_v53, -inf  ;;  %v19841_v4 = vmax.f32 %v6360_v50, %v6361_v27 }
 0x60f   :  { %v6401_v41 = vrot.slane %v6400_v52, 2  ;;  %v6407_v31 = vmax.f32 %v6405_v46, %v6406_v28  ;;  %v6413_v59 = vrot.slane %v6412_v16, 4  ;;  %8762 = vmatpush.bf16.msrb.mxu1 %v11525_v24  ;;  %v6396_v54 = vrot.slane %v6395_v55, 1  ;;  %v5921_v44 = vld.sshfl [vmem:[#allocation1 + $0x20] sm:$0xff pattern:$0x73625140]  ;;  %8691 = vmatmul.bf16.vlgmr.msrb.gmra.mxu0 %v6691_v36 }
 0x610   :  { %v19843_v57 = vmax.f32 %v6367_v62, %v6368_v3  ;;  %v6378_v0 = vrot.slane %v6377_v18, 4  ;;  %v6385_v48 = vrot.slane %v6384_v38, 4  ;;  %8704 = vmatmul.bf16.vlgmr.msrb.gmra.mxu2 %v6692_v12  ;;  %v6375_v35 = vrot.slane %v19821_v8, 1  ;;  %v5922_v50 = vld.sshfl [vmem:[#allocation1 + $0x28] sm:$0xff pattern:$0x73625140]  ;;  %8739 = vmatpush.bf16.msra.mxu0 %v11506_v63 }
 0x611   :  { %v6402_v5 = vmax.f32 %v6400_v52, %v6401_v41  ;;  %v6408_v30 = vrot.slane %v6407_v31, 2  ;;  %v6414_v34 = vmax.f32 %v6412_v16, %v6413_v59  ;;  %8752 = vmatpush.bf16.msra.mxu2 %v11514_v2  ;;  %v11513_v62 = vld [vmem:[%s20213_s7 + $0x4d0] sm:$0xff]  ;;  %v6397_v49 = vmax.f32 %v6395_v55, %v6396_v54  ;;  %v11531_v36 = vld [vmem:[%s20213_s7 + $0x560] sm:$0xff]  ;;  %v11504_v63 = vld [vmem:[%s20213_s7 + $0x488] sm:$0xff] }
 0x612   :  { %8775 = vmatpush.bf16.msrb.mxu3 %v11533_v10  ;;  %v6379_v15 = vmax.f32 %v6377_v18, %v6378_v0  ;;  %v6419_v60 = vsel %vm5765_vm11, %v5921_v44, -inf  ;;  %v21195_v6 = vrot.slane %v21148_v25, 6  ;;  %v6426_v58 = vsel %vm5765_vm11, %v5922_v50, -inf  ;;  %v11512_v2 = vld [vmem:[%s20213_s7 + $0x4c8] sm:$0xff] }
 0x613   :  { %v6403_v42 = vrot.slane %v6402_v5, 1  ;;  %v6409_v27 = vmax.f32 %v6407_v31, %v6408_v30  ;;  %v6415_v9 = vrot.slane %v6414_v34, 2  ;;  %v6420_v46 = vrot.slane %v6419_v60, 4  ;;  %8763 = vmatpush.bf16.msrb.mxu1 %v11524_v17 }
 0x614   :  { %5926 = vst [vmem:[#allocation1 + $0x20] ss:$4 sm:$0xff] %v21195_v6  ;;  %v6541_v12 = vmax.f32 %v19819_v33, %v6397_v49  ;;  %v6380_v25 = vrot.slane %v6379_v15, 2  ;;  %v6386_v24 = vmax.f32 %v6384_v38, %v6385_v48  ;;  %v6427_v10 = vrot.slane %v6426_v58, 4  ;;  %8740 = vmatpush.bf16.msra.mxu0 %v11505_v47  ;;  %v21199_v6 = vld [vmem:[#allocation29_spill] sm:$0xff] }
 0x615   :  { %v6404_v22 = vmax.f32 %v6402_v5, %v6403_v42  ;;  %v6410_v3 = vrot.slane %v6409_v27, 1  ;;  %v6416_v52 = vmax.f32 %v6414_v34, %v6415_v9  ;;  %v6421_v28 = vmax.f32 %v6419_v60, %v6420_v46  ;;  %8753 = vmatpush.bf16.msra.mxu2 %v11513_v62  ;;  %v11503_v34 = vld [vmem:[%s20213_s7 + $0x480] sm:$0xff] }
 0x616   :  { %8776 = vmatpush.bf16.msrb.mxu3 %v11532_v11  ;;  %v21196_v33 = vmax.f32 %v19553_v23, %v19557_v61  ;;  %v6381_v20 = vmax.f32 %v6379_v15, %v6380_v25  ;;  %v6387_v16 = vrot.slane %v6386_v24, 2  ;;  %v6428_v19 = vmax.f32 %v6426_v58, %v6427_v10  ;;  %v11522_v11 = vld [vmem:[%s20213_s7 + $0x518] sm:$0xff] }
 0x617   :  { %v6542_v53 = vmax.f32 %v19841_v4, %v6404_v22  ;;  %v6411_v38 = vmax.f32 %v6409_v27, %v6410_v3  ;;  %v6417_v17 = vrot.slane %v6416_v52, 1  ;;  %8764 = vmatpush.bf16.msrb.mxu1 %v11523_v7  ;;  %v11530_v61 = vld [vmem:[%s20213_s7 + $0x558] sm:$0xff]  ;;  %v6422_v23 = vrot.slane %v6421_v28, 2  ;;  %v11521_v27 = vld [vmem:[%s20213_s7 + $0x510] sm:$0xff] }
 0x618   :  { %v6633_v55 = vsel %vm5076_vm4, %v6541_v12, %v21196_v33  ;;  %v6388_v41 = vmax.f32 %v6386_v24, %v6387_v16  ;;  %v6429_v31 = vrot.slane %v6428_v19, 2  ;;  %v6198_v59 = vrot.slane %v19717_v14, 2  ;;  %8741 = vmatpush.bf16.msra.mxu0 %v11504_v63  ;;  %v21202_v7 = vld [vmem:[#allocation35_spill] sm:$0xff]  ;;  %v21204_v12 = vld [vmem:[#allocation32_spill] sm:$0xff]  ;;  %v11549_v16 = vld [vmem:[%s20213_s7 + $0x5f0] sm:$0xff] }
 0x619   :  { %v6693_v18 = vpack.c.bf16 %v6633_v55, %v6633_v55  ;;  %v21197_v4 = vmax.f32 %v19559_v26, %v19581_v1  ;;  %v6543_v44 = vmax.f32 %v19843_v57, %v6411_v38  ;;  %v6376_v0 = vmax.f32 %v19821_v8, %v6375_v35  ;;  %8754 = vmatpush.bf16.msra.mxu2 %v11512_v2  ;;  %v11511_v26 = vld [vmem:[%s20213_s7 + $0x4c0] sm:$0xff]  ;;  %v11542_v8 = vld [vmem:[%s20213_s7 + $0x5b8] sm:$0xff]  ;;  %v11541_v55 = vld [vmem:[%s20213_s7 + $0x5b0] sm:$0xff] }
 0x61a   :  { %8777 = vmatpush.bf16.msrb.mxu3 %v11531_v36  ;;  %v6418_v48 = vmax.f32 %v6416_v52, %v6417_v17  ;;  %v6382_v50 = vrot.slane %v6381_v20, 1  ;;  %v6423_v57 = vmax.f32 %v6421_v28, %v6422_v23  ;;  %v6389_v47 = vrot.slane %v6388_v41, 1  ;;  %v11550_v35 = vld [vmem:[%s20213_s7 + $0x5f8] sm:$0xff]  ;;  %v21207_v38 = vld [vmem:[#allocation8_spill] sm:$0xff] }
 0x61b   :  { %8717 = vmatmul.bf16.vlgmr.msra.gmra.mxu1 %v6693_v18  ;;  %v6634_v54 = vsel %vm5076_vm4, %v6542_v53, %v21197_v4  ;;  %v19887_v5 = vld.sshfl [vmem:[#allocation1 + $0x20] sm:$0xff pattern:$0x73625140]  ;;  %v19889_v30 = vld.sshfl [vmem:[#allocation1 + $0x28] sm:$0xff pattern:$0x73625140]  ;;  %v21198_v62 = vmax.f32 %v19585_v37, %v19632_v45  ;;  %v6430_v60 = vmax.f32 %v6428_v19, %v6429_v31  ;;  %v19912_v42 = vmax.f32 %v19638_v29, %v6203_v39 }
 0x61c   :  { %v6694_v1 = vpack.c.bf16 %v6634_v54, %v6634_v54  ;;  %v6544_v15 = vmax.f32 %v6376_v0, %v6418_v48  ;;  %v21200_v58 = vrot.slane %v21199_v6, 2  ;;  %8765 = vmatpush.bf16.msrb.mxu1 %v11522_v11  ;;  %v6424_v37 = vrot.slane %v6423_v57, 1  ;;  %v21201_v45 = vld [vmem:[#allocation54_spill] sm:$0xff]  ;;  %v21203_v39 = vld [vmem:[#allocation7_spill] sm:$0xff]  ;;  %8742 = vmatpush.bf16.msra.mxu0 %v11503_v34  ;;  %v11528_v23 = vld [vmem:[%s20213_s7 + $0x548] sm:$0xff]  ;;  %v19983_v6 = vpop.f32.mrf.mxu0 }
 0x61d   :  { %v6641_v49 = vsel %vm5076_vm4, %v6543_v44, %v21198_v62  ;;  %v6433_v46 = vsel %vm5765_vm11, %v21201_v45, -inf  ;;  %v6237_v36 = vsel %vm5765_vm11, %v21202_v7, -inf  ;;  %v11529_v29 = vld [vmem:[%s20213_s7 + $0x550] sm:$0xff]  ;;  %v21205_v25 = vmax.f32 %v21203_v39, %v21204_v12  ;;  %v21206_v3 = vld [vmem:[#allocation51_spill] sm:$0xff]  ;;  %8755 = vmatpush.bf16.msra.mxu2 %v11511_v26  ;;  %v21210_v34 = vld [vmem:[#allocation12_spill] sm:$0xff] }
 0x61e   :  { %5932 = vst [vmem:[#allocation1 + $0x20] ss:$4 sm:$0xff] %v21200_v58  ;;  %8730 = vmatmul.bf16.vlgmr.msra.gmra.mxu3 %v6694_v1  ;;  %v6695_v9 = vpack.c.bf16 %v6641_v49, %v6641_v49  ;;  %v6431_v10 = vrot.slane %v6430_v60, 1  ;;  %v6434_v22 = vrot.slane %v6433_v46, 4  ;;  %v6440_v52 = vsel %vm5765_vm11, %v21206_v3, -inf  ;;  %v21208_v44 = vld [vmem:[#allocation45_spill] sm:$0xff] }
 0x61f   :  { %8778 = vmatpush.bf16.msrb.mxu3 %v11530_v61  ;;  %v6642_v24 = vsel %vm5076_vm4, %v6544_v15, %v21205_v25  ;;  %v19930_v63 = vmax.f32 %v6381_v20, %v6382_v50  ;;  %v19932_v2 = vmax.f32 %v6388_v41, %v6389_v47  ;;  %v6441_v33 = vrot.slane %v6440_v52, 4  ;;  %v11520_v20 = vld [vmem:[%s20213_s7 + $0x508] sm:$0xff]  ;;  %v21209_v0 = vld [vmem:[#allocation38_spill] sm:$0xff]  ;;  %v11527_v58 = vld [vmem:[%s20213_s7 + $0x540] sm:$0xff] }
 0x620   :  { %v6696_v28 = vpack.c.bf16 %v6642_v24, %v6642_v24  ;;  %8787 = vmatpush.bf16.msrb.mxu0 %v11542_v8  ;;  %v6425_v19 = vmax.f32 %v6423_v57, %v6424_v37  ;;  %v6432_v18 = vmax.f32 %v6430_v60, %v6431_v10  ;;  %v6435_v53 = vmax.f32 %v6433_v46, %v6434_v22  ;;  %v11540_v8 = vld [vmem:[%s20213_s7 + $0x5a8] sm:$0xff]  ;;  %v21212_v46 = vld [vmem:[#allocation34_spill] sm:$0xff]  ;;  %v11539_v24 = vld [vmem:[%s20213_s7 + $0x5a0] sm:$0xff] }
 0x621   :  { %8800 = vmatpush.bf16.msrb.mxu2 %v11550_v35  ;;  %v5831_v17 = vrot.slane %v21207_v38, 6  ;;  %8766 = vmatpush.bf16.msrb.mxu1 %v11521_v27  ;;  %v6233_v11 = vrot.slane %v19776_v32, 2  ;;  %v6238_v61 = vrot.slane %v6237_v36, 4  ;;  %v6186_v41 = vrot.slane %v19761_v56, 1  ;;  %v11558_v27 = vld [vmem:[%s20213_s7 + $0x638] sm:$0xff]  ;;  %v11547_v10 = vld [vmem:[%s20213_s7 + $0x5e0] sm:$0xff] }
 0x622   :  { %8743 = vmatmul.bf16.vlgmr.msra.gmra.mxu0 %v6695_v9  ;;  %v6228_v31 = vrot.slane %v19793_v40, 1  ;;  %v6436_v4 = vrot.slane %v6435_v53, 2  ;;  %v6442_v54 = vmax.f32 %v6440_v52, %v6441_v33  ;;  %8756 = vmatmul.bf16.vlgmr.msra.gmra.mxu2 %v6696_v28  ;;  %v6527_v48 = vmax.f32 %v21209_v0, %v21208_v44  ;;  %v11557_v33 = vld [vmem:[%s20213_s7 + $0x630] sm:$0xff]  ;;  %v11546_v38 = vld [vmem:[%s20213_s7 + $0x5d8] sm:$0xff] }
 0x623   :  { %8779 = vmatpush.bf16.msrb.mxu3 %v11529_v29  ;;  %v6528_v26 = vmax.f32 %v21210_v34, %v19756_v13  ;;  %v19957_v57 = vmax.f32 %v19660_v43, %v6191_v51  ;;  %v19962_v47 = vmax.f32 %v19717_v14, %v6198_v59  ;;  %v11548_v13 = vld [vmem:[%s20213_s7 + $0x5e8] sm:$0xff]  ;;  %v6545_v35 = vmax.f32 %v19930_v63, %v6425_v19  ;;  %v11519_v14 = vld [vmem:[%s20213_s7 + $0x500] sm:$0xff] }
 0x624   :  { %8788 = vmatpush.bf16.msrb.mxu0 %v11541_v55  ;;  %v6546_v43 = vmax.f32 %v19932_v2, %v6432_v18  ;;  %v6205_v62 = vrot.slane %v19912_v42, 2  ;;  %v19978_v49 = vmax.f32 %v19776_v32, %v6233_v11  ;;  %v19981_v60 = vmax.f32 %v6237_v36, %v6238_v61  ;;  %v21211_v32 = vld [vmem:[#allocation62_spill] sm:$0xff]  ;;  %v5937_v34 = vld.sshfl [vmem:[#allocation1 + $0x8] sm:$0xff pattern:$0x73625140] }
 0x625   :  { %v5933_v1 = vld.sshfl [vmem:[#allocation1 + $0x20] sm:$0xff pattern:$0x73625140]  ;;  %v5934_v50 = vld.sshfl [vmem:[#allocation1 + $0x28] sm:$0xff pattern:$0x73625140]  ;;  %8801 = vmatpush.bf16.msrb.mxu2 %v11549_v16  ;;  %8767 = vmatpush.bf16.msrb.mxu1 %v11520_v20  ;;  %v20000_v29 = vmax.f32 %v6435_v53, %v6436_v4  ;;  %v6649_v22 = vsel %vm5076_vm4, %v6545_v35, %v6527_v48  ;;  %v20030_v4 = vpop.f32.mrf.mxu2  ;;  %v20040_v44 = vmax.f32 %v19793_v40, %v6228_v31 }
 0x626   :  { %v6475_v51 = vsel %vm5765_vm11, %v5933_v1, -inf  ;;  %v6482_v15 = vsel %vm5765_vm11, %v5934_v50, -inf  ;;  %5938 = vst [vmem:[#allocation1 + $0x20] ss:$4 sm:$0xff] %v5831_v17  ;;  %v6443_v9 = vrot.slane %v6442_v54, 2  ;;  %v6244_v45 = vsel %vm5765_vm11, %v21211_v32, -inf }
 0x627   :  { %v6476_v59 = vrot.slane %v6475_v51, 4  ;;  %8780 = vmatpush.bf16.msrb.mxu3 %v11528_v23  ;;  %v6483_v37 = vrot.slane %v6482_v15, 4  ;;  %v19995_v7 = vsel %vm5765_vm11, %v21212_v46, -inf  ;;  %v11566_v36 = vld [vmem:[%s20213_s7 + $0x678] sm:$0xff]  ;;  %v6447_v12 = vsel %vm5765_vm11, %v19887_v5, -inf  ;;  %v11565_v11 = vld [vmem:[%s20213_s7 + $0x670] sm:$0xff] }
 0x628   :  { %v6454_v25 = vsel %vm5765_vm11, %v19889_v30, -inf  ;;  %8789 = vmatpush.bf16.msrb.mxu0 %v11540_v8  ;;  %v6650_v3 = vsel %vm5076_vm4, %v6546_v43, %v6528_v26  ;;  %v6193_v52 = vrot.slane %v19957_v57, 1  ;;  %v6235_v30 = vrot.slane %v19978_v49, 1  ;;  %v11538_v53 = vld [vmem:[%s20213_s7 + $0x598] sm:$0xff]  ;;  %v8510_v43 = vpop.f32.mrf.mxu1 }
 0x629   :  { %v6477_v39 = vmax.f32 %v6475_v51, %v6476_v59  ;;  %8802 = vmatpush.bf16.msrb.mxu2 %v11548_v13  ;;  %v6484_v5 = vmax.f32 %v6482_v15, %v6483_v37  ;;  %8768 = vmatpush.bf16.msrb.mxu1 %v11519_v14  ;;  %v6240_v63 = vrot.slane %v19981_v60, 2  ;;  %v6245_v2 = vrot.slane %v6244_v45, 4  ;;  %v5936_v48 = vld.sshfl [vmem:[#allocation1] sm:$0xff pattern:$0x73625140]  ;;  %v8590_v13 = vpop.f32.mrf.mxu0  ;;  %v11564_v51 = vld [vmem:[%s20213_s7 + $0x668] sm:$0xff] }
 0x62a   :  { %v6444_v55 = vmax.f32 %v6442_v54, %v6443_v9  ;;  %v6448_v19 = vrot.slane %v6447_v12, 4  ;;  %v6455_v18 = vrot.slane %v6454_v25, 4  ;;  %v6697_v17 = vpack.c.bf16 %v6649_v22, %v6649_v22  ;;  %v11545_v9 = vld [vmem:[%s20213_s7 + $0x5d0] sm:$0xff] }
 0x62b   :  { %v6478_v28 = vrot.slane %v6477_v39, 2  ;;  %8781 = vmatpush.bf16.msrb.mxu3 %v11527_v58  ;;  %v6485_v16 = vrot.slane %v6484_v5, 2  ;;  %v6698_v20 = vpack.c.bf16 %v6650_v3, %v6650_v3  ;;  %v6438_v61 = vrot.slane %v20000_v29, 1  ;;  %v11563_v3 = vld [vmem:[%s20213_s7 + $0x660] sm:$0xff] }
 0x62c   :  { %8790 = vmatpush.bf16.msrb.mxu0 %v11539_v24  ;;  %v20035_v54 = vmax.f32 %v19761_v56, %v6186_v41  ;;  %8769 = vmatmul.bf16.vlgmr.msrb.gmra.mxu1 %v6697_v17  ;;  %v6489_v1 = vsel %vm5765_vm11, %v5936_v48, -inf  ;;  %v6246_v50 = vmax.f32 %v6244_v45, %v6245_v2  ;;  %v6496_v8 = vsel %vm5765_vm11, %v5937_v34, -inf  ;;  %v11556_v56 = vld [vmem:[%s20213_s7 + $0x628] sm:$0xff]  ;;  %v21213_v45 = vld [vmem:[#allocation15_spill] sm:$0xff]  ;;  %v8523_v17 = vpop.f32.mrf.mxu3 }
 0x62d   :  { %8813 = vmatpush.bf16.msra.mxu1 %v11558_v27  ;;  %v6479_v23 = vmax.f32 %v6477_v39, %v6478_v28  ;;  %8803 = vmatpush.bf16.msrb.mxu2 %v11547_v10  ;;  %v6486_v0 = vmax.f32 %v6484_v5, %v6485_v16  ;;  %v6445_v41 = vrot.slane %v6444_v55, 1  ;;  %v6490_v31 = vrot.slane %v6489_v1, 4  ;;  %v11537_v27 = vld [vmem:[%s20213_s7 + $0x590] sm:$0xff]  ;;  %v8603_v28 = vpop.f32.mrf.mxu2  ;;  %v11562_v34 = vld [vmem:[%s20213_s7 + $0x658] sm:$0xff] }
 0x62e   :  { %8782 = vmatmul.bf16.vlgmr.msrb.gmra.mxu3 %v6698_v20  ;;  %v6497_v35 = vrot.slane %v6496_v8, 4  ;;  %v6241_v14 = vmax.f32 %v19981_v60, %v6240_v63  ;;  %v6449_v59 = vmax.f32 %v6447_v12, %v6448_v19  ;;  %v20054_v15 = vmax.f32 %v19912_v42, %v6205_v62  ;;  %v11584_v42 = vld [vmem:[%s20214_s8] ss:$0 sm:$0xff]  ;;  %v11544_v63 = vld [vmem:[%s20213_s7 + $0x5c8] sm:$0xff] }
 0x62f   :  { %8826 = vmatpush.bf16.msra.mxu3 %v11566_v36  ;;  %v6480_v26 = vrot.slane %v6479_v23, 1  ;;  %v6487_v40 = vrot.slane %v6486_v0, 1  ;;  %v6456_v58 = vmax.f32 %v6454_v25, %v6455_v18  ;;  %v6439_v37 = vmax.f32 %v20000_v29, %v6438_v61  ;;  %v11555_v29 = vld [vmem:[%s20213_s7 + $0x620] sm:$0xff]  ;;  %v11554_v61 = vld [vmem:[%s20213_s7 + $0x618] sm:$0xff] }
 0x630   :  { %8791 = vmatpush.bf16.msrb.mxu0 %v11538_v53  ;;  %v6491_v32 = vmax.f32 %v6489_v1, %v6490_v31  ;;  %v6251_v46 = vsel %vm5765_vm11, %v21213_v45, -inf  ;;  %v6194_v62 = vmax.f32 %v19957_v57, %v6193_v52  ;;  %v6236_v36 = vmax.f32 %v19978_v49, %v6235_v30  ;;  %v11536_v30 = vld [vmem:[%s20213_s7 + $0x588] sm:$0xff]  ;;  %v8512_v48 = vpop.f32.mrf.mxu1  ;;  %v21215_v31 = vld [vmem:[#allocation47_spill] sm:$0xff] }
 0x631   :  { %8814 = vmatpush.bf16.msra.mxu1 %v11557_v33  ;;  %8804 = vmatpush.bf16.msrb.mxu2 %v11546_v38  ;;  %v6481_v60 = vmax.f32 %v6479_v23, %v6480_v26  ;;  %v6498_v39 = vmax.f32 %v6496_v8, %v6497_v35  ;;  %v6210_v12 = vrot.slane %v19995_v7, 4  ;;  %v6446_v25 = vmax.f32 %v6444_v55, %v6445_v41  ;;  %v11543_v8 = vld [vmem:[%s20213_s7 + $0x5c0] sm:$0xff]  ;;  %v21214_v41 = vld [vmem:[#allocation6_spill] sm:$0xff] }
 0x632   :  { %v6488_v24 = vmax.f32 %v6486_v0, %v6487_v40  ;;  %v6492_v10 = vrot.slane %v6491_v32, 2  ;;  %v6247_v22 = vrot.slane %v6246_v50, 2  ;;  %v6242_v57 = vrot.slane %v6241_v14, 1 }
 0x633   :  { %8827 = vmatpush.bf16.msra.mxu3 %v11565_v11  ;;  %v6450_v52 = vrot.slane %v6449_v59, 2  ;;  %v6499_v49 = vrot.slane %v6498_v39, 2  ;;  %v6252_v5 = vrot.slane %v6251_v46, 4  ;;  %v6529_v2 = vmax.f32 %v20035_v54, %v20040_v44  ;;  %v5939_v44 = vld.sshfl [vmem:[#allocation1 + $0x20] sm:$0xff pattern:$0x73625140] }
 0x634   :  { %8792 = vmatpush.bf16.msrb.mxu0 %v11537_v27  ;;  %v6547_v33 = vmax.f32 %v6439_v37, %v6481_v60  ;;  %v6200_v55 = vrot.slane %v19962_v47, 1  ;;  %v6457_v16 = vrot.slane %v6456_v58, 2  ;;  %v8511_v19 = vadd.f32 %v11584_v42, %v8510_v43  ;;  %v21216_v43 = vld [vmem:[#allocation9_spill] sm:$0xff] }
 0x635   :  { %8815 = vmatpush.bf16.msra.mxu1 %v11556_v56  ;;  %8805 = vmatpush.bf16.msrb.mxu2 %v11545_v9  ;;  %v6493_v18 = vmax.f32 %v6491_v32, %v6492_v10  ;;  %v6207_v53 = vrot.slane %v20054_v15, 1  ;;  %v20088_v38 = vmax.f32 %v19995_v7, %v6210_v12  ;;  %v6530_v20 = vmax.f32 %v6194_v62, %v6236_v36  ;;  %v21217_v9 = vld [vmem:[#allocation11_spill] sm:$0xff]  ;;  %v11553_v32 = vld [vmem:[%s20213_s7 + $0x610] sm:$0xff]  ;;  %v5940_v10 = vld.sshfl [vmem:[#allocation1 + $0x28] sm:$0xff pattern:$0x73625140] }
 0x636   :  { %v6548_v11 = vmax.f32 %v6446_v25, %v6488_v24  ;;  %v6248_v23 = vmax.f32 %v6246_v50, %v6247_v22  ;;  %v6500_v54 = vmax.f32 %v6498_v39, %v6499_v49  ;;  %v8524_v0 = vadd.f32 %v8523_v17, %v8511_v19  ;;  %v11535_v50 = vld [vmem:[%s20213_s7 + $0x580] sm:$0xff]  ;;  %v11561_v36 = vld [vmem:[%s20213_s7 + $0x650] sm:$0xff] }
 0x637   :  { %8828 = vmatpush.bf16.msra.mxu3 %v11564_v51  ;;  %v20096_v7 = vmax.f32 %v6241_v14, %v6242_v57  ;;  %v6451_v26 = vmax.f32 %v6449_v59, %v6450_v52  ;;  %v20098_v1 = vmax.f32 %v6251_v46, %v6252_v5  ;;  %v6657_v13 = vsel %vm5076_vm4, %v6547_v33, %v6529_v2  ;;  %v11574_v14 = vld [vmem:[%s20213_s7 + $0x6b8] sm:$0xff]  ;;  %v11581_v49 = vld [vmem:[%s20213_s7 + $0x6f0] sm:$0xff]  ;;  %v11552_v2 = vld [vmem:[%s20213_s7 + $0x608] sm:$0xff] }
 0x638   :  { %8793 = vmatpush.bf16.msrb.mxu0 %v11536_v30  ;;  %v6458_v56 = vmax.f32 %v6456_v58, %v6457_v16  ;;  %v6216_v40 = vsel %vm5765_vm11, %v21214_v41, -inf  ;;  %v6258_v35 = vsel %vm5765_vm11, %v21215_v31, -inf  ;;  %v8537_v51 = vadd.f32 %v21216_v43, %v8524_v0  ;;  %v11582_v59 = vld [vmem:[%s20213_s7 + $0x6f8] sm:$0xff]  ;;  %v11560_v0 = vld [vmem:[%s20213_s7 + $0x648] sm:$0xff] }
 0x639   :  { %8816 = vmatpush.bf16.msra.mxu1 %v11555_v29  ;;  %8806 = vmatpush.bf16.msrb.mxu2 %v11544_v63  ;;  %v6494_v27 = vrot.slane %v6493_v18, 1  ;;  %v6461_v58 = vsel %vm5765_vm11, %v21217_v9, -inf  ;;  %v6503_v37 = vsel %vm5765_vm11, %v5939_v44, -inf  ;;  %v6658_v60 = vsel %vm5076_vm4, %v6548_v11, %v6530_v20  ;;  %v8525_v63 = vpop.f32.mrf.mxu3  ;;  %v8562_v20 = vpop.f32.mrf.mxu1 }
 0x63a   :  { %v6249_v45 = vrot.slane %v6248_v23, 1  ;;  %v6501_v46 = vrot.slane %v6500_v54, 1  ;;  %v6462_v42 = vrot.slane %v6461_v58, 4  ;;  %v8550_v62 = vadd.f32 %v19692_v21, %v8537_v51  ;;  %v11573_v21 = vld [vmem:[%s20213_s7 + $0x6b0] sm:$0xff] }
 0x63b   :  { %8829 = vmatpush.bf16.msra.mxu3 %v11563_v3  ;;  %v6452_v39 = vrot.slane %v6451_v26, 1  ;;  %v6504_v12 = vrot.slane %v6503_v37, 4  ;;  %v6217_v29 = vrot.slane %v6216_v40, 4  ;;  %v6699_v25 = vpack.c.bf16 %v6657_v13, %v6657_v13  ;;  %v21218_v3 = vld [vmem:[#allocation31_spill] sm:$0xff] }
 0x63c   :  { %8794 = vmatpush.bf16.msrb.mxu0 %v11535_v50  ;;  %v6459_v24 = vrot.slane %v6458_v56, 1  ;;  %v6259_v22 = vrot.slane %v6258_v35, 4  ;;  %v6468_v57 = vsel %vm5765_vm11, %v21218_v3, -inf  ;;  %v6700_v52 = vpack.c.bf16 %v6658_v60, %v6658_v60 }
 0x63d   :  { %8817 = vmatpush.bf16.msra.mxu1 %v11554_v61  ;;  %8807 = vmatpush.bf16.msrb.mxu2 %v11543_v8  ;;  %v6495_v5 = vmax.f32 %v6493_v18, %v6494_v27  ;;  %v6469_v28 = vrot.slane %v6468_v57, 4  ;;  %v6510_v30 = vsel %vm5765_vm11, %v5940_v10, -inf  ;;  %v6250_v33 = vmax.f32 %v6248_v23, %v6249_v45  ;;  %v11572_v23 = vld [vmem:[%s20213_s7 + $0x6a8] sm:$0xff]  ;;  %v11570_v10 = vld [vmem:[%s20213_s7 + $0x698] sm:$0xff] }
 0x63e   :  { %v6502_v16 = vmax.f32 %v6500_v54, %v6501_v46  ;;  %v6463_v19 = vmax.f32 %v6461_v58, %v6462_v42  ;;  %v6511_v17 = vrot.slane %v6510_v30, 4  ;;  %v6453_v11 = vmax.f32 %v6451_v26, %v6452_v39  ;;  %v11580_v54 = vld [vmem:[%s20213_s7 + $0x6e8] sm:$0xff] }
 0x63f   :  { %8830 = vmatpush.bf16.msra.mxu3 %v11562_v34  ;;  %8795 = vmatmul.bf16.vlgmr.msrb.gmra.mxu0 %v6699_v25  ;;  %v6505_v61 = vmax.f32 %v6503_v37, %v6504_v12  ;;  %v6470_v44 = vmax.f32 %v6468_v57, %v6469_v28  ;;  %v8563_v18 = vadd.f32 %v8562_v20, %v8550_v62  ;;  %v6254_v27 = vrot.slane %v20098_v1, 2  ;;  %v11577_v28 = vld [vmem:[%s20213_s7 + $0x6d0] sm:$0xff] }
 0x640   :  { %8839 = vmatpush.bf16.msra.mxu0 %v11574_v14  ;;  %8808 = vmatmul.bf16.vlgmr.msrb.gmra.mxu2 %v6700_v52  ;;  %v6460_v48 = vmax.f32 %v6458_v56, %v6459_v24  ;;  %v6218_v34 = vmax.f32 %v6216_v40, %v6217_v29  ;;  %v6512_v50 = vmax.f32 %v6510_v30, %v6511_v17  ;;  %v11551_v56 = vld [vmem:[%s20213_s7 + $0x600] sm:$0xff]  ;;  %v6464_v31 = vrot.slane %v6463_v19, 2 }
 0x641   :  { %8852 = vmatpush.bf16.msra.mxu2 %v11582_v59  ;;  %8818 = vmatpush.bf16.msra.mxu1 %v11553_v32  ;;  %v6201_v26 = vmax.f32 %v19962_v47, %v6200_v55  ;;  %v6549_v8 = vmax.f32 %v6453_v11, %v6495_v5  ;;  %v6260_v13 = vmax.f32 %v6258_v35, %v6259_v22  ;;  %v6506_v51 = vrot.slane %v6505_v61, 2  ;;  %v11559_v47 = vld [vmem:[%s20213_s7 + $0x640] sm:$0xff]  ;;  %v8575_v37 = vpop.f32.mrf.mxu3  ;;  %v8564_v46 = vpop.f32.mrf.mxu1  ;;  %v11578_v22 = vld [vmem:[%s20213_s7 + $0x6d8] sm:$0xff]  ;;  %v11569_v5 = vld [vmem:[%s20213_s7 + $0x690] sm:$0xff] }
 0x642   :  { %v6208_v41 = vmax.f32 %v20054_v15, %v6207_v53  ;;  %v6550_v40 = vmax.f32 %v6460_v48, %v6502_v16  ;;  %v6471_v14 = vrot.slane %v6470_v44, 2  ;;  %v6513_v59 = vrot.slane %v6512_v50, 2  ;;  %v11571_v15 = vld [vmem:[%s20213_s7 + $0x6a0] sm:$0xff] }
 0x643   :  { %8831 = vmatpush.bf16.msra.mxu3 %v11561_v36  ;;  %v6531_v43 = vmax.f32 %v6201_v26, %v20096_v7  ;;  %v6212_v35 = vrot.slane %v20088_v38, 2  ;;  %v6219_v9 = vrot.slane %v6218_v34, 2  ;;  %v11579_v53 = vld [vmem:[%s20213_s7 + $0x6e0] sm:$0xff]  ;;  %v6261_v58 = vrot.slane %v6260_v13, 2 }
 0x644   :  { %8840 = vmatpush.bf16.msra.mxu0 %v11573_v21  ;;  %v6532_v55 = vmax.f32 %v6208_v41, %v6250_v33  ;;  %v6465_v32 = vmax.f32 %v6463_v19, %v6464_v31  ;;  %v8576_v45 = vadd.f32 %v8575_v37, %v8563_v18  ;;  %v6507_v42 = vmax.f32 %v6505_v61, %v6506_v51  ;;  %v11568_v61 = vld [vmem:[%s20213_s7 + $0x688] sm:$0xff]  ;;  %v11575_v26 = vld [vmem:[%s20213_s7 + $0x6c0] sm:$0xff] }
 0x645   :  { %8853 = vmatpush.bf16.msra.mxu2 %v11581_v49  ;;  %8819 = vmatpush.bf16.msra.mxu1 %v11552_v2  ;;  %v6665_v7 = vsel %vm5076_vm4, %v6549_v8, %v6531_v43  ;;  %v6472_v62 = vmax.f32 %v6470_v44, %v6471_v14  ;;  %v6514_v36 = vmax.f32 %v6512_v50, %v6513_v59  ;;  %v11576_v44 = vld [vmem:[%s20213_s7 + $0x6c8] sm:$0xff] }
 0x646   :  { %v6666_v60 = vsel %vm5076_vm4, %v6550_v40, %v6532_v55  ;;  %v6701_v39 = vpack.c.bf16 %v6665_v7, %v6665_v7  ;;  %v6213_v12 = vmax.f32 %v20088_v38, %v6212_v35  ;;  %v6255_v29 = vmax.f32 %v20098_v1, %v6254_v27 }
 0x647   :  { %8832 = vmatpush.bf16.msra.mxu3 %v11560_v0  ;;  %v6220_v25 = vmax.f32 %v6218_v34, %v6219_v9  ;;  %v8589_v24 = vadd.f32 %v19983_v6, %v8576_v45  ;;  %v6702_v3 = vpack.c.bf16 %v6666_v60, %v6666_v60  ;;  %v6262_v57 = vmax.f32 %v6260_v13, %v6261_v58 }
 0x648   :  { %8841 = vmatpush.bf16.msra.mxu0 %v11572_v23  ;;  %v6466_v52 = vrot.slane %v6465_v32, 1  ;;  %v6508_v1 = vrot.slane %v6507_v42, 1  ;;  %v6473_v21 = vrot.slane %v6472_v62, 1  ;;  %v6515_v6 = vrot.slane %v6514_v36, 1 }
 0x649   :  { %8854 = vmatpush.bf16.msra.mxu2 %v11580_v54  ;;  %8820 = vmatpush.bf16.msra.mxu1 %v11551_v56  ;;  %v8602_v38 = vadd.f32 %v20030_v4, %v8589_v24  ;;  %v6214_v49 = vrot.slane %v6213_v12, 1  ;;  %v6256_v30 = vrot.slane %v6255_v29, 1  ;;  %v6221_v63 = vrot.slane %v6220_v25, 1  ;;  %v8577_v33 = vpop.f32.mrf.mxu3  ;;  %v8614_v11 = vpop.f32.mrf.mxu1  ;;  %v11567_v54 = vld [vmem:[%s20213_s7 + $0x680] sm:$0xff]  ;;  %s11974_s7 = smov [#allocation2]  }
 0x64a   :  { %v6263_v2 = vrot.slane %v6262_v57, 1  ;;  %v6467_v16 = vmax.f32 %v6465_v32, %v6466_v52  ;;  %v6509_v4 = vmax.f32 %v6507_v42, %v6508_v1  ;;  %v6474_v19 = vmax.f32 %v6472_v62, %v6473_v21  ;;  %s8872_s5 = sshll.u32 %s11974_s7, 4  ;;  %s8873_s5 = int_to_ptr.vmem [resolvable:$true] %s8872_s5 }
 0x64b   :  { %8833 = vmatpush.bf16.msra.mxu3 %v11559_v47  ;;  %v6516_v17 = vmax.f32 %v6514_v36, %v6515_v6  ;;  %v6215_v20 = vmax.f32 %v6213_v12, %v6214_v49  ;;  %v6257_v18 = vmax.f32 %v6255_v29, %v6256_v30  ;;  %v6222_v0 = vmax.f32 %v6220_v25, %v6221_v63 }
 0x64c   :  { %8842 = vmatpush.bf16.msra.mxu0 %v11571_v15  ;;  %8821 = vmatmul.bf16.vlgmr.msra.gmra.mxu1 %v6701_v39  ;;  %v6264_v48 = vmax.f32 %v6262_v57, %v6263_v2  ;;  %v8615_v34 = vadd.f32 %v8614_v11, %v8602_v38  ;;  %v6551_v50 = vmax.f32 %v6467_v16, %v6509_v4 }
 0x64d   :  { %8855 = vmatpush.bf16.msra.mxu2 %v11579_v53  ;;  %v6552_v23 = vmax.f32 %v6474_v19, %v6516_v17  ;;  %v6533_v8 = vmax.f32 %v6215_v20, %v6257_v18 }
 0x64e   :  { %8834 = vmatmul.bf16.vlgmr.msra.gmra.mxu3 %v6702_v3  ;;  %v6534_v13 = vmax.f32 %v6222_v0, %v6264_v48 }
 0x64f   :  { %v6673_v41 = vsel %vm5076_vm4, %v6551_v50, %v6533_v8 }
 0x650   :  { %8843 = vmatpush.bf16.msra.mxu0 %v11570_v10  ;;  %v6674_v40 = vsel %vm5076_vm4, %v6552_v23, %v6534_v13  ;;  %v6703_v51 = vpack.c.bf16 %v6673_v41, %v6673_v41 }
 0x651   :  { %8856 = vmatpush.bf16.msra.mxu2 %v11578_v22  ;;  %v8627_v56 = vpop.f32.mrf.mxu3  ;;  %v8616_v43 = vpop.f32.mrf.mxu1  ;;  %v6704_v14 = vpack.c.bf16 %v6674_v40, %v6674_v40 }
 0x652   :  { %v8628_v31 = vadd.f32 %v8627_v56, %v8615_v34 }
 0x654   :  { %8844 = vmatpush.bf16.msra.mxu0 %v11569_v5 }
 0x655   :  { %8857 = vmatpush.bf16.msra.mxu2 %v11577_v28 }
 0x658   :  { %8845 = vmatpush.bf16.msra.mxu0 %v11568_v61 }
 0x659   :  { %8858 = vmatpush.bf16.msra.mxu2 %v11576_v44  ;;  %v8629_v59 = vpop.f32.mrf.mxu3 }
 0x65c   :  { %8846 = vmatpush.bf16.msra.mxu0 %v11567_v54 }
 0x65d   :  { %8859 = vmatpush.bf16.msra.mxu2 %v11575_v26 }
 0x65f   :  { %8847 = vmatmul.bf16.vlgmr.msra.gmra.mxu0 %v6703_v51 }
 0x660   :  { %8860 = vmatmul.bf16.vlgmr.msra.gmra.mxu2 %v6704_v14 }
 0x67c   :  { %v8640_v47 = vpop.f32.mrf.mxu0 }
 0x67d   :  { %v8641_v22 = vadd.f32 %v8640_v47, %v8628_v31 }
 0x67e   :  { %v8666_v55 = vpop.f32.mrf.mxu1 }
 0x683   :  { %v8653_v35 = vpop.f32.mrf.mxu2 }
 0x684   :  { %v8642_v27 = vpop.f32.mrf.mxu0  ;;  %v8654_v3 = vadd.f32 %v8653_v35, %v8641_v22 }
 0x686   :  { %v8679_v9 = vpop.f32.mrf.mxu3  ;;  %v8668_v15 = vpop.f32.mrf.mxu1  ;;  %v8667_v52 = vadd.f32 %v8666_v55, %v8654_v3 }
 0x688   :  { %v8680_v38 = vadd.f32 %v8679_v9, %v8667_v52 }
 0x68b   :  { %v8655_v53 = vpop.f32.mrf.mxu2 }
 0x68c   :  { %v8692_v7 = vpop.f32.mrf.mxu0 }
 0x68d   :  { %v8693_v21 = vadd.f32 %v8692_v7, %v8680_v38 }
 0x68e   :  { %v8681_v58 = vpop.f32.mrf.mxu3 }
 0x693   :  { %v8705_v37 = vpop.f32.mrf.mxu2 }
 0x694   :  { %v8694_v60 = vpop.f32.mrf.mxu0  ;;  %v8706_v49 = vadd.f32 %v8705_v37, %v8693_v21 }
 0x698   :  { %v8718_v32 = vpop.f32.mrf.mxu1 }
 0x699   :  { %v8719_v28 = vadd.f32 %v8718_v32, %v8706_v49 }
 0x69b   :  { %v8707_v45 = vpop.f32.mrf.mxu2 }
 0x69f   :  { %v8744_v42 = vpop.f32.mrf.mxu0 }
 0x6a0   :  { %v8720_v46 = vpop.f32.mrf.mxu1 }
 0x6a1   :  { %v8731_v62 = vpop.f32.mrf.mxu3 }
 0x6a2   :  { %v8732_v63 = vadd.f32 %v8731_v62, %v8719_v28 }
 0x6a4   :  { %v8745_v33 = vadd.f32 %v8744_v42, %v8732_v63 }
 0x6a5   :  { %v8757_v36 = vpop.f32.mrf.mxu2 }
 0x6a6   :  { %v8758_v16 = vadd.f32 %v8757_v36, %v8745_v33 }
 0x6a7   :  { %v8746_v39 = vpop.f32.mrf.mxu0 }
 0x6a9   :  { %v8733_v12 = vpop.f32.mrf.mxu3  ;;  %v8770_v29 = vpop.f32.mrf.mxu1 }
 0x6aa   :  { %v8771_v17 = vadd.f32 %v8770_v29, %v8758_v16 }
 0x6ad   :  { %v8759_v25 = vpop.f32.mrf.mxu2 }
 0x6b1   :  { %v8783_v24 = vpop.f32.mrf.mxu3  ;;  %v8772_v10 = vpop.f32.mrf.mxu1 }
 0x6b2   :  { %v8784_v20 = vadd.f32 %v8783_v24, %v8771_v17 }
 0x6b9   :  { %v8785_v57 = vpop.f32.mrf.mxu3 }
 0x6bc   :  { %v8796_v1 = vpop.f32.mrf.mxu0 }
 0x6bd   :  { %v8797_v11 = vadd.f32 %v8796_v1, %v8784_v20 }
 0x6c3   :  { %v8809_v6 = vpop.f32.mrf.mxu2 }
 0x6c4   :  { %v8798_v5 = vpop.f32.mrf.mxu0  ;;  %v8810_v44 = vadd.f32 %v8809_v6, %v8797_v11 }
 0x6c9   :  { %v8822_v30 = vpop.f32.mrf.mxu1 }
 0x6ca   :  { %v8823_v0 = vadd.f32 %v8822_v30, %v8810_v44 }
 0x6cb   :  { %v8811_v2 = vpop.f32.mrf.mxu2 }
 0x6d1   :  { %v8835_v4 = vpop.f32.mrf.mxu3  ;;  %v8824_v19 = vpop.f32.mrf.mxu1 }
 0x6d2   :  { %v8836_v48 = vadd.f32 %v8835_v4, %v8823_v0 }
 0x6d9   :  { %v8837_v61 = vpop.f32.mrf.mxu3 }
 0x6dc   :  { %v8848_v18 = vpop.f32.mrf.mxu0 }
 0x6dd   :  { %v8849_v34 = vadd.f32 %v8848_v18, %v8836_v48 }
 0x6e3   :  { %v8861_v50 = vpop.f32.mrf.mxu2 }
 0x6e4   :  { %v8862_v23 = vadd.f32 %v8861_v50, %v8849_v34  ;;  %v8850_v54 = vpop.f32.mrf.mxu0 }
 0x6e6   :  { %8866 = vst.msk [vmem:[#allocation2] sm:$0x3] %vm8865_vm15, %v8862_v23 }
 0x6e7   :  { %8877 = dma.vmem_to_hbm [thread:$0]  %s8873_s5, 32, %s8875_s16, [#allocation3]  }
 0x6eb   :  { %v8863_v26 = vpop.f32.mrf.mxu2 }
 0x6ec   :  { %11972 = dma.done.wait [#allocation3], 32  }
 0x6ed   :  { %11973 = vsyncadd [#allocation3], 4294967264 }
 0x6ee   :  { %8882 = vsyncpa [#allocation3], 1 }

</bundles_post_ra>
